<compile_context>
chip_gen: v7x
topology: tpu7x:2x2x1
jax: 0.10.0
libtpu: 0.0.40
codegen_flags: <defaults>
</compile_context>

<pallas_src>
import functools

import jax
import jax.numpy as jnp
from jax.experimental import pallas as pl
from jax.experimental.pallas import tpu as pltpu

_BN_EPS = 1e-5
# Safe on every generation (v5e/v6e: 128 MiB physical, v7x: 64 MiB per TC);
# the tile sizes below use well under 1 MiB of VMEM per call anyway.
_VMEM_LIMIT = 40 * 1024 * 1024
_FULL_VMEM = pl.BlockSpec(memory_space=pltpu.MemorySpace.VMEM)


def _round_up(v, m):
    return ((v + m - 1) // m) * m


# ---------------------------------------------------------------------------
# Pallas kernels
# ---------------------------------------------------------------------------
def _conv_matmul_kernel(*refs, relu: bool, has_res: bool):
    """Grid = (M tiles, N tiles, taps).

    Accumulate bf16 x bf16 -> f32 over the tap axis in a VMEM scratch; on the
    final tap apply the folded BN scale/bias, optional residual add and ReLU,
    then store the bf16 output tile (single store per output block).
    """
    a_ref, b_ref, scale_ref, bias_ref = refs[:4]
    res_ref = refs[4] if has_res else None
    o_ref, acc_ref = refs[-2], refs[-1]

    t = pl.program_id(2)

    @pl.when(t == 0)
    def _init():
        acc_ref[...] = jnp.zeros_like(acc_ref)

    acc_ref[...] += jnp.dot(a_ref[0], b_ref[0],
                            preferred_element_type=jnp.float32)

    @pl.when(t == pl.num_programs(2) - 1)
    def _finalize():
        out = acc_ref[...] * scale_ref[...] + bias_ref[...]
        if has_res:
            out = out + res_ref[...].astype(jnp.float32)
        if relu:
            out = jnp.maximum(out, 0.0)
        o_ref[...] = out.astype(o_ref.dtype)


def _maxpool_kernel(p_ref, o_ref, acc_ref):
    """Grid = (M tiles, taps). Running max over the tap axis (VPU, mem-bound)."""
    t = pl.program_id(1)

    @pl.when(t == 0)
    def _init():
        acc_ref[...] = p_ref[0]

    @pl.when(t > 0)
    def _update():
        acc_ref[...] = jnp.maximum(acc_ref[...], p_ref[0])

    @pl.when(t == pl.num_programs(1) - 1)
    def _store():
        o_ref[...] = acc_ref[...]


def _fc_softmax_kernel(x_ref, w_ref, b_ref, o_ref):
    """Fused FC (bf16 operands, f32 accumulate) + row softmax (f32)."""
    logits = jnp.dot(x_ref[...], w_ref[...],
                     preferred_element_type=jnp.float32) + b_ref[...]
    m = jnp.max(logits, axis=-1, keepdims=True)
    e = jnp.exp(logits - m)
    o_ref[...] = e / jnp.sum(e, axis=-1, keepdims=True)


# ---------------------------------------------------------------------------
# Pallas wrappers
# ---------------------------------------------------------------------------
def pallas_conv_matmul(a_taps, wmat, scale, bias, residual=None, relu=False,
                       out_dtype=jnp.bfloat16, max_tm=256, max_tn=256):
    """a_taps: (T, M, K) activations; wmat: (T, K, N) weights.

    Returns (M, N) = maybe_relu(sum_t a[t] @ w[t] * scale + bias (+ residual)).
    """
    T, M, K = a_taps.shape
    N = wmat.shape[-1]

    tm = min(max_tm, _round_up(M, 8))
    M_pad = _round_up(M, tm)
    tn = min(max_tn, N)
    while N % tn:
        tn //= 2

    a = a_taps.astype(jnp.bfloat16)
    if M_pad != M:
        a = jnp.pad(a, ((0, 0), (0, M_pad - M), (0, 0)))
    b = wmat.astype(jnp.bfloat16)
    scale2 = scale.reshape(1, N).astype(jnp.float32)
    bias2 = bias.reshape(1, N).astype(jnp.float32)

    inputs = [a, b, scale2, bias2]
    in_specs = [
        pl.BlockSpec((1, tm, K), lambda m, n, t: (t, m, 0)),
        pl.BlockSpec((1, K, tn), lambda m, n, t: (t, 0, n)),
        pl.BlockSpec((1, tn), lambda m, n, t: (0, n)),
        pl.BlockSpec((1, tn), lambda m, n, t: (0, n)),
    ]
    if residual is not None:
        r = residual.astype(jnp.bfloat16)
        if M_pad != M:
            r = jnp.pad(r, ((0, M_pad - M), (0, 0)))
        inputs.append(r)
        # Block index independent of t -> stays VMEM-resident across the taps.
        in_specs.append(pl.BlockSpec((tm, tn), lambda m, n, t: (m, n)))

    kernel = functools.partial(_conv_matmul_kernel, relu=relu,
                               has_res=residual is not None)
    out = pl.pallas_call(
        kernel,
        out_shape=jax.ShapeDtypeStruct((M_pad, N), out_dtype),
        grid=(M_pad // tm, N // tn, T),
        in_specs=in_specs,
        out_specs=pl.BlockSpec((tm, tn), lambda m, n, t: (m, n)),
        scratch_shapes=[pltpu.VMEM((tm, tn), jnp.float32)],
        compiler_params=pltpu.CompilerParams(
            dimension_semantics=("parallel", "parallel", "arbitrary"),
            vmem_limit_bytes=_VMEM_LIMIT),
    )(*inputs)
    return out[:M]


def pallas_maxpool(taps, max_tm=512):
    """taps: (T, M, C) -> (M, C) max over the tap axis via a tap-grid reduction."""
    T, M, C = taps.shape
    tm = min(max_tm, _round_up(M, 8))
    M_pad = _round_up(M, tm)
    a = taps
    if M_pad != M:
        a = jnp.pad(a, ((0, 0), (0, M_pad - M), (0, 0)))
    out = pl.pallas_call(
        _maxpool_kernel,
        out_shape=jax.ShapeDtypeStruct((M_pad, C), taps.dtype),
        grid=(M_pad // tm, T),
        in_specs=[pl.BlockSpec((1, tm, C), lambda m, t: (t, m, 0))],
        out_specs=pl.BlockSpec((tm, C), lambda m, t: (m, 0)),
        scratch_shapes=[pltpu.VMEM((tm, C), taps.dtype)],
        compiler_params=pltpu.CompilerParams(
            dimension_semantics=("parallel", "arbitrary"),
            vmem_limit_bytes=_VMEM_LIMIT),
    )(a)
    return out[:M]


def pallas_fc_softmax(x, w, b, n_classes):
    """x: (M, K); w: (K, n_classes); b: (n_classes,). Class dim padded to 128."""
    M, K = x.shape
    Np = max(128, _round_up(n_classes, 128))   # lane-dense output tile
    Mp = _round_up(M, 8)
    xp = jnp.zeros((Mp, K), jnp.bfloat16).at[:M].set(x.astype(jnp.bfloat16))
    wp = jnp.zeros((K, Np), jnp.bfloat16).at[:, :n_classes].set(
        w.astype(jnp.bfloat16))
    # Padded classes get -1e30 bias -> exp underflows to 0, softmax unchanged.
    bp = jnp.full((1, Np), -1e30, jnp.float32).at[:, :n_classes].set(
        b.reshape(1, n_classes).astype(jnp.float32))
    out = pl.pallas_call(
        _fc_softmax_kernel,
        out_shape=jax.ShapeDtypeStruct((Mp, Np), jnp.float32),
        in_specs=[_FULL_VMEM] * 3,
        out_specs=_FULL_VMEM,
        compiler_params=pltpu.CompilerParams(vmem_limit_bytes=_VMEM_LIMIT),
    )(xp, wp, bp)
    return out[:M, :n_classes]


# ---------------------------------------------------------------------------
# Plain-JAX glue: patch extraction, parameter folding, network wiring
# ---------------------------------------------------------------------------
def _extract_patches(x, kh, kw, stride, pad, pad_value=0.0):
    """x: (N,H,W,C) -> list of kh*kw taps, each (N,OH,OW,C)."""
    N, H, W, C = x.shape
    xp = jnp.pad(x, ((0, 0), (pad, pad), (pad, pad), (0, 0)),
                 constant_values=pad_value)
    OH = (H + 2 * pad - kh) // stride + 1
    OW = (W + 2 * pad - kw) // stride + 1
    taps = []
    for i in range(kh):
        for j in range(kw):
            taps.append(xp[:, i:i + stride * (OH - 1) + 1:stride,
                            j:j + stride * (OW - 1) + 1:stride, :])
    return taps, OH, OW


def conv_bn_act(x, w, b, bn, stride, pad, relu=False, residual=None):
    """Conv2d(+bias) + BatchNorm(folded) + optional residual + optional ReLU.

    x: (N,H,W,Cin) NHWC bf16; w: (Cout,Cin,kh,kw) (PyTorch layout);
    residual: (N,OH,OW,Cout) or None.
    """
    Cout, Cin, kh, kw = w.shape
    Nb = x.shape[0]
    taps, OH, OW = _extract_patches(x, kh, kw, stride, pad, 0.0)
    M = Nb * OH * OW
    if kh == 3 and kw == 3:
        # Tap-major: the Pallas grid reduces over the 9 taps (K per step = Cin),
        # avoiding a wide concatenated im2col matrix and pipelining the tap DMAs.
        # TODO(synk): stride-aware Element-offset BlockSpecs could read the padded
        # activation directly and avoid materializing the tap stack entirely.
        a = jnp.stack([t.reshape(M, Cin) for t in taps], axis=0)
        wmat = jnp.transpose(w, (2, 3, 1, 0)).reshape(kh * kw, Cin, Cout)
    else:
        # 7x7 stem / 1x1 shortcut: fold taps into K (single-tap matmul).
        a = jnp.concatenate(taps, axis=-1).reshape(1, M, kh * kw * Cin)
        wmat = jnp.transpose(w, (2, 3, 1, 0)).reshape(1, kh * kw * Cin, Cout)

    s = bn["gamma"] / jnp.sqrt(bn["var"] + _BN_EPS)
    bias = (b - bn["mean"]) * s + bn["beta"]
    res_flat = None if residual is None else residual.reshape(M, Cout)
    y = pallas_conv_matmul(a, wmat, s, bias, residual=res_flat, relu=relu)
    return y.reshape(Nb, OH, OW, Cout)


def maxpool_3x3_s2_p1(x):
    Nb, H, W, C = x.shape
    taps, OH, OW = _extract_patches(x, 3, 3, 2, 1, pad_value=-jnp.inf)
    M = Nb * OH * OW
    a = jnp.stack([t.reshape(M, C) for t in taps], axis=0)
    y = pallas_maxpool(a)
    return y.reshape(Nb, OH, OW, C)


def basic_block(x, p, stride):
    cin = x.shape[-1]
    cout = p["conv1_w"].shape[0]
    y = conv_bn_act(x, p["conv1_w"], p["conv1_b"], p["bn1"], stride, 1, relu=True)
    if stride != 1 or cin != cout:
        sc = conv_bn_act(x, p["sc_w"], p["sc_b"], p["sc_bn"], stride, 0, relu=False)
    else:
        sc = x
    out = conv_bn_act(y, p["conv2_w"], p["conv2_b"], p["bn2"], 1, 1,
                      relu=True, residual=sc)
    return out


def resnet18_forward(x_nchw, params):
    x = jnp.transpose(x_nchw, (0, 2, 3, 1)).astype(jnp.bfloat16)  # NCHW -> NHWC
    x = conv_bn_act(x, params["conv1_w"], params["conv1_b"], params["bn1"],
                    stride=2, pad=3, relu=True)
    x = maxpool_3x3_s2_p1(x)
    for layer_name, strides in (("layer1", (1, 1)), ("layer2", (2, 1)),
                                ("layer3", (2, 1)), ("layer4", (2, 1))):
        for block_idx, s in enumerate(strides):
            x = basic_block(x, params[layer_name][block_idx], s)
    # mimic torch's x.view(-1, 512) on the (contiguous) NCHW tensor
    x = jnp.transpose(x, (0, 3, 1, 2)).reshape(-1, 512)
    out = pallas_fc_softmax(x, params["fc_w"].T, params["fc_b"], n_classes=10)
    return out


# ---------------------------------------------------------------------------
# Deterministic parameter initialization (shapes follow the PyTorch module)
# ---------------------------------------------------------------------------
def init_params(key):
    keys = iter(jax.random.split(key, 256))

    def conv_w(cout, cin, k):
        fan_in = cin * k * k
        return jax.random.normal(next(keys), (cout, cin, k, k), jnp.float32) / jnp.sqrt(fan_in)

    def conv_b(cout):
        return 0.01 * jax.random.normal(next(keys), (cout,), jnp.float32)

    def bn(c):
        return dict(
            gamma=1.0 + 0.05 * jax.random.normal(next(keys), (c,), jnp.float32),
            beta=0.05 * jax.random.normal(next(keys), (c,), jnp.float32),
            mean=0.05 * jax.random.normal(next(keys), (c,), jnp.float32),
            var=1.0 + 0.05 * jnp.abs(jax.random.normal(next(keys), (c,), jnp.float32)),
        )

    def block(cin, cout, stride):
        p = dict(conv1_w=conv_w(cout, cin, 3), conv1_b=conv_b(cout), bn1=bn(cout),
                 conv2_w=conv_w(cout, cout, 3), conv2_b=conv_b(cout), bn2=bn(cout))
        if stride != 1 or cin != cout:
            p.update(sc_w=conv_w(cout, cin, 1), sc_b=conv_b(cout), sc_bn=bn(cout))
        return p

    params = dict(
        conv1_w=conv_w(64, 3, 7), conv1_b=conv_b(64), bn1=bn(64),
        layer1=[block(64, 64, 1), block(64, 64, 1)],
        layer2=[block(64, 128, 2), block(128, 128, 1)],
        layer3=[block(128, 256, 2), block(256, 256, 1)],
        layer4=[block(256, 512, 2), block(512, 512, 1)],
        fc_w=jax.random.normal(next(keys), (10, 512), jnp.float32) / jnp.sqrt(512.0),
        fc_b=0.01 * jax.random.normal(next(keys), (10,), jnp.float32),
    )
    return params


if __name__ == "__main__":
    root = jax.random.PRNGKey(0)
    pkey, xkey = jax.random.split(root)
    params = init_params(pkey)
    # 3x32x32 input (CIFAR-like) so the final spatial size is 1x1 and view(-1,512)
    # yields one row per image, giving the documented (b, 10) output.
    x = jax.random.normal(xkey, (2, 3, 32, 32), jnp.float32)

    fwd = jax.jit(lambda inp: resnet18_forward(inp, params))
    out = jax.block_until_ready(fwd(x))

    assert out.shape == (2, 10), out.shape
    assert bool(jnp.all(jnp.isfinite(out)))
    assert bool(jnp.allclose(jnp.sum(out, axis=1), 1.0, atol=1e-4))
    print("KERNEL_OK")
</pallas_src>

<mosaic_0001>
module attributes {stable_mosaic.version = 11 : i64} {
  func.func @_conv_matmul_kernel(%arg0: i32, %arg1: i32, %arg2: i32, %arg3: memref<1x256x147xbf16, #tpu.memory_space<vmem>>, %arg4: memref<1x147x64xbf16, #tpu.memory_space<vmem>>, %arg5: memref<1x64xf32, #tpu.memory_space<vmem>>, %arg6: memref<1x64xf32, #tpu.memory_space<vmem>>, %arg7: memref<256x64xbf16, #tpu.memory_space<vmem>>, %arg8: memref<256x64xf32, #tpu.memory_space<vmem>>) attributes {dimension_semantics = [#tpu.dimension_semantics<parallel>, #tpu.dimension_semantics<parallel>, #tpu.dimension_semantics<arbitrary>], iteration_bounds = array<i64: 2, 1, 1>, scalar_prefetch = 0 : i64, scratch_operands = 1 : i64, tpu.core_type = #tpu.core_type<tc>, window_params = [{transform_indices = @transform_0, window_bounds = array<i64: 1, 256, 147>}, {transform_indices = @transform_1, window_bounds = array<i64: 1, 147, 64>}, {transform_indices = @transform_2, window_bounds = array<i64: 1, 64>}, {transform_indices = @transform_3, window_bounds = array<i64: 1, 64>}, {transform_indices = @transform_4, window_bounds = array<i64: 256, 64>}]} {
    %c0_i32 = arith.constant 0 : i32
    %0 = arith.cmpi eq, %arg2, %c0_i32 : i32
    %1 = arith.extui %0 : i1 to i32
    %c0_i32_0 = arith.constant 0 : i32
    %2 = arith.cmpi ne, %1, %c0_i32_0 : i32
    scf.if %2 {
      %cst_12 = arith.constant 0.000000e+00 : f32
      %14 = vector.broadcast %cst_12 : f32 to vector<256x64xf32>
      %c0_13 = arith.constant 0 : index
      %c0_14 = arith.constant 0 : index
      %15 = vector.load %arg8[%c0_13, %c0_14] : memref<256x64xf32, #tpu.memory_space<vmem>>, vector<256x64xf32>
      tpu.vector_store %arg8[%c0_13, %c0_14], %14 {strides = array<i32>} : memref<256x64xf32, #tpu.memory_space<vmem>>, vector<256x64xf32>,
    } else {
    }
    %c0 = arith.constant 0 : index
    %c0_1 = arith.constant 0 : index
    %3 = vector.load %arg8[%c0, %c0_1] : memref<256x64xf32, #tpu.memory_space<vmem>>, vector<256x64xf32>
    %c0_2 = arith.constant 0 : index
    %c0_3 = arith.constant 0 : index
    %c0_4 = arith.constant 0 : index
    %4 = vector.load %arg3[%c0_2, %c0_3, %c0_4] : memref<1x256x147xbf16, #tpu.memory_space<vmem>>, vector<1x256x147xbf16>
    %5 = vector.shape_cast %4 : vector<1x256x147xbf16> to vector<256x147xbf16>
    %c0_5 = arith.constant 0 : index
    %c0_6 = arith.constant 0 : index
    %c0_7 = arith.constant 0 : index
    %6 = vector.load %arg4[%c0_5, %c0_6, %c0_7] : memref<1x147x64xbf16, #tpu.memory_space<vmem>>, vector<1x147x64xbf16>
    %7 = vector.shape_cast %6 : vector<1x147x64xbf16> to vector<147x64xbf16>
    %cst = arith.constant dense<0.000000e+00> : vector<256x64xf32>
    %8 = tpu.matmul %5, %7, %cst {dimension_numbers = #tpu.dot_dimension_numbers<[1], [0], [0], [1], [0, 0, 1, 1], [], []>} : vector<256x147xbf16>, vector<147x64xbf16>, vector<256x64xf32> -> vector<256x64xf32>
    %9 = arith.addf %3, %8 : vector<256x64xf32>
    %c0_8 = arith.constant 0 : index
    %c0_9 = arith.constant 0 : index
    %10 = vector.load %arg8[%c0_8, %c0_9] : memref<256x64xf32, #tpu.memory_space<vmem>>, vector<256x64xf32>
    tpu.vector_store %arg8[%c0_8, %c0_9], %9 {strides = array<i32>} : memref<256x64xf32, #tpu.memory_space<vmem>>, vector<256x64xf32>,
    %c0_i32_10 = arith.constant 0 : i32
    %11 = arith.cmpi eq, %arg2, %c0_i32_10 : i32
    %12 = arith.extui %11 : i1 to i32
    %c0_i32_11 = arith.constant 0 : i32
    %13 = arith.cmpi ne, %12, %c0_i32_11 : i32
    scf.if %13 {
      %c0_12 = arith.constant 0 : index
      %c0_13 = arith.constant 0 : index
      %14 = vector.load %arg8[%c0_12, %c0_13] : memref<256x64xf32, #tpu.memory_space<vmem>>, vector<256x64xf32>
      %c0_14 = arith.constant 0 : index
      %c0_15 = arith.constant 0 : index
      %15 = vector.load %arg5[%c0_14, %c0_15] : memref<1x64xf32, #tpu.memory_space<vmem>>, vector<1x64xf32>
      %16 = vector.broadcast %15 : vector<1x64xf32> to vector<256x64xf32>
      %17 = arith.mulf %14, %16 : vector<256x64xf32>
      %c0_16 = arith.constant 0 : index
      %c0_17 = arith.constant 0 : index
      %18 = vector.load %arg6[%c0_16, %c0_17] : memref<1x64xf32, #tpu.memory_space<vmem>>, vector<1x64xf32>
      %19 = vector.broadcast %18 : vector<1x64xf32> to vector<256x64xf32>
      %20 = arith.addf %17, %19 : vector<256x64xf32>
      %cst_18 = arith.constant 0.000000e+00 : f32
      %21 = vector.broadcast %cst_18 : f32 to vector<256x64xf32>
      %22 = arith.maximumf %20, %21 : vector<256x64xf32>
      %23 = arith.truncf %22 : vector<256x64xf32> to vector<256x64xbf16>
      %c0_19 = arith.constant 0 : index
      %c0_20 = arith.constant 0 : index
      %24 = vector.load %arg7[%c0_19, %c0_20] : memref<256x64xbf16, #tpu.memory_space<vmem>>, vector<256x64xbf16>
      tpu.vector_store %arg7[%c0_19, %c0_20], %23 {strides = array<i32>} : memref<256x64xbf16, #tpu.memory_space<vmem>>, vector<256x64xbf16>,
    } else {
    }
    return
  }
  func.func @transform_0(%arg0: i32, %arg1: i32, %arg2: i32) -> (i32, i32, i32) {
    %c0_i32 = arith.constant 0 : i32
    %c0_i32_0 = arith.constant 0 : i32
    return %arg2, %arg0, %c0_i32 : i32, i32, i32
  }
  func.func @transform_1(%arg0: i32, %arg1: i32, %arg2: i32) -> (i32, i32, i32) {
    %c0_i32 = arith.constant 0 : i32
    %c0_i32_0 = arith.constant 0 : i32
    return %arg2, %c0_i32, %arg1 : i32, i32, i32
  }
  func.func @transform_2(%arg0: i32, %arg1: i32, %arg2: i32) -> (i32, i32) {
    %c0_i32 = arith.constant 0 : i32
    %c0_i32_0 = arith.constant 0 : i32
    return %c0_i32, %arg1 : i32, i32
  }
  func.func @transform_3(%arg0: i32, %arg1: i32, %arg2: i32) -> (i32, i32) {
    %c0_i32 = arith.constant 0 : i32
    %c0_i32_0 = arith.constant 0 : i32
    return %c0_i32, %arg1 : i32, i32
  }
  func.func @transform_4(%arg0: i32, %arg1: i32, %arg2: i32) -> (i32, i32) {
    %c0_i32 = arith.constant 0 : i32
    return %arg0, %arg1 : i32, i32
  }
}

module attributes {stable_mosaic.version = 11 : i64} {
  func.func @_maxpool_kernel(%arg0: i32, %arg1: i32, %arg2: memref<1x128x64xbf16, #tpu.memory_space<vmem>>, %arg3: memref<128x64xbf16, #tpu.memory_space<vmem>>, %arg4: memref<128x64xbf16, #tpu.memory_space<vmem>>) attributes {dimension_semantics = [#tpu.dimension_semantics<parallel>, #tpu.dimension_semantics<arbitrary>], iteration_bounds = array<i64: 1, 9>, scalar_prefetch = 0 : i64, scratch_operands = 1 : i64, tpu.core_type = #tpu.core_type<tc>, window_params = [{transform_indices = @transform_0, window_bounds = array<i64: 1, 128, 64>}, {transform_indices = @transform_1, window_bounds = array<i64: 128, 64>}]} {
    %c0_i32 = arith.constant 0 : i32
    %0 = arith.cmpi eq, %arg1, %c0_i32 : i32
    %1 = arith.extui %0 : i1 to i32
    %c0_i32_0 = arith.constant 0 : i32
    %2 = arith.cmpi ne, %1, %c0_i32_0 : i32
    scf.if %2 {
      %c0 = arith.constant 0 : index
      %c0_4 = arith.constant 0 : index
      %c0_5 = arith.constant 0 : index
      %9 = vector.load %arg2[%c0, %c0_4, %c0_5] : memref<1x128x64xbf16, #tpu.memory_space<vmem>>, vector<1x128x64xbf16>
      %10 = vector.shape_cast %9 : vector<1x128x64xbf16> to vector<128x64xbf16>
      %c0_6 = arith.constant 0 : index
      %c0_7 = arith.constant 0 : index
      %11 = vector.load %arg4[%c0_6, %c0_7] : memref<128x64xbf16, #tpu.memory_space<vmem>>, vector<128x64xbf16>
      tpu.vector_store %arg4[%c0_6, %c0_7], %10 {strides = array<i32>} : memref<128x64xbf16, #tpu.memory_space<vmem>>, vector<128x64xbf16>,
    } else {
    }
    %c0_i32_1 = arith.constant 0 : i32
    %3 = arith.cmpi sgt, %arg1, %c0_i32_1 : i32
    %4 = arith.extui %3 : i1 to i32
    %c0_i32_2 = arith.constant 0 : i32
    %5 = arith.cmpi ne, %4, %c0_i32_2 : i32
    scf.if %5 {
      %c0 = arith.constant 0 : index
      %c0_4 = arith.constant 0 : index
      %9 = vector.load %arg4[%c0, %c0_4] : memref<128x64xbf16, #tpu.memory_space<vmem>>, vector<128x64xbf16>
      %c0_5 = arith.constant 0 : index
      %c0_6 = arith.constant 0 : index
      %c0_7 = arith.constant 0 : index
      %10 = vector.load %arg2[%c0_5, %c0_6, %c0_7] : memref<1x128x64xbf16, #tpu.memory_space<vmem>>, vector<1x128x64xbf16>
      %11 = vector.shape_cast %10 : vector<1x128x64xbf16> to vector<128x64xbf16>
      %12 = arith.maximumf %9, %11 : vector<128x64xbf16>
      %c0_8 = arith.constant 0 : index
      %c0_9 = arith.constant 0 : index
      %13 = vector.load %arg4[%c0_8, %c0_9] : memref<128x64xbf16, #tpu.memory_space<vmem>>, vector<128x64xbf16>
      tpu.vector_store %arg4[%c0_8, %c0_9], %12 {strides = array<i32>} : memref<128x64xbf16, #tpu.memory_space<vmem>>, vector<128x64xbf16>,
    } else {
    }
    %c8_i32 = arith.constant 8 : i32
    %6 = arith.cmpi eq, %arg1, %c8_i32 : i32
    %7 = arith.extui %6 : i1 to i32
    %c0_i32_3 = arith.constant 0 : i32
    %8 = arith.cmpi ne, %7, %c0_i32_3 : i32
    scf.if %8 {
      %c0 = arith.constant 0 : index
      %c0_4 = arith.constant 0 : index
      %9 = vector.load %arg4[%c0, %c0_4] : memref<128x64xbf16, #tpu.memory_space<vmem>>, vector<128x64xbf16>
      %c0_5 = arith.constant 0 : index
      %c0_6 = arith.constant 0 : index
      %10 = vector.load %arg3[%c0_5, %c0_6] : memref<128x64xbf16, #tpu.memory_space<vmem>>, vector<128x64xbf16>
      tpu.vector_store %arg3[%c0_5, %c0_6], %9 {strides = array<i32>} : memref<128x64xbf16, #tpu.memory_space<vmem>>, vector<128x64xbf16>,
    } else {
    }
    return
  }
  func.func @transform_0(%arg0: i32, %arg1: i32) -> (i32, i32, i32) {
    %c0_i32 = arith.constant 0 : i32
    %c0_i32_0 = arith.constant 0 : i32
    return %arg1, %arg0, %c0_i32 : i32, i32, i32
  }
  func.func @transform_1(%arg0: i32, %arg1: i32) -> (i32, i32) {
    %c0_i32 = arith.constant 0 : i32
    %c0_i32_0 = arith.constant 0 : i32
    return %arg0, %c0_i32 : i32, i32
  }
}

module attributes {stable_mosaic.version = 11 : i64} {
  func.func @_conv_matmul_kernel(%arg0: i32, %arg1: i32, %arg2: i32, %arg3: memref<1x128x64xbf16, #tpu.memory_space<vmem>>, %arg4: memref<1x64x64xbf16, #tpu.memory_space<vmem>>, %arg5: memref<1x64xf32, #tpu.memory_space<vmem>>, %arg6: memref<1x64xf32, #tpu.memory_space<vmem>>, %arg7: memref<128x64xbf16, #tpu.memory_space<vmem>>, %arg8: memref<128x64xf32, #tpu.memory_space<vmem>>) attributes {dimension_semantics = [#tpu.dimension_semantics<parallel>, #tpu.dimension_semantics<parallel>, #tpu.dimension_semantics<arbitrary>], iteration_bounds = array<i64: 1, 1, 9>, scalar_prefetch = 0 : i64, scratch_operands = 1 : i64, tpu.core_type = #tpu.core_type<tc>, window_params = [{transform_indices = @transform_0, window_bounds = array<i64: 1, 128, 64>}, {transform_indices = @transform_1, window_bounds = array<i64: 1, 64, 64>}, {transform_indices = @transform_2, window_bounds = array<i64: 1, 64>}, {transform_indices = @transform_3, window_bounds = array<i64: 1, 64>}, {transform_indices = @transform_4, window_bounds = array<i64: 128, 64>}]} {
    %c0_i32 = arith.constant 0 : i32
    %0 = arith.cmpi eq, %arg2, %c0_i32 : i32
    %1 = arith.extui %0 : i1 to i32
    %c0_i32_0 = arith.constant 0 : i32
    %2 = arith.cmpi ne, %1, %c0_i32_0 : i32
    scf.if %2 {
      %cst_11 = arith.constant 0.000000e+00 : f32
      %14 = vector.broadcast %cst_11 : f32 to vector<128x64xf32>
      %c0_12 = arith.constant 0 : index
      %c0_13 = arith.constant 0 : index
      %15 = vector.load %arg8[%c0_12, %c0_13] : memref<128x64xf32, #tpu.memory_space<vmem>>, vector<128x64xf32>
      tpu.vector_store %arg8[%c0_12, %c0_13], %14 {strides = array<i32>} : memref<128x64xf32, #tpu.memory_space<vmem>>, vector<128x64xf32>,
    } else {
    }
    %c0 = arith.constant 0 : index
    %c0_1 = arith.constant 0 : index
    %3 = vector.load %arg8[%c0, %c0_1] : memref<128x64xf32, #tpu.memory_space<vmem>>, vector<128x64xf32>
    %c0_2 = arith.constant 0 : index
    %c0_3 = arith.constant 0 : index
    %c0_4 = arith.constant 0 : index
    %4 = vector.load %arg3[%c0_2, %c0_3, %c0_4] : memref<1x128x64xbf16, #tpu.memory_space<vmem>>, vector<1x128x64xbf16>
    %5 = vector.shape_cast %4 : vector<1x128x64xbf16> to vector<128x64xbf16>
    %c0_5 = arith.constant 0 : index
    %c0_6 = arith.constant 0 : index
    %c0_7 = arith.constant 0 : index
    %6 = vector.load %arg4[%c0_5, %c0_6, %c0_7] : memref<1x64x64xbf16, #tpu.memory_space<vmem>>, vector<1x64x64xbf16>
    %7 = vector.shape_cast %6 : vector<1x64x64xbf16> to vector<64x64xbf16>
    %cst = arith.constant dense<0.000000e+00> : vector<128x64xf32>
    %8 = tpu.matmul %5, %7, %cst {dimension_numbers = #tpu.dot_dimension_numbers<[1], [0], [0], [1], [0, 0, 1, 1], [], []>} : vector<128x64xbf16>, vector<64x64xbf16>, vector<128x64xf32> -> vector<128x64xf32>
    %9 = arith.addf %3, %8 : vector<128x64xf32>
    %c0_8 = arith.constant 0 : index
    %c0_9 = arith.constant 0 : index
    %10 = vector.load %arg8[%c0_8, %c0_9] : memref<128x64xf32, #tpu.memory_space<vmem>>, vector<128x64xf32>
    tpu.vector_store %arg8[%c0_8, %c0_9], %9 {strides = array<i32>} : memref<128x64xf32, #tpu.memory_space<vmem>>, vector<128x64xf32>,
    %c8_i32 = arith.constant 8 : i32
    %11 = arith.cmpi eq, %arg2, %c8_i32 : i32
    %12 = arith.extui %11 : i1 to i32
    %c0_i32_10 = arith.constant 0 : i32
    %13 = arith.cmpi ne, %12, %c0_i32_10 : i32
    scf.if %13 {
      %c0_11 = arith.constant 0 : index
      %c0_12 = arith.constant 0 : index
      %14 = vector.load %arg8[%c0_11, %c0_12] : memref<128x64xf32, #tpu.memory_space<vmem>>, vector<128x64xf32>
      %c0_13 = arith.constant 0 : index
      %c0_14 = arith.constant 0 : index
      %15 = vector.load %arg5[%c0_13, %c0_14] : memref<1x64xf32, #tpu.memory_space<vmem>>, vector<1x64xf32>
      %16 = vector.broadcast %15 : vector<1x64xf32> to vector<128x64xf32>
      %17 = arith.mulf %14, %16 : vector<128x64xf32>
      %c0_15 = arith.constant 0 : index
      %c0_16 = arith.constant 0 : index
      %18 = vector.load %arg6[%c0_15, %c0_16] : memref<1x64xf32, #tpu.memory_space<vmem>>, vector<1x64xf32>
      %19 = vector.broadcast %18 : vector<1x64xf32> to vector<128x64xf32>
      %20 = arith.addf %17, %19 : vector<128x64xf32>
      %cst_17 = arith.constant 0.000000e+00 : f32
      %21 = vector.broadcast %cst_17 : f32 to vector<128x64xf32>
      %22 = arith.maximumf %20, %21 : vector<128x64xf32>
      %23 = arith.truncf %22 : vector<128x64xf32> to vector<128x64xbf16>
      %c0_18 = arith.constant 0 : index
      %c0_19 = arith.constant 0 : index
      %24 = vector.load %arg7[%c0_18, %c0_19] : memref<128x64xbf16, #tpu.memory_space<vmem>>, vector<128x64xbf16>
      tpu.vector_store %arg7[%c0_18, %c0_19], %23 {strides = array<i32>} : memref<128x64xbf16, #tpu.memory_space<vmem>>, vector<128x64xbf16>,
    } else {
    }
    return
  }
  func.func @transform_0(%arg0: i32, %arg1: i32, %arg2: i32) -> (i32, i32, i32) {
    %c0_i32 = arith.constant 0 : i32
    %c0_i32_0 = arith.constant 0 : i32
    return %arg2, %arg0, %c0_i32 : i32, i32, i32
  }
  func.func @transform_1(%arg0: i32, %arg1: i32, %arg2: i32) -> (i32, i32, i32) {
    %c0_i32 = arith.constant 0 : i32
    %c0_i32_0 = arith.constant 0 : i32
    return %arg2, %c0_i32, %arg1 : i32, i32, i32
  }
  func.func @transform_2(%arg0: i32, %arg1: i32, %arg2: i32) -> (i32, i32) {
    %c0_i32 = arith.constant 0 : i32
    %c0_i32_0 = arith.constant 0 : i32
    return %c0_i32, %arg1 : i32, i32
  }
  func.func @transform_3(%arg0: i32, %arg1: i32, %arg2: i32) -> (i32, i32) {
    %c0_i32 = arith.constant 0 : i32
    %c0_i32_0 = arith.constant 0 : i32
    return %c0_i32, %arg1 : i32, i32
  }
  func.func @transform_4(%arg0: i32, %arg1: i32, %arg2: i32) -> (i32, i32) {
    %c0_i32 = arith.constant 0 : i32
    return %arg0, %arg1 : i32, i32
  }
}

module attributes {stable_mosaic.version = 11 : i64} {
  func.func @_conv_matmul_kernel(%arg0: i32, %arg1: i32, %arg2: i32, %arg3: memref<1x128x64xbf16, #tpu.memory_space<vmem>>, %arg4: memref<1x64x64xbf16, #tpu.memory_space<vmem>>, %arg5: memref<1x64xf32, #tpu.memory_space<vmem>>, %arg6: memref<1x64xf32, #tpu.memory_space<vmem>>, %arg7: memref<128x64xbf16, #tpu.memory_space<vmem>>, %arg8: memref<128x64xbf16, #tpu.memory_space<vmem>>, %arg9: memref<128x64xf32, #tpu.memory_space<vmem>>) attributes {dimension_semantics = [#tpu.dimension_semantics<parallel>, #tpu.dimension_semantics<parallel>, #tpu.dimension_semantics<arbitrary>], iteration_bounds = array<i64: 1, 1, 9>, scalar_prefetch = 0 : i64, scratch_operands = 1 : i64, tpu.core_type = #tpu.core_type<tc>, window_params = [{transform_indices = @transform_0, window_bounds = array<i64: 1, 128, 64>}, {transform_indices = @transform_1, window_bounds = array<i64: 1, 64, 64>}, {transform_indices = @transform_2, window_bounds = array<i64: 1, 64>}, {transform_indices = @transform_3, window_bounds = array<i64: 1, 64>}, {transform_indices = @transform_4, window_bounds = array<i64: 128, 64>}, {transform_indices = @transform_5, window_bounds = array<i64: 128, 64>}]} {
    %c0_i32 = arith.constant 0 : i32
    %0 = arith.cmpi eq, %arg2, %c0_i32 : i32
    %1 = arith.extui %0 : i1 to i32
    %c0_i32_0 = arith.constant 0 : i32
    %2 = arith.cmpi ne, %1, %c0_i32_0 : i32
    scf.if %2 {
      %cst_11 = arith.constant 0.000000e+00 : f32
      %14 = vector.broadcast %cst_11 : f32 to vector<128x64xf32>
      %c0_12 = arith.constant 0 : index
      %c0_13 = arith.constant 0 : index
      %15 = vector.load %arg9[%c0_12, %c0_13] : memref<128x64xf32, #tpu.memory_space<vmem>>, vector<128x64xf32>
      tpu.vector_store %arg9[%c0_12, %c0_13], %14 {strides = array<i32>} : memref<128x64xf32, #tpu.memory_space<vmem>>, vector<128x64xf32>,
    } else {
    }
    %c0 = arith.constant 0 : index
    %c0_1 = arith.constant 0 : index
    %3 = vector.load %arg9[%c0, %c0_1] : memref<128x64xf32, #tpu.memory_space<vmem>>, vector<128x64xf32>
    %c0_2 = arith.constant 0 : index
    %c0_3 = arith.constant 0 : index
    %c0_4 = arith.constant 0 : index
    %4 = vector.load %arg3[%c0_2, %c0_3, %c0_4] : memref<1x128x64xbf16, #tpu.memory_space<vmem>>, vector<1x128x64xbf16>
    %5 = vector.shape_cast %4 : vector<1x128x64xbf16> to vector<128x64xbf16>
    %c0_5 = arith.constant 0 : index
    %c0_6 = arith.constant 0 : index
    %c0_7 = arith.constant 0 : index
    %6 = vector.load %arg4[%c0_5, %c0_6, %c0_7] : memref<1x64x64xbf16, #tpu.memory_space<vmem>>, vector<1x64x64xbf16>
    %7 = vector.shape_cast %6 : vector<1x64x64xbf16> to vector<64x64xbf16>
    %cst = arith.constant dense<0.000000e+00> : vector<128x64xf32>
    %8 = tpu.matmul %5, %7, %cst {dimension_numbers = #tpu.dot_dimension_numbers<[1], [0], [0], [1], [0, 0, 1, 1], [], []>} : vector<128x64xbf16>, vector<64x64xbf16>, vector<128x64xf32> -> vector<128x64xf32>
    %9 = arith.addf %3, %8 : vector<128x64xf32>
    %c0_8 = arith.constant 0 : index
    %c0_9 = arith.constant 0 : index
    %10 = vector.load %arg9[%c0_8, %c0_9] : memref<128x64xf32, #tpu.memory_space<vmem>>, vector<128x64xf32>
    tpu.vector_store %arg9[%c0_8, %c0_9], %9 {strides = array<i32>} : memref<128x64xf32, #tpu.memory_space<vmem>>, vector<128x64xf32>,
    %c8_i32 = arith.constant 8 : i32
    %11 = arith.cmpi eq, %arg2, %c8_i32 : i32
    %12 = arith.extui %11 : i1 to i32
    %c0_i32_10 = arith.constant 0 : i32
    %13 = arith.cmpi ne, %12, %c0_i32_10 : i32
    scf.if %13 {
      %c0_11 = arith.constant 0 : index
      %c0_12 = arith.constant 0 : index
      %14 = vector.load %arg9[%c0_11, %c0_12] : memref<128x64xf32, #tpu.memory_space<vmem>>, vector<128x64xf32>
      %c0_13 = arith.constant 0 : index
      %c0_14 = arith.constant 0 : index
      %15 = vector.load %arg5[%c0_13, %c0_14] : memref<1x64xf32, #tpu.memory_space<vmem>>, vector<1x64xf32>
      %16 = vector.broadcast %15 : vector<1x64xf32> to vector<128x64xf32>
      %17 = arith.mulf %14, %16 : vector<128x64xf32>
      %c0_15 = arith.constant 0 : index
      %c0_16 = arith.constant 0 : index
      %18 = vector.load %arg6[%c0_15, %c0_16] : memref<1x64xf32, #tpu.memory_space<vmem>>, vector<1x64xf32>
      %19 = vector.broadcast %18 : vector<1x64xf32> to vector<128x64xf32>
      %20 = arith.addf %17, %19 : vector<128x64xf32>
      %c0_17 = arith.constant 0 : index
      %c0_18 = arith.constant 0 : index
      %21 = vector.load %arg7[%c0_17, %c0_18] : memref<128x64xbf16, #tpu.memory_space<vmem>>, vector<128x64xbf16>
      %22 = arith.extf %21 : vector<128x64xbf16> to vector<128x64xf32>
      %23 = arith.addf %20, %22 : vector<128x64xf32>
      %cst_19 = arith.constant 0.000000e+00 : f32
      %24 = vector.broadcast %cst_19 : f32 to vector<128x64xf32>
      %25 = arith.maximumf %23, %24 : vector<128x64xf32>
      %26 = arith.truncf %25 : vector<128x64xf32> to vector<128x64xbf16>
      %c0_20 = arith.constant 0 : index
      %c0_21 = arith.constant 0 : index
      %27 = vector.load %arg8[%c0_20, %c0_21] : memref<128x64xbf16, #tpu.memory_space<vmem>>, vector<128x64xbf16>
      tpu.vector_store %arg8[%c0_20, %c0_21], %26 {strides = array<i32>} : memref<128x64xbf16, #tpu.memory_space<vmem>>, vector<128x64xbf16>,
    } else {
    }
    return
  }
  func.func @transform_0(%arg0: i32, %arg1: i32, %arg2: i32) -> (i32, i32, i32) {
    %c0_i32 = arith.constant 0 : i32
    %c0_i32_0 = arith.constant 0 : i32
    return %arg2, %arg0, %c0_i32 : i32, i32, i32
  }
  func.func @transform_1(%arg0: i32, %arg1: i32, %arg2: i32) -> (i32, i32, i32) {
    %c0_i32 = arith.constant 0 : i32
    %c0_i32_0 = arith.constant 0 : i32
    return %arg2, %c0_i32, %arg1 : i32, i32, i32
  }
  func.func @transform_2(%arg0: i32, %arg1: i32, %arg2: i32) -> (i32, i32) {
    %c0_i32 = arith.constant 0 : i32
    %c0_i32_0 = arith.constant 0 : i32
    return %c0_i32, %arg1 : i32, i32
  }
  func.func @transform_3(%arg0: i32, %arg1: i32, %arg2: i32) -> (i32, i32) {
    %c0_i32 = arith.constant 0 : i32
    %c0_i32_0 = arith.constant 0 : i32
    return %c0_i32, %arg1 : i32, i32
  }
  func.func @transform_4(%arg0: i32, %arg1: i32, %arg2: i32) -> (i32, i32) {
    %c0_i32 = arith.constant 0 : i32
    return %arg0, %arg1 : i32, i32
  }
  func.func @transform_5(%arg0: i32, %arg1: i32, %arg2: i32) -> (i32, i32) {
    %c0_i32 = arith.constant 0 : i32
    return %arg0, %arg1 : i32, i32
  }
}

module attributes {stable_mosaic.version = 11 : i64} {
  func.func @_conv_matmul_kernel(%arg0: i32, %arg1: i32, %arg2: i32, %arg3: memref<1x32x64xbf16, #tpu.memory_space<vmem>>, %arg4: memref<1x64x128xbf16, #tpu.memory_space<vmem>>, %arg5: memref<1x128xf32, #tpu.memory_space<vmem>>, %arg6: memref<1x128xf32, #tpu.memory_space<vmem>>, %arg7: memref<32x128xbf16, #tpu.memory_space<vmem>>, %arg8: memref<32x128xf32, #tpu.memory_space<vmem>>) attributes {dimension_semantics = [#tpu.dimension_semantics<parallel>, #tpu.dimension_semantics<parallel>, #tpu.dimension_semantics<arbitrary>], iteration_bounds = array<i64: 1, 1, 9>, scalar_prefetch = 0 : i64, scratch_operands = 1 : i64, tpu.core_type = #tpu.core_type<tc>, window_params = [{transform_indices = @transform_0, window_bounds = array<i64: 1, 32, 64>}, {transform_indices = @transform_1, window_bounds = array<i64: 1, 64, 128>}, {transform_indices = @transform_2, window_bounds = array<i64: 1, 128>}, {transform_indices = @transform_3, window_bounds = array<i64: 1, 128>}, {transform_indices = @transform_4, window_bounds = array<i64: 32, 128>}]} {
    %c0_i32 = arith.constant 0 : i32
    %0 = arith.cmpi eq, %arg2, %c0_i32 : i32
    %1 = arith.extui %0 : i1 to i32
    %c0_i32_0 = arith.constant 0 : i32
    %2 = arith.cmpi ne, %1, %c0_i32_0 : i32
    scf.if %2 {
      %cst_11 = arith.constant 0.000000e+00 : f32
      %14 = vector.broadcast %cst_11 : f32 to vector<32x128xf32>
      %c0_12 = arith.constant 0 : index
      %c0_13 = arith.constant 0 : index
      %15 = vector.load %arg8[%c0_12, %c0_13] : memref<32x128xf32, #tpu.memory_space<vmem>>, vector<32x128xf32>
      tpu.vector_store %arg8[%c0_12, %c0_13], %14 {strides = array<i32>} : memref<32x128xf32, #tpu.memory_space<vmem>>, vector<32x128xf32>,
    } else {
    }
    %c0 = arith.constant 0 : index
    %c0_1 = arith.constant 0 : index
    %3 = vector.load %arg8[%c0, %c0_1] : memref<32x128xf32, #tpu.memory_space<vmem>>, vector<32x128xf32>
    %c0_2 = arith.constant 0 : index
    %c0_3 = arith.constant 0 : index
    %c0_4 = arith.constant 0 : index
    %4 = vector.load %arg3[%c0_2, %c0_3, %c0_4] : memref<1x32x64xbf16, #tpu.memory_space<vmem>>, vector<1x32x64xbf16>
    %5 = vector.shape_cast %4 : vector<1x32x64xbf16> to vector<32x64xbf16>
    %c0_5 = arith.constant 0 : index
    %c0_6 = arith.constant 0 : index
    %c0_7 = arith.constant 0 : index
    %6 = vector.load %arg4[%c0_5, %c0_6, %c0_7] : memref<1x64x128xbf16, #tpu.memory_space<vmem>>, vector<1x64x128xbf16>
    %7 = vector.shape_cast %6 : vector<1x64x128xbf16> to vector<64x128xbf16>
    %cst = arith.constant dense<0.000000e+00> : vector<32x128xf32>
    %8 = tpu.matmul %5, %7, %cst {dimension_numbers = #tpu.dot_dimension_numbers<[1], [0], [0], [1], [0, 0, 1, 1], [], []>} : vector<32x64xbf16>, vector<64x128xbf16>, vector<32x128xf32> -> vector<32x128xf32>
    %9 = arith.addf %3, %8 : vector<32x128xf32>
    %c0_8 = arith.constant 0 : index
    %c0_9 = arith.constant 0 : index
    %10 = vector.load %arg8[%c0_8, %c0_9] : memref<32x128xf32, #tpu.memory_space<vmem>>, vector<32x128xf32>
    tpu.vector_store %arg8[%c0_8, %c0_9], %9 {strides = array<i32>} : memref<32x128xf32, #tpu.memory_space<vmem>>, vector<32x128xf32>,
    %c8_i32 = arith.constant 8 : i32
    %11 = arith.cmpi eq, %arg2, %c8_i32 : i32
    %12 = arith.extui %11 : i1 to i32
    %c0_i32_10 = arith.constant 0 : i32
    %13 = arith.cmpi ne, %12, %c0_i32_10 : i32
    scf.if %13 {
      %c0_11 = arith.constant 0 : index
      %c0_12 = arith.constant 0 : index
      %14 = vector.load %arg8[%c0_11, %c0_12] : memref<32x128xf32, #tpu.memory_space<vmem>>, vector<32x128xf32>
      %c0_13 = arith.constant 0 : index
      %c0_14 = arith.constant 0 : index
      %15 = vector.load %arg5[%c0_13, %c0_14] : memref<1x128xf32, #tpu.memory_space<vmem>>, vector<1x128xf32>
      %16 = vector.broadcast %15 : vector<1x128xf32> to vector<32x128xf32>
      %17 = arith.mulf %14, %16 : vector<32x128xf32>
      %c0_15 = arith.constant 0 : index
      %c0_16 = arith.constant 0 : index
      %18 = vector.load %arg6[%c0_15, %c0_16] : memref<1x128xf32, #tpu.memory_space<vmem>>, vector<1x128xf32>
      %19 = vector.broadcast %18 : vector<1x128xf32> to vector<32x128xf32>
      %20 = arith.addf %17, %19 : vector<32x128xf32>
      %cst_17 = arith.constant 0.000000e+00 : f32
      %21 = vector.broadcast %cst_17 : f32 to vector<32x128xf32>
      %22 = arith.maximumf %20, %21 : vector<32x128xf32>
      %23 = arith.truncf %22 : vector<32x128xf32> to vector<32x128xbf16>
      %c0_18 = arith.constant 0 : index
      %c0_19 = arith.constant 0 : index
      %24 = vector.load %arg7[%c0_18, %c0_19] : memref<32x128xbf16, #tpu.memory_space<vmem>>, vector<32x128xbf16>
      tpu.vector_store %arg7[%c0_18, %c0_19], %23 {strides = array<i32>} : memref<32x128xbf16, #tpu.memory_space<vmem>>, vector<32x128xbf16>,
    } else {
    }
    return
  }
  func.func @transform_0(%arg0: i32, %arg1: i32, %arg2: i32) -> (i32, i32, i32) {
    %c0_i32 = arith.constant 0 : i32
    %c0_i32_0 = arith.constant 0 : i32
    return %arg2, %arg0, %c0_i32 : i32, i32, i32
  }
  func.func @transform_1(%arg0: i32, %arg1: i32, %arg2: i32) -> (i32, i32, i32) {
    %c0_i32 = arith.constant 0 : i32
    %c0_i32_0 = arith.constant 0 : i32
    return %arg2, %c0_i32, %arg1 : i32, i32, i32
  }
  func.func @transform_2(%arg0: i32, %arg1: i32, %arg2: i32) -> (i32, i32) {
    %c0_i32 = arith.constant 0 : i32
    %c0_i32_0 = arith.constant 0 : i32
    return %c0_i32, %arg1 : i32, i32
  }
  func.func @transform_3(%arg0: i32, %arg1: i32, %arg2: i32) -> (i32, i32) {
    %c0_i32 = arith.constant 0 : i32
    %c0_i32_0 = arith.constant 0 : i32
    return %c0_i32, %arg1 : i32, i32
  }
  func.func @transform_4(%arg0: i32, %arg1: i32, %arg2: i32) -> (i32, i32) {
    %c0_i32 = arith.constant 0 : i32
    return %arg0, %arg1 : i32, i32
  }
}

module attributes {stable_mosaic.version = 11 : i64} {
  func.func @_conv_matmul_kernel(%arg0: i32, %arg1: i32, %arg2: i32, %arg3: memref<1x32x64xbf16, #tpu.memory_space<vmem>>, %arg4: memref<1x64x128xbf16, #tpu.memory_space<vmem>>, %arg5: memref<1x128xf32, #tpu.memory_space<vmem>>, %arg6: memref<1x128xf32, #tpu.memory_space<vmem>>, %arg7: memref<32x128xbf16, #tpu.memory_space<vmem>>, %arg8: memref<32x128xf32, #tpu.memory_space<vmem>>) attributes {dimension_semantics = [#tpu.dimension_semantics<parallel>, #tpu.dimension_semantics<parallel>, #tpu.dimension_semantics<arbitrary>], iteration_bounds = array<i64: 1, 1, 1>, scalar_prefetch = 0 : i64, scratch_operands = 1 : i64, tpu.core_type = #tpu.core_type<tc>, window_params = [{transform_indices = @transform_0, window_bounds = array<i64: 1, 32, 64>}, {transform_indices = @transform_1, window_bounds = array<i64: 1, 64, 128>}, {transform_indices = @transform_2, window_bounds = array<i64: 1, 128>}, {transform_indices = @transform_3, window_bounds = array<i64: 1, 128>}, {transform_indices = @transform_4, window_bounds = array<i64: 32, 128>}]} {
    %c0_i32 = arith.constant 0 : i32
    %0 = arith.cmpi eq, %arg2, %c0_i32 : i32
    %1 = arith.extui %0 : i1 to i32
    %c0_i32_0 = arith.constant 0 : i32
    %2 = arith.cmpi ne, %1, %c0_i32_0 : i32
    scf.if %2 {
      %cst_12 = arith.constant 0.000000e+00 : f32
      %14 = vector.broadcast %cst_12 : f32 to vector<32x128xf32>
      %c0_13 = arith.constant 0 : index
      %c0_14 = arith.constant 0 : index
      %15 = vector.load %arg8[%c0_13, %c0_14] : memref<32x128xf32, #tpu.memory_space<vmem>>, vector<32x128xf32>
      tpu.vector_store %arg8[%c0_13, %c0_14], %14 {strides = array<i32>} : memref<32x128xf32, #tpu.memory_space<vmem>>, vector<32x128xf32>,
    } else {
    }
    %c0 = arith.constant 0 : index
    %c0_1 = arith.constant 0 : index
    %3 = vector.load %arg8[%c0, %c0_1] : memref<32x128xf32, #tpu.memory_space<vmem>>, vector<32x128xf32>
    %c0_2 = arith.constant 0 : index
    %c0_3 = arith.constant 0 : index
    %c0_4 = arith.constant 0 : index
    %4 = vector.load %arg3[%c0_2, %c0_3, %c0_4] : memref<1x32x64xbf16, #tpu.memory_space<vmem>>, vector<1x32x64xbf16>
    %5 = vector.shape_cast %4 : vector<1x32x64xbf16> to vector<32x64xbf16>
    %c0_5 = arith.constant 0 : index
    %c0_6 = arith.constant 0 : index
    %c0_7 = arith.constant 0 : index
    %6 = vector.load %arg4[%c0_5, %c0_6, %c0_7] : memref<1x64x128xbf16, #tpu.memory_space<vmem>>, vector<1x64x128xbf16>
    %7 = vector.shape_cast %6 : vector<1x64x128xbf16> to vector<64x128xbf16>
    %cst = arith.constant dense<0.000000e+00> : vector<32x128xf32>
    %8 = tpu.matmul %5, %7, %cst {dimension_numbers = #tpu.dot_dimension_numbers<[1], [0], [0], [1], [0, 0, 1, 1], [], []>} : vector<32x64xbf16>, vector<64x128xbf16>, vector<32x128xf32> -> vector<32x128xf32>
    %9 = arith.addf %3, %8 : vector<32x128xf32>
    %c0_8 = arith.constant 0 : index
    %c0_9 = arith.constant 0 : index
    %10 = vector.load %arg8[%c0_8, %c0_9] : memref<32x128xf32, #tpu.memory_space<vmem>>, vector<32x128xf32>
    tpu.vector_store %arg8[%c0_8, %c0_9], %9 {strides = array<i32>} : memref<32x128xf32, #tpu.memory_space<vmem>>, vector<32x128xf32>,
    %c0_i32_10 = arith.constant 0 : i32
    %11 = arith.cmpi eq, %arg2, %c0_i32_10 : i32
    %12 = arith.extui %11 : i1 to i32
    %c0_i32_11 = arith.constant 0 : i32
    %13 = arith.cmpi ne, %12, %c0_i32_11 : i32
    scf.if %13 {
      %c0_12 = arith.constant 0 : index
      %c0_13 = arith.constant 0 : index
      %14 = vector.load %arg8[%c0_12, %c0_13] : memref<32x128xf32, #tpu.memory_space<vmem>>, vector<32x128xf32>
      %c0_14 = arith.constant 0 : index
      %c0_15 = arith.constant 0 : index
      %15 = vector.load %arg5[%c0_14, %c0_15] : memref<1x128xf32, #tpu.memory_space<vmem>>, vector<1x128xf32>
      %16 = vector.broadcast %15 : vector<1x128xf32> to vector<32x128xf32>
      %17 = arith.mulf %14, %16 : vector<32x128xf32>
      %c0_16 = arith.constant 0 : index
      %c0_17 = arith.constant 0 : index
      %18 = vector.load %arg6[%c0_16, %c0_17] : memref<1x128xf32, #tpu.memory_space<vmem>>, vector<1x128xf32>
      %19 = vector.broadcast %18 : vector<1x128xf32> to vector<32x128xf32>
      %20 = arith.addf %17, %19 : vector<32x128xf32>
      %21 = arith.truncf %20 : vector<32x128xf32> to vector<32x128xbf16>
      %c0_18 = arith.constant 0 : index
      %c0_19 = arith.constant 0 : index
      %22 = vector.load %arg7[%c0_18, %c0_19] : memref<32x128xbf16, #tpu.memory_space<vmem>>, vector<32x128xbf16>
      tpu.vector_store %arg7[%c0_18, %c0_19], %21 {strides = array<i32>} : memref<32x128xbf16, #tpu.memory_space<vmem>>, vector<32x128xbf16>,
    } else {
    }
    return
  }
  func.func @transform_0(%arg0: i32, %arg1: i32, %arg2: i32) -> (i32, i32, i32) {
    %c0_i32 = arith.constant 0 : i32
    %c0_i32_0 = arith.constant 0 : i32
    return %arg2, %arg0, %c0_i32 : i32, i32, i32
  }
  func.func @transform_1(%arg0: i32, %arg1: i32, %arg2: i32) -> (i32, i32, i32) {
    %c0_i32 = arith.constant 0 : i32
    %c0_i32_0 = arith.constant 0 : i32
    return %arg2, %c0_i32, %arg1 : i32, i32, i32
  }
  func.func @transform_2(%arg0: i32, %arg1: i32, %arg2: i32) -> (i32, i32) {
    %c0_i32 = arith.constant 0 : i32
    %c0_i32_0 = arith.constant 0 : i32
    return %c0_i32, %arg1 : i32, i32
  }
  func.func @transform_3(%arg0: i32, %arg1: i32, %arg2: i32) -> (i32, i32) {
    %c0_i32 = arith.constant 0 : i32
    %c0_i32_0 = arith.constant 0 : i32
    return %c0_i32, %arg1 : i32, i32
  }
  func.func @transform_4(%arg0: i32, %arg1: i32, %arg2: i32) -> (i32, i32) {
    %c0_i32 = arith.constant 0 : i32
    return %arg0, %arg1 : i32, i32
  }
}

module attributes {stable_mosaic.version = 11 : i64} {
  func.func @_conv_matmul_kernel(%arg0: i32, %arg1: i32, %arg2: i32, %arg3: memref<1x32x128xbf16, #tpu.memory_space<vmem>>, %arg4: memref<1x128x128xbf16, #tpu.memory_space<vmem>>, %arg5: memref<1x128xf32, #tpu.memory_space<vmem>>, %arg6: memref<1x128xf32, #tpu.memory_space<vmem>>, %arg7: memref<32x128xbf16, #tpu.memory_space<vmem>>, %arg8: memref<32x128xbf16, #tpu.memory_space<vmem>>, %arg9: memref<32x128xf32, #tpu.memory_space<vmem>>) attributes {dimension_semantics = [#tpu.dimension_semantics<parallel>, #tpu.dimension_semantics<parallel>, #tpu.dimension_semantics<arbitrary>], iteration_bounds = array<i64: 1, 1, 9>, scalar_prefetch = 0 : i64, scratch_operands = 1 : i64, tpu.core_type = #tpu.core_type<tc>, window_params = [{transform_indices = @transform_0, window_bounds = array<i64: 1, 32, 128>}, {transform_indices = @transform_1, window_bounds = array<i64: 1, 128, 128>}, {transform_indices = @transform_2, window_bounds = array<i64: 1, 128>}, {transform_indices = @transform_3, window_bounds = array<i64: 1, 128>}, {transform_indices = @transform_4, window_bounds = array<i64: 32, 128>}, {transform_indices = @transform_5, window_bounds = array<i64: 32, 128>}]} {
    %c0_i32 = arith.constant 0 : i32
    %0 = arith.cmpi eq, %arg2, %c0_i32 : i32
    %1 = arith.extui %0 : i1 to i32
    %c0_i32_0 = arith.constant 0 : i32
    %2 = arith.cmpi ne, %1, %c0_i32_0 : i32
    scf.if %2 {
      %cst_11 = arith.constant 0.000000e+00 : f32
      %14 = vector.broadcast %cst_11 : f32 to vector<32x128xf32>
      %c0_12 = arith.constant 0 : index
      %c0_13 = arith.constant 0 : index
      %15 = vector.load %arg9[%c0_12, %c0_13] : memref<32x128xf32, #tpu.memory_space<vmem>>, vector<32x128xf32>
      tpu.vector_store %arg9[%c0_12, %c0_13], %14 {strides = array<i32>} : memref<32x128xf32, #tpu.memory_space<vmem>>, vector<32x128xf32>,
    } else {
    }
    %c0 = arith.constant 0 : index
    %c0_1 = arith.constant 0 : index
    %3 = vector.load %arg9[%c0, %c0_1] : memref<32x128xf32, #tpu.memory_space<vmem>>, vector<32x128xf32>
    %c0_2 = arith.constant 0 : index
    %c0_3 = arith.constant 0 : index
    %c0_4 = arith.constant 0 : index
    %4 = vector.load %arg3[%c0_2, %c0_3, %c0_4] : memref<1x32x128xbf16, #tpu.memory_space<vmem>>, vector<1x32x128xbf16>
    %5 = vector.shape_cast %4 : vector<1x32x128xbf16> to vector<32x128xbf16>
    %c0_5 = arith.constant 0 : index
    %c0_6 = arith.constant 0 : index
    %c0_7 = arith.constant 0 : index
    %6 = vector.load %arg4[%c0_5, %c0_6, %c0_7] : memref<1x128x128xbf16, #tpu.memory_space<vmem>>, vector<1x128x128xbf16>
    %7 = vector.shape_cast %6 : vector<1x128x128xbf16> to vector<128x128xbf16>
    %cst = arith.constant dense<0.000000e+00> : vector<32x128xf32>
    %8 = tpu.matmul %5, %7, %cst {dimension_numbers = #tpu.dot_dimension_numbers<[1], [0], [0], [1], [0, 0, 1, 1], [], []>} : vector<32x128xbf16>, vector<128x128xbf16>, vector<32x128xf32> -> vector<32x128xf32>
    %9 = arith.addf %3, %8 : vector<32x128xf32>
    %c0_8 = arith.constant 0 : index
    %c0_9 = arith.constant 0 : index
    %10 = vector.load %arg9[%c0_8, %c0_9] : memref<32x128xf32, #tpu.memory_space<vmem>>, vector<32x128xf32>
    tpu.vector_store %arg9[%c0_8, %c0_9], %9 {strides = array<i32>} : memref<32x128xf32, #tpu.memory_space<vmem>>, vector<32x128xf32>,
    %c8_i32 = arith.constant 8 : i32
    %11 = arith.cmpi eq, %arg2, %c8_i32 : i32
    %12 = arith.extui %11 : i1 to i32
    %c0_i32_10 = arith.constant 0 : i32
    %13 = arith.cmpi ne, %12, %c0_i32_10 : i32
    scf.if %13 {
      %c0_11 = arith.constant 0 : index
      %c0_12 = arith.constant 0 : index
      %14 = vector.load %arg9[%c0_11, %c0_12] : memref<32x128xf32, #tpu.memory_space<vmem>>, vector<32x128xf32>
      %c0_13 = arith.constant 0 : index
      %c0_14 = arith.constant 0 : index
      %15 = vector.load %arg5[%c0_13, %c0_14] : memref<1x128xf32, #tpu.memory_space<vmem>>, vector<1x128xf32>
      %16 = vector.broadcast %15 : vector<1x128xf32> to vector<32x128xf32>
      %17 = arith.mulf %14, %16 : vector<32x128xf32>
      %c0_15 = arith.constant 0 : index
      %c0_16 = arith.constant 0 : index
      %18 = vector.load %arg6[%c0_15, %c0_16] : memref<1x128xf32, #tpu.memory_space<vmem>>, vector<1x128xf32>
      %19 = vector.broadcast %18 : vector<1x128xf32> to vector<32x128xf32>
      %20 = arith.addf %17, %19 : vector<32x128xf32>
      %c0_17 = arith.constant 0 : index
      %c0_18 = arith.constant 0 : index
      %21 = vector.load %arg7[%c0_17, %c0_18] : memref<32x128xbf16, #tpu.memory_space<vmem>>, vector<32x128xbf16>
      %22 = arith.extf %21 : vector<32x128xbf16> to vector<32x128xf32>
      %23 = arith.addf %20, %22 : vector<32x128xf32>
      %cst_19 = arith.constant 0.000000e+00 : f32
      %24 = vector.broadcast %cst_19 : f32 to vector<32x128xf32>
      %25 = arith.maximumf %23, %24 : vector<32x128xf32>
      %26 = arith.truncf %25 : vector<32x128xf32> to vector<32x128xbf16>
      %c0_20 = arith.constant 0 : index
      %c0_21 = arith.constant 0 : index
      %27 = vector.load %arg8[%c0_20, %c0_21] : memref<32x128xbf16, #tpu.memory_space<vmem>>, vector<32x128xbf16>
      tpu.vector_store %arg8[%c0_20, %c0_21], %26 {strides = array<i32>} : memref<32x128xbf16, #tpu.memory_space<vmem>>, vector<32x128xbf16>,
    } else {
    }
    return
  }
  func.func @transform_0(%arg0: i32, %arg1: i32, %arg2: i32) -> (i32, i32, i32) {
    %c0_i32 = arith.constant 0 : i32
    %c0_i32_0 = arith.constant 0 : i32
    return %arg2, %arg0, %c0_i32 : i32, i32, i32
  }
  func.func @transform_1(%arg0: i32, %arg1: i32, %arg2: i32) -> (i32, i32, i32) {
    %c0_i32 = arith.constant 0 : i32
    %c0_i32_0 = arith.constant 0 : i32
    return %arg2, %c0_i32, %arg1 : i32, i32, i32
  }
  func.func @transform_2(%arg0: i32, %arg1: i32, %arg2: i32) -> (i32, i32) {
    %c0_i32 = arith.constant 0 : i32
    %c0_i32_0 = arith.constant 0 : i32
    return %c0_i32, %arg1 : i32, i32
  }
  func.func @transform_3(%arg0: i32, %arg1: i32, %arg2: i32) -> (i32, i32) {
    %c0_i32 = arith.constant 0 : i32
    %c0_i32_0 = arith.constant 0 : i32
    return %c0_i32, %arg1 : i32, i32
  }
  func.func @transform_4(%arg0: i32, %arg1: i32, %arg2: i32) -> (i32, i32) {
    %c0_i32 = arith.constant 0 : i32
    return %arg0, %arg1 : i32, i32
  }
  func.func @transform_5(%arg0: i32, %arg1: i32, %arg2: i32) -> (i32, i32) {
    %c0_i32 = arith.constant 0 : i32
    return %arg0, %arg1 : i32, i32
  }
}

module attributes {stable_mosaic.version = 11 : i64} {
  func.func @_conv_matmul_kernel(%arg0: i32, %arg1: i32, %arg2: i32, %arg3: memref<1x32x128xbf16, #tpu.memory_space<vmem>>, %arg4: memref<1x128x128xbf16, #tpu.memory_space<vmem>>, %arg5: memref<1x128xf32, #tpu.memory_space<vmem>>, %arg6: memref<1x128xf32, #tpu.memory_space<vmem>>, %arg7: memref<32x128xbf16, #tpu.memory_space<vmem>>, %arg8: memref<32x128xf32, #tpu.memory_space<vmem>>) attributes {dimension_semantics = [#tpu.dimension_semantics<parallel>, #tpu.dimension_semantics<parallel>, #tpu.dimension_semantics<arbitrary>], iteration_bounds = array<i64: 1, 1, 9>, scalar_prefetch = 0 : i64, scratch_operands = 1 : i64, tpu.core_type = #tpu.core_type<tc>, window_params = [{transform_indices = @transform_0, window_bounds = array<i64: 1, 32, 128>}, {transform_indices = @transform_1, window_bounds = array<i64: 1, 128, 128>}, {transform_indices = @transform_2, window_bounds = array<i64: 1, 128>}, {transform_indices = @transform_3, window_bounds = array<i64: 1, 128>}, {transform_indices = @transform_4, window_bounds = array<i64: 32, 128>}]} {
    %c0_i32 = arith.constant 0 : i32
    %0 = arith.cmpi eq, %arg2, %c0_i32 : i32
    %1 = arith.extui %0 : i1 to i32
    %c0_i32_0 = arith.constant 0 : i32
    %2 = arith.cmpi ne, %1, %c0_i32_0 : i32
    scf.if %2 {
      %cst_11 = arith.constant 0.000000e+00 : f32
      %14 = vector.broadcast %cst_11 : f32 to vector<32x128xf32>
      %c0_12 = arith.constant 0 : index
      %c0_13 = arith.constant 0 : index
      %15 = vector.load %arg8[%c0_12, %c0_13] : memref<32x128xf32, #tpu.memory_space<vmem>>, vector<32x128xf32>
      tpu.vector_store %arg8[%c0_12, %c0_13], %14 {strides = array<i32>} : memref<32x128xf32, #tpu.memory_space<vmem>>, vector<32x128xf32>,
    } else {
    }
    %c0 = arith.constant 0 : index
    %c0_1 = arith.constant 0 : index
    %3 = vector.load %arg8[%c0, %c0_1] : memref<32x128xf32, #tpu.memory_space<vmem>>, vector<32x128xf32>
    %c0_2 = arith.constant 0 : index
    %c0_3 = arith.constant 0 : index
    %c0_4 = arith.constant 0 : index
    %4 = vector.load %arg3[%c0_2, %c0_3, %c0_4] : memref<1x32x128xbf16, #tpu.memory_space<vmem>>, vector<1x32x128xbf16>
    %5 = vector.shape_cast %4 : vector<1x32x128xbf16> to vector<32x128xbf16>
    %c0_5 = arith.constant 0 : index
    %c0_6 = arith.constant 0 : index
    %c0_7 = arith.constant 0 : index
    %6 = vector.load %arg4[%c0_5, %c0_6, %c0_7] : memref<1x128x128xbf16, #tpu.memory_space<vmem>>, vector<1x128x128xbf16>
    %7 = vector.shape_cast %6 : vector<1x128x128xbf16> to vector<128x128xbf16>
    %cst = arith.constant dense<0.000000e+00> : vector<32x128xf32>
    %8 = tpu.matmul %5, %7, %cst {dimension_numbers = #tpu.dot_dimension_numbers<[1], [0], [0], [1], [0, 0, 1, 1], [], []>} : vector<32x128xbf16>, vector<128x128xbf16>, vector<32x128xf32> -> vector<32x128xf32>
    %9 = arith.addf %3, %8 : vector<32x128xf32>
    %c0_8 = arith.constant 0 : index
    %c0_9 = arith.constant 0 : index
    %10 = vector.load %arg8[%c0_8, %c0_9] : memref<32x128xf32, #tpu.memory_space<vmem>>, vector<32x128xf32>
    tpu.vector_store %arg8[%c0_8, %c0_9], %9 {strides = array<i32>} : memref<32x128xf32, #tpu.memory_space<vmem>>, vector<32x128xf32>,
    %c8_i32 = arith.constant 8 : i32
    %11 = arith.cmpi eq, %arg2, %c8_i32 : i32
    %12 = arith.extui %11 : i1 to i32
    %c0_i32_10 = arith.constant 0 : i32
    %13 = arith.cmpi ne, %12, %c0_i32_10 : i32
    scf.if %13 {
      %c0_11 = arith.constant 0 : index
      %c0_12 = arith.constant 0 : index
      %14 = vector.load %arg8[%c0_11, %c0_12] : memref<32x128xf32, #tpu.memory_space<vmem>>, vector<32x128xf32>
      %c0_13 = arith.constant 0 : index
      %c0_14 = arith.constant 0 : index
      %15 = vector.load %arg5[%c0_13, %c0_14] : memref<1x128xf32, #tpu.memory_space<vmem>>, vector<1x128xf32>
      %16 = vector.broadcast %15 : vector<1x128xf32> to vector<32x128xf32>
      %17 = arith.mulf %14, %16 : vector<32x128xf32>
      %c0_15 = arith.constant 0 : index
      %c0_16 = arith.constant 0 : index
      %18 = vector.load %arg6[%c0_15, %c0_16] : memref<1x128xf32, #tpu.memory_space<vmem>>, vector<1x128xf32>
      %19 = vector.broadcast %18 : vector<1x128xf32> to vector<32x128xf32>
      %20 = arith.addf %17, %19 : vector<32x128xf32>
      %cst_17 = arith.constant 0.000000e+00 : f32
      %21 = vector.broadcast %cst_17 : f32 to vector<32x128xf32>
      %22 = arith.maximumf %20, %21 : vector<32x128xf32>
      %23 = arith.truncf %22 : vector<32x128xf32> to vector<32x128xbf16>
      %c0_18 = arith.constant 0 : index
      %c0_19 = arith.constant 0 : index
      %24 = vector.load %arg7[%c0_18, %c0_19] : memref<32x128xbf16, #tpu.memory_space<vmem>>, vector<32x128xbf16>
      tpu.vector_store %arg7[%c0_18, %c0_19], %23 {strides = array<i32>} : memref<32x128xbf16, #tpu.memory_space<vmem>>, vector<32x128xbf16>,
    } else {
    }
    return
  }
  func.func @transform_0(%arg0: i32, %arg1: i32, %arg2: i32) -> (i32, i32, i32) {
    %c0_i32 = arith.constant 0 : i32
    %c0_i32_0 = arith.constant 0 : i32
    return %arg2, %arg0, %c0_i32 : i32, i32, i32
  }
  func.func @transform_1(%arg0: i32, %arg1: i32, %arg2: i32) -> (i32, i32, i32) {
    %c0_i32 = arith.constant 0 : i32
    %c0_i32_0 = arith.constant 0 : i32
    return %arg2, %c0_i32, %arg1 : i32, i32, i32
  }
  func.func @transform_2(%arg0: i32, %arg1: i32, %arg2: i32) -> (i32, i32) {
    %c0_i32 = arith.constant 0 : i32
    %c0_i32_0 = arith.constant 0 : i32
    return %c0_i32, %arg1 : i32, i32
  }
  func.func @transform_3(%arg0: i32, %arg1: i32, %arg2: i32) -> (i32, i32) {
    %c0_i32 = arith.constant 0 : i32
    %c0_i32_0 = arith.constant 0 : i32
    return %c0_i32, %arg1 : i32, i32
  }
  func.func @transform_4(%arg0: i32, %arg1: i32, %arg2: i32) -> (i32, i32) {
    %c0_i32 = arith.constant 0 : i32
    return %arg0, %arg1 : i32, i32
  }
}

module attributes {stable_mosaic.version = 11 : i64} {
  func.func @_conv_matmul_kernel(%arg0: i32, %arg1: i32, %arg2: i32, %arg3: memref<1x8x128xbf16, #tpu.memory_space<vmem>>, %arg4: memref<1x128x256xbf16, #tpu.memory_space<vmem>>, %arg5: memref<1x256xf32, #tpu.memory_space<vmem>>, %arg6: memref<1x256xf32, #tpu.memory_space<vmem>>, %arg7: memref<8x256xbf16, #tpu.memory_space<vmem>>, %arg8: memref<8x256xf32, #tpu.memory_space<vmem>>) attributes {dimension_semantics = [#tpu.dimension_semantics<parallel>, #tpu.dimension_semantics<parallel>, #tpu.dimension_semantics<arbitrary>], iteration_bounds = array<i64: 1, 1, 9>, scalar_prefetch = 0 : i64, scratch_operands = 1 : i64, tpu.core_type = #tpu.core_type<tc>, window_params = [{transform_indices = @transform_0, window_bounds = array<i64: 1, 8, 128>}, {transform_indices = @transform_1, window_bounds = array<i64: 1, 128, 256>}, {transform_indices = @transform_2, window_bounds = array<i64: 1, 256>}, {transform_indices = @transform_3, window_bounds = array<i64: 1, 256>}, {transform_indices = @transform_4, window_bounds = array<i64: 8, 256>}]} {
    %c0_i32 = arith.constant 0 : i32
    %0 = arith.cmpi eq, %arg2, %c0_i32 : i32
    %1 = arith.extui %0 : i1 to i32
    %c0_i32_0 = arith.constant 0 : i32
    %2 = arith.cmpi ne, %1, %c0_i32_0 : i32
    scf.if %2 {
      %cst_11 = arith.constant 0.000000e+00 : f32
      %14 = vector.broadcast %cst_11 : f32 to vector<8x256xf32>
      %c0_12 = arith.constant 0 : index
      %c0_13 = arith.constant 0 : index
      %15 = vector.load %arg8[%c0_12, %c0_13] : memref<8x256xf32, #tpu.memory_space<vmem>>, vector<8x256xf32>
      tpu.vector_store %arg8[%c0_12, %c0_13], %14 {strides = array<i32>} : memref<8x256xf32, #tpu.memory_space<vmem>>, vector<8x256xf32>,
    } else {
    }
    %c0 = arith.constant 0 : index
    %c0_1 = arith.constant 0 : index
    %3 = vector.load %arg8[%c0, %c0_1] : memref<8x256xf32, #tpu.memory_space<vmem>>, vector<8x256xf32>
    %c0_2 = arith.constant 0 : index
    %c0_3 = arith.constant 0 : index
    %c0_4 = arith.constant 0 : index
    %4 = vector.load %arg3[%c0_2, %c0_3, %c0_4] : memref<1x8x128xbf16, #tpu.memory_space<vmem>>, vector<1x8x128xbf16>
    %5 = vector.shape_cast %4 : vector<1x8x128xbf16> to vector<8x128xbf16>
    %c0_5 = arith.constant 0 : index
    %c0_6 = arith.constant 0 : index
    %c0_7 = arith.constant 0 : index
    %6 = vector.load %arg4[%c0_5, %c0_6, %c0_7] : memref<1x128x256xbf16, #tpu.memory_space<vmem>>, vector<1x128x256xbf16>
    %7 = vector.shape_cast %6 : vector<1x128x256xbf16> to vector<128x256xbf16>
    %cst = arith.constant dense<0.000000e+00> : vector<8x256xf32>
    %8 = tpu.matmul %5, %7, %cst {dimension_numbers = #tpu.dot_dimension_numbers<[1], [0], [0], [1], [0, 0, 1, 1], [], []>} : vector<8x128xbf16>, vector<128x256xbf16>, vector<8x256xf32> -> vector<8x256xf32>
    %9 = arith.addf %3, %8 : vector<8x256xf32>
    %c0_8 = arith.constant 0 : index
    %c0_9 = arith.constant 0 : index
    %10 = vector.load %arg8[%c0_8, %c0_9] : memref<8x256xf32, #tpu.memory_space<vmem>>, vector<8x256xf32>
    tpu.vector_store %arg8[%c0_8, %c0_9], %9 {strides = array<i32>} : memref<8x256xf32, #tpu.memory_space<vmem>>, vector<8x256xf32>,
    %c8_i32 = arith.constant 8 : i32
    %11 = arith.cmpi eq, %arg2, %c8_i32 : i32
    %12 = arith.extui %11 : i1 to i32
    %c0_i32_10 = arith.constant 0 : i32
    %13 = arith.cmpi ne, %12, %c0_i32_10 : i32
    scf.if %13 {
      %c0_11 = arith.constant 0 : index
      %c0_12 = arith.constant 0 : index
      %14 = vector.load %arg8[%c0_11, %c0_12] : memref<8x256xf32, #tpu.memory_space<vmem>>, vector<8x256xf32>
      %c0_13 = arith.constant 0 : index
      %c0_14 = arith.constant 0 : index
      %15 = vector.load %arg5[%c0_13, %c0_14] : memref<1x256xf32, #tpu.memory_space<vmem>>, vector<1x256xf32>
      %16 = vector.broadcast %15 : vector<1x256xf32> to vector<8x256xf32>
      %17 = arith.mulf %14, %16 : vector<8x256xf32>
      %c0_15 = arith.constant 0 : index
      %c0_16 = arith.constant 0 : index
      %18 = vector.load %arg6[%c0_15, %c0_16] : memref<1x256xf32, #tpu.memory_space<vmem>>, vector<1x256xf32>
      %19 = vector.broadcast %18 : vector<1x256xf32> to vector<8x256xf32>
      %20 = arith.addf %17, %19 : vector<8x256xf32>
      %cst_17 = arith.constant 0.000000e+00 : f32
      %21 = vector.broadcast %cst_17 : f32 to vector<8x256xf32>
      %22 = arith.maximumf %20, %21 : vector<8x256xf32>
      %23 = arith.truncf %22 : vector<8x256xf32> to vector<8x256xbf16>
      %c0_18 = arith.constant 0 : index
      %c0_19 = arith.constant 0 : index
      %24 = vector.load %arg7[%c0_18, %c0_19] : memref<8x256xbf16, #tpu.memory_space<vmem>>, vector<8x256xbf16>
      tpu.vector_store %arg7[%c0_18, %c0_19], %23 {strides = array<i32>} : memref<8x256xbf16, #tpu.memory_space<vmem>>, vector<8x256xbf16>,
    } else {
    }
    return
  }
  func.func @transform_0(%arg0: i32, %arg1: i32, %arg2: i32) -> (i32, i32, i32) {
    %c0_i32 = arith.constant 0 : i32
    %c0_i32_0 = arith.constant 0 : i32
    return %arg2, %arg0, %c0_i32 : i32, i32, i32
  }
  func.func @transform_1(%arg0: i32, %arg1: i32, %arg2: i32) -> (i32, i32, i32) {
    %c0_i32 = arith.constant 0 : i32
    %c0_i32_0 = arith.constant 0 : i32
    return %arg2, %c0_i32, %arg1 : i32, i32, i32
  }
  func.func @transform_2(%arg0: i32, %arg1: i32, %arg2: i32) -> (i32, i32) {
    %c0_i32 = arith.constant 0 : i32
    %c0_i32_0 = arith.constant 0 : i32
    return %c0_i32, %arg1 : i32, i32
  }
  func.func @transform_3(%arg0: i32, %arg1: i32, %arg2: i32) -> (i32, i32) {
    %c0_i32 = arith.constant 0 : i32
    %c0_i32_0 = arith.constant 0 : i32
    return %c0_i32, %arg1 : i32, i32
  }
  func.func @transform_4(%arg0: i32, %arg1: i32, %arg2: i32) -> (i32, i32) {
    %c0_i32 = arith.constant 0 : i32
    return %arg0, %arg1 : i32, i32
  }
}

module attributes {stable_mosaic.version = 11 : i64} {
  func.func @_conv_matmul_kernel(%arg0: i32, %arg1: i32, %arg2: i32, %arg3: memref<1x8x128xbf16, #tpu.memory_space<vmem>>, %arg4: memref<1x128x256xbf16, #tpu.memory_space<vmem>>, %arg5: memref<1x256xf32, #tpu.memory_space<vmem>>, %arg6: memref<1x256xf32, #tpu.memory_space<vmem>>, %arg7: memref<8x256xbf16, #tpu.memory_space<vmem>>, %arg8: memref<8x256xf32, #tpu.memory_space<vmem>>) attributes {dimension_semantics = [#tpu.dimension_semantics<parallel>, #tpu.dimension_semantics<parallel>, #tpu.dimension_semantics<arbitrary>], iteration_bounds = array<i64: 1, 1, 1>, scalar_prefetch = 0 : i64, scratch_operands = 1 : i64, tpu.core_type = #tpu.core_type<tc>, window_params = [{transform_indices = @transform_0, window_bounds = array<i64: 1, 8, 128>}, {transform_indices = @transform_1, window_bounds = array<i64: 1, 128, 256>}, {transform_indices = @transform_2, window_bounds = array<i64: 1, 256>}, {transform_indices = @transform_3, window_bounds = array<i64: 1, 256>}, {transform_indices = @transform_4, window_bounds = array<i64: 8, 256>}]} {
    %c0_i32 = arith.constant 0 : i32
    %0 = arith.cmpi eq, %arg2, %c0_i32 : i32
    %1 = arith.extui %0 : i1 to i32
    %c0_i32_0 = arith.constant 0 : i32
    %2 = arith.cmpi ne, %1, %c0_i32_0 : i32
    scf.if %2 {
      %cst_12 = arith.constant 0.000000e+00 : f32
      %14 = vector.broadcast %cst_12 : f32 to vector<8x256xf32>
      %c0_13 = arith.constant 0 : index
      %c0_14 = arith.constant 0 : index
      %15 = vector.load %arg8[%c0_13, %c0_14] : memref<8x256xf32, #tpu.memory_space<vmem>>, vector<8x256xf32>
      tpu.vector_store %arg8[%c0_13, %c0_14], %14 {strides = array<i32>} : memref<8x256xf32, #tpu.memory_space<vmem>>, vector<8x256xf32>,
    } else {
    }
    %c0 = arith.constant 0 : index
    %c0_1 = arith.constant 0 : index
    %3 = vector.load %arg8[%c0, %c0_1] : memref<8x256xf32, #tpu.memory_space<vmem>>, vector<8x256xf32>
    %c0_2 = arith.constant 0 : index
    %c0_3 = arith.constant 0 : index
    %c0_4 = arith.constant 0 : index
    %4 = vector.load %arg3[%c0_2, %c0_3, %c0_4] : memref<1x8x128xbf16, #tpu.memory_space<vmem>>, vector<1x8x128xbf16>
    %5 = vector.shape_cast %4 : vector<1x8x128xbf16> to vector<8x128xbf16>
    %c0_5 = arith.constant 0 : index
    %c0_6 = arith.constant 0 : index
    %c0_7 = arith.constant 0 : index
    %6 = vector.load %arg4[%c0_5, %c0_6, %c0_7] : memref<1x128x256xbf16, #tpu.memory_space<vmem>>, vector<1x128x256xbf16>
    %7 = vector.shape_cast %6 : vector<1x128x256xbf16> to vector<128x256xbf16>
    %cst = arith.constant dense<0.000000e+00> : vector<8x256xf32>
    %8 = tpu.matmul %5, %7, %cst {dimension_numbers = #tpu.dot_dimension_numbers<[1], [0], [0], [1], [0, 0, 1, 1], [], []>} : vector<8x128xbf16>, vector<128x256xbf16>, vector<8x256xf32> -> vector<8x256xf32>
    %9 = arith.addf %3, %8 : vector<8x256xf32>
    %c0_8 = arith.constant 0 : index
    %c0_9 = arith.constant 0 : index
    %10 = vector.load %arg8[%c0_8, %c0_9] : memref<8x256xf32, #tpu.memory_space<vmem>>, vector<8x256xf32>
    tpu.vector_store %arg8[%c0_8, %c0_9], %9 {strides = array<i32>} : memref<8x256xf32, #tpu.memory_space<vmem>>, vector<8x256xf32>,
    %c0_i32_10 = arith.constant 0 : i32
    %11 = arith.cmpi eq, %arg2, %c0_i32_10 : i32
    %12 = arith.extui %11 : i1 to i32
    %c0_i32_11 = arith.constant 0 : i32
    %13 = arith.cmpi ne, %12, %c0_i32_11 : i32
    scf.if %13 {
      %c0_12 = arith.constant 0 : index
      %c0_13 = arith.constant 0 : index
      %14 = vector.load %arg8[%c0_12, %c0_13] : memref<8x256xf32, #tpu.memory_space<vmem>>, vector<8x256xf32>
      %c0_14 = arith.constant 0 : index
      %c0_15 = arith.constant 0 : index
      %15 = vector.load %arg5[%c0_14, %c0_15] : memref<1x256xf32, #tpu.memory_space<vmem>>, vector<1x256xf32>
      %16 = vector.broadcast %15 : vector<1x256xf32> to vector<8x256xf32>
      %17 = arith.mulf %14, %16 : vector<8x256xf32>
      %c0_16 = arith.constant 0 : index
      %c0_17 = arith.constant 0 : index
      %18 = vector.load %arg6[%c0_16, %c0_17] : memref<1x256xf32, #tpu.memory_space<vmem>>, vector<1x256xf32>
      %19 = vector.broadcast %18 : vector<1x256xf32> to vector<8x256xf32>
      %20 = arith.addf %17, %19 : vector<8x256xf32>
      %21 = arith.truncf %20 : vector<8x256xf32> to vector<8x256xbf16>
      %c0_18 = arith.constant 0 : index
      %c0_19 = arith.constant 0 : index
      %22 = vector.load %arg7[%c0_18, %c0_19] : memref<8x256xbf16, #tpu.memory_space<vmem>>, vector<8x256xbf16>
      tpu.vector_store %arg7[%c0_18, %c0_19], %21 {strides = array<i32>} : memref<8x256xbf16, #tpu.memory_space<vmem>>, vector<8x256xbf16>,
    } else {
    }
    return
  }
  func.func @transform_0(%arg0: i32, %arg1: i32, %arg2: i32) -> (i32, i32, i32) {
    %c0_i32 = arith.constant 0 : i32
    %c0_i32_0 = arith.constant 0 : i32
    return %arg2, %arg0, %c0_i32 : i32, i32, i32
  }
  func.func @transform_1(%arg0: i32, %arg1: i32, %arg2: i32) -> (i32, i32, i32) {
    %c0_i32 = arith.constant 0 : i32
    %c0_i32_0 = arith.constant 0 : i32
    return %arg2, %c0_i32, %arg1 : i32, i32, i32
  }
  func.func @transform_2(%arg0: i32, %arg1: i32, %arg2: i32) -> (i32, i32) {
    %c0_i32 = arith.constant 0 : i32
    %c0_i32_0 = arith.constant 0 : i32
    return %c0_i32, %arg1 : i32, i32
  }
  func.func @transform_3(%arg0: i32, %arg1: i32, %arg2: i32) -> (i32, i32) {
    %c0_i32 = arith.constant 0 : i32
    %c0_i32_0 = arith.constant 0 : i32
    return %c0_i32, %arg1 : i32, i32
  }
  func.func @transform_4(%arg0: i32, %arg1: i32, %arg2: i32) -> (i32, i32) {
    %c0_i32 = arith.constant 0 : i32
    return %arg0, %arg1 : i32, i32
  }
}

module attributes {stable_mosaic.version = 11 : i64} {
  func.func @_conv_matmul_kernel(%arg0: i32, %arg1: i32, %arg2: i32, %arg3: memref<1x8x256xbf16, #tpu.memory_space<vmem>>, %arg4: memref<1x256x256xbf16, #tpu.memory_space<vmem>>, %arg5: memref<1x256xf32, #tpu.memory_space<vmem>>, %arg6: memref<1x256xf32, #tpu.memory_space<vmem>>, %arg7: memref<8x256xbf16, #tpu.memory_space<vmem>>, %arg8: memref<8x256xbf16, #tpu.memory_space<vmem>>, %arg9: memref<8x256xf32, #tpu.memory_space<vmem>>) attributes {dimension_semantics = [#tpu.dimension_semantics<parallel>, #tpu.dimension_semantics<parallel>, #tpu.dimension_semantics<arbitrary>], iteration_bounds = array<i64: 1, 1, 9>, scalar_prefetch = 0 : i64, scratch_operands = 1 : i64, tpu.core_type = #tpu.core_type<tc>, window_params = [{transform_indices = @transform_0, window_bounds = array<i64: 1, 8, 256>}, {transform_indices = @transform_1, window_bounds = array<i64: 1, 256, 256>}, {transform_indices = @transform_2, window_bounds = array<i64: 1, 256>}, {transform_indices = @transform_3, window_bounds = array<i64: 1, 256>}, {transform_indices = @transform_4, window_bounds = array<i64: 8, 256>}, {transform_indices = @transform_5, window_bounds = array<i64: 8, 256>}]} {
    %c0_i32 = arith.constant 0 : i32
    %0 = arith.cmpi eq, %arg2, %c0_i32 : i32
    %1 = arith.extui %0 : i1 to i32
    %c0_i32_0 = arith.constant 0 : i32
    %2 = arith.cmpi ne, %1, %c0_i32_0 : i32
    scf.if %2 {
      %cst_11 = arith.constant 0.000000e+00 : f32
      %14 = vector.broadcast %cst_11 : f32 to vector<8x256xf32>
      %c0_12 = arith.constant 0 : index
      %c0_13 = arith.constant 0 : index
      %15 = vector.load %arg9[%c0_12, %c0_13] : memref<8x256xf32, #tpu.memory_space<vmem>>, vector<8x256xf32>
      tpu.vector_store %arg9[%c0_12, %c0_13], %14 {strides = array<i32>} : memref<8x256xf32, #tpu.memory_space<vmem>>, vector<8x256xf32>,
    } else {
    }
    %c0 = arith.constant 0 : index
    %c0_1 = arith.constant 0 : index
    %3 = vector.load %arg9[%c0, %c0_1] : memref<8x256xf32, #tpu.memory_space<vmem>>, vector<8x256xf32>
    %c0_2 = arith.constant 0 : index
    %c0_3 = arith.constant 0 : index
    %c0_4 = arith.constant 0 : index
    %4 = vector.load %arg3[%c0_2, %c0_3, %c0_4] : memref<1x8x256xbf16, #tpu.memory_space<vmem>>, vector<1x8x256xbf16>
    %5 = vector.shape_cast %4 : vector<1x8x256xbf16> to vector<8x256xbf16>
    %c0_5 = arith.constant 0 : index
    %c0_6 = arith.constant 0 : index
    %c0_7 = arith.constant 0 : index
    %6 = vector.load %arg4[%c0_5, %c0_6, %c0_7] : memref<1x256x256xbf16, #tpu.memory_space<vmem>>, vector<1x256x256xbf16>
    %7 = vector.shape_cast %6 : vector<1x256x256xbf16> to vector<256x256xbf16>
    %cst = arith.constant dense<0.000000e+00> : vector<8x256xf32>
    %8 = tpu.matmul %5, %7, %cst {dimension_numbers = #tpu.dot_dimension_numbers<[1], [0], [0], [1], [0, 0, 1, 1], [], []>} : vector<8x256xbf16>, vector<256x256xbf16>, vector<8x256xf32> -> vector<8x256xf32>
    %9 = arith.addf %3, %8 : vector<8x256xf32>
    %c0_8 = arith.constant 0 : index
    %c0_9 = arith.constant 0 : index
    %10 = vector.load %arg9[%c0_8, %c0_9] : memref<8x256xf32, #tpu.memory_space<vmem>>, vector<8x256xf32>
    tpu.vector_store %arg9[%c0_8, %c0_9], %9 {strides = array<i32>} : memref<8x256xf32, #tpu.memory_space<vmem>>, vector<8x256xf32>,
    %c8_i32 = arith.constant 8 : i32
    %11 = arith.cmpi eq, %arg2, %c8_i32 : i32
    %12 = arith.extui %11 : i1 to i32
    %c0_i32_10 = arith.constant 0 : i32
    %13 = arith.cmpi ne, %12, %c0_i32_10 : i32
    scf.if %13 {
      %c0_11 = arith.constant 0 : index
      %c0_12 = arith.constant 0 : index
      %14 = vector.load %arg9[%c0_11, %c0_12] : memref<8x256xf32, #tpu.memory_space<vmem>>, vector<8x256xf32>
      %c0_13 = arith.constant 0 : index
      %c0_14 = arith.constant 0 : index
      %15 = vector.load %arg5[%c0_13, %c0_14] : memref<1x256xf32, #tpu.memory_space<vmem>>, vector<1x256xf32>
      %16 = vector.broadcast %15 : vector<1x256xf32> to vector<8x256xf32>
      %17 = arith.mulf %14, %16 : vector<8x256xf32>
      %c0_15 = arith.constant 0 : index
      %c0_16 = arith.constant 0 : index
      %18 = vector.load %arg6[%c0_15, %c0_16] : memref<1x256xf32, #tpu.memory_space<vmem>>, vector<1x256xf32>
      %19 = vector.broadcast %18 : vector<1x256xf32> to vector<8x256xf32>
      %20 = arith.addf %17, %19 : vector<8x256xf32>
      %c0_17 = arith.constant 0 : index
      %c0_18 = arith.constant 0 : index
      %21 = vector.load %arg7[%c0_17, %c0_18] : memref<8x256xbf16, #tpu.memory_space<vmem>>, vector<8x256xbf16>
      %22 = arith.extf %21 : vector<8x256xbf16> to vector<8x256xf32>
      %23 = arith.addf %20, %22 : vector<8x256xf32>
      %cst_19 = arith.constant 0.000000e+00 : f32
      %24 = vector.broadcast %cst_19 : f32 to vector<8x256xf32>
      %25 = arith.maximumf %23, %24 : vector<8x256xf32>
      %26 = arith.truncf %25 : vector<8x256xf32> to vector<8x256xbf16>
      %c0_20 = arith.constant 0 : index
      %c0_21 = arith.constant 0 : index
      %27 = vector.load %arg8[%c0_20, %c0_21] : memref<8x256xbf16, #tpu.memory_space<vmem>>, vector<8x256xbf16>
      tpu.vector_store %arg8[%c0_20, %c0_21], %26 {strides = array<i32>} : memref<8x256xbf16, #tpu.memory_space<vmem>>, vector<8x256xbf16>,
    } else {
    }
    return
  }
  func.func @transform_0(%arg0: i32, %arg1: i32, %arg2: i32) -> (i32, i32, i32) {
    %c0_i32 = arith.constant 0 : i32
    %c0_i32_0 = arith.constant 0 : i32
    return %arg2, %arg0, %c0_i32 : i32, i32, i32
  }
  func.func @transform_1(%arg0: i32, %arg1: i32, %arg2: i32) -> (i32, i32, i32) {
    %c0_i32 = arith.constant 0 : i32
    %c0_i32_0 = arith.constant 0 : i32
    return %arg2, %c0_i32, %arg1 : i32, i32, i32
  }
  func.func @transform_2(%arg0: i32, %arg1: i32, %arg2: i32) -> (i32, i32) {
    %c0_i32 = arith.constant 0 : i32
    %c0_i32_0 = arith.constant 0 : i32
    return %c0_i32, %arg1 : i32, i32
  }
  func.func @transform_3(%arg0: i32, %arg1: i32, %arg2: i32) -> (i32, i32) {
    %c0_i32 = arith.constant 0 : i32
    %c0_i32_0 = arith.constant 0 : i32
    return %c0_i32, %arg1 : i32, i32
  }
  func.func @transform_4(%arg0: i32, %arg1: i32, %arg2: i32) -> (i32, i32) {
    %c0_i32 = arith.constant 0 : i32
    return %arg0, %arg1 : i32, i32
  }
  func.func @transform_5(%arg0: i32, %arg1: i32, %arg2: i32) -> (i32, i32) {
    %c0_i32 = arith.constant 0 : i32
    return %arg0, %arg1 : i32, i32
  }
}

module attributes {stable_mosaic.version = 11 : i64} {
  func.func @_conv_matmul_kernel(%arg0: i32, %arg1: i32, %arg2: i32, %arg3: memref<1x8x256xbf16, #tpu.memory_space<vmem>>, %arg4: memref<1x256x256xbf16, #tpu.memory_space<vmem>>, %arg5: memref<1x256xf32, #tpu.memory_space<vmem>>, %arg6: memref<1x256xf32, #tpu.memory_space<vmem>>, %arg7: memref<8x256xbf16, #tpu.memory_space<vmem>>, %arg8: memref<8x256xf32, #tpu.memory_space<vmem>>) attributes {dimension_semantics = [#tpu.dimension_semantics<parallel>, #tpu.dimension_semantics<parallel>, #tpu.dimension_semantics<arbitrary>], iteration_bounds = array<i64: 1, 1, 9>, scalar_prefetch = 0 : i64, scratch_operands = 1 : i64, tpu.core_type = #tpu.core_type<tc>, window_params = [{transform_indices = @transform_0, window_bounds = array<i64: 1, 8, 256>}, {transform_indices = @transform_1, window_bounds = array<i64: 1, 256, 256>}, {transform_indices = @transform_2, window_bounds = array<i64: 1, 256>}, {transform_indices = @transform_3, window_bounds = array<i64: 1, 256>}, {transform_indices = @transform_4, window_bounds = array<i64: 8, 256>}]} {
    %c0_i32 = arith.constant 0 : i32
    %0 = arith.cmpi eq, %arg2, %c0_i32 : i32
    %1 = arith.extui %0 : i1 to i32
    %c0_i32_0 = arith.constant 0 : i32
    %2 = arith.cmpi ne, %1, %c0_i32_0 : i32
    scf.if %2 {
      %cst_11 = arith.constant 0.000000e+00 : f32
      %14 = vector.broadcast %cst_11 : f32 to vector<8x256xf32>
      %c0_12 = arith.constant 0 : index
      %c0_13 = arith.constant 0 : index
      %15 = vector.load %arg8[%c0_12, %c0_13] : memref<8x256xf32, #tpu.memory_space<vmem>>, vector<8x256xf32>
      tpu.vector_store %arg8[%c0_12, %c0_13], %14 {strides = array<i32>} : memref<8x256xf32, #tpu.memory_space<vmem>>, vector<8x256xf32>,
    } else {
    }
    %c0 = arith.constant 0 : index
    %c0_1 = arith.constant 0 : index
    %3 = vector.load %arg8[%c0, %c0_1] : memref<8x256xf32, #tpu.memory_space<vmem>>, vector<8x256xf32>
    %c0_2 = arith.constant 0 : index
    %c0_3 = arith.constant 0 : index
    %c0_4 = arith.constant 0 : index
    %4 = vector.load %arg3[%c0_2, %c0_3, %c0_4] : memref<1x8x256xbf16, #tpu.memory_space<vmem>>, vector<1x8x256xbf16>
    %5 = vector.shape_cast %4 : vector<1x8x256xbf16> to vector<8x256xbf16>
    %c0_5 = arith.constant 0 : index
    %c0_6 = arith.constant 0 : index
    %c0_7 = arith.constant 0 : index
    %6 = vector.load %arg4[%c0_5, %c0_6, %c0_7] : memref<1x256x256xbf16, #tpu.memory_space<vmem>>, vector<1x256x256xbf16>
    %7 = vector.shape_cast %6 : vector<1x256x256xbf16> to vector<256x256xbf16>
    %cst = arith.constant dense<0.000000e+00> : vector<8x256xf32>
    %8 = tpu.matmul %5, %7, %cst {dimension_numbers = #tpu.dot_dimension_numbers<[1], [0], [0], [1], [0, 0, 1, 1], [], []>} : vector<8x256xbf16>, vector<256x256xbf16>, vector<8x256xf32> -> vector<8x256xf32>
    %9 = arith.addf %3, %8 : vector<8x256xf32>
    %c0_8 = arith.constant 0 : index
    %c0_9 = arith.constant 0 : index
    %10 = vector.load %arg8[%c0_8, %c0_9] : memref<8x256xf32, #tpu.memory_space<vmem>>, vector<8x256xf32>
    tpu.vector_store %arg8[%c0_8, %c0_9], %9 {strides = array<i32>} : memref<8x256xf32, #tpu.memory_space<vmem>>, vector<8x256xf32>,
    %c8_i32 = arith.constant 8 : i32
    %11 = arith.cmpi eq, %arg2, %c8_i32 : i32
    %12 = arith.extui %11 : i1 to i32
    %c0_i32_10 = arith.constant 0 : i32
    %13 = arith.cmpi ne, %12, %c0_i32_10 : i32
    scf.if %13 {
      %c0_11 = arith.constant 0 : index
      %c0_12 = arith.constant 0 : index
      %14 = vector.load %arg8[%c0_11, %c0_12] : memref<8x256xf32, #tpu.memory_space<vmem>>, vector<8x256xf32>
      %c0_13 = arith.constant 0 : index
      %c0_14 = arith.constant 0 : index
      %15 = vector.load %arg5[%c0_13, %c0_14] : memref<1x256xf32, #tpu.memory_space<vmem>>, vector<1x256xf32>
      %16 = vector.broadcast %15 : vector<1x256xf32> to vector<8x256xf32>
      %17 = arith.mulf %14, %16 : vector<8x256xf32>
      %c0_15 = arith.constant 0 : index
      %c0_16 = arith.constant 0 : index
      %18 = vector.load %arg6[%c0_15, %c0_16] : memref<1x256xf32, #tpu.memory_space<vmem>>, vector<1x256xf32>
      %19 = vector.broadcast %18 : vector<1x256xf32> to vector<8x256xf32>
      %20 = arith.addf %17, %19 : vector<8x256xf32>
      %cst_17 = arith.constant 0.000000e+00 : f32
      %21 = vector.broadcast %cst_17 : f32 to vector<8x256xf32>
      %22 = arith.maximumf %20, %21 : vector<8x256xf32>
      %23 = arith.truncf %22 : vector<8x256xf32> to vector<8x256xbf16>
      %c0_18 = arith.constant 0 : index
      %c0_19 = arith.constant 0 : index
      %24 = vector.load %arg7[%c0_18, %c0_19] : memref<8x256xbf16, #tpu.memory_space<vmem>>, vector<8x256xbf16>
      tpu.vector_store %arg7[%c0_18, %c0_19], %23 {strides = array<i32>} : memref<8x256xbf16, #tpu.memory_space<vmem>>, vector<8x256xbf16>,
    } else {
    }
    return
  }
  func.func @transform_0(%arg0: i32, %arg1: i32, %arg2: i32) -> (i32, i32, i32) {
    %c0_i32 = arith.constant 0 : i32
    %c0_i32_0 = arith.constant 0 : i32
    return %arg2, %arg0, %c0_i32 : i32, i32, i32
  }
  func.func @transform_1(%arg0: i32, %arg1: i32, %arg2: i32) -> (i32, i32, i32) {
    %c0_i32 = arith.constant 0 : i32
    %c0_i32_0 = arith.constant 0 : i32
    return %arg2, %c0_i32, %arg1 : i32, i32, i32
  }
  func.func @transform_2(%arg0: i32, %arg1: i32, %arg2: i32) -> (i32, i32) {
    %c0_i32 = arith.constant 0 : i32
    %c0_i32_0 = arith.constant 0 : i32
    return %c0_i32, %arg1 : i32, i32
  }
  func.func @transform_3(%arg0: i32, %arg1: i32, %arg2: i32) -> (i32, i32) {
    %c0_i32 = arith.constant 0 : i32
    %c0_i32_0 = arith.constant 0 : i32
    return %c0_i32, %arg1 : i32, i32
  }
  func.func @transform_4(%arg0: i32, %arg1: i32, %arg2: i32) -> (i32, i32) {
    %c0_i32 = arith.constant 0 : i32
    return %arg0, %arg1 : i32, i32
  }
}

module attributes {stable_mosaic.version = 11 : i64} {
  func.func @_conv_matmul_kernel(%arg0: i32, %arg1: i32, %arg2: i32, %arg3: memref<1x8x256xbf16, #tpu.memory_space<vmem>>, %arg4: memref<1x256x256xbf16, #tpu.memory_space<vmem>>, %arg5: memref<1x256xf32, #tpu.memory_space<vmem>>, %arg6: memref<1x256xf32, #tpu.memory_space<vmem>>, %arg7: memref<8x256xbf16, #tpu.memory_space<vmem>>, %arg8: memref<8x256xf32, #tpu.memory_space<vmem>>) attributes {dimension_semantics = [#tpu.dimension_semantics<parallel>, #tpu.dimension_semantics<parallel>, #tpu.dimension_semantics<arbitrary>], iteration_bounds = array<i64: 1, 2, 9>, scalar_prefetch = 0 : i64, scratch_operands = 1 : i64, tpu.core_type = #tpu.core_type<tc>, window_params = [{transform_indices = @transform_0, window_bounds = array<i64: 1, 8, 256>}, {transform_indices = @transform_1, window_bounds = array<i64: 1, 256, 256>}, {transform_indices = @transform_2, window_bounds = array<i64: 1, 256>}, {transform_indices = @transform_3, window_bounds = array<i64: 1, 256>}, {transform_indices = @transform_4, window_bounds = array<i64: 8, 256>}]} {
    %c0_i32 = arith.constant 0 : i32
    %0 = arith.cmpi eq, %arg2, %c0_i32 : i32
    %1 = arith.extui %0 : i1 to i32
    %c0_i32_0 = arith.constant 0 : i32
    %2 = arith.cmpi ne, %1, %c0_i32_0 : i32
    scf.if %2 {
      %cst_11 = arith.constant 0.000000e+00 : f32
      %14 = vector.broadcast %cst_11 : f32 to vector<8x256xf32>
      %c0_12 = arith.constant 0 : index
      %c0_13 = arith.constant 0 : index
      %15 = vector.load %arg8[%c0_12, %c0_13] : memref<8x256xf32, #tpu.memory_space<vmem>>, vector<8x256xf32>
      tpu.vector_store %arg8[%c0_12, %c0_13], %14 {strides = array<i32>} : memref<8x256xf32, #tpu.memory_space<vmem>>, vector<8x256xf32>,
    } else {
    }
    %c0 = arith.constant 0 : index
    %c0_1 = arith.constant 0 : index
    %3 = vector.load %arg8[%c0, %c0_1] : memref<8x256xf32, #tpu.memory_space<vmem>>, vector<8x256xf32>
    %c0_2 = arith.constant 0 : index
    %c0_3 = arith.constant 0 : index
    %c0_4 = arith.constant 0 : index
    %4 = vector.load %arg3[%c0_2, %c0_3, %c0_4] : memref<1x8x256xbf16, #tpu.memory_space<vmem>>, vector<1x8x256xbf16>
    %5 = vector.shape_cast %4 : vector<1x8x256xbf16> to vector<8x256xbf16>
    %c0_5 = arith.constant 0 : index
    %c0_6 = arith.constant 0 : index
    %c0_7 = arith.constant 0 : index
    %6 = vector.load %arg4[%c0_5, %c0_6, %c0_7] : memref<1x256x256xbf16, #tpu.memory_space<vmem>>, vector<1x256x256xbf16>
    %7 = vector.shape_cast %6 : vector<1x256x256xbf16> to vector<256x256xbf16>
    %cst = arith.constant dense<0.000000e+00> : vector<8x256xf32>
    %8 = tpu.matmul %5, %7, %cst {dimension_numbers = #tpu.dot_dimension_numbers<[1], [0], [0], [1], [0, 0, 1, 1], [], []>} : vector<8x256xbf16>, vector<256x256xbf16>, vector<8x256xf32> -> vector<8x256xf32>
    %9 = arith.addf %3, %8 : vector<8x256xf32>
    %c0_8 = arith.constant 0 : index
    %c0_9 = arith.constant 0 : index
    %10 = vector.load %arg8[%c0_8, %c0_9] : memref<8x256xf32, #tpu.memory_space<vmem>>, vector<8x256xf32>
    tpu.vector_store %arg8[%c0_8, %c0_9], %9 {strides = array<i32>} : memref<8x256xf32, #tpu.memory_space<vmem>>, vector<8x256xf32>,
    %c8_i32 = arith.constant 8 : i32
    %11 = arith.cmpi eq, %arg2, %c8_i32 : i32
    %12 = arith.extui %11 : i1 to i32
    %c0_i32_10 = arith.constant 0 : i32
    %13 = arith.cmpi ne, %12, %c0_i32_10 : i32
    scf.if %13 {
      %c0_11 = arith.constant 0 : index
      %c0_12 = arith.constant 0 : index
      %14 = vector.load %arg8[%c0_11, %c0_12] : memref<8x256xf32, #tpu.memory_space<vmem>>, vector<8x256xf32>
      %c0_13 = arith.constant 0 : index
      %c0_14 = arith.constant 0 : index
      %15 = vector.load %arg5[%c0_13, %c0_14] : memref<1x256xf32, #tpu.memory_space<vmem>>, vector<1x256xf32>
      %16 = vector.broadcast %15 : vector<1x256xf32> to vector<8x256xf32>
      %17 = arith.mulf %14, %16 : vector<8x256xf32>
      %c0_15 = arith.constant 0 : index
      %c0_16 = arith.constant 0 : index
      %18 = vector.load %arg6[%c0_15, %c0_16] : memref<1x256xf32, #tpu.memory_space<vmem>>, vector<1x256xf32>
      %19 = vector.broadcast %18 : vector<1x256xf32> to vector<8x256xf32>
      %20 = arith.addf %17, %19 : vector<8x256xf32>
      %cst_17 = arith.constant 0.000000e+00 : f32
      %21 = vector.broadcast %cst_17 : f32 to vector<8x256xf32>
      %22 = arith.maximumf %20, %21 : vector<8x256xf32>
      %23 = arith.truncf %22 : vector<8x256xf32> to vector<8x256xbf16>
      %c0_18 = arith.constant 0 : index
      %c0_19 = arith.constant 0 : index
      %24 = vector.load %arg7[%c0_18, %c0_19] : memref<8x256xbf16, #tpu.memory_space<vmem>>, vector<8x256xbf16>
      tpu.vector_store %arg7[%c0_18, %c0_19], %23 {strides = array<i32>} : memref<8x256xbf16, #tpu.memory_space<vmem>>, vector<8x256xbf16>,
    } else {
    }
    return
  }
  func.func @transform_0(%arg0: i32, %arg1: i32, %arg2: i32) -> (i32, i32, i32) {
    %c0_i32 = arith.constant 0 : i32
    %c0_i32_0 = arith.constant 0 : i32
    return %arg2, %arg0, %c0_i32 : i32, i32, i32
  }
  func.func @transform_1(%arg0: i32, %arg1: i32, %arg2: i32) -> (i32, i32, i32) {
    %c0_i32 = arith.constant 0 : i32
    %c0_i32_0 = arith.constant 0 : i32
    return %arg2, %c0_i32, %arg1 : i32, i32, i32
  }
  func.func @transform_2(%arg0: i32, %arg1: i32, %arg2: i32) -> (i32, i32) {
    %c0_i32 = arith.constant 0 : i32
    %c0_i32_0 = arith.constant 0 : i32
    return %c0_i32, %arg1 : i32, i32
  }
  func.func @transform_3(%arg0: i32, %arg1: i32, %arg2: i32) -> (i32, i32) {
    %c0_i32 = arith.constant 0 : i32
    %c0_i32_0 = arith.constant 0 : i32
    return %c0_i32, %arg1 : i32, i32
  }
  func.func @transform_4(%arg0: i32, %arg1: i32, %arg2: i32) -> (i32, i32) {
    %c0_i32 = arith.constant 0 : i32
    return %arg0, %arg1 : i32, i32
  }
}

module attributes {stable_mosaic.version = 11 : i64} {
  func.func @_conv_matmul_kernel(%arg0: i32, %arg1: i32, %arg2: i32, %arg3: memref<1x8x256xbf16, #tpu.memory_space<vmem>>, %arg4: memref<1x256x256xbf16, #tpu.memory_space<vmem>>, %arg5: memref<1x256xf32, #tpu.memory_space<vmem>>, %arg6: memref<1x256xf32, #tpu.memory_space<vmem>>, %arg7: memref<8x256xbf16, #tpu.memory_space<vmem>>, %arg8: memref<8x256xf32, #tpu.memory_space<vmem>>) attributes {dimension_semantics = [#tpu.dimension_semantics<parallel>, #tpu.dimension_semantics<parallel>, #tpu.dimension_semantics<arbitrary>], iteration_bounds = array<i64: 1, 2, 1>, scalar_prefetch = 0 : i64, scratch_operands = 1 : i64, tpu.core_type = #tpu.core_type<tc>, window_params = [{transform_indices = @transform_0, window_bounds = array<i64: 1, 8, 256>}, {transform_indices = @transform_1, window_bounds = array<i64: 1, 256, 256>}, {transform_indices = @transform_2, window_bounds = array<i64: 1, 256>}, {transform_indices = @transform_3, window_bounds = array<i64: 1, 256>}, {transform_indices = @transform_4, window_bounds = array<i64: 8, 256>}]} {
    %c0_i32 = arith.constant 0 : i32
    %0 = arith.cmpi eq, %arg2, %c0_i32 : i32
    %1 = arith.extui %0 : i1 to i32
    %c0_i32_0 = arith.constant 0 : i32
    %2 = arith.cmpi ne, %1, %c0_i32_0 : i32
    scf.if %2 {
      %cst_12 = arith.constant 0.000000e+00 : f32
      %14 = vector.broadcast %cst_12 : f32 to vector<8x256xf32>
      %c0_13 = arith.constant 0 : index
      %c0_14 = arith.constant 0 : index
      %15 = vector.load %arg8[%c0_13, %c0_14] : memref<8x256xf32, #tpu.memory_space<vmem>>, vector<8x256xf32>
      tpu.vector_store %arg8[%c0_13, %c0_14], %14 {strides = array<i32>} : memref<8x256xf32, #tpu.memory_space<vmem>>, vector<8x256xf32>,
    } else {
    }
    %c0 = arith.constant 0 : index
    %c0_1 = arith.constant 0 : index
    %3 = vector.load %arg8[%c0, %c0_1] : memref<8x256xf32, #tpu.memory_space<vmem>>, vector<8x256xf32>
    %c0_2 = arith.constant 0 : index
    %c0_3 = arith.constant 0 : index
    %c0_4 = arith.constant 0 : index
    %4 = vector.load %arg3[%c0_2, %c0_3, %c0_4] : memref<1x8x256xbf16, #tpu.memory_space<vmem>>, vector<1x8x256xbf16>
    %5 = vector.shape_cast %4 : vector<1x8x256xbf16> to vector<8x256xbf16>
    %c0_5 = arith.constant 0 : index
    %c0_6 = arith.constant 0 : index
    %c0_7 = arith.constant 0 : index
    %6 = vector.load %arg4[%c0_5, %c0_6, %c0_7] : memref<1x256x256xbf16, #tpu.memory_space<vmem>>, vector<1x256x256xbf16>
    %7 = vector.shape_cast %6 : vector<1x256x256xbf16> to vector<256x256xbf16>
    %cst = arith.constant dense<0.000000e+00> : vector<8x256xf32>
    %8 = tpu.matmul %5, %7, %cst {dimension_numbers = #tpu.dot_dimension_numbers<[1], [0], [0], [1], [0, 0, 1, 1], [], []>} : vector<8x256xbf16>, vector<256x256xbf16>, vector<8x256xf32> -> vector<8x256xf32>
    %9 = arith.addf %3, %8 : vector<8x256xf32>
    %c0_8 = arith.constant 0 : index
    %c0_9 = arith.constant 0 : index
    %10 = vector.load %arg8[%c0_8, %c0_9] : memref<8x256xf32, #tpu.memory_space<vmem>>, vector<8x256xf32>
    tpu.vector_store %arg8[%c0_8, %c0_9], %9 {strides = array<i32>} : memref<8x256xf32, #tpu.memory_space<vmem>>, vector<8x256xf32>,
    %c0_i32_10 = arith.constant 0 : i32
    %11 = arith.cmpi eq, %arg2, %c0_i32_10 : i32
    %12 = arith.extui %11 : i1 to i32
    %c0_i32_11 = arith.constant 0 : i32
    %13 = arith.cmpi ne, %12, %c0_i32_11 : i32
    scf.if %13 {
      %c0_12 = arith.constant 0 : index
      %c0_13 = arith.constant 0 : index
      %14 = vector.load %arg8[%c0_12, %c0_13] : memref<8x256xf32, #tpu.memory_space<vmem>>, vector<8x256xf32>
      %c0_14 = arith.constant 0 : index
      %c0_15 = arith.constant 0 : index
      %15 = vector.load %arg5[%c0_14, %c0_15] : memref<1x256xf32, #tpu.memory_space<vmem>>, vector<1x256xf32>
      %16 = vector.broadcast %15 : vector<1x256xf32> to vector<8x256xf32>
      %17 = arith.mulf %14, %16 : vector<8x256xf32>
      %c0_16 = arith.constant 0 : index
      %c0_17 = arith.constant 0 : index
      %18 = vector.load %arg6[%c0_16, %c0_17] : memref<1x256xf32, #tpu.memory_space<vmem>>, vector<1x256xf32>
      %19 = vector.broadcast %18 : vector<1x256xf32> to vector<8x256xf32>
      %20 = arith.addf %17, %19 : vector<8x256xf32>
      %21 = arith.truncf %20 : vector<8x256xf32> to vector<8x256xbf16>
      %c0_18 = arith.constant 0 : index
      %c0_19 = arith.constant 0 : index
      %22 = vector.load %arg7[%c0_18, %c0_19] : memref<8x256xbf16, #tpu.memory_space<vmem>>, vector<8x256xbf16>
      tpu.vector_store %arg7[%c0_18, %c0_19], %21 {strides = array<i32>} : memref<8x256xbf16, #tpu.memory_space<vmem>>, vector<8x256xbf16>,
    } else {
    }
    return
  }
  func.func @transform_0(%arg0: i32, %arg1: i32, %arg2: i32) -> (i32, i32, i32) {
    %c0_i32 = arith.constant 0 : i32
    %c0_i32_0 = arith.constant 0 : i32
    return %arg2, %arg0, %c0_i32 : i32, i32, i32
  }
  func.func @transform_1(%arg0: i32, %arg1: i32, %arg2: i32) -> (i32, i32, i32) {
    %c0_i32 = arith.constant 0 : i32
    %c0_i32_0 = arith.constant 0 : i32
    return %arg2, %c0_i32, %arg1 : i32, i32, i32
  }
  func.func @transform_2(%arg0: i32, %arg1: i32, %arg2: i32) -> (i32, i32) {
    %c0_i32 = arith.constant 0 : i32
    %c0_i32_0 = arith.constant 0 : i32
    return %c0_i32, %arg1 : i32, i32
  }
  func.func @transform_3(%arg0: i32, %arg1: i32, %arg2: i32) -> (i32, i32) {
    %c0_i32 = arith.constant 0 : i32
    %c0_i32_0 = arith.constant 0 : i32
    return %c0_i32, %arg1 : i32, i32
  }
  func.func @transform_4(%arg0: i32, %arg1: i32, %arg2: i32) -> (i32, i32) {
    %c0_i32 = arith.constant 0 : i32
    return %arg0, %arg1 : i32, i32
  }
}

module attributes {stable_mosaic.version = 11 : i64} {
  func.func @_conv_matmul_kernel(%arg0: i32, %arg1: i32, %arg2: i32, %arg3: memref<1x8x512xbf16, #tpu.memory_space<vmem>>, %arg4: memref<1x512x256xbf16, #tpu.memory_space<vmem>>, %arg5: memref<1x256xf32, #tpu.memory_space<vmem>>, %arg6: memref<1x256xf32, #tpu.memory_space<vmem>>, %arg7: memref<8x256xbf16, #tpu.memory_space<vmem>>, %arg8: memref<8x256xbf16, #tpu.memory_space<vmem>>, %arg9: memref<8x256xf32, #tpu.memory_space<vmem>>) attributes {dimension_semantics = [#tpu.dimension_semantics<parallel>, #tpu.dimension_semantics<parallel>, #tpu.dimension_semantics<arbitrary>], iteration_bounds = array<i64: 1, 2, 9>, scalar_prefetch = 0 : i64, scratch_operands = 1 : i64, tpu.core_type = #tpu.core_type<tc>, window_params = [{transform_indices = @transform_0, window_bounds = array<i64: 1, 8, 512>}, {transform_indices = @transform_1, window_bounds = array<i64: 1, 512, 256>}, {transform_indices = @transform_2, window_bounds = array<i64: 1, 256>}, {transform_indices = @transform_3, window_bounds = array<i64: 1, 256>}, {transform_indices = @transform_4, window_bounds = array<i64: 8, 256>}, {transform_indices = @transform_5, window_bounds = array<i64: 8, 256>}]} {
    %c0_i32 = arith.constant 0 : i32
    %0 = arith.cmpi eq, %arg2, %c0_i32 : i32
    %1 = arith.extui %0 : i1 to i32
    %c0_i32_0 = arith.constant 0 : i32
    %2 = arith.cmpi ne, %1, %c0_i32_0 : i32
    scf.if %2 {
      %cst_11 = arith.constant 0.000000e+00 : f32
      %14 = vector.broadcast %cst_11 : f32 to vector<8x256xf32>
      %c0_12 = arith.constant 0 : index
      %c0_13 = arith.constant 0 : index
      %15 = vector.load %arg9[%c0_12, %c0_13] : memref<8x256xf32, #tpu.memory_space<vmem>>, vector<8x256xf32>
      tpu.vector_store %arg9[%c0_12, %c0_13], %14 {strides = array<i32>} : memref<8x256xf32, #tpu.memory_space<vmem>>, vector<8x256xf32>,
    } else {
    }
    %c0 = arith.constant 0 : index
    %c0_1 = arith.constant 0 : index
    %3 = vector.load %arg9[%c0, %c0_1] : memref<8x256xf32, #tpu.memory_space<vmem>>, vector<8x256xf32>
    %c0_2 = arith.constant 0 : index
    %c0_3 = arith.constant 0 : index
    %c0_4 = arith.constant 0 : index
    %4 = vector.load %arg3[%c0_2, %c0_3, %c0_4] : memref<1x8x512xbf16, #tpu.memory_space<vmem>>, vector<1x8x512xbf16>
    %5 = vector.shape_cast %4 : vector<1x8x512xbf16> to vector<8x512xbf16>
    %c0_5 = arith.constant 0 : index
    %c0_6 = arith.constant 0 : index
    %c0_7 = arith.constant 0 : index
    %6 = vector.load %arg4[%c0_5, %c0_6, %c0_7] : memref<1x512x256xbf16, #tpu.memory_space<vmem>>, vector<1x512x256xbf16>
    %7 = vector.shape_cast %6 : vector<1x512x256xbf16> to vector<512x256xbf16>
    %cst = arith.constant dense<0.000000e+00> : vector<8x256xf32>
    %8 = tpu.matmul %5, %7, %cst {dimension_numbers = #tpu.dot_dimension_numbers<[1], [0], [0], [1], [0, 0, 1, 1], [], []>} : vector<8x512xbf16>, vector<512x256xbf16>, vector<8x256xf32> -> vector<8x256xf32>
    %9 = arith.addf %3, %8 : vector<8x256xf32>
    %c0_8 = arith.constant 0 : index
    %c0_9 = arith.constant 0 : index
    %10 = vector.load %arg9[%c0_8, %c0_9] : memref<8x256xf32, #tpu.memory_space<vmem>>, vector<8x256xf32>
    tpu.vector_store %arg9[%c0_8, %c0_9], %9 {strides = array<i32>} : memref<8x256xf32, #tpu.memory_space<vmem>>, vector<8x256xf32>,
    %c8_i32 = arith.constant 8 : i32
    %11 = arith.cmpi eq, %arg2, %c8_i32 : i32
    %12 = arith.extui %11 : i1 to i32
    %c0_i32_10 = arith.constant 0 : i32
    %13 = arith.cmpi ne, %12, %c0_i32_10 : i32
    scf.if %13 {
      %c0_11 = arith.constant 0 : index
      %c0_12 = arith.constant 0 : index
      %14 = vector.load %arg9[%c0_11, %c0_12] : memref<8x256xf32, #tpu.memory_space<vmem>>, vector<8x256xf32>
      %c0_13 = arith.constant 0 : index
      %c0_14 = arith.constant 0 : index
      %15 = vector.load %arg5[%c0_13, %c0_14] : memref<1x256xf32, #tpu.memory_space<vmem>>, vector<1x256xf32>
      %16 = vector.broadcast %15 : vector<1x256xf32> to vector<8x256xf32>
      %17 = arith.mulf %14, %16 : vector<8x256xf32>
      %c0_15 = arith.constant 0 : index
      %c0_16 = arith.constant 0 : index
      %18 = vector.load %arg6[%c0_15, %c0_16] : memref<1x256xf32, #tpu.memory_space<vmem>>, vector<1x256xf32>
      %19 = vector.broadcast %18 : vector<1x256xf32> to vector<8x256xf32>
      %20 = arith.addf %17, %19 : vector<8x256xf32>
      %c0_17 = arith.constant 0 : index
      %c0_18 = arith.constant 0 : index
      %21 = vector.load %arg7[%c0_17, %c0_18] : memref<8x256xbf16, #tpu.memory_space<vmem>>, vector<8x256xbf16>
      %22 = arith.extf %21 : vector<8x256xbf16> to vector<8x256xf32>
      %23 = arith.addf %20, %22 : vector<8x256xf32>
      %cst_19 = arith.constant 0.000000e+00 : f32
      %24 = vector.broadcast %cst_19 : f32 to vector<8x256xf32>
      %25 = arith.maximumf %23, %24 : vector<8x256xf32>
      %26 = arith.truncf %25 : vector<8x256xf32> to vector<8x256xbf16>
      %c0_20 = arith.constant 0 : index
      %c0_21 = arith.constant 0 : index
      %27 = vector.load %arg8[%c0_20, %c0_21] : memref<8x256xbf16, #tpu.memory_space<vmem>>, vector<8x256xbf16>
      tpu.vector_store %arg8[%c0_20, %c0_21], %26 {strides = array<i32>} : memref<8x256xbf16, #tpu.memory_space<vmem>>, vector<8x256xbf16>,
    } else {
    }
    return
  }
  func.func @transform_0(%arg0: i32, %arg1: i32, %arg2: i32) -> (i32, i32, i32) {
    %c0_i32 = arith.constant 0 : i32
    %c0_i32_0 = arith.constant 0 : i32
    return %arg2, %arg0, %c0_i32 : i32, i32, i32
  }
  func.func @transform_1(%arg0: i32, %arg1: i32, %arg2: i32) -> (i32, i32, i32) {
    %c0_i32 = arith.constant 0 : i32
    %c0_i32_0 = arith.constant 0 : i32
    return %arg2, %c0_i32, %arg1 : i32, i32, i32
  }
  func.func @transform_2(%arg0: i32, %arg1: i32, %arg2: i32) -> (i32, i32) {
    %c0_i32 = arith.constant 0 : i32
    %c0_i32_0 = arith.constant 0 : i32
    return %c0_i32, %arg1 : i32, i32
  }
  func.func @transform_3(%arg0: i32, %arg1: i32, %arg2: i32) -> (i32, i32) {
    %c0_i32 = arith.constant 0 : i32
    %c0_i32_0 = arith.constant 0 : i32
    return %c0_i32, %arg1 : i32, i32
  }
  func.func @transform_4(%arg0: i32, %arg1: i32, %arg2: i32) -> (i32, i32) {
    %c0_i32 = arith.constant 0 : i32
    return %arg0, %arg1 : i32, i32
  }
  func.func @transform_5(%arg0: i32, %arg1: i32, %arg2: i32) -> (i32, i32) {
    %c0_i32 = arith.constant 0 : i32
    return %arg0, %arg1 : i32, i32
  }
}

module attributes {stable_mosaic.version = 11 : i64} {
  func.func @_conv_matmul_kernel(%arg0: i32, %arg1: i32, %arg2: i32, %arg3: memref<1x8x512xbf16, #tpu.memory_space<vmem>>, %arg4: memref<1x512x256xbf16, #tpu.memory_space<vmem>>, %arg5: memref<1x256xf32, #tpu.memory_space<vmem>>, %arg6: memref<1x256xf32, #tpu.memory_space<vmem>>, %arg7: memref<8x256xbf16, #tpu.memory_space<vmem>>, %arg8: memref<8x256xf32, #tpu.memory_space<vmem>>) attributes {dimension_semantics = [#tpu.dimension_semantics<parallel>, #tpu.dimension_semantics<parallel>, #tpu.dimension_semantics<arbitrary>], iteration_bounds = array<i64: 1, 2, 9>, scalar_prefetch = 0 : i64, scratch_operands = 1 : i64, tpu.core_type = #tpu.core_type<tc>, window_params = [{transform_indices = @transform_0, window_bounds = array<i64: 1, 8, 512>}, {transform_indices = @transform_1, window_bounds = array<i64: 1, 512, 256>}, {transform_indices = @transform_2, window_bounds = array<i64: 1, 256>}, {transform_indices = @transform_3, window_bounds = array<i64: 1, 256>}, {transform_indices = @transform_4, window_bounds = array<i64: 8, 256>}]} {
    %c0_i32 = arith.constant 0 : i32
    %0 = arith.cmpi eq, %arg2, %c0_i32 : i32
    %1 = arith.extui %0 : i1 to i32
    %c0_i32_0 = arith.constant 0 : i32
    %2 = arith.cmpi ne, %1, %c0_i32_0 : i32
    scf.if %2 {
      %cst_11 = arith.constant 0.000000e+00 : f32
      %14 = vector.broadcast %cst_11 : f32 to vector<8x256xf32>
      %c0_12 = arith.constant 0 : index
      %c0_13 = arith.constant 0 : index
      %15 = vector.load %arg8[%c0_12, %c0_13] : memref<8x256xf32, #tpu.memory_space<vmem>>, vector<8x256xf32>
      tpu.vector_store %arg8[%c0_12, %c0_13], %14 {strides = array<i32>} : memref<8x256xf32, #tpu.memory_space<vmem>>, vector<8x256xf32>,
    } else {
    }
    %c0 = arith.constant 0 : index
    %c0_1 = arith.constant 0 : index
    %3 = vector.load %arg8[%c0, %c0_1] : memref<8x256xf32, #tpu.memory_space<vmem>>, vector<8x256xf32>
    %c0_2 = arith.constant 0 : index
    %c0_3 = arith.constant 0 : index
    %c0_4 = arith.constant 0 : index
    %4 = vector.load %arg3[%c0_2, %c0_3, %c0_4] : memref<1x8x512xbf16, #tpu.memory_space<vmem>>, vector<1x8x512xbf16>
    %5 = vector.shape_cast %4 : vector<1x8x512xbf16> to vector<8x512xbf16>
    %c0_5 = arith.constant 0 : index
    %c0_6 = arith.constant 0 : index
    %c0_7 = arith.constant 0 : index
    %6 = vector.load %arg4[%c0_5, %c0_6, %c0_7] : memref<1x512x256xbf16, #tpu.memory_space<vmem>>, vector<1x512x256xbf16>
    %7 = vector.shape_cast %6 : vector<1x512x256xbf16> to vector<512x256xbf16>
    %cst = arith.constant dense<0.000000e+00> : vector<8x256xf32>
    %8 = tpu.matmul %5, %7, %cst {dimension_numbers = #tpu.dot_dimension_numbers<[1], [0], [0], [1], [0, 0, 1, 1], [], []>} : vector<8x512xbf16>, vector<512x256xbf16>, vector<8x256xf32> -> vector<8x256xf32>
    %9 = arith.addf %3, %8 : vector<8x256xf32>
    %c0_8 = arith.constant 0 : index
    %c0_9 = arith.constant 0 : index
    %10 = vector.load %arg8[%c0_8, %c0_9] : memref<8x256xf32, #tpu.memory_space<vmem>>, vector<8x256xf32>
    tpu.vector_store %arg8[%c0_8, %c0_9], %9 {strides = array<i32>} : memref<8x256xf32, #tpu.memory_space<vmem>>, vector<8x256xf32>,
    %c8_i32 = arith.constant 8 : i32
    %11 = arith.cmpi eq, %arg2, %c8_i32 : i32
    %12 = arith.extui %11 : i1 to i32
    %c0_i32_10 = arith.constant 0 : i32
    %13 = arith.cmpi ne, %12, %c0_i32_10 : i32
    scf.if %13 {
      %c0_11 = arith.constant 0 : index
      %c0_12 = arith.constant 0 : index
      %14 = vector.load %arg8[%c0_11, %c0_12] : memref<8x256xf32, #tpu.memory_space<vmem>>, vector<8x256xf32>
      %c0_13 = arith.constant 0 : index
      %c0_14 = arith.constant 0 : index
      %15 = vector.load %arg5[%c0_13, %c0_14] : memref<1x256xf32, #tpu.memory_space<vmem>>, vector<1x256xf32>
      %16 = vector.broadcast %15 : vector<1x256xf32> to vector<8x256xf32>
      %17 = arith.mulf %14, %16 : vector<8x256xf32>
      %c0_15 = arith.constant 0 : index
      %c0_16 = arith.constant 0 : index
      %18 = vector.load %arg6[%c0_15, %c0_16] : memref<1x256xf32, #tpu.memory_space<vmem>>, vector<1x256xf32>
      %19 = vector.broadcast %18 : vector<1x256xf32> to vector<8x256xf32>
      %20 = arith.addf %17, %19 : vector<8x256xf32>
      %cst_17 = arith.constant 0.000000e+00 : f32
      %21 = vector.broadcast %cst_17 : f32 to vector<8x256xf32>
      %22 = arith.maximumf %20, %21 : vector<8x256xf32>
      %23 = arith.truncf %22 : vector<8x256xf32> to vector<8x256xbf16>
      %c0_18 = arith.constant 0 : index
      %c0_19 = arith.constant 0 : index
      %24 = vector.load %arg7[%c0_18, %c0_19] : memref<8x256xbf16, #tpu.memory_space<vmem>>, vector<8x256xbf16>
      tpu.vector_store %arg7[%c0_18, %c0_19], %23 {strides = array<i32>} : memref<8x256xbf16, #tpu.memory_space<vmem>>, vector<8x256xbf16>,
    } else {
    }
    return
  }
  func.func @transform_0(%arg0: i32, %arg1: i32, %arg2: i32) -> (i32, i32, i32) {
    %c0_i32 = arith.constant 0 : i32
    %c0_i32_0 = arith.constant 0 : i32
    return %arg2, %arg0, %c0_i32 : i32, i32, i32
  }
  func.func @transform_1(%arg0: i32, %arg1: i32, %arg2: i32) -> (i32, i32, i32) {
    %c0_i32 = arith.constant 0 : i32
    %c0_i32_0 = arith.constant 0 : i32
    return %arg2, %c0_i32, %arg1 : i32, i32, i32
  }
  func.func @transform_2(%arg0: i32, %arg1: i32, %arg2: i32) -> (i32, i32) {
    %c0_i32 = arith.constant 0 : i32
    %c0_i32_0 = arith.constant 0 : i32
    return %c0_i32, %arg1 : i32, i32
  }
  func.func @transform_3(%arg0: i32, %arg1: i32, %arg2: i32) -> (i32, i32) {
    %c0_i32 = arith.constant 0 : i32
    %c0_i32_0 = arith.constant 0 : i32
    return %c0_i32, %arg1 : i32, i32
  }
  func.func @transform_4(%arg0: i32, %arg1: i32, %arg2: i32) -> (i32, i32) {
    %c0_i32 = arith.constant 0 : i32
    return %arg0, %arg1 : i32, i32
  }
}

module attributes {stable_mosaic.version = 11 : i64} {
  func.func @_fc_softmax_kernel(%arg0: memref<8x512xbf16, #tpu.memory_space<vmem>>, %arg1: memref<512x128xbf16, #tpu.memory_space<vmem>>, %arg2: memref<1x128xf32, #tpu.memory_space<vmem>>, %arg3: memref<8x128xf32, #tpu.memory_space<vmem>>) attributes {dimension_semantics = [], scalar_prefetch = 0 : i64, scratch_operands = 0 : i64, tpu.core_type = #tpu.core_type<tc>} {
    %c0 = arith.constant 0 : index
    %c0_0 = arith.constant 0 : index
    %0 = vector.load %arg0[%c0, %c0_0] : memref<8x512xbf16, #tpu.memory_space<vmem>>, vector<8x512xbf16>
    %c0_1 = arith.constant 0 : index
    %c0_2 = arith.constant 0 : index
    %1 = vector.load %arg1[%c0_1, %c0_2] : memref<512x128xbf16, #tpu.memory_space<vmem>>, vector<512x128xbf16>
    %cst = arith.constant dense<0.000000e+00> : vector<8x128xf32>
    %2 = tpu.matmul %0, %1, %cst {dimension_numbers = #tpu.dot_dimension_numbers<[1], [0], [0], [1], [0, 0, 1, 1], [], []>} : vector<8x512xbf16>, vector<512x128xbf16>, vector<8x128xf32> -> vector<8x128xf32>
    %c0_3 = arith.constant 0 : index
    %c0_4 = arith.constant 0 : index
    %3 = vector.load %arg2[%c0_3, %c0_4] : memref<1x128xf32, #tpu.memory_space<vmem>>, vector<1x128xf32>
    %4 = vector.broadcast %3 : vector<1x128xf32> to vector<8x128xf32>
    %5 = arith.addf %2, %4 : vector<8x128xf32>
    %cst_5 = arith.constant dense<0xFF800000> : vector<8xf32>
    %6 = vector.multi_reduction <maximumf>, %5, %cst_5 [1] : vector<8x128xf32> to vector<8xf32>
    %7 = vector.shape_cast %6 : vector<8xf32> to vector<8x1xf32>
    %8 = vector.broadcast %7 : vector<8x1xf32> to vector<8x128xf32>
    %9 = arith.subf %5, %8 : vector<8x128xf32>
    %10 = math.exp %9 : vector<8x128xf32>
    %cst_6 = arith.constant dense<0.000000e+00> : vector<8xf32>
    %11 = vector.multi_reduction <add>, %10, %cst_6 [1] : vector<8x128xf32> to vector<8xf32>
    %12 = vector.shape_cast %11 : vector<8xf32> to vector<8x1xf32>
    %13 = vector.broadcast %12 : vector<8x1xf32> to vector<8x128xf32>
    %14 = arith.divf %10, %13 : vector<8x128xf32>
    %c0_7 = arith.constant 0 : index
    %c0_8 = arith.constant 0 : index
    %15 = vector.load %arg3[%c0_7, %c0_8] : memref<8x128xf32, #tpu.memory_space<vmem>>, vector<8x128xf32>
    tpu.vector_store %arg3[%c0_7, %c0_8], %14 {strides = array<i32>} : memref<8x128xf32, #tpu.memory_space<vmem>>, vector<8x128xf32>,
    return
  }
}

</mosaic_0001>

<bundles_post_ra>
// kernel: _lambda_.23
= control target key start
LH: loop header
LB: loop body
LE: loop exit
PB: predicated region body
PF: predicated region fallthrough
CT: control target
= control target key end

     0   :  { %s597_s6 = smov 0   ;;  %s599_s7 = smov 0   ;;  %s724_s0 = inlined_call_operand.vmem [shape: bf16[9,128,64], index: 0, kind: input, shape index: {}]   ;;  %s725_s1 = inlined_call_operand.vmem [shape: bf16[128,64], index: 1, kind: output, shape index: {}]  }
   0x1   :  { %s601_s8 = smov 0  }
   0x2 LB: > { %s20_s9 = sadd.s32 1, %s581_s7  ;;  %p472_p0 = scmp.ge.s32.totalorder %s585_s8, 1  ;;  %s585_s8 = sphi %s601_s8, %s11_s8   ;;  %s581_s7 = sphi %s599_s7, %s727_s7   ;;  %s577_s6 = sphi %s597_s6, %s726_s6  }
   0x3   : > { %p21_p1 = scmp.ge.s32.totalorder %s20_s9, 9  ;;  %p106_p2 = scmp.lt.s32.totalorder %s585_s8, 10 }
   0x5   : > { %s729_s9 = smov (%p21_p1, %s20_s9), 0  ;;  %p107_p3 = pnand %p472_p0, %p106_p2 }
   0x6   : > { %p131_p4 = scmp.lt.s32.totalorder (!%p107_p3), %s577_s6, 8  ;;  %p475_p5 = scmp.ne.s32.totalorder (!%p107_p3), %s577_s6, 0 }
   0x7   : > { %110 = sbr.rel (%p107_p3) target bundleno = 50 (0x32), region = 24 }
   0xe   : > { %s132_s10 = scalar_select %p131_p4, %s577_s6, 8 }
   0xf   : > { %149 = sbr.rel (%p475_p5) target bundleno = 23 (0x17), region = 28  ;;  %vm214_vm0 = vcmask (!%p475_p5), 523264  }
  0x10   : > { %s514_s11 = sshll.u32 %s132_s10, 6 }
  0x11   : > { %s622_s14 = scalar_lea.vmem %s724_s0, %s514_s11 }
  0x12   : > { %v539_v0 = vld [vmem:[%s622_s14] sm:$0xff] (!%p475_p5)   ;;  %v540_v1 = vld [vmem:[%s622_s14 + $0x8] sm:$0xff] (!%p475_p5)   ;;  %v541_v2 = vld [vmem:[%s622_s14 + $0x10] sm:$0xff] (!%p475_p5)  }
  0x13   : > { %215 = vst.msk [vmem:[#allocation2] sm:$0xff] (!%p475_p5), %vm214_vm0, %v539_v0  ;;  %216 = vst.msk [vmem:[#allocation2 + $0x8] sm:$0xff] (!%p475_p5), %vm214_vm0, %v540_v1  ;;  %v542_v3 = vld [vmem:[%s622_s14 + $0x18] sm:$0xff] (!%p475_p5)   ;;  %v543_v4 = vld [vmem:[%s622_s14 + $0x20] sm:$0xff] (!%p475_p5)  }
  0x14   : > { %217 = vst.msk [vmem:[#allocation2 + $0x10] sm:$0xff] (!%p475_p5), %vm214_vm0, %v541_v2  ;;  %218 = vst.msk [vmem:[#allocation2 + $0x18] sm:$0xff] (!%p475_p5), %vm214_vm0, %v542_v3  ;;  %v544_v5 = vld [vmem:[%s622_s14 + $0x28] sm:$0xff] (!%p475_p5)   ;;  %v545_v6 = vld [vmem:[%s622_s14 + $0x30] sm:$0xff] (!%p475_p5)  }
  0x15   : > { %219 = vst.msk [vmem:[#allocation2 + $0x20] sm:$0xff] (!%p475_p5), %vm214_vm0, %v543_v4  ;;  %220 = vst.msk [vmem:[#allocation2 + $0x28] sm:$0xff] (!%p475_p5), %vm214_vm0, %v544_v5  ;;  %v546_v7 = vld [vmem:[%s622_s14 + $0x38] sm:$0xff] (!%p475_p5)  }
  0x16   : > { %221 = vst.msk [vmem:[#allocation2 + $0x30] sm:$0xff] %vm214_vm0, %v545_v6  ;;  %222 = vst.msk [vmem:[#allocation2 + $0x38] sm:$0xff] %vm214_vm0, %v546_v7 }
  0x17 PF: > { %p484_p6 = scmp.le.s32.totalorder %s577_s6, 0 }
  0x18   : > { %v547_v9 = vld [vmem:[%s622_s14] sm:$0xff] (!%p484_p6)   ;;  %vm307_vm1 = vcmask (!%p484_p6), 523264   ;;  %v548_v11 = vld [vmem:[%s622_s14 + $0x8] sm:$0xff] (!%p484_p6)   ;;  %v549_v14 = vld [vmem:[%s622_s14 + $0x10] sm:$0xff] (!%p484_p6)  }
  0x19   : > { %226 = sbr.rel (%p484_p6) target bundleno = 34 (0x22), region = 32  ;;  %v550_v18 = vld [vmem:[%s622_s14 + $0x18] sm:$0xff] (!%p484_p6)   ;;  %v551_v20 = vld [vmem:[%s622_s14 + $0x20] sm:$0xff] (!%p484_p6)   ;;  %v552_v23 = vld [vmem:[%s622_s14 + $0x28] sm:$0xff] (!%p484_p6)  }
  0x1a   : > { %v553_v27 = vld [vmem:[%s622_s14 + $0x30] sm:$0xff] (!%p484_p6)   ;;  %v554_v29 = vld [vmem:[%s622_s14 + $0x38] sm:$0xff] (!%p484_p6)  }
  0x1b   : > { %v227_v8 = vld [vmem:[#allocation2] sm:$0xff] (!%p484_p6)  ;;  %v228_v10 = vld [vmem:[#allocation2 + $0x8] sm:$0xff] (!%p484_p6) }
  0x1c   : > { %v229_v12 = vld [vmem:[#allocation2 + $0x10] sm:$0xff] (!%p484_p6)  ;;  %v299_v13 = vmax.bf16 (!%p484_p6), %v547_v9, %v227_v8  ;;  %v300_v15 = vmax.bf16 (!%p484_p6), %v548_v11, %v228_v10  ;;  %v230_v16 = vld [vmem:[#allocation2 + $0x18] sm:$0xff] (!%p484_p6) }
  0x1d   : > { %v301_v17 = vmax.bf16 (!%p484_p6), %v549_v14, %v229_v12  ;;  %v231_v19 = vld [vmem:[#allocation2 + $0x20] sm:$0xff] (!%p484_p6)  ;;  %v232_v21 = vld [vmem:[#allocation2 + $0x28] sm:$0xff] (!%p484_p6)  ;;  %v302_v22 = vmax.bf16 (!%p484_p6), %v550_v18, %v230_v16  ;;  %v233_v25 = vld [vmem:[#allocation2 + $0x30] sm:$0xff] (!%p484_p6) }
  0x1e   : > { %308 = vst.msk [vmem:[#allocation2] sm:$0xff] (!%p484_p6), %vm307_vm1, %v299_v13  ;;  %309 = vst.msk [vmem:[#allocation2 + $0x8] sm:$0xff] (!%p484_p6), %vm307_vm1, %v300_v15  ;;  %v303_v24 = vmax.bf16 (!%p484_p6), %v551_v20, %v231_v19  ;;  %v304_v26 = vmax.bf16 (!%p484_p6), %v552_v23, %v232_v21  ;;  %v234_v28 = vld [vmem:[#allocation2 + $0x38] sm:$0xff] (!%p484_p6)  ;;  %v305_v30 = vmax.bf16 (!%p484_p6), %v553_v27, %v233_v25 }
  0x1f   : > { %310 = vst.msk [vmem:[#allocation2 + $0x10] sm:$0xff] (!%p484_p6), %vm307_vm1, %v301_v17  ;;  %311 = vst.msk [vmem:[#allocation2 + $0x18] sm:$0xff] (!%p484_p6), %vm307_vm1, %v302_v22  ;;  %v306_v31 = vmax.bf16 (!%p484_p6), %v554_v29, %v234_v28 }
  0x20   : > { %312 = vst.msk [vmem:[#allocation2 + $0x20] sm:$0xff] %vm307_vm1, %v303_v24  ;;  %313 = vst.msk [vmem:[#allocation2 + $0x28] sm:$0xff] %vm307_vm1, %v304_v26 }
  0x21   : > { %314 = vst.msk [vmem:[#allocation2 + $0x30] sm:$0xff] %vm307_vm1, %v305_v30  ;;  %315 = vst.msk [vmem:[#allocation2 + $0x38] sm:$0xff] %vm307_vm1, %v306_v31 }
  0x22 PF: > { %p493_p7 = scmp.ne.s32.totalorder %s577_s6, 8 }
  0x23   : > { %vm384_vm2 = vcmask (!%p493_p7), 519168  }
  0x24   : > { %319 = sbr.rel (%p493_p7) target bundleno = 50 (0x32), region = 36 }
  0x27   : > { %v320_v32 = vld [vmem:[#allocation2] sm:$0xff] (!%p493_p7)  ;;  %v321_v33 = vld [vmem:[#allocation2 + $0x8] sm:$0xff] (!%p493_p7) }
  0x28   : > { %v322_v34 = vld [vmem:[#allocation2 + $0x10] sm:$0xff] (!%p493_p7)  ;;  %v494_v35 = vcombine.low (!%p493_p7), %v320_v32, %v320_v32  ;;  %v495_v36 = vcombine.high (!%p493_p7), %v320_v32, %v320_v32  ;;  %v496_v37 = vcombine.low (!%p493_p7), %v321_v33, %v321_v33  ;;  %v497_v38 = vcombine.high (!%p493_p7), %v321_v33, %v321_v33  ;;  %v323_v39 = vld [vmem:[#allocation2 + $0x18] sm:$0xff] (!%p493_p7) }
  0x29   : > { %v324_v40 = vld [vmem:[#allocation2 + $0x20] sm:$0xff] (!%p493_p7)  ;;  %v325_v41 = vld [vmem:[#allocation2 + $0x28] sm:$0xff] (!%p493_p7)  ;;  %v498_v42 = vcombine.low (!%p493_p7), %v322_v34, %v322_v34  ;;  %v499_v43 = vcombine.high (!%p493_p7), %v322_v34, %v322_v34  ;;  %v500_v44 = vcombine.low (!%p493_p7), %v323_v39, %v323_v39  ;;  %v501_v45 = vcombine.high (!%p493_p7), %v323_v39, %v323_v39  ;;  %v326_v46 = vld [vmem:[#allocation2 + $0x30] sm:$0xff] (!%p493_p7) }
  0x2a   : > { %v327_v47 = vld [vmem:[#allocation2 + $0x38] sm:$0xff] (!%p493_p7)  ;;  %385 = vst.msk [vmem:[%s725_s1] sm:$0xf] (!%p493_p7), %vm384_vm2, %v494_v35  ;;  %386 = vst.msk [vmem:[%s725_s1 + $0x4] sm:$0xf] (!%p493_p7), %vm384_vm2, %v495_v36  ;;  %v502_v48 = vcombine.low (!%p493_p7), %v324_v40, %v324_v40  ;;  %v503_v49 = vcombine.high (!%p493_p7), %v324_v40, %v324_v40  ;;  %v504_v50 = vcombine.low (!%p493_p7), %v325_v41, %v325_v41 }
  0x2b   : > { %387 = vst.msk [vmem:[%s725_s1 + $0x8] sm:$0xf] %vm384_vm2, %v496_v37  ;;  %388 = vst.msk [vmem:[%s725_s1 + $0xc] sm:$0xf] %vm384_vm2, %v497_v38  ;;  %v505_v51 = vcombine.high %v325_v41, %v325_v41  ;;  %v506_v52 = vcombine.low %v326_v46, %v326_v46  ;;  %v507_v53 = vcombine.high %v326_v46, %v326_v46 }
  0x2c   : > { %389 = vst.msk [vmem:[%s725_s1 + $0x10] sm:$0xf] %vm384_vm2, %v498_v42  ;;  %390 = vst.msk [vmem:[%s725_s1 + $0x14] sm:$0xf] %vm384_vm2, %v499_v43  ;;  %v508_v54 = vcombine.low %v327_v47, %v327_v47  ;;  %v509_v55 = vcombine.high %v327_v47, %v327_v47 }
  0x2d   : > { %391 = vst.msk [vmem:[%s725_s1 + $0x18] sm:$0xf] %vm384_vm2, %v500_v44  ;;  %392 = vst.msk [vmem:[%s725_s1 + $0x1c] sm:$0xf] %vm384_vm2, %v501_v45 }
  0x2e   : > { %393 = vst.msk [vmem:[%s725_s1 + $0x20] sm:$0xf] %vm384_vm2, %v502_v48  ;;  %394 = vst.msk [vmem:[%s725_s1 + $0x24] sm:$0xf] %vm384_vm2, %v503_v49 }
  0x2f   : > { %395 = vst.msk [vmem:[%s725_s1 + $0x28] sm:$0xf] %vm384_vm2, %v504_v50  ;;  %396 = vst.msk [vmem:[%s725_s1 + $0x2c] sm:$0xf] %vm384_vm2, %v505_v51 }
  0x30   : > { %397 = vst.msk [vmem:[%s725_s1 + $0x30] sm:$0xf] %vm384_vm2, %v506_v52  ;;  %398 = vst.msk [vmem:[%s725_s1 + $0x34] sm:$0xf] %vm384_vm2, %v507_v53 }
  0x31   : > { %399 = vst.msk [vmem:[%s725_s1 + $0x38] sm:$0xf] %vm384_vm2, %v508_v54  ;;  %400 = vst.msk [vmem:[%s725_s1 + $0x3c] sm:$0xf] %vm384_vm2, %v509_v55 }
  0x32 PF: > { %s11_s8 = sadd.s32 1, %s585_s8   ;;  %s726_s6 = smov %s581_s7 }
  0x33   : > { %p8_p8 = scmp.ge.s32.totalorder %s11_s8, 11   ;;  %s727_s7 = smov %s729_s9 }
  0x35   :  { %10 = sbr.rel (!%p8_p8) target bundleno = 2 (0x2), region = 66 }

// kernel: _lambda_.22
= control target key start
LH: loop header
LB: loop body
LE: loop exit
PB: predicated region body
PF: predicated region fallthrough
CT: control target
= control target key end

     0   :  { %s1643_s15 = smov 0   ;;  %s1645_s16 = smov 0   ;;  %s1986_s0 = inlined_call_operand.vmem [shape: bf16[1,512,147], index: 0, kind: input, shape index: {}]   ;;  %s1987_s1 = inlined_call_operand.vmem [shape: bf16[1,147,64], index: 1, kind: input, shape index: {}]   ;;  %s1988_s2 = inlined_call_operand.vmem [shape: f32[1,64], index: 2, kind: input, shape index: {}]   ;;  %s1989_s3 = inlined_call_operand.vmem [shape: f32[1,64], index: 3, kind: input, shape index: {}]   ;;  %s1990_s4 = inlined_call_operand.vmem [shape: bf16[512,64], index: 4, kind: output, shape index: {}]  }
   0x1   :  { %s1647_s17 = smov 0  }
   0x2 LB: > { %s33_s18 = sadd.s32 1, %s1609_s16  ;;  %p1353_p0 = scmp.ge.s32.totalorder %s1613_s17, 1  ;;  %s1613_s17 = sphi %s1647_s17, %s14_s17   ;;  %s1609_s16 = sphi %s1645_s16, %s1992_s16   ;;  %s1605_s15 = sphi %s1643_s15, %s1991_s15  }
   0x3   : > { %p35_p1 = scmp.ge.s32.totalorder %s33_s18, 2  ;;  %p222_p2 = scmp.lt.s32.totalorder %s1613_s17, 3 }
   0x5   : > { %s1994_s18 = smov (%p35_p1, %s33_s18), 0  ;;  %p223_p3 = pnand %p1353_p0, %p222_p2 }
   0x6   : > { %v1533_v0 = vld [vmem:[%s1987_s1] sm:$0xff] (!%p223_p3)   ;;  %v1615_v1 = vmov (!%p223_p3), 0   ;;  %v1534_v2 = vld [vmem:[%s1987_s1 + $0x8] sm:$0xff] (!%p223_p3)   ;;  %v1535_v3 = vld [vmem:[%s1987_s1 + $0x10] sm:$0xff] (!%p223_p3)   ;;  %s1354_s25 = sshll.u32 (!%p223_p3), %s1605_s15, 5  ;;  %vm309_vm0 = vcmask (!%p223_p3), 523264  }
   0x7   : > { %226 = sbr.rel (%p223_p3) target bundleno = 338 (0x152), region = 36  ;;  %682 = vmatprep.subr.bf16.mxu0 (!%p223_p3), %v1615_v1  ;;  %1486 = vmatprep.subr.bf16.mxu1 (!%p223_p3), %v1615_v1  ;;  %p273_p4 = scmp.lt.s32.totalorder (!%p223_p3), %s1354_s25, 63  ;;  %v1536_v4 = vld [vmem:[%s1987_s1 + $0x18] sm:$0xff] (!%p223_p3)   ;;  %v1616_v5 = vmov (!%p223_p3), 0.0   ;;  %v1537_v6 = vld [vmem:[%s1987_s1 + $0x20] sm:$0xff] (!%p223_p3)   ;;  %vm626_vm1 = vcmask (!%p223_p3), 154624  }
   0x8   : > { %683 = vmatpush1.bf16.msra.mxu0 (!%p223_p3), %v1533_v0  ;;  %1496 = vmatpush1.bf16.msra.mxu1 (!%p223_p3), %v1533_v0  ;;  %310 = vst.msk [vmem:[#allocation2] sm:$0xff] (!%p223_p3), %vm309_vm0, %v1616_v5  ;;  %311 = vst.msk [vmem:[#allocation2 + $0x8] sm:$0xff] (!%p223_p3), %vm309_vm0, %v1616_v5  ;;  %v1538_v9 = vld [vmem:[%s1987_s1 + $0x28] sm:$0xff] (!%p223_p3)   ;;  %v1539_v10 = vld [vmem:[%s1987_s1 + $0x30] sm:$0xff] (!%p223_p3)   ;;  %vm675_vm2 = vcmask (!%p223_p3), 1040384   ;;  %vm676_vm3 = vcmask (!%p223_p3), 1041408  }
   0x9   : > { %684 = vmatprep.subr.bf16.mxu0 (!%p223_p3), %v1615_v1  ;;  %1487 = vmatprep.subr.bf16.mxu1 (!%p223_p3), %v1615_v1  ;;  %312 = vst.msk [vmem:[#allocation2 + $0x10] sm:$0xff] (!%p223_p3), %vm309_vm0, %v1616_v5  ;;  %313 = vst.msk [vmem:[#allocation2 + $0x18] sm:$0xff] (!%p223_p3), %vm309_vm0, %v1616_v5  ;;  %v1540_v11 = vld [vmem:[%s1987_s1 + $0x38] sm:$0xff] (!%p223_p3)   ;;  %v1617_v12 = vmov (!%p223_p3), 65535   ;;  %v1541_v14 = vld [vmem:[%s1987_s1 + $0x40] sm:$0xff] (!%p223_p3)   ;;  %vm1181_vm4 = vcmask (!%p223_p3), 519168  }
   0xa   : > { %314 = vst.msk [vmem:[#allocation2 + $0x20] sm:$0xff] (!%p223_p3), %vm309_vm0, %v1616_v5  ;;  %315 = vst.msk [vmem:[#allocation2 + $0x28] sm:$0xff] (!%p223_p3), %vm309_vm0, %v1616_v5  ;;  %v677_v13 = vsel (!%p223_p3), %vm675_vm2, 4294967295, %v1617_v12  ;;  %v1542_v15 = vld [vmem:[%s1987_s1 + $0x48] ss:$0 sps:$4 sm:$0x33] (!%p223_p3)  }
   0xb   : > { %316 = vst.msk [vmem:[#allocation2 + $0x30] sm:$0xff] (!%p223_p3), %vm309_vm0, %v1616_v5  ;;  %317 = vst.msk [vmem:[#allocation2 + $0x38] sm:$0xff] (!%p223_p3), %vm309_vm0, %v1616_v5  ;;  %v678_v16 = vsel (!%p223_p3), %vm676_vm3, %v677_v13, 0  ;;  %v1813_v12 = vld [vmem:[%s1989_s3] ss:$0 sm:$0xff] (!%p223_p3) }
   0xc   : > { %685 = vmatpush1.bf16.msra.mxu0 (!%p223_p3), %v1534_v2  ;;  %1497 = vmatpush1.bf16.msra.mxu1 (!%p223_p3), %v1534_v2  ;;  %318 = vst.msk [vmem:[#allocation2 + $0x40] sm:$0xff] (!%p223_p3), %vm309_vm0, %v1616_v5  ;;  %319 = vst.msk [vmem:[#allocation2 + $0x48] sm:$0xff] (!%p223_p3), %vm309_vm0, %v1616_v5  ;;  %v680_v17 = vand.u32 (!%p223_p3), %v1542_v15, %v678_v16  ;;  %v1808_v2 = vld [vmem:[%s1988_s2] ss:$0 sm:$0xff] (!%p223_p3) }
   0xd   : > { %686 = vmatprep.subr.bf16.mxu0 (!%p223_p3), %v1615_v1  ;;  %1488 = vmatprep.subr.bf16.mxu1 (!%p223_p3), %v1615_v1  ;;  %320 = vst.msk [vmem:[#allocation2 + $0x50] sm:$0xff] (!%p223_p3), %vm309_vm0, %v1616_v5  ;;  %321 = vst.msk [vmem:[#allocation2 + $0x58] sm:$0xff] (!%p223_p3), %vm309_vm0, %v1616_v5 }
   0xe   : > { %s1996_s25 = smov (!%p273_p4, %s1354_s25), 63  ;;  %322 = vst.msk [vmem:[#allocation2 + $0x60] sm:$0xff] %vm309_vm0, %v1616_v5  ;;  %323 = vst.msk [vmem:[#allocation2 + $0x68] sm:$0xff] %vm309_vm0, %v1616_v5 }
   0xf   : > { %s1453_s28 = sshll.u32 %s1996_s25, 3  ;;  %324 = vst.msk [vmem:[#allocation2 + $0x70] sm:$0xff] %vm309_vm0, %v1616_v5  ;;  %325 = vst.msk [vmem:[#allocation2 + $0x78] sm:$0xff] %vm309_vm0, %v1616_v5  ;;  %v342_v48 = vld [vmem:[#allocation2] sm:$0xff]  ;;  %v343_v52 = vld [vmem:[#allocation2 + $0x8] sm:$0xff]  ;;  %s1358_s26 = sshll.u32 %s1996_s25, 2 }
  0x10   : > { %687 = vmatpush1.bf16.msra.mxu0 %v1535_v3  ;;  %1498 = vmatpush1.bf16.msra.mxu1 %v1535_v3  ;;  %326 = vst.msk [vmem:[#allocation2 + $0x80] sm:$0xff] %vm309_vm0, %v1616_v5  ;;  %327 = vst.msk [vmem:[#allocation2 + $0x88] sm:$0xff] %vm309_vm0, %v1616_v5  ;;  %s1721_s5 = scalar_lea.vmem %s1986_s0, %s1453_s28  ;;  %v344_v0 = vld [vmem:[#allocation2 + $0x10] sm:$0xff]  ;;  %s1831_s28 = scalar_lea.vmem %s1990_s4, %s1358_s26 }
  0x11   : > { %688 = vmatprep.subr.bf16.mxu0 %v1615_v1  ;;  %1489 = vmatprep.subr.bf16.mxu1 %v1615_v1  ;;  %328 = vst.msk [vmem:[#allocation2 + $0x90] sm:$0xff] %vm309_vm0, %v1616_v5  ;;  %329 = vst.msk [vmem:[#allocation2 + $0x98] sm:$0xff] %vm309_vm0, %v1616_v5  ;;  %v1545_v7 = vld [vmem:[%s1721_s5 + $0x4] ss:$8 sps:$4 sm:$0xff]   ;;  %v1543_v18 = vld [vmem:[%s1721_s5] ss:$8 sps:$4 sm:$0xff]  }
  0x12   : > { %330 = vst.msk [vmem:[#allocation2 + $0xa0] sm:$0xff] %vm309_vm0, %v1616_v5  ;;  %331 = vst.msk [vmem:[#allocation2 + $0xa8] sm:$0xff] %vm309_vm0, %v1616_v5  ;;  %v1548_v8 = vld [vmem:[%s1721_s5 + $0x84] ss:$8 sps:$4 sm:$0xff]   ;;  %1401 = vmatprep.mubr.msk.bf16.mxu0 %vm626_vm1, %v1545_v7  ;;  %v1546_v19 = vld [vmem:[%s1721_s5 + $0x80] ss:$8 sps:$4 sm:$0xff]  }
  0x13   : > { %332 = vst.msk [vmem:[#allocation2 + $0xb0] sm:$0xff] %vm309_vm0, %v1616_v5  ;;  %333 = vst.msk [vmem:[#allocation2 + $0xb8] sm:$0xff] %vm309_vm0, %v1616_v5  ;;  %1409 = vmatprep.mubr.msk.bf16.mxu1 %vm626_vm1, %v1548_v8  ;;  %v1549_v20 = vld [vmem:[%s1721_s5 + $0x14] ss:$8 sps:$4 sm:$0xff]   ;;  %v1553_v22 = vld [vmem:[%s1721_s5 + $0x10] ss:$8 sps:$4 sm:$0xff]  }
  0x14   : > { %334 = vst.msk [vmem:[#allocation2 + $0xc0] sm:$0xff] %vm309_vm0, %v1616_v5  ;;  %335 = vst.msk [vmem:[#allocation2 + $0xc8] sm:$0xff] %vm309_vm0, %v1616_v5  ;;  %689 = vmatpush1.bf16.msra.mxu0 %v1536_v4  ;;  %1499 = vmatpush1.bf16.msra.mxu1 %v1536_v4  ;;  %v1551_v21 = vld [vmem:[%s1721_s5 + $0x94] ss:$8 sps:$4 sm:$0xff]   ;;  %v1554_v23 = vld [vmem:[%s1721_s5 + $0x90] ss:$8 sps:$4 sm:$0xff]  }
  0x15   : > { %336 = vst.msk [vmem:[#allocation2 + $0xd0] sm:$0xff] %vm309_vm0, %v1616_v5  ;;  %337 = vst.msk [vmem:[#allocation2 + $0xd8] sm:$0xff] %vm309_vm0, %v1616_v5  ;;  %690 = vmatprep.subr.bf16.mxu0 %v1615_v1  ;;  %1490 = vmatprep.subr.bf16.mxu1 %v1615_v1  ;;  %v1555_v24 = vld [vmem:[%s1721_s5 + $0x24] ss:$8 sps:$4 sm:$0xff]   ;;  %v1559_v26 = vld [vmem:[%s1721_s5 + $0x20] ss:$8 sps:$4 sm:$0xff]  }
  0x16   : > { %338 = vst.msk [vmem:[#allocation2 + $0xe0] sm:$0xff] %vm309_vm0, %v1616_v5  ;;  %339 = vst.msk [vmem:[#allocation2 + $0xe8] sm:$0xff] %vm309_vm0, %v1616_v5  ;;  %v1557_v25 = vld [vmem:[%s1721_s5 + $0xa4] ss:$8 sps:$4 sm:$0xff]   ;;  %v1560_v27 = vld [vmem:[%s1721_s5 + $0xa0] ss:$8 sps:$4 sm:$0xff]  }
  0x17   : > { %340 = vst.msk [vmem:[#allocation2 + $0xf0] sm:$0xff] %vm309_vm0, %v1616_v5  ;;  %341 = vst.msk [vmem:[#allocation2 + $0xf8] sm:$0xff] %vm309_vm0, %v1616_v5  ;;  %v1561_v28 = vld [vmem:[%s1721_s5 + $0x34] ss:$8 sps:$4 sm:$0xff]   ;;  %v1565_v30 = vld [vmem:[%s1721_s5 + $0x30] ss:$8 sps:$4 sm:$0xff]  }
  0x18   : > { %691 = vmatpush1.bf16.msra.mxu0 %v1537_v6  ;;  %1500 = vmatpush1.bf16.msra.mxu1 %v1537_v6  ;;  %v1563_v29 = vld [vmem:[%s1721_s5 + $0xb4] ss:$8 sps:$4 sm:$0xff]   ;;  %v1566_v31 = vld [vmem:[%s1721_s5 + $0xb0] ss:$8 sps:$4 sm:$0xff]   ;;  %v1567_v32 = vld [vmem:[%s1721_s5 + $0x44] ss:$8 sps:$4 sm:$0xff]  }
  0x19   : > { %692 = vmatprep.subr.bf16.mxu0 %v1615_v1  ;;  %1491 = vmatprep.subr.bf16.mxu1 %v1615_v1  ;;  %v1569_v33 = vld [vmem:[%s1721_s5 + $0xc4] ss:$8 sps:$4 sm:$0xff]   ;;  %v1571_v34 = vld [vmem:[%s1721_s5 + $0x40] ss:$8 sps:$4 sm:$0xff]   ;;  %v1573_v36 = vld [vmem:[%s1721_s5 + $0x54] ss:$8 sps:$4 sm:$0xff]  }
  0x1a   : > { %v1572_v35 = vld [vmem:[%s1721_s5 + $0xc0] ss:$8 sps:$4 sm:$0xff]   ;;  %v1575_v37 = vld [vmem:[%s1721_s5 + $0xd4] ss:$8 sps:$4 sm:$0xff]   ;;  %v1577_v38 = vld [vmem:[%s1721_s5 + $0x50] ss:$8 sps:$4 sm:$0xff]  }
  0x1b   : > { %v1578_v39 = vld [vmem:[%s1721_s5 + $0xd0] ss:$8 sps:$4 sm:$0xff]   ;;  %v1579_v40 = vld [vmem:[%s1721_s5 + $0x64] ss:$8 sps:$4 sm:$0xff]   ;;  %v1583_v42 = vld [vmem:[%s1721_s5 + $0x60] ss:$8 sps:$4 sm:$0xff]  }
  0x1c   : > { %693 = vmatpush1.bf16.msra.mxu0 %v1538_v9  ;;  %1501 = vmatpush1.bf16.msra.mxu1 %v1538_v9  ;;  %v1581_v41 = vld [vmem:[%s1721_s5 + $0xe4] ss:$8 sps:$4 sm:$0xff]   ;;  %v1584_v43 = vld [vmem:[%s1721_s5 + $0xe0] ss:$8 sps:$4 sm:$0xff]   ;;  %v1585_v44 = vld [vmem:[%s1721_s5 + $0x74] ss:$8 sps:$4 sm:$0xff]  }
  0x1d   : > { %694 = vmatprep.subr.bf16.mxu0 %v1615_v1  ;;  %1492 = vmatprep.subr.bf16.mxu1 %v1615_v1  ;;  %v1587_v45 = vld [vmem:[%s1721_s5 + $0xf4] ss:$8 sps:$4 sm:$0xff]   ;;  %v1589_v46 = vld [vmem:[%s1721_s5 + $0x70] ss:$8 sps:$4 sm:$0xff]   ;;  %v358_v49 = vld [vmem:[#allocation2 + $0x80] sm:$0xff] }
  0x1e   : > { %v1590_v47 = vld [vmem:[%s1721_s5 + $0xf0] ss:$8 sps:$4 sm:$0xff]   ;;  %v359_v53 = vld [vmem:[#allocation2 + $0x88] sm:$0xff] }
  0x1f   : > { %v345_v5 = vld [vmem:[#allocation2 + $0x18] sm:$0xff] }
  0x20   : > { %695 = vmatpush1.bf16.msra.mxu0 %v1539_v10  ;;  %1502 = vmatpush1.bf16.msra.mxu1 %v1539_v10  ;;  %v361_v6 = vld [vmem:[#allocation2 + $0x98] sm:$0xff] }
  0x21   : > { %696 = vmatprep.subr.bf16.mxu0 %v1615_v1  ;;  %1493 = vmatprep.subr.bf16.mxu1 %v1615_v1 }
  0x24   : > { %697 = vmatpush1.bf16.msra.mxu0 %v1540_v11  ;;  %1503 = vmatpush1.bf16.msra.mxu1 %v1540_v11 }
  0x25   : > { %698 = vmatprep.subr.bf16.mxu0 %v1615_v1  ;;  %1494 = vmatprep.subr.bf16.mxu1 %v1615_v1 }
  0x28   : > { %699 = vmatpush1.bf16.msra.mxu0 %v1541_v14  ;;  %1504 = vmatpush1.bf16.msra.mxu1 %v1541_v14 }
  0x29   : > { %700 = vmatprep.subr.bf16.mxu0 %v1615_v1  ;;  %1495 = vmatprep.subr.bf16.mxu1 %v1615_v1  ;;  %v360_v1 = vld [vmem:[#allocation2 + $0x90] sm:$0xff] }
  0x2c   : > { %701 = vmatpush1.bf16.msra.mxu0 %v680_v17  ;;  %1505 = vmatpush1.bf16.msra.mxu1 %v680_v17 }
  0x2f   : > { %715 = vmatmul.mubr.bf16.vlgmr.msra.gmra.mrb[0].mxu0 %v1543_v18  ;;  %779 = vmatmul.mubr.bf16.vlgmr.msra.gmra.mrb[0].mxu1 %v1546_v19 }
  0x30   : > { %1402 = vmatprep.mubr.msk.bf16.mxu0 %vm626_vm1, %v1549_v20  ;;  %1410 = vmatprep.mubr.msk.bf16.mxu1 %vm626_vm1, %v1551_v21 }
  0x37   : > { %723 = vmatmul.mubr.bf16.gmra.mrb[4].mxu0 %v1553_v22  ;;  %787 = vmatmul.mubr.bf16.gmra.mrb[4].mxu1 %v1554_v23 }
  0x38   : > { %1403 = vmatprep.mubr.msk.bf16.mxu0 %vm626_vm1, %v1555_v24  ;;  %1411 = vmatprep.mubr.msk.bf16.mxu1 %vm626_vm1, %v1557_v25 }
  0x3f   : > { %731 = vmatmul.mubr.bf16.gmra.mrb[8].mxu0 %v1559_v26  ;;  %795 = vmatmul.mubr.bf16.gmra.mrb[8].mxu1 %v1560_v27 }
  0x40   : > { %1404 = vmatprep.mubr.msk.bf16.mxu0 %vm626_vm1, %v1561_v28  ;;  %1412 = vmatprep.mubr.msk.bf16.mxu1 %vm626_vm1, %v1563_v29 }
  0x47   : > { %739 = vmatmul.mubr.bf16.gmra.mrb[12].mxu0 %v1565_v30  ;;  %803 = vmatmul.mubr.bf16.gmra.mrb[12].mxu1 %v1566_v31 }
  0x48   : > { %1405 = vmatprep.mubr.msk.bf16.mxu0 %vm626_vm1, %v1567_v32  ;;  %1413 = vmatprep.mubr.msk.bf16.mxu1 %vm626_vm1, %v1569_v33  ;;  %v346_v32 = vld [vmem:[#allocation2 + $0x20] sm:$0xff] }
  0x49   : > { %v362_v33 = vld [vmem:[#allocation2 + $0xa0] sm:$0xff] }
  0x4f   : > { %747 = vmatmul.mubr.bf16.gmra.mrb[16].mxu0 %v1571_v34  ;;  %811 = vmatmul.mubr.bf16.gmra.mrb[16].mxu1 %v1572_v35 }
  0x50   : > { %1406 = vmatprep.mubr.msk.bf16.mxu0 %vm626_vm1, %v1573_v36  ;;  %1414 = vmatprep.mubr.msk.bf16.mxu1 %vm626_vm1, %v1575_v37 }
  0x57   : > { %755 = vmatmul.mubr.bf16.gmra.mrb[20].mxu0 %v1577_v38  ;;  %819 = vmatmul.mubr.bf16.gmra.mrb[20].mxu1 %v1578_v39 }
  0x58   : > { %1407 = vmatprep.mubr.msk.bf16.mxu0 %vm626_vm1, %v1579_v40  ;;  %1415 = vmatprep.mubr.msk.bf16.mxu1 %vm626_vm1, %v1581_v41 }
  0x5f   : > { %763 = vmatmul.mubr.bf16.gmra.mrb[24].mxu0 %v1583_v42  ;;  %827 = vmatmul.mubr.bf16.gmra.mrb[24].mxu1 %v1584_v43  ;;  %v347_v42 = vld [vmem:[#allocation2 + $0x28] sm:$0xff] }
  0x60   : > { %1408 = vmatprep.mubr.msk.bf16.mxu0 %vm626_vm1, %v1585_v44  ;;  %1416 = vmatprep.mubr.msk.bf16.mxu1 %vm626_vm1, %v1587_v45  ;;  %v363_v43 = vld [vmem:[#allocation2 + $0xa8] sm:$0xff] }
  0x67   : > { %771 = vmatmul.mubr.bf16.gmra.mrb[28].mxu0 %v1589_v46  ;;  %835 = vmatmul.mubr.bf16.gmra.mrb[28].mxu1 %v1590_v47 }
 0x102   : > { %v716_v50 = vpop.f32.mrb[0].mxu0  ;;  %v780_v51 = vpop.f32.mrb[0].mxu1 }
 0x103   : > { %v843_v54 = vadd.f32 %v716_v50, %v342_v48  ;;  %v859_v55 = vadd.f32 %v780_v51, %v358_v49  ;;  %v718_v56 = vpop.f32.mrb[1].mxu0  ;;  %v782_v57 = vpop.f32.mrb[1].mxu1 }
 0x104   : > { %v719_v58 = vpop.f32.mrb[2].mxu0  ;;  %v783_v59 = vpop.f32.mrb[2].mxu1 }
 0x105   : > { %876 = vst.msk [vmem:[#allocation2] sm:$0xff] %vm309_vm0, %v843_v54  ;;  %892 = vst.msk [vmem:[#allocation2 + $0x80] sm:$0xff] %vm309_vm0, %v859_v55  ;;  %v844_v60 = vadd.f32 %v719_v58, %v343_v52  ;;  %v860_v61 = vadd.f32 %v783_v59, %v359_v53  ;;  %v721_v62 = vpop.f32.mrb[3].mxu0  ;;  %v785_v63 = vpop.f32.mrb[3].mxu1 }
 0x107   : > { %877 = vst.msk [vmem:[#allocation2 + $0x8] sm:$0xff] %vm309_vm0, %v844_v60  ;;  %893 = vst.msk [vmem:[#allocation2 + $0x88] sm:$0xff] %vm309_vm0, %v860_v61 }
 0x10a   : > { %v724_v3 = vpop.f32.mrb[4].mxu0  ;;  %v788_v4 = vpop.f32.mrb[4].mxu1 }
 0x10b   : > { %v845_v7 = vadd.f32 %v724_v3, %v344_v0  ;;  %v861_v8 = vadd.f32 %v788_v4, %v360_v1  ;;  %v726_v9 = vpop.f32.mrb[5].mxu0  ;;  %v790_v10 = vpop.f32.mrb[5].mxu1 }
 0x10c   : > { %v911_v11 = vld [vmem:[#allocation2] sm:$0xff]  ;;  %v727_v14 = vpop.f32.mrb[6].mxu0  ;;  %v791_v15 = vpop.f32.mrb[6].mxu1  ;;  %v349_v9 = vld [vmem:[#allocation2 + $0x38] sm:$0xff] }
 0x10d   : > { %v927_v13 = vld [vmem:[#allocation2 + $0x80] sm:$0xff]  ;;  %v950_v16 = vmul.f32 %v1808_v2, %v911_v11  ;;  %878 = vst.msk [vmem:[#allocation2 + $0x10] sm:$0xff] %vm309_vm0, %v845_v7  ;;  %894 = vst.msk [vmem:[#allocation2 + $0x90] sm:$0xff] %vm309_vm0, %v861_v8  ;;  %v846_v18 = vadd.f32 %v727_v14, %v345_v5  ;;  %v862_v19 = vadd.f32 %v791_v15, %v361_v6  ;;  %v729_v20 = vpop.f32.mrb[7].mxu0  ;;  %v793_v21 = vpop.f32.mrb[7].mxu1  ;;  %v348_v5 = vld [vmem:[#allocation2 + $0x30] sm:$0xff] }
 0x10e   : > { %v966_v17 = vmul.f32 %v1808_v2, %v927_v13  ;;  %v912_v22 = vld [vmem:[#allocation2 + $0x8] sm:$0xff]  ;;  %v364_v6 = vld [vmem:[#allocation2 + $0xb0] sm:$0xff]  ;;  %v365_v10 = vld [vmem:[#allocation2 + $0xb8] sm:$0xff] }
 0x10f   : > { %v928_v23 = vld [vmem:[#allocation2 + $0x88] sm:$0xff]  ;;  %v989_v24 = vadd.f32 %v1813_v12, %v950_v16  ;;  %v951_v26 = vmul.f32 %v1808_v2, %v912_v22  ;;  %879 = vst.msk [vmem:[#allocation2 + $0x18] sm:$0xff] %vm309_vm0, %v846_v18  ;;  %895 = vst.msk [vmem:[#allocation2 + $0x98] sm:$0xff] %vm309_vm0, %v862_v19 }
 0x110   : > { %v1005_v25 = vadd.f32 %v1813_v12, %v966_v17  ;;  %v967_v27 = vmul.f32 %v1808_v2, %v928_v23 }
 0x111   : > { %v1021_v28 = vmax.f32 %v989_v24, 0.0  ;;  %v990_v30 = vadd.f32 %v1813_v12, %v951_v26 }
 0x112   : > { %v1037_v29 = vmax.f32 %v1005_v25, 0.0  ;;  %v1006_v31 = vadd.f32 %v1813_v12, %v967_v27  ;;  %v732_v34 = vpop.f32.mrb[8].mxu0  ;;  %v796_v35 = vpop.f32.mrb[8].mxu1 }
 0x113   : > { %v1454_v36 = vpack.c.bf16 %v1021_v28, %v1021_v28  ;;  %v1022_v38 = vmax.f32 %v990_v30, 0.0  ;;  %v734_v40 = vpop.f32.mrb[9].mxu0  ;;  %v798_v41 = vpop.f32.mrb[9].mxu1  ;;  %v847_v46 = vadd.f32 %v732_v34, %v346_v32  ;;  %v863_v47 = vadd.f32 %v796_v35, %v362_v33 }
 0x114   : > { %v1470_v37 = vpack.c.bf16 %v1037_v29, %v1037_v29  ;;  %v1038_v39 = vmax.f32 %v1006_v31, 0.0  ;;  %v913_v44 = vld [vmem:[#allocation2 + $0x10] sm:$0xff]  ;;  %v735_v48 = vpop.f32.mrb[10].mxu0  ;;  %v799_v49 = vpop.f32.mrb[10].mxu1 }
 0x115   : > { %v929_v45 = vld [vmem:[#allocation2 + $0x90] sm:$0xff]  ;;  %1182 = vst.msk [vmem:[%s1831_s28] sm:$0xf] %vm1181_vm4, %v1454_v36  ;;  %v1455_v50 = vpack.c.bf16 %v1022_v38, %v1022_v38  ;;  %v952_v52 = vmul.f32 %v1808_v2, %v913_v44  ;;  %v737_v54 = vpop.f32.mrb[11].mxu0  ;;  %v801_v55 = vpop.f32.mrb[11].mxu1  ;;  %v848_v58 = vadd.f32 %v735_v48, %v347_v42  ;;  %v864_v59 = vadd.f32 %v799_v49, %v363_v43  ;;  %v350_v38 = vld [vmem:[#allocation2 + $0x40] sm:$0xff] }
 0x116   : > { %1198 = vst.msk [vmem:[%s1831_s28 + $0x40] sm:$0xf] %vm1181_vm4, %v1470_v37  ;;  %v1471_v51 = vpack.c.bf16 %v1038_v39, %v1038_v39  ;;  %v968_v53 = vmul.f32 %v1808_v2, %v929_v45  ;;  %v914_v56 = vld [vmem:[#allocation2 + $0x18] sm:$0xff]  ;;  %v366_v39 = vld [vmem:[#allocation2 + $0xc0] sm:$0xff] }
 0x117   : > { %v930_v57 = vld [vmem:[#allocation2 + $0x98] sm:$0xff]  ;;  %880 = vst.msk [vmem:[#allocation2 + $0x20] sm:$0xff] %vm309_vm0, %v847_v46  ;;  %896 = vst.msk [vmem:[#allocation2 + $0xa0] sm:$0xff] %vm309_vm0, %v863_v47  ;;  %v991_v60 = vadd.f32 %v1813_v12, %v952_v52  ;;  %v953_v62 = vmul.f32 %v1808_v2, %v914_v56  ;;  %v351_v46 = vld [vmem:[#allocation2 + $0x48] sm:$0xff] }
 0x118   : > { %1183 = vst.msk [vmem:[%s1831_s28 + $0x4] sm:$0xf] %vm1181_vm4, %v1455_v50  ;;  %1199 = vst.msk [vmem:[%s1831_s28 + $0x44] sm:$0xf] %vm1181_vm4, %v1471_v51  ;;  %v1007_v61 = vadd.f32 %v1813_v12, %v968_v53  ;;  %v969_v63 = vmul.f32 %v1808_v2, %v930_v57  ;;  %v367_v47 = vld [vmem:[#allocation2 + $0xc8] sm:$0xff] }
 0x119   : > { %881 = vst.msk [vmem:[#allocation2 + $0x28] sm:$0xff] %vm309_vm0, %v848_v58  ;;  %897 = vst.msk [vmem:[#allocation2 + $0xa8] sm:$0xff] %vm309_vm0, %v864_v59  ;;  %v1023_v0 = vmax.f32 %v991_v60, 0.0  ;;  %v992_v3 = vadd.f32 %v1813_v12, %v953_v62 }
 0x11a   : > { %v1039_v1 = vmax.f32 %v1007_v61, 0.0  ;;  %v1008_v4 = vadd.f32 %v1813_v12, %v969_v63  ;;  %v740_v7 = vpop.f32.mrb[12].mxu0  ;;  %v804_v8 = vpop.f32.mrb[12].mxu1 }
 0x11b   : > { %v1456_v11 = vpack.c.bf16 %v1023_v0, %v1023_v0  ;;  %v1024_v14 = vmax.f32 %v992_v3, 0.0  ;;  %v742_v16 = vpop.f32.mrb[13].mxu0  ;;  %v806_v17 = vpop.f32.mrb[13].mxu1  ;;  %v849_v18 = vadd.f32 %v740_v7, %v348_v5  ;;  %v865_v19 = vadd.f32 %v804_v8, %v364_v6 }
 0x11c   : > { %v1472_v13 = vpack.c.bf16 %v1039_v1, %v1039_v1  ;;  %v1040_v15 = vmax.f32 %v1008_v4, 0.0  ;;  %v743_v20 = vpop.f32.mrb[14].mxu0  ;;  %v807_v21 = vpop.f32.mrb[14].mxu1 }
 0x11d   : > { %1184 = vst.msk [vmem:[%s1831_s28 + $0x8] sm:$0xf] %vm1181_vm4, %v1456_v11  ;;  %v1457_v22 = vpack.c.bf16 %v1024_v14, %v1024_v14  ;;  %v850_v26 = vadd.f32 %v743_v20, %v349_v9  ;;  %v866_v27 = vadd.f32 %v807_v21, %v365_v10  ;;  %v745_v28 = vpop.f32.mrb[15].mxu0  ;;  %v809_v29 = vpop.f32.mrb[15].mxu1  ;;  %v352_v11 = vld [vmem:[#allocation2 + $0x50] sm:$0xff] }
 0x11e   : > { %1200 = vst.msk [vmem:[%s1831_s28 + $0x48] sm:$0xf] %vm1181_vm4, %v1472_v13  ;;  %v1473_v23 = vpack.c.bf16 %v1040_v15, %v1040_v15  ;;  %v915_v24 = vld [vmem:[#allocation2 + $0x20] sm:$0xff]  ;;  %v368_v13 = vld [vmem:[#allocation2 + $0xd0] sm:$0xff] }
 0x11f   : > { %v931_v25 = vld [vmem:[#allocation2 + $0xa0] sm:$0xff]  ;;  %v954_v30 = vmul.f32 %v1808_v2, %v915_v24  ;;  %882 = vst.msk [vmem:[#allocation2 + $0x30] sm:$0xff] %vm309_vm0, %v849_v18  ;;  %898 = vst.msk [vmem:[#allocation2 + $0xb0] sm:$0xff] %vm309_vm0, %v865_v19 }
 0x120   : > { %v970_v31 = vmul.f32 %v1808_v2, %v931_v25  ;;  %1185 = vst.msk [vmem:[%s1831_s28 + $0xc] sm:$0xf] %vm1181_vm4, %v1457_v22  ;;  %1201 = vst.msk [vmem:[%s1831_s28 + $0x4c] sm:$0xf] %vm1181_vm4, %v1473_v23  ;;  %v916_v32 = vld [vmem:[#allocation2 + $0x28] sm:$0xff] }
 0x121   : > { %v932_v33 = vld [vmem:[#allocation2 + $0xa8] sm:$0xff]  ;;  %883 = vst.msk [vmem:[#allocation2 + $0x38] sm:$0xff] %vm309_vm0, %v850_v26  ;;  %899 = vst.msk [vmem:[#allocation2 + $0xb8] sm:$0xff] %vm309_vm0, %v866_v27  ;;  %v993_v34 = vadd.f32 %v1813_v12, %v954_v30  ;;  %v955_v36 = vmul.f32 %v1808_v2, %v916_v32  ;;  %v353_v26 = vld [vmem:[#allocation2 + $0x58] sm:$0xff] }
 0x122   : > { %v1009_v35 = vadd.f32 %v1813_v12, %v970_v31  ;;  %v971_v37 = vmul.f32 %v1808_v2, %v932_v33  ;;  %v748_v44 = vpop.f32.mrb[16].mxu0  ;;  %v812_v45 = vpop.f32.mrb[16].mxu1  ;;  %v369_v27 = vld [vmem:[#allocation2 + $0xd8] sm:$0xff] }
 0x123   : > { %v1025_v40 = vmax.f32 %v993_v34, 0.0  ;;  %v994_v42 = vadd.f32 %v1813_v12, %v955_v36  ;;  %v851_v48 = vadd.f32 %v748_v44, %v350_v38  ;;  %v867_v49 = vadd.f32 %v812_v45, %v366_v39  ;;  %v750_v50 = vpop.f32.mrb[17].mxu0  ;;  %v814_v51 = vpop.f32.mrb[17].mxu1 }
 0x124   : > { %v1041_v41 = vmax.f32 %v1009_v35, 0.0  ;;  %v1010_v43 = vadd.f32 %v1813_v12, %v971_v37  ;;  %v751_v56 = vpop.f32.mrb[18].mxu0  ;;  %v815_v57 = vpop.f32.mrb[18].mxu1 }
 0x125   : > { %v1458_v52 = vpack.c.bf16 %v1025_v40, %v1025_v40  ;;  %v1026_v54 = vmax.f32 %v994_v42, 0.0  ;;  %884 = vst.msk [vmem:[#allocation2 + $0x40] sm:$0xff] %vm309_vm0, %v851_v48  ;;  %900 = vst.msk [vmem:[#allocation2 + $0xc0] sm:$0xff] %vm309_vm0, %v867_v49  ;;  %v852_v60 = vadd.f32 %v751_v56, %v351_v46  ;;  %v868_v61 = vadd.f32 %v815_v57, %v367_v47  ;;  %v753_v62 = vpop.f32.mrb[19].mxu0  ;;  %v817_v63 = vpop.f32.mrb[19].mxu1 }
 0x126   : > { %v1474_v53 = vpack.c.bf16 %v1041_v41, %v1041_v41  ;;  %v1042_v55 = vmax.f32 %v1010_v43, 0.0  ;;  %v917_v58 = vld [vmem:[#allocation2 + $0x30] sm:$0xff]  ;;  %v355_v62 = vld [vmem:[#allocation2 + $0x68] sm:$0xff] }
 0x127   : > { %v933_v59 = vld [vmem:[#allocation2 + $0xb0] sm:$0xff]  ;;  %1186 = vst.msk [vmem:[%s1831_s28 + $0x10] sm:$0xf] %vm1181_vm4, %v1458_v52  ;;  %v1459_v0 = vpack.c.bf16 %v1026_v54, %v1026_v54  ;;  %v956_v3 = vmul.f32 %v1808_v2, %v917_v58  ;;  %v354_v52 = vld [vmem:[#allocation2 + $0x60] sm:$0xff]  ;;  %v371_v63 = vld [vmem:[#allocation2 + $0xe8] sm:$0xff] }
 0x128   : > { %1202 = vst.msk [vmem:[%s1831_s28 + $0x50] sm:$0xf] %vm1181_vm4, %v1474_v53  ;;  %v1475_v1 = vpack.c.bf16 %v1042_v55, %v1042_v55  ;;  %v972_v4 = vmul.f32 %v1808_v2, %v933_v59  ;;  %v918_v5 = vld [vmem:[#allocation2 + $0x38] sm:$0xff]  ;;  %v370_v53 = vld [vmem:[#allocation2 + $0xe0] sm:$0xff] }
 0x129   : > { %v934_v6 = vld [vmem:[#allocation2 + $0xb8] sm:$0xff]  ;;  %v957_v7 = vmul.f32 %v1808_v2, %v918_v5  ;;  %885 = vst.msk [vmem:[#allocation2 + $0x48] sm:$0xff] %vm309_vm0, %v852_v60  ;;  %901 = vst.msk [vmem:[#allocation2 + $0xc8] sm:$0xff] %vm309_vm0, %v868_v61  ;;  %v995_v9 = vadd.f32 %v1813_v12, %v956_v3 }
 0x12a   : > { %v973_v8 = vmul.f32 %v1808_v2, %v934_v6  ;;  %1187 = vst.msk [vmem:[%s1831_s28 + $0x14] sm:$0xf] %vm1181_vm4, %v1459_v0  ;;  %1203 = vst.msk [vmem:[%s1831_s28 + $0x54] sm:$0xf] %vm1181_vm4, %v1475_v1  ;;  %v1011_v10 = vadd.f32 %v1813_v12, %v972_v4  ;;  %v756_v18 = vpop.f32.mrb[20].mxu0  ;;  %v820_v19 = vpop.f32.mrb[20].mxu1 }
 0x12b   : > { %v996_v14 = vadd.f32 %v1813_v12, %v957_v7  ;;  %v1027_v16 = vmax.f32 %v995_v9, 0.0  ;;  %v853_v22 = vadd.f32 %v756_v18, %v352_v11  ;;  %v869_v23 = vadd.f32 %v820_v19, %v368_v13  ;;  %v758_v24 = vpop.f32.mrb[21].mxu0  ;;  %v822_v25 = vpop.f32.mrb[21].mxu1 }
 0x12c   : > { %v1012_v15 = vadd.f32 %v1813_v12, %v973_v8  ;;  %v1043_v17 = vmax.f32 %v1011_v10, 0.0  ;;  %v919_v30 = vld [vmem:[#allocation2 + $0x40] sm:$0xff]  ;;  %v759_v32 = vpop.f32.mrb[22].mxu0  ;;  %v823_v33 = vpop.f32.mrb[22].mxu1 }
 0x12d   : > { %v1028_v20 = vmax.f32 %v996_v14, 0.0  ;;  %v1460_v28 = vpack.c.bf16 %v1027_v16, %v1027_v16  ;;  %v935_v31 = vld [vmem:[#allocation2 + $0xc0] sm:$0xff]  ;;  %v958_v36 = vmul.f32 %v1808_v2, %v919_v30  ;;  %886 = vst.msk [vmem:[#allocation2 + $0x50] sm:$0xff] %vm309_vm0, %v853_v22  ;;  %902 = vst.msk [vmem:[#allocation2 + $0xd0] sm:$0xff] %vm309_vm0, %v869_v23  ;;  %v761_v38 = vpop.f32.mrb[23].mxu0  ;;  %v825_v39 = vpop.f32.mrb[23].mxu1  ;;  %v854_v42 = vadd.f32 %v759_v32, %v353_v26 }
 0x12e   : > { %v1044_v21 = vmax.f32 %v1012_v15, 0.0  ;;  %v1476_v29 = vpack.c.bf16 %v1043_v17, %v1043_v17  ;;  %v974_v37 = vmul.f32 %v1808_v2, %v935_v31  ;;  %v870_v43 = vadd.f32 %v823_v33, %v369_v27  ;;  %v356_v22 = vld [vmem:[#allocation2 + $0x70] sm:$0xff]  ;;  %v357_v30 = vld [vmem:[#allocation2 + $0x78] sm:$0xff] }
 0x12f   : > { %v1461_v34 = vpack.c.bf16 %v1028_v20, %v1028_v20  ;;  %1188 = vst.msk [vmem:[%s1831_s28 + $0x18] sm:$0xf] %vm1181_vm4, %v1460_v28  ;;  %v997_v44 = vadd.f32 %v1813_v12, %v958_v36  ;;  %v372_v23 = vld [vmem:[#allocation2 + $0xf0] sm:$0xff]  ;;  %v373_v31 = vld [vmem:[#allocation2 + $0xf8] sm:$0xff] }
 0x130   : > { %v1477_v35 = vpack.c.bf16 %v1044_v21, %v1044_v21  ;;  %1204 = vst.msk [vmem:[%s1831_s28 + $0x58] sm:$0xf] %vm1181_vm4, %v1476_v29  ;;  %v920_v40 = vld [vmem:[#allocation2 + $0x48] sm:$0xff]  ;;  %v1013_v45 = vadd.f32 %v1813_v12, %v974_v37 }
 0x131   : > { %v936_v41 = vld [vmem:[#allocation2 + $0xc8] sm:$0xff]  ;;  %1189 = vst.msk [vmem:[%s1831_s28 + $0x1c] sm:$0xf] %vm1181_vm4, %v1461_v34  ;;  %v959_v46 = vmul.f32 %v1808_v2, %v920_v40  ;;  %v1029_v48 = vmax.f32 %v997_v44, 0.0 }
 0x132   : > { %1205 = vst.msk [vmem:[%s1831_s28 + $0x5c] sm:$0xf] %vm1181_vm4, %v1477_v35  ;;  %v975_v47 = vmul.f32 %v1808_v2, %v936_v41  ;;  %v1045_v49 = vmax.f32 %v1013_v45, 0.0  ;;  %v764_v54 = vpop.f32.mrb[24].mxu0  ;;  %v828_v55 = vpop.f32.mrb[24].mxu1 }
 0x133   : > { %887 = vst.msk [vmem:[#allocation2 + $0x58] sm:$0xff] %vm309_vm0, %v854_v42  ;;  %903 = vst.msk [vmem:[#allocation2 + $0xd8] sm:$0xff] %vm309_vm0, %v870_v43  ;;  %v998_v50 = vadd.f32 %v1813_v12, %v959_v46  ;;  %v1462_v56 = vpack.c.bf16 %v1029_v48, %v1029_v48  ;;  %v766_v60 = vpop.f32.mrb[25].mxu0  ;;  %v830_v61 = vpop.f32.mrb[25].mxu1  ;;  %v855_v3 = vadd.f32 %v764_v54, %v354_v52 }
 0x134   : > { %v1014_v51 = vadd.f32 %v1813_v12, %v975_v47  ;;  %v1478_v57 = vpack.c.bf16 %v1045_v49, %v1045_v49  ;;  %v921_v0 = vld [vmem:[#allocation2 + $0x50] sm:$0xff]  ;;  %v871_v4 = vadd.f32 %v828_v55, %v370_v53  ;;  %v767_v5 = vpop.f32.mrb[26].mxu0  ;;  %v831_v6 = vpop.f32.mrb[26].mxu1 }
 0x135   : > { %v1030_v58 = vmax.f32 %v998_v50, 0.0  ;;  %v937_v1 = vld [vmem:[#allocation2 + $0xd0] sm:$0xff]  ;;  %1190 = vst.msk [vmem:[%s1831_s28 + $0x20] sm:$0xf] %vm1181_vm4, %v1462_v56  ;;  %v960_v9 = vmul.f32 %v1808_v2, %v921_v0  ;;  %v769_v11 = vpop.f32.mrb[27].mxu0  ;;  %v833_v13 = vpop.f32.mrb[27].mxu1  ;;  %v856_v14 = vadd.f32 %v767_v5, %v355_v62  ;;  %v872_v15 = vadd.f32 %v831_v6, %v371_v63 }
 0x136   : > { %v1046_v59 = vmax.f32 %v1014_v51, 0.0  ;;  %1206 = vst.msk [vmem:[%s1831_s28 + $0x60] sm:$0xf] %vm1181_vm4, %v1478_v57  ;;  %v976_v10 = vmul.f32 %v1808_v2, %v937_v1 }
 0x137   : > { %v1463_v7 = vpack.c.bf16 %v1030_v58, %v1030_v58  ;;  %888 = vst.msk [vmem:[#allocation2 + $0x60] sm:$0xff] %vm309_vm0, %v855_v3  ;;  %904 = vst.msk [vmem:[#allocation2 + $0xe0] sm:$0xff] %vm309_vm0, %v871_v4  ;;  %v999_v16 = vadd.f32 %v1813_v12, %v960_v9 }
 0x138   : > { %v1479_v8 = vpack.c.bf16 %v1046_v59, %v1046_v59  ;;  %v1015_v17 = vadd.f32 %v1813_v12, %v976_v10  ;;  %889 = vst.msk [vmem:[#allocation2 + $0x68] sm:$0xff] %vm309_vm0, %v856_v14  ;;  %905 = vst.msk [vmem:[#allocation2 + $0xe8] sm:$0xff] %vm309_vm0, %v872_v15 }
 0x139   : > { %1191 = vst.msk [vmem:[%s1831_s28 + $0x24] sm:$0xf] %vm1181_vm4, %v1463_v7  ;;  %v1031_v24 = vmax.f32 %v999_v16, 0.0 }
 0x13a   : > { %1207 = vst.msk [vmem:[%s1831_s28 + $0x64] sm:$0xf] %vm1181_vm4, %v1479_v8  ;;  %v922_v18 = vld [vmem:[#allocation2 + $0x58] sm:$0xff]  ;;  %v1047_v25 = vmax.f32 %v1015_v17, 0.0  ;;  %v772_v28 = vpop.f32.mrb[28].mxu0  ;;  %v836_v29 = vpop.f32.mrb[28].mxu1 }
 0x13b   : > { %v938_v19 = vld [vmem:[#allocation2 + $0xd8] sm:$0xff]  ;;  %v961_v20 = vmul.f32 %v1808_v2, %v922_v18  ;;  %v1464_v32 = vpack.c.bf16 %v1031_v24, %v1031_v24  ;;  %v857_v34 = vadd.f32 %v772_v28, %v356_v22  ;;  %v873_v35 = vadd.f32 %v836_v29, %v372_v23  ;;  %v774_v36 = vpop.f32.mrb[29].mxu0  ;;  %v838_v37 = vpop.f32.mrb[29].mxu1 }
 0x13c   : > { %v977_v21 = vmul.f32 %v1808_v2, %v938_v19  ;;  %v1480_v33 = vpack.c.bf16 %v1047_v25, %v1047_v25  ;;  %v775_v40 = vpop.f32.mrb[30].mxu0  ;;  %v839_v41 = vpop.f32.mrb[30].mxu1 }
 0x13d   : > { %v1000_v26 = vadd.f32 %v1813_v12, %v961_v20  ;;  %1192 = vst.msk [vmem:[%s1831_s28 + $0x28] sm:$0xf] %vm1181_vm4, %v1464_v32  ;;  %v858_v44 = vadd.f32 %v775_v40, %v357_v30  ;;  %v874_v45 = vadd.f32 %v839_v41, %v373_v31  ;;  %v777_v46 = vpop.f32.mrb[31].mxu0  ;;  %v841_v47 = vpop.f32.mrb[31].mxu1 }
 0x13e   : > { %v1016_v27 = vadd.f32 %v1813_v12, %v977_v21  ;;  %1208 = vst.msk [vmem:[%s1831_s28 + $0x68] sm:$0xf] %vm1181_vm4, %v1480_v33  ;;  %v923_v42 = vld [vmem:[#allocation2 + $0x60] sm:$0xff] }
 0x13f   : > { %v1032_v38 = vmax.f32 %v1000_v26, 0.0  ;;  %v939_v43 = vld [vmem:[#allocation2 + $0xe0] sm:$0xff]  ;;  %890 = vst.msk [vmem:[#allocation2 + $0x70] sm:$0xff] %vm309_vm0, %v857_v34  ;;  %906 = vst.msk [vmem:[#allocation2 + $0xf0] sm:$0xff] %vm309_vm0, %v873_v35  ;;  %v962_v50 = vmul.f32 %v1808_v2, %v923_v42  ;;  %v924_v52 = vld [vmem:[#allocation2 + $0x68] sm:$0xff] }
 0x140   : > { %v1048_v39 = vmax.f32 %v1016_v27, 0.0  ;;  %v978_v51 = vmul.f32 %v1808_v2, %v939_v43  ;;  %v940_v53 = vld [vmem:[#allocation2 + $0xe8] sm:$0xff]  ;;  %891 = vst.msk [vmem:[#allocation2 + $0x78] sm:$0xff] %vm309_vm0, %v858_v44  ;;  %907 = vst.msk [vmem:[#allocation2 + $0xf8] sm:$0xff] %vm309_vm0, %v874_v45  ;;  %v963_v56 = vmul.f32 %v1808_v2, %v924_v52 }
 0x141   : > { %v1465_v48 = vpack.c.bf16 %v1032_v38, %v1032_v38  ;;  %v1001_v54 = vadd.f32 %v1813_v12, %v962_v50  ;;  %v979_v57 = vmul.f32 %v1808_v2, %v940_v53 }
 0x142   : > { %v1481_v49 = vpack.c.bf16 %v1048_v39, %v1048_v39  ;;  %v1017_v55 = vadd.f32 %v1813_v12, %v978_v51  ;;  %v1002_v60 = vadd.f32 %v1813_v12, %v963_v56 }
 0x143   : > { %1193 = vst.msk [vmem:[%s1831_s28 + $0x2c] sm:$0xf] %vm1181_vm4, %v1465_v48  ;;  %v1033_v58 = vmax.f32 %v1001_v54, 0.0  ;;  %v1018_v61 = vadd.f32 %v1813_v12, %v979_v57 }
 0x144   : > { %1209 = vst.msk [vmem:[%s1831_s28 + $0x6c] sm:$0xf] %vm1181_vm4, %v1481_v49  ;;  %v1049_v59 = vmax.f32 %v1017_v55, 0.0  ;;  %v1034_v0 = vmax.f32 %v1002_v60, 0.0 }
 0x145   : > { %v1466_v62 = vpack.c.bf16 %v1033_v58, %v1033_v58  ;;  %v1050_v1 = vmax.f32 %v1018_v61, 0.0 }
 0x146   : > { %v1482_v63 = vpack.c.bf16 %v1049_v59, %v1049_v59  ;;  %v925_v3 = vld [vmem:[#allocation2 + $0x70] sm:$0xff]  ;;  %v1467_v7 = vpack.c.bf16 %v1034_v0, %v1034_v0 }
 0x147   : > { %v941_v4 = vld [vmem:[#allocation2 + $0xf0] sm:$0xff]  ;;  %v964_v5 = vmul.f32 %v1808_v2, %v925_v3  ;;  %1194 = vst.msk [vmem:[%s1831_s28 + $0x30] sm:$0xf] %vm1181_vm4, %v1466_v62  ;;  %v1483_v8 = vpack.c.bf16 %v1050_v1, %v1050_v1  ;;  %v926_v9 = vld [vmem:[#allocation2 + $0x78] sm:$0xff] }
 0x148   : > { %v980_v6 = vmul.f32 %v1808_v2, %v941_v4  ;;  %1210 = vst.msk [vmem:[%s1831_s28 + $0x70] sm:$0xf] %vm1181_vm4, %v1482_v63  ;;  %v942_v10 = vld [vmem:[#allocation2 + $0xf8] sm:$0xff]  ;;  %v965_v14 = vmul.f32 %v1808_v2, %v926_v9  ;;  %1195 = vst.msk [vmem:[%s1831_s28 + $0x34] sm:$0xf] %vm1181_vm4, %v1467_v7 }
 0x149   : > { %v1003_v11 = vadd.f32 %v1813_v12, %v964_v5  ;;  %v981_v15 = vmul.f32 %v1808_v2, %v942_v10  ;;  %1211 = vst.msk [vmem:[%s1831_s28 + $0x74] sm:$0xf] %vm1181_vm4, %v1483_v8 }
 0x14a   : > { %v1019_v13 = vadd.f32 %v1813_v12, %v980_v6  ;;  %v1004_v18 = vadd.f32 %v1813_v12, %v965_v14 }
 0x14b   : > { %v1035_v16 = vmax.f32 %v1003_v11, 0.0  ;;  %v1020_v19 = vadd.f32 %v1813_v12, %v981_v15 }
 0x14c   : > { %v1051_v17 = vmax.f32 %v1019_v13, 0.0  ;;  %v1036_v22 = vmax.f32 %v1004_v18, 0.0 }
 0x14d   : > { %v1468_v20 = vpack.c.bf16 %v1035_v16, %v1035_v16  ;;  %v1052_v23 = vmax.f32 %v1020_v19, 0.0 }
 0x14e   : > { %v1484_v21 = vpack.c.bf16 %v1051_v17, %v1051_v17  ;;  %v1469_v2 = vpack.c.bf16 %v1036_v22, %v1036_v22 }
 0x14f   : > { %1196 = vst.msk [vmem:[%s1831_s28 + $0x38] sm:$0xf] %vm1181_vm4, %v1468_v20  ;;  %v1485_v24 = vpack.c.bf16 %v1052_v23, %v1052_v23 }
 0x150   : > { %1212 = vst.msk [vmem:[%s1831_s28 + $0x78] sm:$0xf] %vm1181_vm4, %v1484_v21  ;;  %1197 = vst.msk [vmem:[%s1831_s28 + $0x3c] sm:$0xf] %vm1181_vm4, %v1469_v2 }
 0x151   : > { %1213 = vst.msk [vmem:[%s1831_s28 + $0x7c] sm:$0xf] %vm1181_vm4, %v1485_v24 }
 0x152 PF: > { %s14_s17 = sadd.s32 1, %s1613_s17   ;;  %s1991_s15 = smov %s1609_s16 }
 0x153   : > { %p11_p5 = scmp.ge.s32.totalorder %s14_s17, 4   ;;  %s1992_s16 = smov %s1994_s18 }
 0x155   :  { %13 = sbr.rel (!%p11_p5) target bundleno = 2 (0x2), region = 83 }

// kernel: _lambda_.24
= control target key start
LH: loop header
LB: loop body
LE: loop exit
PB: predicated region body
PF: predicated region fallthrough
CT: control target
= control target key end

     0   :  { %s1070_s15 = smov 0   ;;  %s1072_s16 = smov 0   ;;  %s1271_s0 = inlined_call_operand.vmem [shape: bf16[9,128,64], index: 0, kind: input, shape index: {}]   ;;  %s1272_s1 = inlined_call_operand.vmem [shape: bf16[9,64,64], index: 1, kind: input, shape index: {}]   ;;  %s1273_s2 = inlined_call_operand.vmem [shape: f32[1,64], index: 2, kind: input, shape index: {}]   ;;  %s1274_s3 = inlined_call_operand.vmem [shape: f32[1,64], index: 3, kind: input, shape index: {}]   ;;  %s1275_s4 = inlined_call_operand.vmem [shape: bf16[128,64], index: 4, kind: output, shape index: {}]  }
   0x1   :  { %s1074_s17 = smov 0  }
   0x2 LB: > { %s26_s18 = sadd.s32 1, %s1038_s16  ;;  %p872_p0 = scmp.ge.s32.totalorder %s1042_s17, 1  ;;  %s1042_s17 = sphi %s1074_s17, %s14_s17   ;;  %s1038_s16 = sphi %s1072_s16, %s1277_s16   ;;  %s1034_s15 = sphi %s1070_s15, %s1276_s15  }
   0x3   : > { %p27_p1 = scmp.ge.s32.totalorder %s26_s18, 9  ;;  %p221_p2 = scmp.lt.s32.totalorder %s1042_s17, 10 }
   0x5   : > { %s1279_s18 = smov (%p27_p1, %s26_s18), 0  ;;  %p222_p3 = pnand %p872_p0, %p221_p2 }
   0x6   : > { %p269_p4 = scmp.lt.s32.totalorder (!%p222_p3), %s1034_s15, 8  ;;  %p877_p5 = scmp.ne.s32.totalorder (!%p222_p3), %s1034_s15, 0 }
   0x7   : > { %225 = sbr.rel (%p222_p3) target bundleno = 285 (0x11d), region = 36 }
   0xe   : > { %s270_s19 = scalar_select %p269_p4, %s1034_s15, 8 }
   0xf   : > { %305 = sbr.rel (%p877_p5) target bundleno = 24 (0x18), region = 40  ;;  %vm306_vm0 = vcmask (!%p877_p5), 523264   ;;  %v1044_v0 = vmov (!%p877_p5), 0.0  }
  0x10   : > { %s921_s20 = sshll.u32 %s270_s19, 6  ;;  %s922_s21 = sshll.u32 %s270_s19, 5  ;;  %307 = vst.msk [vmem:[#allocation2] sm:$0xff] (!%p877_p5), %vm306_vm0, %v1044_v0  ;;  %308 = vst.msk [vmem:[#allocation2 + $0x8] sm:$0xff] (!%p877_p5), %vm306_vm0, %v1044_v0 }
  0x11   : > { %s1095_s24 = scalar_lea.vmem %s1271_s0, %s921_s20  ;;  %s1100_s27 = scalar_lea.vmem %s1272_s1, %s922_s21  ;;  %309 = vst.msk [vmem:[#allocation2 + $0x10] sm:$0xff] (!%p877_p5), %vm306_vm0, %v1044_v0  ;;  %310 = vst.msk [vmem:[#allocation2 + $0x18] sm:$0xff] (!%p877_p5), %vm306_vm0, %v1044_v0 }
  0x12   : > { %311 = vst.msk [vmem:[#allocation2 + $0x20] sm:$0xff] (!%p877_p5), %vm306_vm0, %v1044_v0  ;;  %312 = vst.msk [vmem:[#allocation2 + $0x28] sm:$0xff] (!%p877_p5), %vm306_vm0, %v1044_v0 }
  0x13   : > { %313 = vst.msk [vmem:[#allocation2 + $0x30] sm:$0xff] (!%p877_p5), %vm306_vm0, %v1044_v0  ;;  %314 = vst.msk [vmem:[#allocation2 + $0x38] sm:$0xff] (!%p877_p5), %vm306_vm0, %v1044_v0 }
  0x14   : > { %315 = vst.msk [vmem:[#allocation2 + $0x40] sm:$0xff] (!%p877_p5), %vm306_vm0, %v1044_v0  ;;  %316 = vst.msk [vmem:[#allocation2 + $0x48] sm:$0xff] (!%p877_p5), %vm306_vm0, %v1044_v0 }
  0x15   : > { %317 = vst.msk [vmem:[#allocation2 + $0x50] sm:$0xff] (!%p877_p5), %vm306_vm0, %v1044_v0  ;;  %318 = vst.msk [vmem:[#allocation2 + $0x58] sm:$0xff] (!%p877_p5), %vm306_vm0, %v1044_v0 }
  0x16   : > { %319 = vst.msk [vmem:[#allocation2 + $0x60] sm:$0xff] %vm306_vm0, %v1044_v0  ;;  %320 = vst.msk [vmem:[#allocation2 + $0x68] sm:$0xff] %vm306_vm0, %v1044_v0 }
  0x17   : > { %321 = vst.msk [vmem:[#allocation2 + $0x70] sm:$0xff] %vm306_vm0, %v1044_v0  ;;  %322 = vst.msk [vmem:[#allocation2 + $0x78] sm:$0xff] %vm306_vm0, %v1044_v0 }
  0x18 PF: > { %v1008_v1 = vld [vmem:[%s1100_s27] sm:$0xff]   ;;  %v1009_v2 = vld [vmem:[%s1100_s27 + $0x8] sm:$0xff]   ;;  %v1010_v3 = vld [vmem:[%s1100_s27 + $0x10] sm:$0xff]   ;;  %vm427_vm1 = vcmask 523264   ;;  %p898_p6 = scmp.ne.s32.totalorder %s1034_s15, 8 }
  0x19   : > { %951 = vmatprep.subr.bf16.mxu0 %v1008_v1  ;;  %975 = vmatprep.subr.bf16.mxu1 %v1008_v1  ;;  %v1012_v4 = vld [vmem:[%s1095_s24] sm:$0xff]   ;;  %v1011_v6 = vld [vmem:[%s1100_s27 + $0x18] sm:$0xff]   ;;  %v1014_v7 = vld [vmem:[%s1095_s24 + $0x8] sm:$0xff]   ;;  %vm727_vm2 = vcmask (!%p898_p6), 519168  }
  0x1a   : > { %952 = vmatpush3.bf16.msra.mxu0 %v1008_v1  ;;  %979 = vmatpush3.bf16.msra.mxu1 %v1008_v1  ;;  %v1013_v5 = vld [vmem:[%s1095_s24 + $0x20] sm:$0xff]   ;;  %v1015_v8 = vld [vmem:[%s1095_s24 + $0x28] sm:$0xff]   ;;  %v1016_v9 = vld [vmem:[%s1095_s24 + $0x10] sm:$0xff]  }
  0x1b   : > { %953 = vmatprep.subr.bf16.mxu0 %v1009_v2  ;;  %976 = vmatprep.subr.bf16.mxu1 %v1009_v2  ;;  %v1017_v10 = vld [vmem:[%s1095_s24 + $0x30] sm:$0xff]   ;;  %v1018_v11 = vld [vmem:[%s1095_s24 + $0x18] sm:$0xff]   ;;  %v323_v15 = vld [vmem:[#allocation2] sm:$0xff] }
  0x1c   : > { %959 = vmatprep.mubr.msk.bf16.mxu0 %vm427_vm1, %v1012_v4  ;;  %967 = vmatprep.mubr.msk.bf16.mxu1 %vm427_vm1, %v1013_v5  ;;  %v1019_v12 = vld [vmem:[%s1095_s24 + $0x38] sm:$0xff]   ;;  %v325_v13 = vld [vmem:[#allocation2 + $0x10] sm:$0xff]  ;;  %v324_v25 = vld [vmem:[#allocation2 + $0x8] sm:$0xff] }
  0x1d   : > { %v331_v16 = vld [vmem:[#allocation2 + $0x40] sm:$0xff]  ;;  %v326_v19 = vld [vmem:[#allocation2 + $0x18] sm:$0xff]  ;;  %v332_v26 = vld [vmem:[#allocation2 + $0x48] sm:$0xff] }
  0x1e   : > { %954 = vmatpush3.bf16.msra.mxu0 %v1009_v2  ;;  %980 = vmatpush3.bf16.msra.mxu1 %v1009_v2  ;;  %v333_v14 = vld [vmem:[#allocation2 + $0x50] sm:$0xff]  ;;  %v334_v20 = vld [vmem:[#allocation2 + $0x58] sm:$0xff]  ;;  %v327_v39 = vld [vmem:[#allocation2 + $0x20] sm:$0xff] }
  0x1f   : > { %955 = vmatprep.subr.bf16.mxu0 %v1010_v3  ;;  %977 = vmatprep.subr.bf16.mxu1 %v1010_v3  ;;  %v329_v37 = vld [vmem:[#allocation2 + $0x30] sm:$0xff]  ;;  %v335_v40 = vld [vmem:[#allocation2 + $0x60] sm:$0xff]  ;;  %v330_v43 = vld [vmem:[#allocation2 + $0x38] sm:$0xff] }
  0x20   : > { %v337_v38 = vld [vmem:[#allocation2 + $0x70] sm:$0xff]  ;;  %v338_v44 = vld [vmem:[#allocation2 + $0x78] sm:$0xff]  ;;  %v328_v49 = vld [vmem:[#allocation2 + $0x28] sm:$0xff] }
  0x21   : > { %v336_v50 = vld [vmem:[#allocation2 + $0x68] sm:$0xff]  ;;  %v1159_v62 = vld [vmem:[%s1273_s2] ss:$0 sm:$0xff] (!%p898_p6) }
  0x22   : > { %956 = vmatpush3.bf16.msra.mxu0 %v1010_v3  ;;  %981 = vmatpush3.bf16.msra.mxu1 %v1010_v3  ;;  %v1164_v63 = vld [vmem:[%s1274_s3] ss:$0 sm:$0xff] (!%p898_p6) }
  0x23   : > { %957 = vmatprep.subr.bf16.mxu0 %v1011_v6  ;;  %978 = vmatprep.subr.bf16.mxu1 %v1011_v6 }
  0x26   : > { %958 = vmatpush3.bf16.msra.mxu0 %v1011_v6  ;;  %982 = vmatpush3.bf16.msra.mxu1 %v1011_v6 }
  0x29   : > { %960 = vmatmul.mubr.msk.bf16.vlgmr.msra.gmra.mrb[0].mxu0 %vm427_vm1, %v1014_v7  ;;  %968 = vmatmul.mubr.msk.bf16.vlgmr.msra.gmra.mrb[0].mxu1 %vm427_vm1, %v1015_v8 }
  0x2a   : > { %963 = vmatprep.mubr.msk.bf16.mxu0 %vm427_vm1, %v1016_v9  ;;  %971 = vmatprep.mubr.msk.bf16.mxu1 %vm427_vm1, %v1017_v10 }
  0x31   : > { %964 = vmatmul.mubr.msk.bf16.gmra.mrb[4].mxu0 %vm427_vm1, %v1018_v11  ;;  %972 = vmatmul.mubr.msk.bf16.gmra.mrb[4].mxu1 %vm427_vm1, %v1019_v12 }
  0xfc   : > { %v961_v17 = vpop.f32.mrb[0].mxu0  ;;  %v969_v18 = vpop.f32.mrb[0].mxu1 }
  0xfd   : > { %v551_v21 = vadd.f32 %v961_v17, %v325_v13  ;;  %v559_v22 = vadd.f32 %v969_v18, %v333_v14  ;;  %v486_v23 = vpop.f32.mrb[1].mxu0  ;;  %v518_v24 = vpop.f32.mrb[1].mxu1 }
  0xfe   : > { %v549_v27 = vadd.f32 %v486_v23, %v323_v15  ;;  %v557_v28 = vadd.f32 %v518_v24, %v331_v16  ;;  %v962_v29 = vpop.f32.mrb[2].mxu0  ;;  %v970_v30 = vpop.f32.mrb[2].mxu1 }
  0xff   : > { %567 = vst.msk [vmem:[#allocation2 + $0x10] sm:$0xff] %vm427_vm1, %v551_v21  ;;  %575 = vst.msk [vmem:[#allocation2 + $0x50] sm:$0xff] %vm427_vm1, %v559_v22  ;;  %v552_v31 = vadd.f32 %v962_v29, %v326_v19  ;;  %v560_v32 = vadd.f32 %v970_v30, %v334_v20  ;;  %v489_v33 = vpop.f32.mrb[3].mxu0  ;;  %v521_v34 = vpop.f32.mrb[3].mxu1 }
 0x100   : > { %565 = vst.msk [vmem:[#allocation2] sm:$0xff] %vm427_vm1, %v549_v27  ;;  %573 = vst.msk [vmem:[#allocation2 + $0x40] sm:$0xff] %vm427_vm1, %v557_v28  ;;  %v550_v35 = vadd.f32 %v489_v33, %v324_v25  ;;  %v558_v36 = vadd.f32 %v521_v34, %v332_v26 }
 0x101   : > { %568 = vst.msk [vmem:[#allocation2 + $0x18] sm:$0xff] %vm427_vm1, %v552_v31  ;;  %576 = vst.msk [vmem:[#allocation2 + $0x58] sm:$0xff] %vm427_vm1, %v560_v32 }
 0x102   : > { %566 = vst.msk [vmem:[#allocation2 + $0x8] sm:$0xff] %vm427_vm1, %v550_v35  ;;  %574 = vst.msk [vmem:[#allocation2 + $0x48] sm:$0xff] %vm427_vm1, %v558_v36 }
 0x104   : > { %v965_v41 = vpop.f32.mrb[4].mxu0  ;;  %v973_v42 = vpop.f32.mrb[4].mxu1  ;;  %584 = sbr.rel (%p898_p6) target bundleno = 285 (0x11d), region = 44 }
 0x105   : > { %v555_v45 = vadd.f32 %v965_v41, %v329_v37  ;;  %v563_v46 = vadd.f32 %v973_v42, %v337_v38  ;;  %v502_v47 = vpop.f32.mrb[5].mxu0  ;;  %v534_v48 = vpop.f32.mrb[5].mxu1 }
 0x106   : > { %v553_v51 = vadd.f32 %v502_v47, %v327_v39  ;;  %v561_v52 = vadd.f32 %v534_v48, %v335_v40  ;;  %v966_v53 = vpop.f32.mrb[6].mxu0  ;;  %v974_v54 = vpop.f32.mrb[6].mxu1  ;;  %v587_v2 = vld [vmem:[#allocation2 + $0x10] sm:$0xff] (!%p898_p6) }
 0x107   : > { %571 = vst.msk [vmem:[#allocation2 + $0x30] sm:$0xff] %vm427_vm1, %v555_v45  ;;  %579 = vst.msk [vmem:[#allocation2 + $0x70] sm:$0xff] %vm427_vm1, %v563_v46  ;;  %v556_v55 = vadd.f32 %v966_v53, %v330_v43  ;;  %v564_v56 = vadd.f32 %v974_v54, %v338_v44  ;;  %v505_v57 = vpop.f32.mrb[7].mxu0  ;;  %v537_v58 = vpop.f32.mrb[7].mxu1  ;;  %v585_v61 = vld [vmem:[#allocation2] sm:$0xff] (!%p898_p6)  ;;  %v610_v5 = vmul.f32 (!%p898_p6), %v1159_v62, %v587_v2  ;;  %v595_v33 = vld [vmem:[#allocation2 + $0x50] sm:$0xff] (!%p898_p6) }
 0x108   : > { %569 = vst.msk [vmem:[#allocation2 + $0x20] sm:$0xff] %vm427_vm1, %v553_v51  ;;  %577 = vst.msk [vmem:[#allocation2 + $0x60] sm:$0xff] %vm427_vm1, %v561_v52  ;;  %v554_v59 = vadd.f32 %v505_v57, %v328_v49  ;;  %v562_v60 = vadd.f32 %v537_v58, %v336_v50  ;;  %v608_v0 = vmul.f32 (!%p898_p6), %v1159_v62, %v585_v61  ;;  %v588_v3 = vld [vmem:[#allocation2 + $0x18] sm:$0xff] (!%p898_p6)  ;;  %v593_v27 = vld [vmem:[#allocation2 + $0x40] sm:$0xff] (!%p898_p6) }
 0x109   : > { %572 = vst.msk [vmem:[#allocation2 + $0x38] sm:$0xff] %vm427_vm1, %v556_v55  ;;  %580 = vst.msk [vmem:[#allocation2 + $0x78] sm:$0xff] %vm427_vm1, %v564_v56  ;;  %v586_v1 = vld [vmem:[#allocation2 + $0x8] sm:$0xff] (!%p898_p6)  ;;  %v611_v6 = vmul.f32 (!%p898_p6), %v1159_v62, %v588_v3  ;;  %v633_v16 = vadd.f32 (!%p898_p6), %v1164_v63, %v610_v5  ;;  %v596_v34 = vld [vmem:[#allocation2 + $0x58] sm:$0xff] (!%p898_p6)  ;;  %v616_v45 = vmul.f32 (!%p898_p6), %v1159_v62, %v593_v27 }
 0x10a   : > { %570 = vst.msk [vmem:[#allocation2 + $0x28] sm:$0xff] %vm427_vm1, %v554_v59  ;;  %578 = vst.msk [vmem:[#allocation2 + $0x68] sm:$0xff] %vm427_vm1, %v562_v60  ;;  %v609_v4 = vmul.f32 (!%p898_p6), %v1159_v62, %v586_v1  ;;  %v631_v10 = vadd.f32 (!%p898_p6), %v1164_v63, %v608_v0  ;;  %v594_v32 = vld [vmem:[#allocation2 + $0x48] sm:$0xff] (!%p898_p6)  ;;  %v618_v49 = vmul.f32 (!%p898_p6), %v1159_v62, %v595_v33 }
 0x10b   : > { %v634_v17 = vadd.f32 %v1164_v63, %v611_v6  ;;  %v649_v24 = vmax.f32 %v633_v16, 0.0  ;;  %v617_v48 = vmul.f32 %v1159_v62, %v594_v32  ;;  %v619_v50 = vmul.f32 %v1159_v62, %v596_v34 }
 0x10c   : > { %v632_v15 = vadd.f32 %v1164_v63, %v609_v4  ;;  %v647_v19 = vmax.f32 %v631_v10, 0.0  ;;  %v639_v51 = vadd.f32 %v1164_v63, %v616_v45  ;;  %v641_v56 = vadd.f32 %v1164_v63, %v618_v49 }
 0x10d   : > { %v650_v25 = vmax.f32 %v634_v17, 0.0  ;;  %v925_v36 = vpack.c.bf16 %v649_v24, %v649_v24  ;;  %v640_v55 = vadd.f32 %v1164_v63, %v617_v48  ;;  %v642_v57 = vadd.f32 %v1164_v63, %v619_v50 }
 0x10e   : > { %v591_v9 = vld [vmem:[#allocation2 + $0x30] sm:$0xff]  ;;  %v648_v23 = vmax.f32 %v632_v15, 0.0  ;;  %v923_v28 = vpack.c.bf16 %v647_v19, %v647_v19  ;;  %v655_v59 = vmax.f32 %v639_v51, 0.0  ;;  %v657_v2 = vmax.f32 %v641_v56, 0.0 }
 0x10f   : > { %v589_v7 = vld [vmem:[#allocation2 + $0x20] sm:$0xff]  ;;  %v614_v13 = vmul.f32 %v1159_v62, %v591_v9  ;;  %v926_v37 = vpack.c.bf16 %v650_v25, %v650_v25  ;;  %v599_v41 = vld [vmem:[#allocation2 + $0x70] sm:$0xff]  ;;  %730 = vst.msk [vmem:[%s1275_s4 + $0x8] sm:$0xf] %vm727_vm2, %v925_v36  ;;  %v656_v1 = vmax.f32 %v640_v55, 0.0  ;;  %v658_v3 = vmax.f32 %v642_v57, 0.0 }
 0x110   : > { %v612_v11 = vmul.f32 %v1159_v62, %v589_v7  ;;  %v592_v14 = vld [vmem:[#allocation2 + $0x38] sm:$0xff]  ;;  %v924_v35 = vpack.c.bf16 %v648_v23, %v648_v23  ;;  %v597_v39 = vld [vmem:[#allocation2 + $0x60] sm:$0xff]  ;;  %728 = vst.msk [vmem:[%s1275_s4] sm:$0xf] %vm727_vm2, %v923_v28  ;;  %v622_v54 = vmul.f32 %v1159_v62, %v599_v41  ;;  %v931_v5 = vpack.c.bf16 %v655_v59, %v655_v59 }
 0x111   : > { %v590_v8 = vld [vmem:[#allocation2 + $0x28] sm:$0xff]  ;;  %v615_v18 = vmul.f32 %v1159_v62, %v592_v14  ;;  %v637_v22 = vadd.f32 %v1164_v63, %v614_v13  ;;  %v600_v46 = vld [vmem:[#allocation2 + $0x78] sm:$0xff]  ;;  %731 = vst.msk [vmem:[%s1275_s4 + $0xc] sm:$0xf] %vm727_vm2, %v926_v37  ;;  %v620_v52 = vmul.f32 %v1159_v62, %v597_v39  ;;  %v932_v9 = vpack.c.bf16 %v656_v1, %v656_v1 }
 0x112   : > { %v613_v12 = vmul.f32 %v1159_v62, %v590_v8  ;;  %v635_v20 = vadd.f32 %v1164_v63, %v612_v11  ;;  %v598_v40 = vld [vmem:[#allocation2 + $0x68] sm:$0xff]  ;;  %729 = vst.msk [vmem:[%s1275_s4 + $0x4] sm:$0xf] %vm727_vm2, %v924_v35  ;;  %v623_v58 = vmul.f32 %v1159_v62, %v600_v46  ;;  %v645_v0 = vadd.f32 %v1164_v63, %v622_v54 }
 0x113   : > { %v638_v26 = vadd.f32 %v1164_v63, %v615_v18  ;;  %v653_v31 = vmax.f32 %v637_v22, 0.0  ;;  %v621_v53 = vmul.f32 %v1159_v62, %v598_v40  ;;  %v643_v60 = vadd.f32 %v1164_v63, %v620_v52  ;;  %736 = vst.msk [vmem:[%s1275_s4 + $0x20] sm:$0xf] %vm727_vm2, %v931_v5  ;;  %737 = vst.msk [vmem:[%s1275_s4 + $0x24] sm:$0xf] %vm727_vm2, %v932_v9 }
 0x114   : > { %v636_v21 = vadd.f32 %v1164_v63, %v613_v12  ;;  %v651_v29 = vmax.f32 %v635_v20, 0.0  ;;  %v646_v4 = vadd.f32 %v1164_v63, %v623_v58  ;;  %v661_v8 = vmax.f32 %v645_v0, 0.0 }
 0x115   : > { %v654_v38 = vmax.f32 %v638_v26, 0.0  ;;  %v929_v44 = vpack.c.bf16 %v653_v31, %v653_v31  ;;  %v644_v61 = vadd.f32 %v1164_v63, %v621_v53  ;;  %v659_v6 = vmax.f32 %v643_v60, 0.0 }
 0x116   : > { %v652_v30 = vmax.f32 %v636_v21, 0.0  ;;  %v927_v42 = vpack.c.bf16 %v651_v29, %v651_v29  ;;  %v933_v10 = vpack.c.bf16 %v657_v2, %v657_v2  ;;  %v934_v11 = vpack.c.bf16 %v658_v3, %v658_v3 }
 0x117   : > { %v930_v47 = vpack.c.bf16 %v654_v38, %v654_v38  ;;  %734 = vst.msk [vmem:[%s1275_s4 + $0x18] sm:$0xf] %vm727_vm2, %v929_v44  ;;  %v660_v7 = vmax.f32 %v644_v61, 0.0  ;;  %v662_v62 = vmax.f32 %v646_v4, 0.0  ;;  %v935_v12 = vpack.c.bf16 %v659_v6, %v659_v6 }
 0x118   : > { %v928_v43 = vpack.c.bf16 %v652_v30, %v652_v30  ;;  %732 = vst.msk [vmem:[%s1275_s4 + $0x10] sm:$0xf] %vm727_vm2, %v927_v42  ;;  %v937_v14 = vpack.c.bf16 %v661_v8, %v661_v8  ;;  %738 = vst.msk [vmem:[%s1275_s4 + $0x28] sm:$0xf] %vm727_vm2, %v933_v10 }
 0x119   : > { %735 = vst.msk [vmem:[%s1275_s4 + $0x1c] sm:$0xf] %vm727_vm2, %v930_v47  ;;  %v936_v13 = vpack.c.bf16 %v660_v7, %v660_v7  ;;  %739 = vst.msk [vmem:[%s1275_s4 + $0x2c] sm:$0xf] %vm727_vm2, %v934_v11  ;;  %v938_v63 = vpack.c.bf16 %v662_v62, %v662_v62 }
 0x11a   : > { %733 = vst.msk [vmem:[%s1275_s4 + $0x14] sm:$0xf] %vm727_vm2, %v928_v43  ;;  %740 = vst.msk [vmem:[%s1275_s4 + $0x30] sm:$0xf] %vm727_vm2, %v935_v12 }
 0x11b   : > { %741 = vst.msk [vmem:[%s1275_s4 + $0x34] sm:$0xf] %vm727_vm2, %v936_v13  ;;  %742 = vst.msk [vmem:[%s1275_s4 + $0x38] sm:$0xf] %vm727_vm2, %v937_v14 }
 0x11c   : > { %743 = vst.msk [vmem:[%s1275_s4 + $0x3c] sm:$0xf] %vm727_vm2, %v938_v63 }
 0x11d PF: > { %s14_s17 = sadd.s32 1, %s1042_s17   ;;  %s1276_s15 = smov %s1038_s16 }
 0x11e   : > { %p11_p7 = scmp.ge.s32.totalorder %s14_s17, 11   ;;  %s1277_s16 = smov %s1279_s18 }
 0x120   :  { %13 = sbr.rel (!%p11_p7) target bundleno = 2 (0x2), region = 83 }

// kernel: _lambda_.25
= control target key start
LH: loop header
LB: loop body
LE: loop exit
PB: predicated region body
PF: predicated region fallthrough
CT: control target
= control target key end

     0   :  { %s1241_s18 = smov 0   ;;  %s1243_s19 = smov 0   ;;  %s1466_s0 = inlined_call_operand.vmem [shape: bf16[9,128,64], index: 0, kind: input, shape index: {}]   ;;  %s1467_s1 = inlined_call_operand.vmem [shape: bf16[9,64,64], index: 1, kind: input, shape index: {}]   ;;  %s1468_s2 = inlined_call_operand.vmem [shape: f32[1,64], index: 2, kind: input, shape index: {}]   ;;  %s1469_s3 = inlined_call_operand.vmem [shape: f32[1,64], index: 3, kind: input, shape index: {}]   ;;  %s1470_s4 = inlined_call_operand.vmem [shape: bf16[128,64], index: 4, kind: input, shape index: {}]   ;;  %s1471_s5 = inlined_call_operand.vmem [shape: bf16[128,64], index: 5, kind: output, shape index: {}]  }
   0x1   :  { %s1245_s20 = smov 0  }
   0x2 LB: > { %s27_s21 = sadd.s32 1, %s1204_s19  ;;  %p999_p0 = scmp.ge.s32.totalorder %s1208_s20, 1  ;;  %s1208_s20 = sphi %s1245_s20, %s15_s20   ;;  %s1204_s19 = sphi %s1243_s19, %s1473_s19   ;;  %s1200_s18 = sphi %s1241_s18, %s1472_s18  }
   0x3   : > { %p28_p1 = scmp.ge.s32.totalorder %s27_s21, 9  ;;  %p262_p2 = scmp.lt.s32.totalorder %s1208_s20, 10 }
   0x5   : > { %s1475_s21 = smov (%p28_p1, %s27_s21), 0  ;;  %p263_p3 = pnand %p999_p0, %p262_p2 }
   0x6   : > { %p320_p4 = scmp.lt.s32.totalorder (!%p263_p3), %s1200_s18, 8  ;;  %p1004_p5 = scmp.ne.s32.totalorder (!%p263_p3), %s1200_s18, 0 }
   0x7   : > { %266 = sbr.rel (%p263_p3) target bundleno = 294 (0x126), region = 40 }
   0xe   : > { %s321_s22 = scalar_select %p320_p4, %s1200_s18, 8 }
   0xf   : > { %365 = sbr.rel (%p1004_p5) target bundleno = 24 (0x18), region = 44  ;;  %vm366_vm0 = vcmask (!%p1004_p5), 523264   ;;  %v1210_v0 = vmov (!%p1004_p5), 0.0  }
  0x10   : > { %s1048_s23 = sshll.u32 %s321_s22, 6  ;;  %s1049_s24 = sshll.u32 %s321_s22, 5  ;;  %367 = vst.msk [vmem:[#allocation2] sm:$0xff] (!%p1004_p5), %vm366_vm0, %v1210_v0  ;;  %368 = vst.msk [vmem:[#allocation2 + $0x8] sm:$0xff] (!%p1004_p5), %vm366_vm0, %v1210_v0 }
  0x11   : > { %s1266_s27 = scalar_lea.vmem %s1466_s0, %s1048_s23  ;;  %s1271_s30 = scalar_lea.vmem %s1467_s1, %s1049_s24  ;;  %369 = vst.msk [vmem:[#allocation2 + $0x10] sm:$0xff] (!%p1004_p5), %vm366_vm0, %v1210_v0  ;;  %370 = vst.msk [vmem:[#allocation2 + $0x18] sm:$0xff] (!%p1004_p5), %vm366_vm0, %v1210_v0 }
  0x12   : > { %371 = vst.msk [vmem:[#allocation2 + $0x20] sm:$0xff] (!%p1004_p5), %vm366_vm0, %v1210_v0  ;;  %372 = vst.msk [vmem:[#allocation2 + $0x28] sm:$0xff] (!%p1004_p5), %vm366_vm0, %v1210_v0 }
  0x13   : > { %373 = vst.msk [vmem:[#allocation2 + $0x30] sm:$0xff] (!%p1004_p5), %vm366_vm0, %v1210_v0  ;;  %374 = vst.msk [vmem:[#allocation2 + $0x38] sm:$0xff] (!%p1004_p5), %vm366_vm0, %v1210_v0 }
  0x14   : > { %375 = vst.msk [vmem:[#allocation2 + $0x40] sm:$0xff] (!%p1004_p5), %vm366_vm0, %v1210_v0  ;;  %376 = vst.msk [vmem:[#allocation2 + $0x48] sm:$0xff] (!%p1004_p5), %vm366_vm0, %v1210_v0 }
  0x15   : > { %377 = vst.msk [vmem:[#allocation2 + $0x50] sm:$0xff] (!%p1004_p5), %vm366_vm0, %v1210_v0  ;;  %378 = vst.msk [vmem:[#allocation2 + $0x58] sm:$0xff] (!%p1004_p5), %vm366_vm0, %v1210_v0 }
  0x16   : > { %379 = vst.msk [vmem:[#allocation2 + $0x60] sm:$0xff] %vm366_vm0, %v1210_v0  ;;  %380 = vst.msk [vmem:[#allocation2 + $0x68] sm:$0xff] %vm366_vm0, %v1210_v0 }
  0x17   : > { %381 = vst.msk [vmem:[#allocation2 + $0x70] sm:$0xff] %vm366_vm0, %v1210_v0  ;;  %382 = vst.msk [vmem:[#allocation2 + $0x78] sm:$0xff] %vm366_vm0, %v1210_v0 }
  0x18 PF: > { %v1174_v1 = vld [vmem:[%s1271_s30] sm:$0xff]   ;;  %v1175_v2 = vld [vmem:[%s1271_s30 + $0x8] sm:$0xff]   ;;  %v1176_v3 = vld [vmem:[%s1271_s30 + $0x10] sm:$0xff]   ;;  %vm487_vm1 = vcmask 523264   ;;  %p1025_p6 = scmp.ne.s32.totalorder %s1200_s18, 8 }
  0x19   : > { %1117 = vmatprep.subr.bf16.mxu0 %v1174_v1  ;;  %1141 = vmatprep.subr.bf16.mxu1 %v1174_v1  ;;  %v1178_v4 = vld [vmem:[%s1266_s27] sm:$0xff]   ;;  %v1177_v6 = vld [vmem:[%s1271_s30 + $0x18] sm:$0xff]   ;;  %v1180_v7 = vld [vmem:[%s1266_s27 + $0x8] sm:$0xff]   ;;  %vm835_vm2 = vcmask (!%p1025_p6), 519168  }
  0x1a   : > { %1118 = vmatpush3.bf16.msra.mxu0 %v1174_v1  ;;  %1145 = vmatpush3.bf16.msra.mxu1 %v1174_v1  ;;  %v1179_v5 = vld [vmem:[%s1266_s27 + $0x20] sm:$0xff]   ;;  %v1181_v8 = vld [vmem:[%s1266_s27 + $0x28] sm:$0xff]   ;;  %v1182_v9 = vld [vmem:[%s1266_s27 + $0x10] sm:$0xff]  }
  0x1b   : > { %1119 = vmatprep.subr.bf16.mxu0 %v1175_v2  ;;  %1142 = vmatprep.subr.bf16.mxu1 %v1175_v2  ;;  %v1183_v10 = vld [vmem:[%s1266_s27 + $0x30] sm:$0xff]   ;;  %v1184_v11 = vld [vmem:[%s1266_s27 + $0x18] sm:$0xff]   ;;  %v383_v15 = vld [vmem:[#allocation2] sm:$0xff] }
  0x1c   : > { %1125 = vmatprep.mubr.msk.bf16.mxu0 %vm487_vm1, %v1178_v4  ;;  %1133 = vmatprep.mubr.msk.bf16.mxu1 %vm487_vm1, %v1179_v5  ;;  %v1185_v12 = vld [vmem:[%s1266_s27 + $0x38] sm:$0xff]   ;;  %v385_v13 = vld [vmem:[#allocation2 + $0x10] sm:$0xff]  ;;  %v384_v25 = vld [vmem:[#allocation2 + $0x8] sm:$0xff] }
  0x1d   : > { %v391_v16 = vld [vmem:[#allocation2 + $0x40] sm:$0xff]  ;;  %v386_v19 = vld [vmem:[#allocation2 + $0x18] sm:$0xff]  ;;  %v392_v26 = vld [vmem:[#allocation2 + $0x48] sm:$0xff] }
  0x1e   : > { %1120 = vmatpush3.bf16.msra.mxu0 %v1175_v2  ;;  %1146 = vmatpush3.bf16.msra.mxu1 %v1175_v2  ;;  %v393_v14 = vld [vmem:[#allocation2 + $0x50] sm:$0xff]  ;;  %v394_v20 = vld [vmem:[#allocation2 + $0x58] sm:$0xff]  ;;  %v387_v39 = vld [vmem:[#allocation2 + $0x20] sm:$0xff] }
  0x1f   : > { %1121 = vmatprep.subr.bf16.mxu0 %v1176_v3  ;;  %1143 = vmatprep.subr.bf16.mxu1 %v1176_v3  ;;  %v389_v37 = vld [vmem:[#allocation2 + $0x30] sm:$0xff]  ;;  %v395_v40 = vld [vmem:[#allocation2 + $0x60] sm:$0xff]  ;;  %v390_v43 = vld [vmem:[#allocation2 + $0x38] sm:$0xff] }
  0x20   : > { %v397_v38 = vld [vmem:[#allocation2 + $0x70] sm:$0xff]  ;;  %v398_v44 = vld [vmem:[#allocation2 + $0x78] sm:$0xff]  ;;  %v388_v49 = vld [vmem:[#allocation2 + $0x28] sm:$0xff] }
  0x21   : > { %v396_v50 = vld [vmem:[#allocation2 + $0x68] sm:$0xff]  ;;  %v1330_v62 = vld [vmem:[%s1468_s2] ss:$0 sm:$0xff] (!%p1025_p6) }
  0x22   : > { %1122 = vmatpush3.bf16.msra.mxu0 %v1176_v3  ;;  %1147 = vmatpush3.bf16.msra.mxu1 %v1176_v3  ;;  %v1335_v63 = vld [vmem:[%s1469_s3] ss:$0 sm:$0xff] (!%p1025_p6) }
  0x23   : > { %1123 = vmatprep.subr.bf16.mxu0 %v1177_v6  ;;  %1144 = vmatprep.subr.bf16.mxu1 %v1177_v6  ;;  %v1067_v1 = vld [vmem:[%s1470_s4] sm:$0xff] (!%p1025_p6)  }
  0x24   : > { %v1068_v4 = vunpack.c.l.bf16 (!%p1025_p6), %v1067_v1 }
  0x26   : > { %1124 = vmatpush3.bf16.msra.mxu0 %v1177_v6  ;;  %1148 = vmatpush3.bf16.msra.mxu1 %v1177_v6  ;;  %v1069_v6 = vunpack.c.h.bf16 (!%p1025_p6), %v1067_v1 }
  0x29   : > { %1126 = vmatmul.mubr.msk.bf16.vlgmr.msra.gmra.mrb[0].mxu0 %vm487_vm1, %v1180_v7  ;;  %1134 = vmatmul.mubr.msk.bf16.vlgmr.msra.gmra.mrb[0].mxu1 %vm487_vm1, %v1181_v8  ;;  %v1098_v8 = vld [vmem:[%s1470_s4 + $0x8] sm:$0xff] (!%p1025_p6)  }
  0x2a   : > { %1129 = vmatprep.mubr.msk.bf16.mxu0 %vm487_vm1, %v1182_v9  ;;  %1137 = vmatprep.mubr.msk.bf16.mxu1 %vm487_vm1, %v1183_v10 }
  0x31   : > { %1130 = vmatmul.mubr.msk.bf16.gmra.mrb[4].mxu0 %vm487_vm1, %v1184_v11  ;;  %1138 = vmatmul.mubr.msk.bf16.gmra.mrb[4].mxu1 %vm487_vm1, %v1185_v12  ;;  %v1072_v12 = vunpack.c.l.bf16 (!%p1025_p6), %v1098_v8 }
  0xfc   : > { %v1127_v17 = vpop.f32.mrb[0].mxu0  ;;  %v1135_v18 = vpop.f32.mrb[0].mxu1 }
  0xfd   : > { %v611_v21 = vadd.f32 %v1127_v17, %v385_v13  ;;  %v619_v22 = vadd.f32 %v1135_v18, %v393_v14  ;;  %v546_v23 = vpop.f32.mrb[1].mxu0  ;;  %v578_v24 = vpop.f32.mrb[1].mxu1  ;;  %v1073_v14 = vunpack.c.h.bf16 (!%p1025_p6), %v1098_v8 }
  0xfe   : > { %v609_v27 = vadd.f32 %v546_v23, %v383_v15  ;;  %v617_v28 = vadd.f32 %v578_v24, %v391_v16  ;;  %v1128_v29 = vpop.f32.mrb[2].mxu0  ;;  %v1136_v30 = vpop.f32.mrb[2].mxu1  ;;  %v1099_v15 = vld [vmem:[%s1470_s4 + $0x10] sm:$0xff] (!%p1025_p6)  }
  0xff   : > { %627 = vst.msk [vmem:[#allocation2 + $0x10] sm:$0xff] %vm487_vm1, %v611_v21  ;;  %635 = vst.msk [vmem:[#allocation2 + $0x50] sm:$0xff] %vm487_vm1, %v619_v22  ;;  %v612_v31 = vadd.f32 %v1128_v29, %v386_v19  ;;  %v620_v32 = vadd.f32 %v1136_v30, %v394_v20  ;;  %v549_v33 = vpop.f32.mrb[3].mxu0  ;;  %v581_v34 = vpop.f32.mrb[3].mxu1  ;;  %v1076_v21 = vunpack.c.l.bf16 (!%p1025_p6), %v1099_v15  ;;  %v1100_v22 = vld [vmem:[%s1470_s4 + $0x18] sm:$0xff] (!%p1025_p6)  }
 0x100   : > { %625 = vst.msk [vmem:[#allocation2] sm:$0xff] %vm487_vm1, %v609_v27  ;;  %633 = vst.msk [vmem:[#allocation2 + $0x40] sm:$0xff] %vm487_vm1, %v617_v28  ;;  %v610_v35 = vadd.f32 %v549_v33, %v384_v25  ;;  %v618_v36 = vadd.f32 %v581_v34, %v392_v26  ;;  %v1077_v26 = vunpack.c.h.bf16 (!%p1025_p6), %v1099_v15 }
 0x101   : > { %628 = vst.msk [vmem:[#allocation2 + $0x18] sm:$0xff] %vm487_vm1, %v612_v31  ;;  %636 = vst.msk [vmem:[#allocation2 + $0x58] sm:$0xff] %vm487_vm1, %v620_v32 }
 0x102   : > { %626 = vst.msk [vmem:[#allocation2 + $0x8] sm:$0xff] %vm487_vm1, %v610_v35  ;;  %634 = vst.msk [vmem:[#allocation2 + $0x48] sm:$0xff] %vm487_vm1, %v618_v36  ;;  %v1080_v35 = vunpack.c.l.bf16 (!%p1025_p6), %v1100_v22 }
 0x104   : > { %v1131_v41 = vpop.f32.mrb[4].mxu0  ;;  %v1139_v42 = vpop.f32.mrb[4].mxu1  ;;  %644 = sbr.rel (%p1025_p6) target bundleno = 294 (0x126), region = 48 }
 0x105   : > { %v615_v45 = vadd.f32 %v1131_v41, %v389_v37  ;;  %v623_v46 = vadd.f32 %v1139_v42, %v397_v38  ;;  %v562_v47 = vpop.f32.mrb[5].mxu0  ;;  %v594_v48 = vpop.f32.mrb[5].mxu1 }
 0x106   : > { %v613_v51 = vadd.f32 %v562_v47, %v387_v39  ;;  %v621_v52 = vadd.f32 %v594_v48, %v395_v40  ;;  %v1132_v53 = vpop.f32.mrb[6].mxu0  ;;  %v1140_v54 = vpop.f32.mrb[6].mxu1  ;;  %v647_v3 = vld [vmem:[#allocation2 + $0x10] sm:$0xff] (!%p1025_p6) }
 0x107   : > { %631 = vst.msk [vmem:[#allocation2 + $0x30] sm:$0xff] %vm487_vm1, %v615_v45  ;;  %639 = vst.msk [vmem:[#allocation2 + $0x70] sm:$0xff] %vm487_vm1, %v623_v46  ;;  %v616_v55 = vadd.f32 %v1132_v53, %v390_v43  ;;  %v624_v56 = vadd.f32 %v1140_v54, %v398_v44  ;;  %v565_v57 = vpop.f32.mrb[7].mxu0  ;;  %v597_v58 = vpop.f32.mrb[7].mxu1  ;;  %v645_v61 = vld [vmem:[#allocation2] sm:$0xff] (!%p1025_p6)  ;;  %v670_v7 = vmul.f32 (!%p1025_p6), %v1330_v62, %v647_v3  ;;  %v1081_v54 = vunpack.c.h.bf16 (!%p1025_p6), %v1100_v22 }
 0x108   : > { %629 = vst.msk [vmem:[#allocation2 + $0x20] sm:$0xff] %vm487_vm1, %v613_v51  ;;  %637 = vst.msk [vmem:[#allocation2 + $0x60] sm:$0xff] %vm487_vm1, %v621_v52  ;;  %v614_v59 = vadd.f32 %v565_v57, %v388_v49  ;;  %v622_v60 = vadd.f32 %v597_v58, %v396_v50  ;;  %v668_v0 = vmul.f32 (!%p1025_p6), %v1330_v62, %v645_v61  ;;  %v648_v9 = vld [vmem:[#allocation2 + $0x18] sm:$0xff] (!%p1025_p6)  ;;  %v653_v44 = vld [vmem:[#allocation2 + $0x40] sm:$0xff] (!%p1025_p6) }
 0x109   : > { %632 = vst.msk [vmem:[#allocation2 + $0x38] sm:$0xff] %vm487_vm1, %v616_v55  ;;  %640 = vst.msk [vmem:[#allocation2 + $0x78] sm:$0xff] %vm487_vm1, %v624_v56  ;;  %v646_v2 = vld [vmem:[#allocation2 + $0x8] sm:$0xff] (!%p1025_p6)  ;;  %v671_v13 = vmul.f32 (!%p1025_p6), %v1330_v62, %v648_v9  ;;  %v693_v19 = vadd.f32 (!%p1025_p6), %v1335_v63, %v670_v7  ;;  %v1101_v45 = vld [vmem:[%s1470_s4 + $0x20] sm:$0xff] (!%p1025_p6)  }
 0x10a   : > { %630 = vst.msk [vmem:[#allocation2 + $0x28] sm:$0xff] %vm487_vm1, %v614_v59  ;;  %638 = vst.msk [vmem:[#allocation2 + $0x68] sm:$0xff] %vm487_vm1, %v622_v60  ;;  %v669_v5 = vmul.f32 (!%p1025_p6), %v1330_v62, %v646_v2  ;;  %v691_v11 = vadd.f32 (!%p1025_p6), %v1335_v63, %v668_v0  ;;  %v654_v50 = vld [vmem:[#allocation2 + $0x48] sm:$0xff] (!%p1025_p6)  ;;  %v655_v55 = vld [vmem:[#allocation2 + $0x50] sm:$0xff] (!%p1025_p6)  ;;  %v676_v59 = vmul.f32 (!%p1025_p6), %v1330_v62, %v653_v44  ;;  %v1084_v60 = vunpack.c.l.bf16 (!%p1025_p6), %v1101_v45 }
 0x10b   : > { %v694_v24 = vadd.f32 %v1335_v63, %v671_v13  ;;  %v741_v28 = vadd.f32 %v1072_v12, %v693_v19  ;;  %v1102_v56 = vld [vmem:[%s1470_s4 + $0x28] sm:$0xff]   ;;  %v656_v61 = vld [vmem:[#allocation2 + $0x58] sm:$0xff]  ;;  %v677_v2 = vmul.f32 %v1330_v62, %v654_v50  ;;  %v1085_v3 = vunpack.c.h.bf16 %v1101_v45 }
 0x10c   : > { %v692_v18 = vadd.f32 %v1335_v63, %v669_v5  ;;  %v739_v23 = vadd.f32 %v1068_v4, %v691_v11  ;;  %v1103_v5 = vld [vmem:[%s1470_s4 + $0x30] sm:$0xff]   ;;  %v699_v7 = vadd.f32 %v1335_v63, %v676_v59  ;;  %v678_v8 = vmul.f32 %v1330_v62, %v655_v55 }
 0x10d   : > { %v742_v33 = vadd.f32 %v1073_v14, %v694_v24  ;;  %v757_v37 = vmax.f32 %v741_v28, 0.0  ;;  %v1088_v9 = vunpack.c.l.bf16 %v1102_v56  ;;  %v700_v12 = vadd.f32 %v1335_v63, %v677_v2  ;;  %v1104_v24 = vld [vmem:[%s1470_s4 + $0x38] sm:$0xff]  }
 0x10e   : > { %v651_v17 = vld [vmem:[#allocation2 + $0x30] sm:$0xff]  ;;  %v740_v27 = vadd.f32 %v1069_v6, %v692_v18  ;;  %v755_v32 = vmax.f32 %v739_v23, 0.0  ;;  %v679_v13 = vmul.f32 %v1330_v62, %v656_v61  ;;  %v1089_v14 = vunpack.c.h.bf16 %v1102_v56 }
 0x10f   : > { %v649_v10 = vld [vmem:[#allocation2 + $0x20] sm:$0xff]  ;;  %v674_v30 = vmul.f32 %v1330_v62, %v651_v17  ;;  %v758_v41 = vmax.f32 %v742_v33, 0.0  ;;  %v1052_v47 = vpack.c.bf16 %v757_v37, %v757_v37  ;;  %v747_v15 = vadd.f32 %v1084_v60, %v699_v7  ;;  %v659_v19 = vld [vmem:[#allocation2 + $0x70] sm:$0xff] }
 0x110   : > { %v672_v20 = vmul.f32 %v1330_v62, %v649_v10  ;;  %v652_v31 = vld [vmem:[#allocation2 + $0x38] sm:$0xff]  ;;  %v756_v36 = vmax.f32 %v740_v27, 0.0  ;;  %v1050_v40 = vpack.c.bf16 %v755_v32, %v755_v32  ;;  %v657_v4 = vld [vmem:[#allocation2 + $0x60] sm:$0xff]  ;;  %v1092_v18 = vunpack.c.l.bf16 %v1103_v5 }
 0x111   : > { %v650_v16 = vld [vmem:[#allocation2 + $0x28] sm:$0xff]  ;;  %v697_v39 = vadd.f32 %v1335_v63, %v674_v30  ;;  %v675_v43 = vmul.f32 %v1330_v62, %v652_v31  ;;  %v1053_v51 = vpack.c.bf16 %v758_v41, %v758_v41  ;;  %838 = vst.msk [vmem:[%s1471_s5 + $0x8] sm:$0xf] %vm835_vm2, %v1052_v47  ;;  %v680_v17 = vmul.f32 %v1330_v62, %v657_v4  ;;  %v660_v33 = vld [vmem:[#allocation2 + $0x78] sm:$0xff] }
 0x112   : > { %v673_v25 = vmul.f32 %v1330_v62, %v650_v16  ;;  %v695_v29 = vadd.f32 %v1335_v63, %v672_v20  ;;  %v1051_v46 = vpack.c.bf16 %v756_v36, %v756_v36  ;;  %836 = vst.msk [vmem:[%s1471_s5] sm:$0xf] %vm835_vm2, %v1050_v40  ;;  %v658_v10 = vld [vmem:[#allocation2 + $0x68] sm:$0xff]  ;;  %v701_v16 = vadd.f32 %v1335_v63, %v678_v8 }
 0x113   : > { %v745_v49 = vadd.f32 %v1080_v35, %v697_v39  ;;  %v698_v53 = vadd.f32 %v1335_v63, %v675_v43  ;;  %839 = vst.msk [vmem:[%s1471_s5 + $0xc] sm:$0xf] %vm835_vm2, %v1053_v51  ;;  %v702_v22 = vadd.f32 %v1335_v63, %v679_v13  ;;  %v681_v23 = vmul.f32 %v1330_v62, %v658_v10 }
 0x114   : > { %v696_v34 = vadd.f32 %v1335_v63, %v673_v25  ;;  %v743_v38 = vadd.f32 %v1076_v21, %v695_v29  ;;  %837 = vst.msk [vmem:[%s1471_s5 + $0x4] sm:$0xf] %vm835_vm2, %v1051_v46  ;;  %v748_v21 = vadd.f32 %v1085_v3, %v700_v12  ;;  %v763_v25 = vmax.f32 %v747_v15, 0.0 }
 0x115   : > { %v761_v58 = vmax.f32 %v745_v49, 0.0  ;;  %v746_v1 = vadd.f32 %v1081_v54, %v698_v53  ;;  %v703_v27 = vadd.f32 %v1335_v63, %v680_v17  ;;  %v1093_v28 = vunpack.c.h.bf16 %v1103_v5 }
 0x116   : > { %v744_v42 = vadd.f32 %v1077_v26, %v696_v34  ;;  %v759_v48 = vmax.f32 %v743_v38, 0.0  ;;  %v749_v26 = vadd.f32 %v1088_v9, %v701_v16  ;;  %v764_v29 = vmax.f32 %v748_v21, 0.0 }
 0x117   : > { %v1056_v6 = vpack.c.bf16 %v761_v58, %v761_v58  ;;  %v762_v11 = vmax.f32 %v746_v1, 0.0  ;;  %v750_v30 = vadd.f32 %v1089_v14, %v702_v22  ;;  %v704_v31 = vadd.f32 %v1335_v63, %v681_v23 }
 0x118   : > { %v760_v52 = vmax.f32 %v744_v42, 0.0  ;;  %v1054_v57 = vpack.c.bf16 %v759_v48, %v759_v48  ;;  %v682_v32 = vmul.f32 %v1330_v62, %v659_v19  ;;  %v1058_v34 = vpack.c.bf16 %v763_v25, %v763_v25 }
 0x119   : > { %842 = vst.msk [vmem:[%s1471_s5 + $0x18] sm:$0xf] %vm835_vm2, %v1056_v6  ;;  %v1057_v20 = vpack.c.bf16 %v762_v11, %v762_v11  ;;  %v765_v35 = vmax.f32 %v749_v26, 0.0  ;;  %v751_v36 = vadd.f32 %v1092_v18, %v703_v27  ;;  %v1096_v37 = vunpack.c.l.bf16 %v1104_v24 }
 0x11a   : > { %v1055_v0 = vpack.c.bf16 %v760_v52, %v760_v52  ;;  %840 = vst.msk [vmem:[%s1471_s5 + $0x10] sm:$0xf] %vm835_vm2, %v1054_v57  ;;  %v1059_v38 = vpack.c.bf16 %v764_v29, %v764_v29  ;;  %v766_v39 = vmax.f32 %v750_v30, 0.0  ;;  %v752_v40 = vadd.f32 %v1093_v28, %v704_v31  ;;  %844 = vst.msk [vmem:[%s1471_s5 + $0x20] sm:$0xf] %vm835_vm2, %v1058_v34 }
 0x11b   : > { %843 = vst.msk [vmem:[%s1471_s5 + $0x1c] sm:$0xf] %vm835_vm2, %v1057_v20  ;;  %v705_v41 = vadd.f32 %v1335_v63, %v682_v32  ;;  %v1060_v42 = vpack.c.bf16 %v765_v35, %v765_v35  ;;  %v767_v43 = vmax.f32 %v751_v36, 0.0  ;;  %v683_v44 = vmul.f32 %v1330_v62, %v660_v33 }
 0x11c   : > { %841 = vst.msk [vmem:[%s1471_s5 + $0x14] sm:$0xf] %vm835_vm2, %v1055_v0  ;;  %v1097_v45 = vunpack.c.h.bf16 %v1104_v24  ;;  %845 = vst.msk [vmem:[%s1471_s5 + $0x24] sm:$0xf] %vm835_vm2, %v1059_v38  ;;  %v1061_v46 = vpack.c.bf16 %v766_v39, %v766_v39  ;;  %v768_v47 = vmax.f32 %v752_v40, 0.0 }
 0x11d   : > { %v753_v48 = vadd.f32 %v1096_v37, %v705_v41  ;;  %846 = vst.msk [vmem:[%s1471_s5 + $0x28] sm:$0xf] %vm835_vm2, %v1060_v42  ;;  %v1062_v49 = vpack.c.bf16 %v767_v43, %v767_v43  ;;  %v706_v50 = vadd.f32 %v1335_v63, %v683_v44 }
 0x11e   : > { %847 = vst.msk [vmem:[%s1471_s5 + $0x2c] sm:$0xf] %vm835_vm2, %v1061_v46  ;;  %v1063_v62 = vpack.c.bf16 %v768_v47, %v768_v47 }
 0x11f   : > { %v769_v51 = vmax.f32 %v753_v48, 0.0  ;;  %848 = vst.msk [vmem:[%s1471_s5 + $0x30] sm:$0xf] %vm835_vm2, %v1062_v49  ;;  %v754_v52 = vadd.f32 %v1097_v45, %v706_v50 }
 0x120   : > { %849 = vst.msk [vmem:[%s1471_s5 + $0x34] sm:$0xf] %vm835_vm2, %v1063_v62 }
 0x121   : > { %v1064_v53 = vpack.c.bf16 %v769_v51, %v769_v51  ;;  %v770_v63 = vmax.f32 %v754_v52, 0.0 }
 0x123   : > { %850 = vst.msk [vmem:[%s1471_s5 + $0x38] sm:$0xf] %vm835_vm2, %v1064_v53  ;;  %v1065_v54 = vpack.c.bf16 %v770_v63, %v770_v63 }
 0x125   : > { %851 = vst.msk [vmem:[%s1471_s5 + $0x3c] sm:$0xf] %vm835_vm2, %v1065_v54 }
 0x126 PF: > { %s15_s20 = sadd.s32 1, %s1208_s20   ;;  %s1472_s18 = smov %s1204_s19 }
 0x127   : > { %p12_p7 = scmp.ge.s32.totalorder %s15_s20, 11   ;;  %s1473_s19 = smov %s1475_s21 }
 0x129   :  { %14 = sbr.rel (!%p12_p7) target bundleno = 2 (0x2), region = 90 }

// kernel: _lambda_.28
= control target key start
LH: loop header
LB: loop body
LE: loop exit
PB: predicated region body
PF: predicated region fallthrough
CT: control target
= control target key end

     0   :  { %s747_s15 = smov 0   ;;  %s749_s16 = smov 0   ;;  %s798_s0 = inlined_call_operand.vmem [shape: bf16[9,32,64], index: 0, kind: input, shape index: {}]   ;;  %s799_s1 = inlined_call_operand.vmem [shape: bf16[9,64,128], index: 1, kind: input, shape index: {}]   ;;  %s800_s2 = inlined_call_operand.vmem [shape: f32[1,128], index: 2, kind: input, shape index: {}]   ;;  %s801_s3 = inlined_call_operand.vmem [shape: f32[1,128], index: 3, kind: input, shape index: {}]   ;;  %s802_s4 = inlined_call_operand.vmem [shape: bf16[32,128], index: 4, kind: output, shape index: {}]  }
   0x1   :  { %s751_s17 = smov 0  }
   0x2 LB: > { %s26_s18 = sadd.s32 1, %s715_s16  ;;  %p606_p0 = scmp.ge.s32.totalorder %s719_s17, 1  ;;  %s719_s17 = sphi %s751_s17, %s14_s17   ;;  %s715_s16 = sphi %s749_s16, %s804_s16   ;;  %s711_s15 = sphi %s747_s15, %s803_s15  }
   0x3   : > { %p27_p1 = scmp.ge.s32.totalorder %s26_s18, 9  ;;  %p221_p2 = scmp.lt.s32.totalorder %s719_s17, 10 }
   0x5   : > { %s806_s18 = smov (%p27_p1, %s26_s18), 0  ;;  %p222_p3 = pnand %p606_p0, %p221_p2 }
   0x6   : > { %p269_p4 = scmp.lt.s32.totalorder (!%p222_p3), %s711_s15, 8  ;;  %p611_p5 = scmp.ne.s32.totalorder (!%p222_p3), %s711_s15, 0 }
   0x7   : > { %225 = sbr.rel (%p222_p3) target bundleno = 273 (0x111), region = 36 }
   0xe   : > { %s270_s19 = scalar_select %p269_p4, %s711_s15, 8 }
   0xf   : > { %305 = sbr.rel (%p611_p5) target bundleno = 22 (0x16), region = 40  ;;  %v721_v0 = vmov (!%p611_p5), 0.0  }
  0x10   : > { %s631_s20 = sshll.u32 %s270_s19, 4  ;;  %s632_s21 = sshll.u32 %s270_s19, 5  ;;  %306 = vst [vmem:[#allocation2] sm:$0xff] (!%p611_p5), %v721_v0  ;;  %307 = vst [vmem:[#allocation2 + $0x8] sm:$0xff] (!%p611_p5), %v721_v0 }
  0x11   : > { %s276_s24 = scalar_lea.vmem %s798_s0, %s631_s20  ;;  %s285_s27 = scalar_lea.vmem %s799_s1, %s632_s21  ;;  %308 = vst [vmem:[#allocation2 + $0x10] sm:$0xff] (!%p611_p5), %v721_v0  ;;  %309 = vst [vmem:[#allocation2 + $0x18] sm:$0xff] (!%p611_p5), %v721_v0 }
  0x16 PF: > { %v691_v1 = vld [vmem:[%s285_s27] sm:$0xff]   ;;  %v692_v2 = vld [vmem:[%s285_s27 + $0x8] sm:$0xff]   ;;  %v693_v3 = vld [vmem:[%s285_s27 + $0x10] sm:$0xff]   ;;  %vm360_vm0 = vcmask 523264   ;;  %p620_p6 = scmp.ne.s32.totalorder %s711_s15, 8 }
  0x17   : > { %654 = vmatprep.subr.bf16.mxu0 %v691_v1  ;;  %v695_v4 = vld [vmem:[%s276_s24] sm:$0xff]   ;;  %v694_v5 = vld [vmem:[%s285_s27 + $0x18] sm:$0xff]   ;;  %v696_v6 = vld [vmem:[%s276_s24 + $0x8] sm:$0xff]  }
  0x18   : > { %655 = vmatpush3.bf16.msra.mxu0 %v691_v1  ;;  %662 = vmatprep.mubr.msk.bf16.mxu0 %vm360_vm0, %v695_v4  ;;  %v312_v7 = vld [vmem:[#allocation2 + $0x10] sm:$0xff]  ;;  %v310_v8 = vld [vmem:[#allocation2] sm:$0xff]  ;;  %v313_v10 = vld [vmem:[#allocation2 + $0x18] sm:$0xff] }
  0x19   : > { %656 = vmatprep.subr.bf16.mxu0 %v692_v2  ;;  %v311_v13 = vld [vmem:[#allocation2 + $0x8] sm:$0xff]  ;;  %v621_v21 = vld [vmem:[%s800_s2] ss:$0 sm:$0xff] (!%p620_p6) }
  0x1a   : > { %v622_v24 = vld [vmem:[%s801_s3] ss:$0 sm:$0xff] (!%p620_p6) }
  0x1c   : > { %657 = vmatpush3.bf16.msra.mxu0 %v692_v2 }
  0x1d   : > { %658 = vmatprep.subr.bf16.mxu0 %v693_v3 }
  0x20   : > { %659 = vmatpush3.bf16.msra.mxu0 %v693_v3 }
  0x21   : > { %660 = vmatprep.subr.bf16.mxu0 %v694_v5 }
  0x24   : > { %661 = vmatpush3.bf16.msra.mxu0 %v694_v5 }
  0x27   : > { %663 = vmatmul.mubr.msk.bf16.vlgmr.msra.gmra.mrb[0].mxu0 %vm360_vm0, %v696_v6 }
  0xfa   : > { %v664_v9 = vpop.f32.mrb[0].mxu0  ;;  %427 = sbr.rel (%p620_p6) target bundleno = 273 (0x111), region = 44 }
  0xfb   : > { %v418_v11 = vadd.f32 %v664_v9, %v312_v7  ;;  %v401_v12 = vpop.f32.mrb[1].mxu0 }
  0xfc   : > { %v416_v14 = vadd.f32 %v401_v12, %v310_v8  ;;  %v665_v15 = vpop.f32.mrb[2].mxu0 }
  0xfd   : > { %422 = vst [vmem:[#allocation2 + $0x10] sm:$0xff] %v418_v11  ;;  %v419_v16 = vadd.f32 %v665_v15, %v313_v10  ;;  %v404_v17 = vpop.f32.mrb[3].mxu0 }
  0xfe   : > { %420 = vst [vmem:[#allocation2] sm:$0xff] %v416_v14  ;;  %v417_v18 = vadd.f32 %v404_v17, %v311_v13 }
  0xff   : > { %423 = vst [vmem:[#allocation2 + $0x18] sm:$0xff] %v419_v16 }
 0x100   : > { %421 = vst [vmem:[#allocation2 + $0x8] sm:$0xff] %v417_v18 }
 0x104   : > { %v430_v25 = vld [vmem:[#allocation2 + $0x10] sm:$0xff] }
 0x105   : > { %v428_v19 = vld [vmem:[#allocation2] sm:$0xff]  ;;  %v441_v27 = vmul.f32 %v621_v21, %v430_v25 }
 0x106   : > { %v439_v22 = vmul.f32 %v621_v21, %v428_v19  ;;  %v431_v26 = vld [vmem:[#allocation2 + $0x18] sm:$0xff] }
 0x107   : > { %v429_v20 = vld [vmem:[#allocation2 + $0x8] sm:$0xff]  ;;  %v442_v28 = vmul.f32 %v621_v21, %v431_v26  ;;  %v452_v31 = vadd.f32 %v622_v24, %v441_v27 }
 0x108   : > { %v440_v23 = vmul.f32 %v621_v21, %v429_v20  ;;  %v450_v29 = vadd.f32 %v622_v24, %v439_v22 }
 0x109   : > { %v453_v32 = vadd.f32 %v622_v24, %v442_v28  ;;  %v456_v35 = vmax.f32 %v452_v31, 0.0 }
 0x10a   : > { %v451_v30 = vadd.f32 %v622_v24, %v440_v23  ;;  %v454_v33 = vmax.f32 %v450_v29, 0.0 }
 0x10b   : > { %v457_v36 = vmax.f32 %v453_v32, 0.0 }
 0x10c   : > { %v455_v34 = vmax.f32 %v451_v30, 0.0 }
 0x10d   : > { %v645_v38 = vpack.c.bf16 %v457_v36, %v456_v35 }
 0x10e   : > { %v640_v37 = vpack.c.bf16 %v455_v34, %v454_v33 }
 0x10f   : > { %647 = vst [vmem:[%s802_s4 + $0x8] sm:$0xff] %v645_v38  }
 0x110   : > { %641 = vst [vmem:[%s802_s4] sm:$0xff] %v640_v37  }
 0x111 PF: > { %s14_s17 = sadd.s32 1, %s719_s17   ;;  %s803_s15 = smov %s715_s16 }
 0x112   : > { %p11_p7 = scmp.ge.s32.totalorder %s14_s17, 11   ;;  %s804_s16 = smov %s806_s18 }
 0x114   :  { %13 = sbr.rel (!%p11_p7) target bundleno = 2 (0x2), region = 83 }

// kernel: _lambda_.29
= control target key start
LH: loop header
LB: loop body
LE: loop exit
PB: predicated region body
PF: predicated region fallthrough
CT: control target
= control target key end

     0   :  { %vm76_vm0 = vcmask 523264   ;;  %s301_s1 = inlined_call_operand.vmem [shape: bf16[1,64,128], index: 1, kind: input, shape index: {}]   ;;  %s302_s0 = inlined_call_operand.vmem [shape: bf16[1,32,64], index: 0, kind: input, shape index: {}]   ;;  %s303_s2 = inlined_call_operand.vmem [shape: f32[1,128], index: 2, kind: input, shape index: {}]   ;;  %s304_s3 = inlined_call_operand.vmem [shape: f32[1,128], index: 3, kind: input, shape index: {}]   ;;  %s305_s4 = inlined_call_operand.vmem [shape: bf16[32,128], index: 4, kind: output, shape index: {}]  }
   0x1   :  { %v240_v0 = vld [vmem:[%s301_s1] sm:$0xff]   ;;  %v241_v1 = vld [vmem:[%s301_s1 + $0x8] sm:$0xff]   ;;  %v242_v2 = vld [vmem:[%s301_s1 + $0x10] sm:$0xff]  }
   0x2   :  { %228 = vmatprep.subr.bf16.mxu0 %v240_v0  ;;  %v244_v3 = vld [vmem:[%s302_s0] sm:$0xff]   ;;  %v243_v4 = vld [vmem:[%s301_s1 + $0x18] sm:$0xff]   ;;  %v245_v5 = vld [vmem:[%s302_s0 + $0x8] sm:$0xff]  }
   0x3   :  { %229 = vmatpush3.bf16.msra.mxu0 %v240_v0  ;;  %236 = vmatprep.mubr.msk.bf16.mxu0 %vm76_vm0, %v244_v3  ;;  %v201_v6 = vld [vmem:[%s303_s2] ss:$0 sm:$0xff] }
   0x4   :  { %230 = vmatprep.subr.bf16.mxu0 %v241_v1  ;;  %v202_v10 = vld [vmem:[%s304_s3] ss:$0 sm:$0xff] }
   0x7   :  { %231 = vmatpush3.bf16.msra.mxu0 %v241_v1 }
   0x8   :  { %232 = vmatprep.subr.bf16.mxu0 %v242_v2 }
   0xb   :  { %233 = vmatpush3.bf16.msra.mxu0 %v242_v2 }
   0xc   :  { %234 = vmatprep.subr.bf16.mxu0 %v243_v4 }
   0xf   :  { %235 = vmatpush3.bf16.msra.mxu0 %v243_v4 }
  0x12   :  { %237 = vmatmul.mubr.msk.bf16.vlgmr.msra.gmra.mrb[0].mxu0 %vm76_vm0, %v245_v5 }
  0xe5   :  { %v238_v7 = vpop.f32.mrb[0].mxu0 }
  0xe6   :  { %v156_v8 = vmul.f32 %v238_v7, %v201_v6  ;;  %v117_v9 = vpop.f32.mrb[1].mxu0 }
  0xe7   :  { %v154_v11 = vmul.f32 %v201_v6, %v117_v9  ;;  %v239_v12 = vpop.f32.mrb[2].mxu0 }
  0xe8   :  { %v157_v13 = vmul.f32 %v239_v12, %v201_v6  ;;  %v120_v14 = vpop.f32.mrb[3].mxu0  ;;  %v167_v16 = vadd.f32 %v202_v10, %v156_v8 }
  0xe9   :  { %v155_v15 = vmul.f32 %v201_v6, %v120_v14  ;;  %v165_v18 = vadd.f32 %v202_v10, %v154_v11 }
  0xea   :  { %v168_v17 = vadd.f32 %v202_v10, %v157_v13 }
  0xeb   :  { %v166_v19 = vadd.f32 %v202_v10, %v155_v15 }
  0xec   :  { %v219_v20 = vpack.c.bf16 %v168_v17, %v167_v16 }
  0xed   :  { %v214_v21 = vpack.c.bf16 %v166_v19, %v165_v18 }
  0xee   :  { %221 = vst [vmem:[%s305_s4 + $0x8] sm:$0xff] %v219_v20  }
  0xef   :  { %215 = vst [vmem:[%s305_s4] sm:$0xff] %v214_v21  }

// kernel: _lambda_.30
= control target key start
LH: loop header
LB: loop body
LE: loop exit
PB: predicated region body
PF: predicated region fallthrough
CT: control target
= control target key end

     0   :  { %s897_s18 = smov 0   ;;  %s899_s19 = smov 0   ;;  %s968_s0 = inlined_call_operand.vmem [shape: bf16[9,32,128], index: 0, kind: input, shape index: {}]   ;;  %s969_s1 = inlined_call_operand.vmem [shape: bf16[9,128,128], index: 1, kind: input, shape index: {}]   ;;  %s970_s2 = inlined_call_operand.vmem [shape: f32[1,128], index: 2, kind: input, shape index: {}]   ;;  %s971_s3 = inlined_call_operand.vmem [shape: f32[1,128], index: 3, kind: input, shape index: {}]   ;;  %s972_s4 = inlined_call_operand.vmem [shape: bf16[32,128], index: 4, kind: input, shape index: {}]   ;;  %s973_s5 = inlined_call_operand.vmem [shape: bf16[32,128], index: 5, kind: output, shape index: {}]  }
   0x1   :  { %s901_s20 = smov 0  }
   0x2 LB: > { %s27_s21 = sadd.s32 1, %s860_s19  ;;  %p724_p0 = scmp.ge.s32.totalorder %s864_s20, 1  ;;  %s864_s20 = sphi %s901_s20, %s15_s20   ;;  %s860_s19 = sphi %s899_s19, %s975_s19   ;;  %s856_s18 = sphi %s897_s18, %s974_s18  }
   0x3   : > { %p28_p1 = scmp.ge.s32.totalorder %s27_s21, 9  ;;  %p262_p2 = scmp.lt.s32.totalorder %s864_s20, 10 }
   0x5   : > { %s977_s21 = smov (%p28_p1, %s27_s21), 0  ;;  %p263_p3 = pnand %p724_p0, %p262_p2 }
   0x6   : > { %p320_p4 = scmp.lt.s32.totalorder (!%p263_p3), %s856_s18, 8  ;;  %p729_p5 = scmp.ne.s32.totalorder (!%p263_p3), %s856_s18, 0 }
   0x7   : > { %266 = sbr.rel (%p263_p3) target bundleno = 291 (0x123), region = 40 }
   0xe   : > { %s321_s22 = scalar_select %p320_p4, %s856_s18, 8 }
   0xf   : > { %365 = sbr.rel (%p729_p5) target bundleno = 22 (0x16), region = 44  ;;  %v866_v0 = vmov (!%p729_p5), 0.0  }
  0x10   : > { %s751_s23 = sshll.u32 %s321_s22, 4  ;;  %s752_s24 = sshll.u32 %s321_s22, 6  ;;  %366 = vst [vmem:[#allocation2] sm:$0xff] (!%p729_p5), %v866_v0  ;;  %367 = vst [vmem:[#allocation2 + $0x8] sm:$0xff] (!%p729_p5), %v866_v0 }
  0x11   : > { %s922_s27 = scalar_lea.vmem %s968_s0, %s751_s23  ;;  %s927_s30 = scalar_lea.vmem %s969_s1, %s752_s24  ;;  %368 = vst [vmem:[#allocation2 + $0x10] sm:$0xff] (!%p729_p5), %v866_v0  ;;  %369 = vst [vmem:[#allocation2 + $0x18] sm:$0xff] (!%p729_p5), %v866_v0 }
  0x16 PF: > { %v832_v1 = vld [vmem:[%s927_s30] sm:$0xff]   ;;  %v833_v2 = vld [vmem:[%s927_s30 + $0x8] sm:$0xff]   ;;  %v834_v3 = vld [vmem:[%s927_s30 + $0x10] sm:$0xff]   ;;  %p740_p6 = scmp.ne.s32.totalorder %s856_s18, 8 }
  0x17   : > { %787 = vmatprep.subr.bf16.mxu0 %v832_v1  ;;  %v835_v4 = vld [vmem:[%s927_s30 + $0x18] sm:$0xff]   ;;  %v840_v5 = vld [vmem:[%s922_s27] sm:$0xff]   ;;  %v837_v7 = vld [vmem:[%s927_s30 + $0x28] sm:$0xff]  }
  0x18   : > { %788 = vmatpush3.bf16.msra.mxu0 %v832_v1  ;;  %803 = vmatprep.mubr.bf16.mxu0 %v840_v5  ;;  %v836_v6 = vld [vmem:[%s927_s30 + $0x20] sm:$0xff]   ;;  %v838_v8 = vld [vmem:[%s927_s30 + $0x30] sm:$0xff]   ;;  %v839_v9 = vld [vmem:[%s927_s30 + $0x38] sm:$0xff]  }
  0x19   : > { %789 = vmatprep.subr.bf16.mxu0 %v833_v2  ;;  %v841_v10 = vld [vmem:[%s922_s27 + $0x8] sm:$0xff]   ;;  %v372_v11 = vld [vmem:[#allocation2 + $0x10] sm:$0xff]  ;;  %v370_v12 = vld [vmem:[#allocation2] sm:$0xff] }
  0x1a   : > { %v373_v14 = vld [vmem:[#allocation2 + $0x18] sm:$0xff]  ;;  %v371_v17 = vld [vmem:[#allocation2 + $0x8] sm:$0xff]  ;;  %v741_v25 = vld [vmem:[%s970_s2] ss:$0 sm:$0xff] (!%p740_p6) }
  0x1b   : > { %v742_v28 = vld [vmem:[%s971_s3] ss:$0 sm:$0xff] (!%p740_p6)  ;;  %v775_v35 = vld [vmem:[%s972_s4 + $0x8] sm:$0xff] (!%p740_p6)  }
  0x1c   : > { %790 = vmatpush3.bf16.msra.mxu0 %v833_v2  ;;  %v758_v29 = vld [vmem:[%s972_s4] sm:$0xff] (!%p740_p6)   ;;  %v763_v39 = vunpack.c.l.bf16 (!%p740_p6), %v775_v35  ;;  %v764_v41 = vunpack.c.h.bf16 (!%p740_p6), %v775_v35 }
  0x1d   : > { %791 = vmatprep.subr.bf16.mxu0 %v834_v3  ;;  %v759_v31 = vunpack.c.l.bf16 (!%p740_p6), %v758_v29  ;;  %v760_v32 = vunpack.c.h.bf16 (!%p740_p6), %v758_v29 }
  0x20   : > { %792 = vmatpush3.bf16.msra.mxu0 %v834_v3 }
  0x21   : > { %793 = vmatprep.subr.bf16.mxu0 %v835_v4 }
  0x24   : > { %794 = vmatpush3.bf16.msra.mxu0 %v835_v4 }
  0x25   : > { %795 = vmatprep.subr.bf16.mxu0 %v836_v6 }
  0x28   : > { %796 = vmatpush3.bf16.msra.mxu0 %v836_v6 }
  0x29   : > { %797 = vmatprep.subr.bf16.mxu0 %v837_v7 }
  0x2c   : > { %798 = vmatpush3.bf16.msra.mxu0 %v837_v7 }
  0x2d   : > { %799 = vmatprep.subr.bf16.mxu0 %v838_v8 }
  0x30   : > { %800 = vmatpush3.bf16.msra.mxu0 %v838_v8 }
  0x31   : > { %801 = vmatprep.subr.bf16.mxu0 %v839_v9 }
  0x34   : > { %802 = vmatpush3.bf16.msra.mxu0 %v839_v9 }
  0x37   : > { %804 = vmatmul.mubr.bf16.vlgmr.msra.gmra.mrb[0].mxu0 %v841_v10 }
 0x10a   : > { %v805_v13 = vpop.f32.mrb[0].mxu0  ;;  %514 = sbr.rel (%p740_p6) target bundleno = 291 (0x123), region = 48 }
 0x10b   : > { %v505_v15 = vadd.f32 %v805_v13, %v372_v11  ;;  %v488_v16 = vpop.f32.mrb[1].mxu0 }
 0x10c   : > { %v503_v18 = vadd.f32 %v488_v16, %v370_v12  ;;  %v806_v19 = vpop.f32.mrb[2].mxu0 }
 0x10d   : > { %509 = vst [vmem:[#allocation2 + $0x10] sm:$0xff] %v505_v15  ;;  %v506_v20 = vadd.f32 %v806_v19, %v373_v14  ;;  %v491_v21 = vpop.f32.mrb[3].mxu0 }
 0x10e   : > { %507 = vst [vmem:[#allocation2] sm:$0xff] %v503_v18  ;;  %v504_v22 = vadd.f32 %v491_v21, %v371_v17 }
 0x10f   : > { %510 = vst [vmem:[#allocation2 + $0x18] sm:$0xff] %v506_v20 }
 0x110   : > { %508 = vst [vmem:[#allocation2 + $0x8] sm:$0xff] %v504_v22 }
 0x114   : > { %v517_v30 = vld [vmem:[#allocation2 + $0x10] sm:$0xff] }
 0x115   : > { %v515_v23 = vld [vmem:[#allocation2] sm:$0xff]  ;;  %v528_v34 = vmul.f32 %v741_v25, %v517_v30 }
 0x116   : > { %v526_v26 = vmul.f32 %v741_v25, %v515_v23  ;;  %v518_v33 = vld [vmem:[#allocation2 + $0x18] sm:$0xff] }
 0x117   : > { %v516_v24 = vld [vmem:[#allocation2 + $0x8] sm:$0xff]  ;;  %v529_v38 = vmul.f32 %v741_v25, %v518_v33  ;;  %v539_v40 = vadd.f32 %v742_v28, %v528_v34 }
 0x118   : > { %v527_v27 = vmul.f32 %v741_v25, %v516_v24  ;;  %v537_v36 = vadd.f32 %v742_v28, %v526_v26 }
 0x119   : > { %v540_v44 = vadd.f32 %v742_v28, %v529_v38  ;;  %v551_v45 = vadd.f32 %v763_v39, %v539_v40 }
 0x11a   : > { %v538_v37 = vadd.f32 %v742_v28, %v527_v27  ;;  %v549_v42 = vadd.f32 %v759_v31, %v537_v36 }
 0x11b   : > { %v552_v48 = vadd.f32 %v764_v41, %v540_v44  ;;  %v555_v49 = vmax.f32 %v551_v45, 0.0 }
 0x11c   : > { %v550_v43 = vadd.f32 %v760_v32, %v538_v37  ;;  %v553_v46 = vmax.f32 %v549_v42, 0.0 }
 0x11d   : > { %v556_v51 = vmax.f32 %v552_v48, 0.0 }
 0x11e   : > { %v554_v47 = vmax.f32 %v550_v43, 0.0 }
 0x11f   : > { %v773_v52 = vpack.c.bf16 %v556_v51, %v555_v49 }
 0x120   : > { %v768_v50 = vpack.c.bf16 %v554_v47, %v553_v46 }
 0x121   : > { %776 = vst [vmem:[%s973_s5 + $0x8] sm:$0xff] %v773_v52  }
 0x122   : > { %769 = vst [vmem:[%s973_s5] sm:$0xff] %v768_v50  }
 0x123 PF: > { %s15_s20 = sadd.s32 1, %s864_s20   ;;  %s974_s18 = smov %s860_s19 }
 0x124   : > { %p12_p7 = scmp.ge.s32.totalorder %s15_s20, 11   ;;  %s975_s19 = smov %s977_s21 }
 0x126   :  { %14 = sbr.rel (!%p12_p7) target bundleno = 2 (0x2), region = 90 }

// kernel: _lambda_.31
= control target key start
LH: loop header
LB: loop body
LE: loop exit
PB: predicated region body
PF: predicated region fallthrough
CT: control target
= control target key end

     0   :  { %s792_s15 = smov 0   ;;  %s794_s16 = smov 0   ;;  %s857_s0 = inlined_call_operand.vmem [shape: bf16[9,32,128], index: 0, kind: input, shape index: {}]   ;;  %s858_s1 = inlined_call_operand.vmem [shape: bf16[9,128,128], index: 1, kind: input, shape index: {}]   ;;  %s859_s2 = inlined_call_operand.vmem [shape: f32[1,128], index: 2, kind: input, shape index: {}]   ;;  %s860_s3 = inlined_call_operand.vmem [shape: f32[1,128], index: 3, kind: input, shape index: {}]   ;;  %s861_s4 = inlined_call_operand.vmem [shape: bf16[32,128], index: 4, kind: output, shape index: {}]  }
   0x1   :  { %s796_s17 = smov 0  }
   0x2 LB: > { %s26_s18 = sadd.s32 1, %s760_s16  ;;  %p633_p0 = scmp.ge.s32.totalorder %s764_s17, 1  ;;  %s764_s17 = sphi %s796_s17, %s14_s17   ;;  %s760_s16 = sphi %s794_s16, %s863_s16   ;;  %s756_s15 = sphi %s792_s15, %s862_s15  }
   0x3   : > { %p27_p1 = scmp.ge.s32.totalorder %s26_s18, 9  ;;  %p221_p2 = scmp.lt.s32.totalorder %s764_s17, 10 }
   0x5   : > { %s865_s18 = smov (%p27_p1, %s26_s18), 0  ;;  %p222_p3 = pnand %p633_p0, %p221_p2 }
   0x6   : > { %p269_p4 = scmp.lt.s32.totalorder (!%p222_p3), %s756_s15, 8  ;;  %p638_p5 = scmp.ne.s32.totalorder (!%p222_p3), %s756_s15, 0 }
   0x7   : > { %225 = sbr.rel (%p222_p3) target bundleno = 289 (0x121), region = 36 }
   0xe   : > { %s270_s19 = scalar_select %p269_p4, %s756_s15, 8 }
   0xf   : > { %305 = sbr.rel (%p638_p5) target bundleno = 22 (0x16), region = 40  ;;  %v766_v0 = vmov (!%p638_p5), 0.0  }
  0x10   : > { %s660_s20 = sshll.u32 %s270_s19, 4  ;;  %s661_s21 = sshll.u32 %s270_s19, 6  ;;  %306 = vst [vmem:[#allocation2] sm:$0xff] (!%p638_p5), %v766_v0  ;;  %307 = vst [vmem:[#allocation2 + $0x8] sm:$0xff] (!%p638_p5), %v766_v0 }
  0x11   : > { %s817_s24 = scalar_lea.vmem %s857_s0, %s660_s20  ;;  %s822_s27 = scalar_lea.vmem %s858_s1, %s661_s21  ;;  %308 = vst [vmem:[#allocation2 + $0x10] sm:$0xff] (!%p638_p5), %v766_v0  ;;  %309 = vst [vmem:[#allocation2 + $0x18] sm:$0xff] (!%p638_p5), %v766_v0 }
  0x16 PF: > { %v732_v1 = vld [vmem:[%s822_s27] sm:$0xff]   ;;  %v733_v2 = vld [vmem:[%s822_s27 + $0x8] sm:$0xff]   ;;  %v734_v3 = vld [vmem:[%s822_s27 + $0x10] sm:$0xff]   ;;  %p649_p6 = scmp.ne.s32.totalorder %s756_s15, 8 }
  0x17   : > { %687 = vmatprep.subr.bf16.mxu0 %v732_v1  ;;  %v735_v4 = vld [vmem:[%s822_s27 + $0x18] sm:$0xff]   ;;  %v740_v5 = vld [vmem:[%s817_s24] sm:$0xff]   ;;  %v737_v7 = vld [vmem:[%s822_s27 + $0x28] sm:$0xff]  }
  0x18   : > { %688 = vmatpush3.bf16.msra.mxu0 %v732_v1  ;;  %703 = vmatprep.mubr.bf16.mxu0 %v740_v5  ;;  %v736_v6 = vld [vmem:[%s822_s27 + $0x20] sm:$0xff]   ;;  %v738_v8 = vld [vmem:[%s822_s27 + $0x30] sm:$0xff]   ;;  %v739_v9 = vld [vmem:[%s822_s27 + $0x38] sm:$0xff]  }
  0x19   : > { %689 = vmatprep.subr.bf16.mxu0 %v733_v2  ;;  %v741_v10 = vld [vmem:[%s817_s24 + $0x8] sm:$0xff]   ;;  %v312_v11 = vld [vmem:[#allocation2 + $0x10] sm:$0xff]  ;;  %v310_v12 = vld [vmem:[#allocation2] sm:$0xff] }
  0x1a   : > { %v313_v14 = vld [vmem:[#allocation2 + $0x18] sm:$0xff]  ;;  %v311_v17 = vld [vmem:[#allocation2 + $0x8] sm:$0xff]  ;;  %v650_v25 = vld [vmem:[%s859_s2] ss:$0 sm:$0xff] (!%p649_p6) }
  0x1b   : > { %v651_v28 = vld [vmem:[%s860_s3] ss:$0 sm:$0xff] (!%p649_p6) }
  0x1c   : > { %690 = vmatpush3.bf16.msra.mxu0 %v733_v2 }
  0x1d   : > { %691 = vmatprep.subr.bf16.mxu0 %v734_v3 }
  0x20   : > { %692 = vmatpush3.bf16.msra.mxu0 %v734_v3 }
  0x21   : > { %693 = vmatprep.subr.bf16.mxu0 %v735_v4 }
  0x24   : > { %694 = vmatpush3.bf16.msra.mxu0 %v735_v4 }
  0x25   : > { %695 = vmatprep.subr.bf16.mxu0 %v736_v6 }
  0x28   : > { %696 = vmatpush3.bf16.msra.mxu0 %v736_v6 }
  0x29   : > { %697 = vmatprep.subr.bf16.mxu0 %v737_v7 }
  0x2c   : > { %698 = vmatpush3.bf16.msra.mxu0 %v737_v7 }
  0x2d   : > { %699 = vmatprep.subr.bf16.mxu0 %v738_v8 }
  0x30   : > { %700 = vmatpush3.bf16.msra.mxu0 %v738_v8 }
  0x31   : > { %701 = vmatprep.subr.bf16.mxu0 %v739_v9 }
  0x34   : > { %702 = vmatpush3.bf16.msra.mxu0 %v739_v9 }
  0x37   : > { %704 = vmatmul.mubr.bf16.vlgmr.msra.gmra.mrb[0].mxu0 %v741_v10 }
 0x10a   : > { %v705_v13 = vpop.f32.mrb[0].mxu0  ;;  %454 = sbr.rel (%p649_p6) target bundleno = 289 (0x121), region = 44 }
 0x10b   : > { %v445_v15 = vadd.f32 %v705_v13, %v312_v11  ;;  %v428_v16 = vpop.f32.mrb[1].mxu0 }
 0x10c   : > { %v443_v18 = vadd.f32 %v428_v16, %v310_v12  ;;  %v706_v19 = vpop.f32.mrb[2].mxu0 }
 0x10d   : > { %449 = vst [vmem:[#allocation2 + $0x10] sm:$0xff] %v445_v15  ;;  %v446_v20 = vadd.f32 %v706_v19, %v313_v14  ;;  %v431_v21 = vpop.f32.mrb[3].mxu0 }
 0x10e   : > { %447 = vst [vmem:[#allocation2] sm:$0xff] %v443_v18  ;;  %v444_v22 = vadd.f32 %v431_v21, %v311_v17 }
 0x10f   : > { %450 = vst [vmem:[#allocation2 + $0x18] sm:$0xff] %v446_v20 }
 0x110   : > { %448 = vst [vmem:[#allocation2 + $0x8] sm:$0xff] %v444_v22 }
 0x114   : > { %v457_v29 = vld [vmem:[#allocation2 + $0x10] sm:$0xff] }
 0x115   : > { %v455_v23 = vld [vmem:[#allocation2] sm:$0xff]  ;;  %v468_v31 = vmul.f32 %v650_v25, %v457_v29 }
 0x116   : > { %v466_v26 = vmul.f32 %v650_v25, %v455_v23  ;;  %v458_v30 = vld [vmem:[#allocation2 + $0x18] sm:$0xff] }
 0x117   : > { %v456_v24 = vld [vmem:[#allocation2 + $0x8] sm:$0xff]  ;;  %v469_v32 = vmul.f32 %v650_v25, %v458_v30  ;;  %v479_v35 = vadd.f32 %v651_v28, %v468_v31 }
 0x118   : > { %v467_v27 = vmul.f32 %v650_v25, %v456_v24  ;;  %v477_v33 = vadd.f32 %v651_v28, %v466_v26 }
 0x119   : > { %v480_v36 = vadd.f32 %v651_v28, %v469_v32  ;;  %v483_v39 = vmax.f32 %v479_v35, 0.0 }
 0x11a   : > { %v478_v34 = vadd.f32 %v651_v28, %v467_v27  ;;  %v481_v37 = vmax.f32 %v477_v33, 0.0 }
 0x11b   : > { %v484_v40 = vmax.f32 %v480_v36, 0.0 }
 0x11c   : > { %v482_v38 = vmax.f32 %v478_v34, 0.0 }
 0x11d   : > { %v674_v42 = vpack.c.bf16 %v484_v40, %v483_v39 }
 0x11e   : > { %v669_v41 = vpack.c.bf16 %v482_v38, %v481_v37 }
 0x11f   : > { %676 = vst [vmem:[%s861_s4 + $0x8] sm:$0xff] %v674_v42  }
 0x120   : > { %670 = vst [vmem:[%s861_s4] sm:$0xff] %v669_v41  }
 0x121 PF: > { %s14_s17 = sadd.s32 1, %s764_s17   ;;  %s862_s15 = smov %s760_s16 }
 0x122   : > { %p11_p7 = scmp.ge.s32.totalorder %s14_s17, 11   ;;  %s863_s16 = smov %s865_s18 }
 0x124   :  { %13 = sbr.rel (!%p11_p7) target bundleno = 2 (0x2), region = 83 }

// kernel: _lambda_.33
= control target key start
LH: loop header
LB: loop body
LE: loop exit
PB: predicated region body
PF: predicated region fallthrough
CT: control target
= control target key end

     0   :  { %s767_s15 = smov 0   ;;  %s769_s16 = smov 0   ;;  %s836_s0 = inlined_call_operand.vmem [shape: bf16[9,8,128], index: 0, kind: input, shape index: {}]   ;;  %s837_s1 = inlined_call_operand.vmem [shape: bf16[9,128,256], index: 1, kind: input, shape index: {}]   ;;  %s838_s2 = inlined_call_operand.vmem [shape: f32[1,256], index: 2, kind: input, shape index: {}]   ;;  %s839_s3 = inlined_call_operand.vmem [shape: f32[1,256], index: 3, kind: input, shape index: {}]   ;;  %s840_s4 = inlined_call_operand.vmem [shape: bf16[8,256], index: 4, kind: output, shape index: {}]  }
   0x1   :  { %s771_s17 = smov 0  }
   0x2 LB: > { %s26_s18 = sadd.s32 1, %s734_s16  ;;  %p637_p0 = scmp.ge.s32.totalorder %s738_s17, 1  ;;  %s738_s17 = sphi %s771_s17, %s14_s17   ;;  %s734_s16 = sphi %s769_s16, %s842_s16   ;;  %s730_s15 = sphi %s767_s15, %s841_s15  }
   0x3   : > { %p27_p1 = scmp.ge.s32.totalorder %s26_s18, 9  ;;  %p224_p2 = scmp.lt.s32.totalorder %s738_s17, 10 }
   0x5   : > { %s844_s18 = smov (%p27_p1, %s26_s18), 0  ;;  %p225_p3 = pnand %p637_p0, %p224_p2 }
   0x6   : > { %p273_p4 = scmp.lt.s32.totalorder (!%p225_p3), %s730_s15, 8  ;;  %p641_p5 = scmp.ne.s32.totalorder (!%p225_p3), %s730_s15, 0 }
   0x7   : > { %228 = sbr.rel (%p225_p3) target bundleno = 287 (0x11f), region = 36 }
   0xe   : > { %s274_s19 = scalar_select %p273_p4, %s730_s15, 8 }
   0xf   : > { %314 = sbr.rel (%p641_p5) target bundleno = 22 (0x16), region = 40  ;;  %v740_v0 = vmov (!%p641_p5), 0.0  }
  0x10   : > { %s638_s20 = sshll.u32 %s274_s19, 2  ;;  %s664_s21 = sshll.u32 %s274_s19, 7  ;;  %315 = vst [vmem:[#allocation2] sm:$0xff] (!%p641_p5), %v740_v0  ;;  %316 = vst [vmem:[#allocation2 + $0x8] sm:$0xff] (!%p641_p5), %v740_v0 }
  0x11   : > { %s792_s24 = scalar_lea.vmem %s836_s0, %s638_s20  ;;  %s797_s27 = scalar_lea.vmem %s837_s1, %s664_s21 }
  0x16 PF: > { %v692_v1 = vld [vmem:[%s797_s27 + $0x4] ss:$8 sps:$4 sm:$0xff]   ;;  %v694_v2 = vld [vmem:[%s797_s27] ss:$8 sps:$4 sm:$0xff]   ;;  %v741_v3 = vmov 0   ;;  %p658_p6 = scmp.ne.s32.totalorder %s730_s15, 8 }
  0x17   : > { %448 = vmatprep.mubr.bf16.mxu0 %v741_v3  ;;  %416 = vmatprep.subr.bf16.mxu0 %v692_v1  ;;  %v695_v4 = vld [vmem:[%s797_s27 + $0x14] ss:$8 sps:$4 sm:$0xff]   ;;  %v697_v5 = vld [vmem:[%s797_s27 + $0x10] ss:$8 sps:$4 sm:$0xff]   ;;  %v698_v6 = vld [vmem:[%s797_s27 + $0x24] ss:$8 sps:$4 sm:$0xff]   ;;  %v469_v27 = vlaneseq (!%p658_p6) }
  0x18   : > { %417 = vmatpush1.bf16.msra.mxu0 %v694_v2  ;;  %v700_v7 = vld [vmem:[%s797_s27 + $0x20] ss:$8 sps:$4 sm:$0xff]   ;;  %v701_v8 = vld [vmem:[%s797_s27 + $0x34] ss:$8 sps:$4 sm:$0xff]   ;;  %v703_v9 = vld [vmem:[%s797_s27 + $0x30] ss:$8 sps:$4 sm:$0xff]  }
  0x19   : > { %418 = vmatprep.subr.bf16.mxu0 %v695_v4  ;;  %v704_v10 = vld [vmem:[%s797_s27 + $0x44] ss:$8 sps:$4 sm:$0xff]   ;;  %v706_v11 = vld [vmem:[%s797_s27 + $0x40] ss:$8 sps:$4 sm:$0xff]   ;;  %v707_v12 = vld [vmem:[%s797_s27 + $0x54] ss:$8 sps:$4 sm:$0xff]  }
  0x1a   : > { %v709_v13 = vld [vmem:[%s797_s27 + $0x50] ss:$8 sps:$4 sm:$0xff]   ;;  %v710_v14 = vld [vmem:[%s797_s27 + $0x64] ss:$8 sps:$4 sm:$0xff]   ;;  %v712_v15 = vld [vmem:[%s797_s27 + $0x60] ss:$8 sps:$4 sm:$0xff]  }
  0x1b   : > { %v713_v16 = vld [vmem:[%s797_s27 + $0x74] ss:$8 sps:$4 sm:$0xff]   ;;  %v715_v17 = vld [vmem:[%s797_s27 + $0x70] ss:$8 sps:$4 sm:$0xff]   ;;  %v319_v18 = vld [vmem:[%s792_s24] sm:$0xf] }
  0x1c   : > { %419 = vmatpush1.bf16.msra.mxu0 %v697_v5  ;;  %v317_v19 = vld [vmem:[#allocation2] sm:$0xff]  ;;  %v318_v20 = vld [vmem:[#allocation2 + $0x8] sm:$0xff]  ;;  %v470_v28 = vshrl.u32 (!%p658_p6), %v469_v27, 7 }
  0x1d   : > { %420 = vmatprep.subr.bf16.mxu0 %v698_v6  ;;  %v467_v29 = vld [vmem:[%s838_s2] sm:$0x3] (!%p658_p6) }
  0x1e   : > { %v481_v30 = vld [vmem:[%s839_s3] sm:$0x3] (!%p658_p6)  ;;  %v471_v31 = vsub.s32 (!%p658_p6), 0, %v470_v28  ;;  %v475_v32 = vsub.s32 (!%p658_p6), 1, %v470_v28 }
  0x20   : > { %421 = vmatpush1.bf16.msra.mxu0 %v700_v7  ;;  %v472_v35 = vrot.slane (!%p658_p6), %v467_v29, %v471_v31  ;;  %v476_v36 = vrot.slane (!%p658_p6), %v467_v29, %v475_v32  ;;  %v486_v37 = vrot.slane (!%p658_p6), %v481_v30, %v471_v31  ;;  %v490_v38 = vrot.slane (!%p658_p6), %v481_v30, %v475_v32 }
  0x21   : > { %422 = vmatprep.subr.bf16.mxu0 %v701_v8 }
  0x24   : > { %423 = vmatpush1.bf16.msra.mxu0 %v703_v9 }
  0x25   : > { %424 = vmatprep.subr.bf16.mxu0 %v704_v10 }
  0x28   : > { %425 = vmatpush1.bf16.msra.mxu0 %v706_v11 }
  0x29   : > { %426 = vmatprep.subr.bf16.mxu0 %v707_v12 }
  0x2c   : > { %427 = vmatpush1.bf16.msra.mxu0 %v709_v13 }
  0x2d   : > { %428 = vmatprep.subr.bf16.mxu0 %v710_v14 }
  0x30   : > { %429 = vmatpush1.bf16.msra.mxu0 %v712_v15 }
  0x31   : > { %430 = vmatprep.subr.bf16.mxu0 %v713_v16 }
  0x34   : > { %431 = vmatpush1.bf16.msra.mxu0 %v715_v17 }
  0x37   : > { %449 = vmatmul.mubr.bf16.vlgmr.msra.gmra.mrb[0].mxu0 %v319_v18 }
 0x108   : > { %464 = sbr.rel (%p658_p6) target bundleno = 287 (0x11f), region = 44 }
 0x10a   : > { %v450_v21 = vpop.f32.mrb[0].mxu0 }
 0x10b   : > { %v457_v22 = vadd.f32 %v450_v21, %v317_v19  ;;  %v452_v23 = vpop.f32.mrb[1].mxu0 }
 0x10c   : > { %v458_v24 = vadd.f32 %v452_v23, %v318_v20  ;;  %v454_v25 = vpop.f32.mrb[2].mxu0 }
 0x10d   : > { %459 = vst [vmem:[#allocation2] sm:$0xff] %v457_v22  ;;  %v455_v26 = vpop.f32.mrb[3].mxu0 }
 0x10e   : > { %460 = vst [vmem:[#allocation2 + $0x8] sm:$0xff] %v458_v24 }
 0x114   : > { %v465_v33 = vld [vmem:[#allocation2] sm:$0xff] }
 0x115   : > { %v466_v34 = vld [vmem:[#allocation2 + $0x8] sm:$0xff]  ;;  %v479_v39 = vmul.f32 %v472_v35, %v465_v33 }
 0x116   : > { %v480_v40 = vmul.f32 %v476_v36, %v466_v34 }
 0x117   : > { %v493_v41 = vadd.f32 %v486_v37, %v479_v39 }
 0x118   : > { %v494_v42 = vadd.f32 %v490_v38, %v480_v40 }
 0x119   : > { %v495_v43 = vmax.f32 %v493_v41, 0.0 }
 0x11a   : > { %v496_v44 = vmax.f32 %v494_v42, 0.0 }
 0x11c   : > { %v665_v45 = vpack.c.bf16 %v496_v44, %v495_v43 }
 0x11e   : > { %505 = vst [vmem:[%s840_s4] sm:$0xff] %v665_v45 }
 0x11f PF: > { %s14_s17 = sadd.s32 1, %s738_s17   ;;  %s841_s15 = smov %s734_s16 }
 0x120   : > { %p11_p7 = scmp.ge.s32.totalorder %s14_s17, 11   ;;  %s842_s16 = smov %s844_s18 }
 0x122   :  { %13 = sbr.rel (!%p11_p7) target bundleno = 2 (0x2), region = 83 }

// kernel: _lambda_.34
= control target key start
LH: loop header
LB: loop body
LE: loop exit
PB: predicated region body
PF: predicated region fallthrough
CT: control target
= control target key end

     0   :  { %v257_v1 = vmov 0   ;;  %v175_v18 = vlaneseq  ;;  %s343_s1 = inlined_call_operand.vmem [shape: bf16[1,128,256], index: 1, kind: input, shape index: {}]   ;;  %s344_s0 = inlined_call_operand.vmem [shape: bf16[1,8,128], index: 0, kind: input, shape index: {}]   ;;  %s345_s2 = inlined_call_operand.vmem [shape: f32[1,256], index: 2, kind: input, shape index: {}]   ;;  %s346_s3 = inlined_call_operand.vmem [shape: f32[1,256], index: 3, kind: input, shape index: {}]   ;;  %s347_s4 = inlined_call_operand.vmem [shape: bf16[8,256], index: 4, kind: output, shape index: {}]  }
   0x1   :  { %v233_v0 = vld [vmem:[%s343_s1 + $0x4] ss:$8 sps:$4 sm:$0xff]   ;;  %155 = vmatprep.mubr.bf16.mxu0 %v257_v1  ;;  %v235_v2 = vld [vmem:[%s343_s1] ss:$8 sps:$4 sm:$0xff]   ;;  %v236_v3 = vld [vmem:[%s343_s1 + $0x14] ss:$8 sps:$4 sm:$0xff]  }
   0x2   :  { %123 = vmatprep.subr.bf16.mxu0 %v233_v0  ;;  %v238_v4 = vld [vmem:[%s343_s1 + $0x10] ss:$8 sps:$4 sm:$0xff]   ;;  %v239_v5 = vld [vmem:[%s343_s1 + $0x24] ss:$8 sps:$4 sm:$0xff]   ;;  %v241_v6 = vld [vmem:[%s343_s1 + $0x20] ss:$8 sps:$4 sm:$0xff]  }
   0x3   :  { %124 = vmatpush1.bf16.msra.mxu0 %v235_v2  ;;  %v242_v7 = vld [vmem:[%s343_s1 + $0x34] ss:$8 sps:$4 sm:$0xff]   ;;  %v244_v8 = vld [vmem:[%s343_s1 + $0x30] ss:$8 sps:$4 sm:$0xff]   ;;  %v245_v9 = vld [vmem:[%s343_s1 + $0x44] ss:$8 sps:$4 sm:$0xff]  }
   0x4   :  { %125 = vmatprep.subr.bf16.mxu0 %v236_v3  ;;  %v247_v10 = vld [vmem:[%s343_s1 + $0x40] ss:$8 sps:$4 sm:$0xff]   ;;  %v248_v11 = vld [vmem:[%s343_s1 + $0x54] ss:$8 sps:$4 sm:$0xff]   ;;  %v250_v12 = vld [vmem:[%s343_s1 + $0x50] ss:$8 sps:$4 sm:$0xff]  }
   0x5   :  { %v251_v13 = vld [vmem:[%s343_s1 + $0x64] ss:$8 sps:$4 sm:$0xff]   ;;  %v253_v14 = vld [vmem:[%s343_s1 + $0x60] ss:$8 sps:$4 sm:$0xff]   ;;  %v254_v15 = vld [vmem:[%s343_s1 + $0x74] ss:$8 sps:$4 sm:$0xff]  }
   0x6   :  { %v256_v16 = vld [vmem:[%s343_s1 + $0x70] ss:$8 sps:$4 sm:$0xff]   ;;  %v26_v17 = vld [vmem:[%s344_s0] sm:$0xf]  ;;  %v176_v19 = vshrl.u32 %v175_v18, 7 }
   0x7   :  { %126 = vmatpush1.bf16.msra.mxu0 %v238_v4  ;;  %v173_v21 = vld [vmem:[%s345_s2] sm:$0x3] }
   0x8   :  { %127 = vmatprep.subr.bf16.mxu0 %v239_v5  ;;  %v177_v20 = vsub.s32 0, %v176_v19  ;;  %v181_v22 = vsub.s32 1, %v176_v19  ;;  %v187_v23 = vld [vmem:[%s346_s3] sm:$0x3] }
   0xa   :  { %v178_v24 = vrot.slane %v173_v21, %v177_v20  ;;  %v182_v25 = vrot.slane %v173_v21, %v181_v22  ;;  %v192_v26 = vrot.slane %v187_v23, %v177_v20  ;;  %v196_v28 = vrot.slane %v187_v23, %v181_v22 }
   0xb   :  { %128 = vmatpush1.bf16.msra.mxu0 %v241_v6 }
   0xc   :  { %129 = vmatprep.subr.bf16.mxu0 %v242_v7 }
   0xf   :  { %130 = vmatpush1.bf16.msra.mxu0 %v244_v8 }
  0x10   :  { %131 = vmatprep.subr.bf16.mxu0 %v245_v9 }
  0x13   :  { %132 = vmatpush1.bf16.msra.mxu0 %v247_v10 }
  0x14   :  { %133 = vmatprep.subr.bf16.mxu0 %v248_v11 }
  0x17   :  { %134 = vmatpush1.bf16.msra.mxu0 %v250_v12 }
  0x18   :  { %135 = vmatprep.subr.bf16.mxu0 %v251_v13 }
  0x1b   :  { %136 = vmatpush1.bf16.msra.mxu0 %v253_v14 }
  0x1c   :  { %137 = vmatprep.subr.bf16.mxu0 %v254_v15 }
  0x1f   :  { %138 = vmatpush1.bf16.msra.mxu0 %v256_v16 }
  0x22   :  { %156 = vmatmul.mubr.bf16.vlgmr.msra.gmra.mrb[0].mxu0 %v26_v17 }
  0xf5   :  { %v157_v27 = vpop.f32.mrb[0].mxu0 }
  0xf6   :  { %v185_v29 = vmul.f32 %v178_v24, %v157_v27  ;;  %v159_v30 = vpop.f32.mrb[1].mxu0 }
  0xf7   :  { %v186_v31 = vmul.f32 %v182_v25, %v159_v30  ;;  %v161_v32 = vpop.f32.mrb[2].mxu0 }
  0xf8   :  { %v199_v33 = vadd.f32 %v192_v26, %v185_v29  ;;  %v162_v34 = vpop.f32.mrb[3].mxu0 }
  0xf9   :  { %v200_v35 = vadd.f32 %v196_v28, %v186_v31 }
  0xfb   :  { %v231_v36 = vpack.c.bf16 %v200_v35, %v199_v33 }
  0xfd   :  { %209 = vst [vmem:[%s347_s4] sm:$0xff] %v231_v36 }

// kernel: _lambda_.35
= control target key start
LH: loop header
LB: loop body
LE: loop exit
PB: predicated region body
PF: predicated region fallthrough
CT: control target
= control target key end

     0   :  { %s1020_s18 = smov 0   ;;  %s1022_s19 = smov 0   ;;  %s1108_s0 = inlined_call_operand.vmem [shape: bf16[9,8,256], index: 0, kind: input, shape index: {}]   ;;  %s1109_s1 = inlined_call_operand.vmem [shape: bf16[9,256,256], index: 1, kind: input, shape index: {}]   ;;  %s1110_s2 = inlined_call_operand.vmem [shape: f32[1,256], index: 2, kind: input, shape index: {}]   ;;  %s1111_s3 = inlined_call_operand.vmem [shape: f32[1,256], index: 3, kind: input, shape index: {}]   ;;  %s1112_s4 = inlined_call_operand.vmem [shape: bf16[8,256], index: 4, kind: input, shape index: {}]   ;;  %s1113_s5 = inlined_call_operand.vmem [shape: bf16[8,256], index: 5, kind: output, shape index: {}]  }
   0x1   :  { %s1024_s20 = smov 0  }
   0x2 LB: > { %s27_s21 = sadd.s32 1, %s983_s19  ;;  %p841_p0 = scmp.ge.s32.totalorder %s987_s20, 1  ;;  %s987_s20 = sphi %s1024_s20, %s15_s20   ;;  %s983_s19 = sphi %s1022_s19, %s1115_s19   ;;  %s979_s18 = sphi %s1020_s18, %s1114_s18  }
   0x3   : > { %p28_p1 = scmp.ge.s32.totalorder %s27_s21, 9  ;;  %p268_p2 = scmp.lt.s32.totalorder %s987_s20, 10 }
   0x5   : > { %s1117_s21 = smov (%p28_p1, %s27_s21), 0  ;;  %p269_p3 = pnand %p841_p0, %p268_p2 }
   0x6   : > { %p330_p4 = scmp.lt.s32.totalorder (!%p269_p3), %s979_s18, 8  ;;  %p846_p5 = scmp.ne.s32.totalorder (!%p269_p3), %s979_s18, 0 }
   0x7   : > { %272 = sbr.rel (%p269_p3) target bundleno = 321 (0x141), region = 40 }
   0xe   : > { %s331_s22 = scalar_select %p330_p4, %s979_s18, 8 }
   0xf   : > { %382 = sbr.rel (%p846_p5) target bundleno = 22 (0x16), region = 44  ;;  %v989_v0 = vmov (!%p846_p5), 0.0  }
  0x10   : > { %s887_s23 = sshll.u32 %s331_s22, 3  ;;  %s888_s24 = sshll.u32 %s331_s22, 8  ;;  %383 = vst [vmem:[#allocation2] sm:$0xff] (!%p846_p5), %v989_v0  ;;  %384 = vst [vmem:[#allocation2 + $0x8] sm:$0xff] (!%p846_p5), %v989_v0 }
  0x11   : > { %s1045_s27 = scalar_lea.vmem %s1108_s0, %s887_s23  ;;  %s1050_s30 = scalar_lea.vmem %s1109_s1, %s888_s24 }
  0x16 PF: > { %v915_v1 = vld [vmem:[%s1050_s30 + $0x4] ss:$8 sps:$4 sm:$0xff]   ;;  %v917_v2 = vld [vmem:[%s1050_s30] ss:$8 sps:$4 sm:$0xff]   ;;  %v918_v3 = vld [vmem:[%s1050_s30 + $0x14] ss:$8 sps:$4 sm:$0xff]  }
  0x17   : > { %587 = vmatprep.subr.bf16.mxu0 %v915_v1  ;;  %v920_v4 = vld [vmem:[%s1050_s30 + $0x10] ss:$8 sps:$4 sm:$0xff]   ;;  %v921_v5 = vld [vmem:[%s1050_s30 + $0x24] ss:$8 sps:$4 sm:$0xff]   ;;  %v923_v6 = vld [vmem:[%s1050_s30 + $0x20] ss:$8 sps:$4 sm:$0xff]  }
  0x18   : > { %588 = vmatpush1.bf16.msra.mxu0 %v917_v2  ;;  %v924_v7 = vld [vmem:[%s1050_s30 + $0x34] ss:$8 sps:$4 sm:$0xff]   ;;  %v926_v8 = vld [vmem:[%s1050_s30 + $0x30] ss:$8 sps:$4 sm:$0xff]   ;;  %v927_v9 = vld [vmem:[%s1050_s30 + $0x44] ss:$8 sps:$4 sm:$0xff]  }
  0x19   : > { %589 = vmatprep.subr.bf16.mxu0 %v918_v3  ;;  %v929_v10 = vld [vmem:[%s1050_s30 + $0x40] ss:$8 sps:$4 sm:$0xff]   ;;  %v930_v11 = vld [vmem:[%s1050_s30 + $0x54] ss:$8 sps:$4 sm:$0xff]   ;;  %v932_v12 = vld [vmem:[%s1050_s30 + $0x50] ss:$8 sps:$4 sm:$0xff]  }
  0x1a   : > { %v933_v13 = vld [vmem:[%s1050_s30 + $0x64] ss:$8 sps:$4 sm:$0xff]   ;;  %v935_v16 = vld [vmem:[%s1050_s30 + $0x60] ss:$8 sps:$4 sm:$0xff]   ;;  %v936_v17 = vld [vmem:[%s1050_s30 + $0x74] ss:$8 sps:$4 sm:$0xff]  }
  0x1b   : > { %v387_v14 = vld [vmem:[%s1045_s27] sm:$0xff]  ;;  %v938_v18 = vld [vmem:[%s1050_s30 + $0x70] ss:$8 sps:$4 sm:$0xff]   ;;  %v942_v21 = vld [vmem:[%s1050_s30 + $0x94] ss:$8 sps:$4 sm:$0xff]   ;;  %p881_p6 = scmp.ne.s32.totalorder %s979_s18, 8 }
  0x1c   : > { %590 = vmatpush1.bf16.msra.mxu0 %v920_v4  ;;  %v848_v15 = vcombine.high %v387_v14, %v387_v14  ;;  %v939_v19 = vld [vmem:[%s1050_s30 + $0x84] ss:$8 sps:$4 sm:$0xff]   ;;  %v941_v20 = vld [vmem:[%s1050_s30 + $0x80] ss:$8 sps:$4 sm:$0xff]   ;;  %v944_v22 = vld [vmem:[%s1050_s30 + $0x90] ss:$8 sps:$4 sm:$0xff]   ;;  %v847_v35 = vcombine.low %v387_v14, %v387_v14  ;;  %v640_v44 = vlaneseq (!%p881_p6) }
  0x1d   : > { %591 = vmatprep.subr.bf16.mxu0 %v921_v5  ;;  %v945_v23 = vld [vmem:[%s1050_s30 + $0xa4] ss:$8 sps:$4 sm:$0xff]   ;;  %v947_v24 = vld [vmem:[%s1050_s30 + $0xa0] ss:$8 sps:$4 sm:$0xff]   ;;  %v948_v25 = vld [vmem:[%s1050_s30 + $0xb4] ss:$8 sps:$4 sm:$0xff]  }
  0x1e   : > { %619 = vmatprep.mubr.bf16.mxu0 %v848_v15  ;;  %v950_v26 = vld [vmem:[%s1050_s30 + $0xb0] ss:$8 sps:$4 sm:$0xff]   ;;  %v951_v27 = vld [vmem:[%s1050_s30 + $0xc4] ss:$8 sps:$4 sm:$0xff]   ;;  %v953_v28 = vld [vmem:[%s1050_s30 + $0xc0] ss:$8 sps:$4 sm:$0xff]  }
  0x1f   : > { %v954_v29 = vld [vmem:[%s1050_s30 + $0xd4] ss:$8 sps:$4 sm:$0xff]   ;;  %v956_v30 = vld [vmem:[%s1050_s30 + $0xd0] ss:$8 sps:$4 sm:$0xff]   ;;  %v957_v31 = vld [vmem:[%s1050_s30 + $0xe4] ss:$8 sps:$4 sm:$0xff]  }
  0x20   : > { %592 = vmatpush1.bf16.msra.mxu0 %v923_v6  ;;  %v959_v32 = vld [vmem:[%s1050_s30 + $0xe0] ss:$8 sps:$4 sm:$0xff]   ;;  %v960_v33 = vld [vmem:[%s1050_s30 + $0xf4] ss:$8 sps:$4 sm:$0xff]   ;;  %v962_v34 = vld [vmem:[%s1050_s30 + $0xf0] ss:$8 sps:$4 sm:$0xff]  }
  0x21   : > { %593 = vmatprep.subr.bf16.mxu0 %v924_v7  ;;  %v385_v36 = vld [vmem:[#allocation2] sm:$0xff]  ;;  %v386_v37 = vld [vmem:[#allocation2 + $0x8] sm:$0xff]  ;;  %v641_v45 = vshrl.u32 (!%p881_p6), %v640_v44, 7 }
  0x22   : > { %v638_v46 = vld [vmem:[%s1110_s2] sm:$0x3] (!%p881_p6) }
  0x23   : > { %v652_v47 = vld [vmem:[%s1111_s3] sm:$0x3] (!%p881_p6)  ;;  %v642_v48 = vsub.s32 (!%p881_p6), 0, %v641_v45  ;;  %v646_v49 = vsub.s32 (!%p881_p6), 1, %v641_v45 }
  0x24   : > { %594 = vmatpush1.bf16.msra.mxu0 %v926_v8  ;;  %v666_v52 = vld [vmem:[%s1112_s4] sm:$0xff] (!%p881_p6) }
  0x25   : > { %595 = vmatprep.subr.bf16.mxu0 %v927_v9  ;;  %v643_v53 = vrot.slane (!%p881_p6), %v638_v46, %v642_v48  ;;  %v647_v54 = vrot.slane (!%p881_p6), %v638_v46, %v646_v49  ;;  %v657_v55 = vrot.slane (!%p881_p6), %v652_v47, %v642_v48  ;;  %v661_v56 = vrot.slane (!%p881_p6), %v652_v47, %v646_v49 }
  0x26   : > { %v667_v59 = vunpack.c.l.bf16 (!%p881_p6), %v666_v52  ;;  %v668_v60 = vunpack.c.h.bf16 (!%p881_p6), %v666_v52 }
  0x28   : > { %596 = vmatpush1.bf16.msra.mxu0 %v929_v10 }
  0x29   : > { %597 = vmatprep.subr.bf16.mxu0 %v930_v11 }
  0x2c   : > { %598 = vmatpush1.bf16.msra.mxu0 %v932_v12 }
  0x2d   : > { %599 = vmatprep.subr.bf16.mxu0 %v933_v13 }
  0x30   : > { %600 = vmatpush1.bf16.msra.mxu0 %v935_v16 }
  0x31   : > { %601 = vmatprep.subr.bf16.mxu0 %v936_v17 }
  0x34   : > { %602 = vmatpush1.bf16.msra.mxu0 %v938_v18 }
  0x35   : > { %603 = vmatprep.subr.bf16.mxu0 %v939_v19 }
  0x38   : > { %604 = vmatpush1.bf16.msra.mxu0 %v941_v20 }
  0x39   : > { %605 = vmatprep.subr.bf16.mxu0 %v942_v21 }
  0x3c   : > { %606 = vmatpush1.bf16.msra.mxu0 %v944_v22 }
  0x3d   : > { %607 = vmatprep.subr.bf16.mxu0 %v945_v23 }
  0x40   : > { %608 = vmatpush1.bf16.msra.mxu0 %v947_v24 }
  0x41   : > { %609 = vmatprep.subr.bf16.mxu0 %v948_v25 }
  0x44   : > { %610 = vmatpush1.bf16.msra.mxu0 %v950_v26 }
  0x45   : > { %611 = vmatprep.subr.bf16.mxu0 %v951_v27 }
  0x48   : > { %612 = vmatpush1.bf16.msra.mxu0 %v953_v28 }
  0x49   : > { %613 = vmatprep.subr.bf16.mxu0 %v954_v29 }
  0x4c   : > { %614 = vmatpush1.bf16.msra.mxu0 %v956_v30 }
  0x4d   : > { %615 = vmatprep.subr.bf16.mxu0 %v957_v31 }
  0x50   : > { %616 = vmatpush1.bf16.msra.mxu0 %v959_v32 }
  0x51   : > { %617 = vmatprep.subr.bf16.mxu0 %v960_v33 }
  0x54   : > { %618 = vmatpush1.bf16.msra.mxu0 %v962_v34 }
  0x57   : > { %620 = vmatmul.mubr.bf16.vlgmr.msra.gmra.mrb[0].mxu0 %v847_v35 }
 0x128   : > { %635 = sbr.rel (%p881_p6) target bundleno = 321 (0x141), region = 48 }
 0x12a   : > { %v621_v38 = vpop.f32.mrb[0].mxu0 }
 0x12b   : > { %v628_v39 = vadd.f32 %v621_v38, %v385_v36  ;;  %v623_v40 = vpop.f32.mrb[1].mxu0 }
 0x12c   : > { %v629_v41 = vadd.f32 %v623_v40, %v386_v37  ;;  %v625_v42 = vpop.f32.mrb[2].mxu0 }
 0x12d   : > { %630 = vst [vmem:[#allocation2] sm:$0xff] %v628_v39  ;;  %v626_v43 = vpop.f32.mrb[3].mxu0 }
 0x12e   : > { %631 = vst [vmem:[#allocation2 + $0x8] sm:$0xff] %v629_v41 }
 0x134   : > { %v636_v50 = vld [vmem:[#allocation2] sm:$0xff] }
 0x135   : > { %v637_v51 = vld [vmem:[#allocation2 + $0x8] sm:$0xff]  ;;  %v650_v57 = vmul.f32 %v643_v53, %v636_v50 }
 0x136   : > { %v651_v58 = vmul.f32 %v647_v54, %v637_v51 }
 0x137   : > { %v664_v61 = vadd.f32 %v657_v55, %v650_v57 }
 0x138   : > { %v665_v62 = vadd.f32 %v661_v56, %v651_v58 }
 0x139   : > { %v669_v63 = vadd.f32 %v667_v59, %v664_v61 }
 0x13a   : > { %v670_v0 = vadd.f32 %v668_v60, %v665_v62 }
 0x13b   : > { %v671_v1 = vmax.f32 %v669_v63, 0.0 }
 0x13c   : > { %v672_v2 = vmax.f32 %v670_v0, 0.0 }
 0x13e   : > { %v889_v3 = vpack.c.bf16 %v672_v2, %v671_v1 }
 0x140   : > { %681 = vst [vmem:[%s1113_s5] sm:$0xff] %v889_v3 }
 0x141 PF: > { %s15_s20 = sadd.s32 1, %s987_s20   ;;  %s1114_s18 = smov %s983_s19 }
 0x142   : > { %p12_p7 = scmp.ge.s32.totalorder %s15_s20, 11   ;;  %s1115_s19 = smov %s1117_s21 }
 0x144   :  { %14 = sbr.rel (!%p12_p7) target bundleno = 2 (0x2), region = 90 }

// kernel: _lambda_.36
= control target key start
LH: loop header
LB: loop body
LE: loop exit
PB: predicated region body
PF: predicated region fallthrough
CT: control target
= control target key end

     0   :  { %s925_s15 = smov 0   ;;  %s927_s16 = smov 0   ;;  %s1010_s0 = inlined_call_operand.vmem [shape: bf16[9,8,256], index: 0, kind: input, shape index: {}]   ;;  %s1011_s1 = inlined_call_operand.vmem [shape: bf16[9,256,256], index: 1, kind: input, shape index: {}]   ;;  %s1012_s2 = inlined_call_operand.vmem [shape: f32[1,256], index: 2, kind: input, shape index: {}]   ;;  %s1013_s3 = inlined_call_operand.vmem [shape: f32[1,256], index: 3, kind: input, shape index: {}]   ;;  %s1014_s4 = inlined_call_operand.vmem [shape: bf16[8,256], index: 4, kind: output, shape index: {}]  }
   0x1   :  { %s929_s17 = smov 0  }
   0x2 LB: > { %s26_s18 = sadd.s32 1, %s893_s16  ;;  %p751_p0 = scmp.ge.s32.totalorder %s897_s17, 1  ;;  %s897_s17 = sphi %s929_s17, %s14_s17   ;;  %s893_s16 = sphi %s927_s16, %s1016_s16   ;;  %s889_s15 = sphi %s925_s15, %s1015_s15  }
   0x3   : > { %p27_p1 = scmp.ge.s32.totalorder %s26_s18, 9  ;;  %p226_p2 = scmp.lt.s32.totalorder %s897_s17, 10 }
   0x5   : > { %s1018_s18 = smov (%p27_p1, %s26_s18), 0  ;;  %p227_p3 = pnand %p751_p0, %p226_p2 }
   0x6   : > { %p277_p4 = scmp.lt.s32.totalorder (!%p227_p3), %s889_s15, 8  ;;  %p756_p5 = scmp.ne.s32.totalorder (!%p227_p3), %s889_s15, 0 }
   0x7   : > { %230 = sbr.rel (%p227_p3) target bundleno = 319 (0x13f), region = 36 }
   0xe   : > { %s278_s19 = scalar_select %p277_p4, %s889_s15, 8 }
   0xf   : > { %319 = sbr.rel (%p756_p5) target bundleno = 22 (0x16), region = 40  ;;  %v899_v0 = vmov (!%p756_p5), 0.0  }
  0x10   : > { %s797_s20 = sshll.u32 %s278_s19, 3  ;;  %s798_s21 = sshll.u32 %s278_s19, 8  ;;  %320 = vst [vmem:[#allocation2] sm:$0xff] (!%p756_p5), %v899_v0  ;;  %321 = vst [vmem:[#allocation2 + $0x8] sm:$0xff] (!%p756_p5), %v899_v0 }
  0x11   : > { %s950_s24 = scalar_lea.vmem %s1010_s0, %s797_s20  ;;  %s955_s27 = scalar_lea.vmem %s1011_s1, %s798_s21 }
  0x16 PF: > { %v825_v1 = vld [vmem:[%s955_s27 + $0x4] ss:$8 sps:$4 sm:$0xff]   ;;  %v827_v2 = vld [vmem:[%s955_s27] ss:$8 sps:$4 sm:$0xff]   ;;  %v828_v3 = vld [vmem:[%s955_s27 + $0x14] ss:$8 sps:$4 sm:$0xff]  }
  0x17   : > { %524 = vmatprep.subr.bf16.mxu0 %v825_v1  ;;  %v830_v4 = vld [vmem:[%s955_s27 + $0x10] ss:$8 sps:$4 sm:$0xff]   ;;  %v831_v5 = vld [vmem:[%s955_s27 + $0x24] ss:$8 sps:$4 sm:$0xff]   ;;  %v833_v6 = vld [vmem:[%s955_s27 + $0x20] ss:$8 sps:$4 sm:$0xff]  }
  0x18   : > { %525 = vmatpush1.bf16.msra.mxu0 %v827_v2  ;;  %v834_v7 = vld [vmem:[%s955_s27 + $0x34] ss:$8 sps:$4 sm:$0xff]   ;;  %v836_v8 = vld [vmem:[%s955_s27 + $0x30] ss:$8 sps:$4 sm:$0xff]   ;;  %v837_v9 = vld [vmem:[%s955_s27 + $0x44] ss:$8 sps:$4 sm:$0xff]  }
  0x19   : > { %526 = vmatprep.subr.bf16.mxu0 %v828_v3  ;;  %v839_v10 = vld [vmem:[%s955_s27 + $0x40] ss:$8 sps:$4 sm:$0xff]   ;;  %v840_v11 = vld [vmem:[%s955_s27 + $0x54] ss:$8 sps:$4 sm:$0xff]   ;;  %v842_v12 = vld [vmem:[%s955_s27 + $0x50] ss:$8 sps:$4 sm:$0xff]  }
  0x1a   : > { %v843_v13 = vld [vmem:[%s955_s27 + $0x64] ss:$8 sps:$4 sm:$0xff]   ;;  %v845_v16 = vld [vmem:[%s955_s27 + $0x60] ss:$8 sps:$4 sm:$0xff]   ;;  %v846_v17 = vld [vmem:[%s955_s27 + $0x74] ss:$8 sps:$4 sm:$0xff]  }
  0x1b   : > { %v324_v14 = vld [vmem:[%s950_s24] sm:$0xff]  ;;  %v848_v18 = vld [vmem:[%s955_s27 + $0x70] ss:$8 sps:$4 sm:$0xff]   ;;  %v852_v21 = vld [vmem:[%s955_s27 + $0x94] ss:$8 sps:$4 sm:$0xff]   ;;  %p791_p6 = scmp.ne.s32.totalorder %s889_s15, 8 }
  0x1c   : > { %527 = vmatpush1.bf16.msra.mxu0 %v830_v4  ;;  %v758_v15 = vcombine.high %v324_v14, %v324_v14  ;;  %v849_v19 = vld [vmem:[%s955_s27 + $0x84] ss:$8 sps:$4 sm:$0xff]   ;;  %v851_v20 = vld [vmem:[%s955_s27 + $0x80] ss:$8 sps:$4 sm:$0xff]   ;;  %v854_v22 = vld [vmem:[%s955_s27 + $0x90] ss:$8 sps:$4 sm:$0xff]   ;;  %v757_v35 = vcombine.low %v324_v14, %v324_v14  ;;  %v577_v44 = vlaneseq (!%p791_p6) }
  0x1d   : > { %528 = vmatprep.subr.bf16.mxu0 %v831_v5  ;;  %v855_v23 = vld [vmem:[%s955_s27 + $0xa4] ss:$8 sps:$4 sm:$0xff]   ;;  %v857_v24 = vld [vmem:[%s955_s27 + $0xa0] ss:$8 sps:$4 sm:$0xff]   ;;  %v858_v25 = vld [vmem:[%s955_s27 + $0xb4] ss:$8 sps:$4 sm:$0xff]  }
  0x1e   : > { %556 = vmatprep.mubr.bf16.mxu0 %v758_v15  ;;  %v860_v26 = vld [vmem:[%s955_s27 + $0xb0] ss:$8 sps:$4 sm:$0xff]   ;;  %v861_v27 = vld [vmem:[%s955_s27 + $0xc4] ss:$8 sps:$4 sm:$0xff]   ;;  %v863_v28 = vld [vmem:[%s955_s27 + $0xc0] ss:$8 sps:$4 sm:$0xff]  }
  0x1f   : > { %v864_v29 = vld [vmem:[%s955_s27 + $0xd4] ss:$8 sps:$4 sm:$0xff]   ;;  %v866_v30 = vld [vmem:[%s955_s27 + $0xd0] ss:$8 sps:$4 sm:$0xff]   ;;  %v867_v31 = vld [vmem:[%s955_s27 + $0xe4] ss:$8 sps:$4 sm:$0xff]  }
  0x20   : > { %529 = vmatpush1.bf16.msra.mxu0 %v833_v6  ;;  %v869_v32 = vld [vmem:[%s955_s27 + $0xe0] ss:$8 sps:$4 sm:$0xff]   ;;  %v870_v33 = vld [vmem:[%s955_s27 + $0xf4] ss:$8 sps:$4 sm:$0xff]   ;;  %v872_v34 = vld [vmem:[%s955_s27 + $0xf0] ss:$8 sps:$4 sm:$0xff]  }
  0x21   : > { %530 = vmatprep.subr.bf16.mxu0 %v834_v7  ;;  %v322_v36 = vld [vmem:[#allocation2] sm:$0xff]  ;;  %v323_v37 = vld [vmem:[#allocation2 + $0x8] sm:$0xff]  ;;  %v578_v45 = vshrl.u32 (!%p791_p6), %v577_v44, 7 }
  0x22   : > { %v575_v46 = vld [vmem:[%s1012_s2] sm:$0x3] (!%p791_p6) }
  0x23   : > { %v589_v47 = vld [vmem:[%s1013_s3] sm:$0x3] (!%p791_p6)  ;;  %v579_v48 = vsub.s32 (!%p791_p6), 0, %v578_v45  ;;  %v583_v49 = vsub.s32 (!%p791_p6), 1, %v578_v45 }
  0x24   : > { %531 = vmatpush1.bf16.msra.mxu0 %v836_v8 }
  0x25   : > { %532 = vmatprep.subr.bf16.mxu0 %v837_v9  ;;  %v580_v52 = vrot.slane (!%p791_p6), %v575_v46, %v579_v48  ;;  %v584_v53 = vrot.slane (!%p791_p6), %v575_v46, %v583_v49  ;;  %v594_v54 = vrot.slane (!%p791_p6), %v589_v47, %v579_v48  ;;  %v598_v55 = vrot.slane (!%p791_p6), %v589_v47, %v583_v49 }
  0x28   : > { %533 = vmatpush1.bf16.msra.mxu0 %v839_v10 }
  0x29   : > { %534 = vmatprep.subr.bf16.mxu0 %v840_v11 }
  0x2c   : > { %535 = vmatpush1.bf16.msra.mxu0 %v842_v12 }
  0x2d   : > { %536 = vmatprep.subr.bf16.mxu0 %v843_v13 }
  0x30   : > { %537 = vmatpush1.bf16.msra.mxu0 %v845_v16 }
  0x31   : > { %538 = vmatprep.subr.bf16.mxu0 %v846_v17 }
  0x34   : > { %539 = vmatpush1.bf16.msra.mxu0 %v848_v18 }
  0x35   : > { %540 = vmatprep.subr.bf16.mxu0 %v849_v19 }
  0x38   : > { %541 = vmatpush1.bf16.msra.mxu0 %v851_v20 }
  0x39   : > { %542 = vmatprep.subr.bf16.mxu0 %v852_v21 }
  0x3c   : > { %543 = vmatpush1.bf16.msra.mxu0 %v854_v22 }
  0x3d   : > { %544 = vmatprep.subr.bf16.mxu0 %v855_v23 }
  0x40   : > { %545 = vmatpush1.bf16.msra.mxu0 %v857_v24 }
  0x41   : > { %546 = vmatprep.subr.bf16.mxu0 %v858_v25 }
  0x44   : > { %547 = vmatpush1.bf16.msra.mxu0 %v860_v26 }
  0x45   : > { %548 = vmatprep.subr.bf16.mxu0 %v861_v27 }
  0x48   : > { %549 = vmatpush1.bf16.msra.mxu0 %v863_v28 }
  0x49   : > { %550 = vmatprep.subr.bf16.mxu0 %v864_v29 }
  0x4c   : > { %551 = vmatpush1.bf16.msra.mxu0 %v866_v30 }
  0x4d   : > { %552 = vmatprep.subr.bf16.mxu0 %v867_v31 }
  0x50   : > { %553 = vmatpush1.bf16.msra.mxu0 %v869_v32 }
  0x51   : > { %554 = vmatprep.subr.bf16.mxu0 %v870_v33 }
  0x54   : > { %555 = vmatpush1.bf16.msra.mxu0 %v872_v34 }
  0x57   : > { %557 = vmatmul.mubr.bf16.vlgmr.msra.gmra.mrb[0].mxu0 %v757_v35 }
 0x128   : > { %572 = sbr.rel (%p791_p6) target bundleno = 319 (0x13f), region = 44 }
 0x12a   : > { %v558_v38 = vpop.f32.mrb[0].mxu0 }
 0x12b   : > { %v565_v39 = vadd.f32 %v558_v38, %v322_v36  ;;  %v560_v40 = vpop.f32.mrb[1].mxu0 }
 0x12c   : > { %v566_v41 = vadd.f32 %v560_v40, %v323_v37  ;;  %v562_v42 = vpop.f32.mrb[2].mxu0 }
 0x12d   : > { %567 = vst [vmem:[#allocation2] sm:$0xff] %v565_v39  ;;  %v563_v43 = vpop.f32.mrb[3].mxu0 }
 0x12e   : > { %568 = vst [vmem:[#allocation2 + $0x8] sm:$0xff] %v566_v41 }
 0x134   : > { %v573_v50 = vld [vmem:[#allocation2] sm:$0xff] }
 0x135   : > { %v574_v51 = vld [vmem:[#allocation2 + $0x8] sm:$0xff]  ;;  %v587_v56 = vmul.f32 %v580_v52, %v573_v50 }
 0x136   : > { %v588_v57 = vmul.f32 %v584_v53, %v574_v51 }
 0x137   : > { %v601_v58 = vadd.f32 %v594_v54, %v587_v56 }
 0x138   : > { %v602_v59 = vadd.f32 %v598_v55, %v588_v57 }
 0x139   : > { %v603_v60 = vmax.f32 %v601_v58, 0.0 }
 0x13a   : > { %v604_v61 = vmax.f32 %v602_v59, 0.0 }
 0x13c   : > { %v799_v62 = vpack.c.bf16 %v604_v61, %v603_v60 }
 0x13e   : > { %613 = vst [vmem:[%s1014_s4] sm:$0xff] %v799_v62 }
 0x13f PF: > { %s14_s17 = sadd.s32 1, %s897_s17   ;;  %s1015_s15 = smov %s893_s16 }
 0x140   : > { %p11_p7 = scmp.ge.s32.totalorder %s14_s17, 11   ;;  %s1016_s16 = smov %s1018_s18 }
 0x142   :  { %13 = sbr.rel (!%p11_p7) target bundleno = 2 (0x2), region = 83 }

// kernel: _lambda_.38
= control target key start
LH: loop header
LB: loop body
LE: loop exit
PB: predicated region body
PF: predicated region fallthrough
CT: control target
= control target key end

     0   :  { %s1143_s15 = smov 0   ;;  %s1145_s16 = smov 0   ;;  %s1367_s0 = inlined_call_operand.vmem [shape: bf16[9,8,256], index: 0, kind: input, shape index: {}]   ;;  %s1368_s1 = inlined_call_operand.vmem [shape: bf16[9,256,512], index: 1, kind: input, shape index: {}]   ;;  %s1369_s2 = inlined_call_operand.vmem [shape: f32[1,512], index: 2, kind: input, shape index: {}]   ;;  %s1370_s3 = inlined_call_operand.vmem [shape: f32[1,512], index: 3, kind: input, shape index: {}]   ;;  %s1371_s4 = inlined_call_operand.vmem [shape: bf16[8,512], index: 4, kind: output, shape index: {}]  }
   0x1   :  { %s1147_s17 = smov 0   ;;  %s1149_s18 = smov 0  }
   0x2   :  { %s1151_s19 = smov 0   ;;  %s1153_s20 = smov 0  }
   0x3   :  { %s1155_s21 = smov 0  }
   0x4 LB: > { %s26_s22 = sadd.s32 1, %s1107_s19  ;;  %s29_s23 = sadd.s32 1, %s1111_s20  ;;  %s1115_s21 = sphi %s1155_s21, %s14_s21   ;;  %s1111_s20 = sphi %s1153_s20, %s1377_s20   ;;  %s1107_s19 = sphi %s1151_s19, %s1376_s19   ;;  %s1103_s18 = sphi %s1149_s18, %s1375_s18   ;;  %s1099_s17 = sphi %s1147_s17, %s1374_s17   ;;  %s1095_s16 = sphi %s1145_s16, %s1373_s16   ;;  %s1091_s15 = sphi %s1143_s15, %s1372_s15  }
   0x5   : > { %p27_p0 = scmp.ge.s32.totalorder %s26_s22, 9  ;;  %p77_p1 = scmp.ne.s32.totalorder %s1095_s16, %s1091_s15 }
   0x6   : > { %p78_p2 = scmp.eq.s32.totalorder %s1115_s21, 0  ;;  %s70_s27 = sadd.s32 1, %s1095_s16 }
   0x7   : > { %s1379_s22 = smov (%p27_p0, %s26_s22), 0  ;;  %s1381_s23 = smov (!%p27_p0, %s29_s23), %s1111_s20 }
   0x8   : > { %p79_p3 = por %p78_p2, %p77_p1  ;;  %p31_p4 = scmp.ge.s32.totalorder %s1381_s23, 2 }
   0x9   : > { %s65_s24 = ssub.s32 %s1107_s19, %s1379_s22  ;;  %p900_p6 = scmp.ge.s32.totalorder %s1115_s21, 18 }
   0xa   : > { %s1383_s23 = smov (%p31_p4, %s1381_s23), 0 }
   0xb   : > { %s66_s25 = ssub.s32 %s1111_s20, %s1383_s23  ;;  %183 = sbr.rel (%p900_p6) target bundleno = 41 (0x29), region = 16 }
   0xc   : > { %s67_s26 = sor.u32 %s66_s25, %s65_s24 }
   0xd   : > { %p68_p5 = scmp.eq.s32.totalorder %s67_s26, 0 }
   0xf   : > { %s1194_s28 = scalar_select %p68_p5, %s1095_s16, %s70_s27  }
  0x12   : > { %198 = sbr.rel (!%p79_p3) target bundleno = 41 (0x29), region = 24  ;;  %s200_s29 = sand.u32 (%p79_p3), 1, %s1095_s16  }
  0x13   : > { %s902_s30 = sshll.u32 (%p79_p3), %s1111_s20, 1  ;;  %s901_s5 = sshll.u32 (%p79_p3), %s200_s29, 8 }
  0x14   : > { %s903_s6 = sshll.u32 (%p79_p3), %s1107_s19, 7  ;;  %s1208_s12 = scalar_lea.vmem (%p79_p3), [#allocation3], %s901_s5 }
  0x15   : > { %s205_s7 = sadd.s32 (%p79_p3), %s903_s6, %s902_s30 }
  0x16   : > { %s904_s8 = sshll.u32 (%p79_p3), %s205_s7, 2 }
  0x17   : > { %s1203_s11 = scalar_lea.vmem (%p79_p3), %s1368_s1, %s904_s8 }
  0x18   : > { %v297_v0 = vld [vmem:[%s1203_s11] sm:$0xff] (%p79_p3)  ;;  %v299_v1 = vld [vmem:[%s1203_s11 + $0x10] sm:$0xff] (%p79_p3) }
  0x19   : > { %v301_v2 = vld [vmem:[%s1203_s11 + $0x20] sm:$0xff]  ;;  %298 = vst [vmem:[%s1208_s12] sm:$0xff] %v297_v0  ;;  %300 = vst [vmem:[%s1208_s12 + $0x8] sm:$0xff] %v299_v1  ;;  %v303_v3 = vld [vmem:[%s1203_s11 + $0x30] sm:$0xff] }
  0x1a   : > { %302 = vst [vmem:[%s1208_s12 + $0x10] sm:$0xff] %v301_v2  ;;  %v305_v4 = vld [vmem:[%s1203_s11 + $0x40] sm:$0xff]  ;;  %v307_v5 = vld [vmem:[%s1203_s11 + $0x50] sm:$0xff]  ;;  %304 = vst [vmem:[%s1208_s12 + $0x18] sm:$0xff] %v303_v3 }
  0x1b   : > { %306 = vst [vmem:[%s1208_s12 + $0x20] sm:$0xff] %v305_v4  ;;  %308 = vst [vmem:[%s1208_s12 + $0x28] sm:$0xff] %v307_v5  ;;  %v309_v6 = vld [vmem:[%s1203_s11 + $0x60] sm:$0xff]  ;;  %v311_v7 = vld [vmem:[%s1203_s11 + $0x70] sm:$0xff] }
  0x1c   : > { %v313_v8 = vld [vmem:[%s1203_s11 + $0x80] sm:$0xff]  ;;  %310 = vst [vmem:[%s1208_s12 + $0x30] sm:$0xff] %v309_v6  ;;  %312 = vst [vmem:[%s1208_s12 + $0x38] sm:$0xff] %v311_v7  ;;  %v315_v9 = vld [vmem:[%s1203_s11 + $0x90] sm:$0xff] }
  0x1d   : > { %314 = vst [vmem:[%s1208_s12 + $0x40] sm:$0xff] %v313_v8  ;;  %v317_v10 = vld [vmem:[%s1203_s11 + $0xa0] sm:$0xff]  ;;  %v319_v11 = vld [vmem:[%s1203_s11 + $0xb0] sm:$0xff]  ;;  %316 = vst [vmem:[%s1208_s12 + $0x48] sm:$0xff] %v315_v9 }
  0x1e   : > { %318 = vst [vmem:[%s1208_s12 + $0x50] sm:$0xff] %v317_v10  ;;  %320 = vst [vmem:[%s1208_s12 + $0x58] sm:$0xff] %v319_v11  ;;  %v321_v12 = vld [vmem:[%s1203_s11 + $0xc0] sm:$0xff]  ;;  %v323_v13 = vld [vmem:[%s1203_s11 + $0xd0] sm:$0xff] }
  0x1f   : > { %v325_v14 = vld [vmem:[%s1203_s11 + $0xe0] sm:$0xff]  ;;  %322 = vst [vmem:[%s1208_s12 + $0x60] sm:$0xff] %v321_v12  ;;  %324 = vst [vmem:[%s1208_s12 + $0x68] sm:$0xff] %v323_v13  ;;  %v327_v15 = vld [vmem:[%s1203_s11 + $0xf0] sm:$0xff] }
  0x20   : > { %326 = vst [vmem:[%s1208_s12 + $0x70] sm:$0xff] %v325_v14  ;;  %v329_v16 = vld [vmem:[%s1203_s11 + $0x100] sm:$0xff]  ;;  %v331_v17 = vld [vmem:[%s1203_s11 + $0x110] sm:$0xff]  ;;  %328 = vst [vmem:[%s1208_s12 + $0x78] sm:$0xff] %v327_v15 }
  0x21   : > { %330 = vst [vmem:[%s1208_s12 + $0x80] sm:$0xff] %v329_v16  ;;  %332 = vst [vmem:[%s1208_s12 + $0x88] sm:$0xff] %v331_v17  ;;  %v333_v18 = vld [vmem:[%s1203_s11 + $0x120] sm:$0xff]  ;;  %v335_v19 = vld [vmem:[%s1203_s11 + $0x130] sm:$0xff] }
  0x22   : > { %v337_v20 = vld [vmem:[%s1203_s11 + $0x140] sm:$0xff]  ;;  %334 = vst [vmem:[%s1208_s12 + $0x90] sm:$0xff] %v333_v18  ;;  %336 = vst [vmem:[%s1208_s12 + $0x98] sm:$0xff] %v335_v19  ;;  %v339_v21 = vld [vmem:[%s1203_s11 + $0x150] sm:$0xff] }
  0x23   : > { %338 = vst [vmem:[%s1208_s12 + $0xa0] sm:$0xff] %v337_v20  ;;  %v341_v22 = vld [vmem:[%s1203_s11 + $0x160] sm:$0xff]  ;;  %v343_v23 = vld [vmem:[%s1203_s11 + $0x170] sm:$0xff]  ;;  %340 = vst [vmem:[%s1208_s12 + $0xa8] sm:$0xff] %v339_v21 }
  0x24   : > { %342 = vst [vmem:[%s1208_s12 + $0xb0] sm:$0xff] %v341_v22  ;;  %344 = vst [vmem:[%s1208_s12 + $0xb8] sm:$0xff] %v343_v23  ;;  %v345_v24 = vld [vmem:[%s1203_s11 + $0x180] sm:$0xff]  ;;  %v347_v25 = vld [vmem:[%s1203_s11 + $0x190] sm:$0xff] }
  0x25   : > { %v349_v26 = vld [vmem:[%s1203_s11 + $0x1a0] sm:$0xff]  ;;  %346 = vst [vmem:[%s1208_s12 + $0xc0] sm:$0xff] %v345_v24  ;;  %348 = vst [vmem:[%s1208_s12 + $0xc8] sm:$0xff] %v347_v25  ;;  %v351_v27 = vld [vmem:[%s1203_s11 + $0x1b0] sm:$0xff] }
  0x26   : > { %350 = vst [vmem:[%s1208_s12 + $0xd0] sm:$0xff] %v349_v26  ;;  %v353_v28 = vld [vmem:[%s1203_s11 + $0x1c0] sm:$0xff]  ;;  %v355_v29 = vld [vmem:[%s1203_s11 + $0x1d0] sm:$0xff]  ;;  %352 = vst [vmem:[%s1208_s12 + $0xd8] sm:$0xff] %v351_v27 }
  0x27   : > { %354 = vst [vmem:[%s1208_s12 + $0xe0] sm:$0xff] %v353_v28  ;;  %356 = vst [vmem:[%s1208_s12 + $0xe8] sm:$0xff] %v355_v29  ;;  %v357_v30 = vld [vmem:[%s1203_s11 + $0x1e0] sm:$0xff]  ;;  %v359_v31 = vld [vmem:[%s1203_s11 + $0x1f0] sm:$0xff] }
  0x28   : > { %358 = vst [vmem:[%s1208_s12 + $0xf0] sm:$0xff] %v357_v30  ;;  %360 = vst [vmem:[%s1208_s12 + $0xf8] sm:$0xff] %v359_v31 }
  0x29 PF: > { %p905_p7 = scmp.ge.s32.totalorder %s1115_s21, 1  ;;  %p381_p8 = scmp.lt.s32.totalorder %s1115_s21, 19 }
  0x2b   : > { %p382_p9 = pnand %p905_p7, %p381_p8 }
  0x2c   : > { %s388_s13 = sand.u32 (!%p382_p9), 1, %s1091_s15   ;;  %p434_p10 = scmp.lt.s32.totalorder (!%p382_p9), %s1099_s17, 8 }
  0x2d   : > { %385 = sbr.rel (%p382_p9) target bundleno = 357 (0x165), region = 70  ;;  %s906_s14 = sshll.u32 (!%p382_p9), %s388_s13, 8 }
  0x2e   : > { %s909_s24 = sshll.u32 (!%p382_p9), %s1103_s18, 1  ;;  %s1298_s13 = scalar_lea.vmem (!%p382_p9), [#allocation3], %s906_s14 }
  0x2f   : > { %p445_p11 = scmp.lt.s32.totalorder (!%p382_p9), %s909_s24, 3  ;;  %p913_p12 = scmp.ne.s32.totalorder (!%p382_p9), %s1099_s17, 0 }
  0x34   : > { %s435_s25 = scalar_select %p434_p10, %s1099_s17, 8 }
  0x35   : > { %s1385_s24 = smov (!%p445_p11, %s909_s24), 3  ;;  %467 = sbr.rel (%p913_p12) target bundleno = 60 (0x3c), region = 78 }
  0x36   : > { %s952_s26 = sshll.u32 %s435_s25, 3  ;;  %s447_s15 = scalar_lea.vmem %s1369_s2, %s1385_s24  ;;  %v1117_v32 = vmov (!%p913_p12), 0.0  }
  0x37   : > { %s1282_s30 = scalar_lea.vmem %s1367_s0, %s952_s26  ;;  %s452_s18 = scalar_lea.vmem %s1370_s3, %s1385_s24  ;;  %468 = vst [vmem:[#allocation2] sm:$0xff] (!%p913_p12), %v1117_v32  ;;  %469 = vst [vmem:[#allocation2 + $0x8] sm:$0xff] (!%p913_p12), %v1117_v32 }
  0x38   : > { %s912_s9 = sshll.u32 %s1385_s24, 2 }
  0x39   : > { %s1296_s12 = scalar_lea.vmem %s1371_s4, %s912_s9 }
  0x3c PF: > { %v1011_v33 = vld [vmem:[%s1298_s13 + $0x4] ss:$8 sps:$4 sm:$0xff]   ;;  %v1013_v34 = vld [vmem:[%s1298_s13] ss:$8 sps:$4 sm:$0xff]   ;;  %v1014_v35 = vld [vmem:[%s1298_s13 + $0x14] ss:$8 sps:$4 sm:$0xff]  }
  0x3d   : > { %672 = vmatprep.subr.bf16.mxu0 %v1011_v33  ;;  %v1016_v36 = vld [vmem:[%s1298_s13 + $0x10] ss:$8 sps:$4 sm:$0xff]   ;;  %v1017_v37 = vld [vmem:[%s1298_s13 + $0x24] ss:$8 sps:$4 sm:$0xff]   ;;  %v1019_v38 = vld [vmem:[%s1298_s13 + $0x20] ss:$8 sps:$4 sm:$0xff]  }
  0x3e   : > { %673 = vmatpush1.bf16.msra.mxu0 %v1013_v34  ;;  %v1020_v39 = vld [vmem:[%s1298_s13 + $0x34] ss:$8 sps:$4 sm:$0xff]   ;;  %v1022_v40 = vld [vmem:[%s1298_s13 + $0x30] ss:$8 sps:$4 sm:$0xff]   ;;  %v1023_v41 = vld [vmem:[%s1298_s13 + $0x44] ss:$8 sps:$4 sm:$0xff]  }
  0x3f   : > { %674 = vmatprep.subr.bf16.mxu0 %v1014_v35  ;;  %v1025_v42 = vld [vmem:[%s1298_s13 + $0x40] ss:$8 sps:$4 sm:$0xff]   ;;  %v1026_v43 = vld [vmem:[%s1298_s13 + $0x54] ss:$8 sps:$4 sm:$0xff]   ;;  %v1028_v44 = vld [vmem:[%s1298_s13 + $0x50] ss:$8 sps:$4 sm:$0xff]  }
  0x40   : > { %v1029_v45 = vld [vmem:[%s1298_s13 + $0x64] ss:$8 sps:$4 sm:$0xff]   ;;  %v472_v46 = vld [vmem:[%s1282_s30] sm:$0xff]  ;;  %v1031_v48 = vld [vmem:[%s1298_s13 + $0x60] ss:$8 sps:$4 sm:$0xff]   ;;  %p948_p13 = scmp.ne.s32.totalorder %s1099_s17, 8 }
  0x41   : > { %v915_v47 = vcombine.high %v472_v46, %v472_v46  ;;  %v1032_v49 = vld [vmem:[%s1298_s13 + $0x74] ss:$8 sps:$4 sm:$0xff]   ;;  %v1034_v50 = vld [vmem:[%s1298_s13 + $0x70] ss:$8 sps:$4 sm:$0xff]   ;;  %v1035_v51 = vld [vmem:[%s1298_s13 + $0x84] ss:$8 sps:$4 sm:$0xff]   ;;  %v914_v3 = vcombine.low %v472_v46, %v472_v46  ;;  %v725_v12 = vlaneseq (!%p948_p13) }
  0x42   : > { %675 = vmatpush1.bf16.msra.mxu0 %v1016_v36  ;;  %v1037_v52 = vld [vmem:[%s1298_s13 + $0x80] ss:$8 sps:$4 sm:$0xff]   ;;  %v1038_v53 = vld [vmem:[%s1298_s13 + $0x94] ss:$8 sps:$4 sm:$0xff]   ;;  %v1040_v54 = vld [vmem:[%s1298_s13 + $0x90] ss:$8 sps:$4 sm:$0xff]  }
  0x43   : > { %676 = vmatprep.subr.bf16.mxu0 %v1017_v37  ;;  %704 = vmatprep.mubr.bf16.mxu0 %v915_v47  ;;  %v1041_v55 = vld [vmem:[%s1298_s13 + $0xa4] ss:$8 sps:$4 sm:$0xff]   ;;  %v1043_v56 = vld [vmem:[%s1298_s13 + $0xa0] ss:$8 sps:$4 sm:$0xff]   ;;  %v1044_v57 = vld [vmem:[%s1298_s13 + $0xb4] ss:$8 sps:$4 sm:$0xff]  }
  0x44   : > { %v1046_v58 = vld [vmem:[%s1298_s13 + $0xb0] ss:$8 sps:$4 sm:$0xff]   ;;  %v1047_v59 = vld [vmem:[%s1298_s13 + $0xc4] ss:$8 sps:$4 sm:$0xff]   ;;  %v1049_v60 = vld [vmem:[%s1298_s13 + $0xc0] ss:$8 sps:$4 sm:$0xff]  }
  0x45   : > { %v1050_v61 = vld [vmem:[%s1298_s13 + $0xd4] ss:$8 sps:$4 sm:$0xff]   ;;  %v1052_v62 = vld [vmem:[%s1298_s13 + $0xd0] ss:$8 sps:$4 sm:$0xff]   ;;  %v1053_v63 = vld [vmem:[%s1298_s13 + $0xe4] ss:$8 sps:$4 sm:$0xff]  }
  0x46   : > { %677 = vmatpush1.bf16.msra.mxu0 %v1019_v38  ;;  %v1055_v0 = vld [vmem:[%s1298_s13 + $0xe0] ss:$8 sps:$4 sm:$0xff]   ;;  %v1056_v1 = vld [vmem:[%s1298_s13 + $0xf4] ss:$8 sps:$4 sm:$0xff]   ;;  %v1058_v2 = vld [vmem:[%s1298_s13 + $0xf0] ss:$8 sps:$4 sm:$0xff]  }
  0x47   : > { %678 = vmatprep.subr.bf16.mxu0 %v1020_v39  ;;  %v470_v4 = vld [vmem:[#allocation2] sm:$0xff]  ;;  %v471_v5 = vld [vmem:[#allocation2 + $0x8] sm:$0xff]  ;;  %v726_v13 = vshrl.u32 (!%p948_p13), %v725_v12, 7 }
  0x48   : > { %v723_v14 = vld [vmem:[%s447_s15] sm:$0x3] (!%p948_p13) }
  0x49   : > { %v737_v15 = vld [vmem:[%s452_s18] sm:$0x3] (!%p948_p13)  ;;  %v727_v16 = vsub.s32 (!%p948_p13), 0, %v726_v13  ;;  %v731_v17 = vsub.s32 (!%p948_p13), 1, %v726_v13 }
  0x4a   : > { %679 = vmatpush1.bf16.msra.mxu0 %v1022_v40 }
  0x4b   : > { %680 = vmatprep.subr.bf16.mxu0 %v1023_v41  ;;  %v728_v20 = vrot.slane (!%p948_p13), %v723_v14, %v727_v16  ;;  %v732_v21 = vrot.slane (!%p948_p13), %v723_v14, %v731_v17  ;;  %v742_v22 = vrot.slane (!%p948_p13), %v737_v15, %v727_v16  ;;  %v746_v23 = vrot.slane (!%p948_p13), %v737_v15, %v731_v17 }
  0x4e   : > { %681 = vmatpush1.bf16.msra.mxu0 %v1025_v42 }
  0x4f   : > { %682 = vmatprep.subr.bf16.mxu0 %v1026_v43 }
  0x52   : > { %683 = vmatpush1.bf16.msra.mxu0 %v1028_v44 }
  0x53   : > { %684 = vmatprep.subr.bf16.mxu0 %v1029_v45 }
  0x56   : > { %685 = vmatpush1.bf16.msra.mxu0 %v1031_v48 }
  0x57   : > { %686 = vmatprep.subr.bf16.mxu0 %v1032_v49 }
  0x5a   : > { %687 = vmatpush1.bf16.msra.mxu0 %v1034_v50 }
  0x5b   : > { %688 = vmatprep.subr.bf16.mxu0 %v1035_v51 }
  0x5e   : > { %689 = vmatpush1.bf16.msra.mxu0 %v1037_v52 }
  0x5f   : > { %690 = vmatprep.subr.bf16.mxu0 %v1038_v53 }
  0x62   : > { %691 = vmatpush1.bf16.msra.mxu0 %v1040_v54 }
  0x63   : > { %692 = vmatprep.subr.bf16.mxu0 %v1041_v55 }
  0x66   : > { %693 = vmatpush1.bf16.msra.mxu0 %v1043_v56 }
  0x67   : > { %694 = vmatprep.subr.bf16.mxu0 %v1044_v57 }
  0x6a   : > { %695 = vmatpush1.bf16.msra.mxu0 %v1046_v58 }
  0x6b   : > { %696 = vmatprep.subr.bf16.mxu0 %v1047_v59 }
  0x6e   : > { %697 = vmatpush1.bf16.msra.mxu0 %v1049_v60 }
  0x6f   : > { %698 = vmatprep.subr.bf16.mxu0 %v1050_v61 }
  0x72   : > { %699 = vmatpush1.bf16.msra.mxu0 %v1052_v62 }
  0x73   : > { %700 = vmatprep.subr.bf16.mxu0 %v1053_v63 }
  0x76   : > { %701 = vmatpush1.bf16.msra.mxu0 %v1055_v0 }
  0x77   : > { %702 = vmatprep.subr.bf16.mxu0 %v1056_v1 }
  0x7a   : > { %703 = vmatpush1.bf16.msra.mxu0 %v1058_v2 }
  0x7d   : > { %705 = vmatmul.mubr.bf16.vlgmr.msra.gmra.mrb[0].mxu0 %v914_v3 }
 0x14e   : > { %720 = sbr.rel (%p948_p13) target bundleno = 357 (0x165), region = 82 }
 0x150   : > { %v706_v6 = vpop.f32.mrb[0].mxu0 }
 0x151   : > { %v713_v7 = vadd.f32 %v706_v6, %v470_v4  ;;  %v708_v8 = vpop.f32.mrb[1].mxu0 }
 0x152   : > { %v714_v9 = vadd.f32 %v708_v8, %v471_v5  ;;  %v710_v10 = vpop.f32.mrb[2].mxu0 }
 0x153   : > { %715 = vst [vmem:[#allocation2] sm:$0xff] %v713_v7  ;;  %v711_v11 = vpop.f32.mrb[3].mxu0 }
 0x154   : > { %716 = vst [vmem:[#allocation2 + $0x8] sm:$0xff] %v714_v9 }
 0x15a   : > { %v721_v18 = vld [vmem:[#allocation2] sm:$0xff] }
 0x15b   : > { %v722_v19 = vld [vmem:[#allocation2 + $0x8] sm:$0xff]  ;;  %v735_v24 = vmul.f32 %v728_v20, %v721_v18 }
 0x15c   : > { %v736_v25 = vmul.f32 %v732_v21, %v722_v19 }
 0x15d   : > { %v749_v26 = vadd.f32 %v742_v22, %v735_v24 }
 0x15e   : > { %v750_v27 = vadd.f32 %v746_v23, %v736_v25 }
 0x15f   : > { %v751_v28 = vmax.f32 %v749_v26, 0.0 }
 0x160   : > { %v752_v29 = vmax.f32 %v750_v27, 0.0 }
 0x162   : > { %v953_v30 = vpack.c.bf16 %v752_v29, %v751_v28 }
 0x164   : > { %761 = vst [vmem:[%s1296_s12] sm:$0xff] %v953_v30 }
 0x165 PF: > { %s14_s21 = sadd.s32 1, %s1115_s21   ;;  %s1372_s15 = smov %s1095_s16 }
 0x166   : > { %p11_p0 = scmp.ge.s32.totalorder %s14_s21, 20   ;;  %s1373_s16 = smov %s1194_s28 }
 0x167   : > { %s1374_s17 = smov %s1107_s19  ;;  %s1375_s18 = smov %s1111_s20 }
 0x168   : > { %s1376_s19 = smov %s1379_s22  ;;  %s1377_s20 = smov %s1383_s23 }
 0x169   :  { %13 = sbr.rel (!%p11_p0) target bundleno = 4 (0x4), region = 126 }

// kernel: _lambda_.39
= control target key start
LH: loop header
LB: loop body
LE: loop exit
PB: predicated region body
PF: predicated region fallthrough
CT: control target
= control target key end

     0   :  { %s1102_s15 = smov 0   ;;  %s1104_s16 = smov 0   ;;  %s1284_s0 = inlined_call_operand.vmem [shape: bf16[1,8,256], index: 0, kind: input, shape index: {}]   ;;  %s1285_s1 = inlined_call_operand.vmem [shape: bf16[1,256,512], index: 1, kind: input, shape index: {}]   ;;  %s1286_s2 = inlined_call_operand.vmem [shape: f32[1,512], index: 2, kind: input, shape index: {}]   ;;  %s1287_s3 = inlined_call_operand.vmem [shape: f32[1,512], index: 3, kind: input, shape index: {}]   ;;  %s1288_s4 = inlined_call_operand.vmem [shape: bf16[8,512], index: 4, kind: output, shape index: {}]  }
   0x1   :  { %s1106_s17 = smov 0   ;;  %s1108_s18 = smov 0  }
   0x2   :  { %s1110_s19 = smov 0  }
   0x3 LB: > { %s29_s20 = sadd.s32 1, %s1071_s18  ;;  %p77_p1 = scmp.ne.s32.totalorder %s1063_s16, %s1059_s15  ;;  %s1075_s19 = sphi %s1110_s19, %s14_s19   ;;  %s1071_s18 = sphi %s1108_s18, %s1292_s18   ;;  %s1067_s17 = sphi %s1106_s17, %s1291_s17   ;;  %s1063_s16 = sphi %s1104_s16, %s1290_s16   ;;  %s1059_s15 = sphi %s1102_s15, %s1289_s15  }
   0x4   : > { %p31_p0 = scmp.ge.s32.totalorder %s29_s20, 2  ;;  %p78_p2 = scmp.eq.s32.totalorder %s1075_s19, 0 }
   0x5   : > { %s70_s22 = sadd.s32 1, %s1063_s16  ;;  %p898_p5 = scmp.ge.s32.totalorder %s1075_s19, 2 }
   0x6   : > { %s1294_s20 = smov (%p31_p0, %s29_s20), 0  ;;  %p79_p3 = por %p78_p2, %p77_p1 }
   0x7   : > { %s66_s21 = ssub.s32 %s1071_s18, %s1294_s20  ;;  %195 = sbr.rel (%p898_p5) target bundleno = 34 (0x22), region = 20 }
   0x8   : > { %p68_p4 = scmp.eq.s32.totalorder %s66_s21, 0 }
   0xa   : > { %s1137_s23 = scalar_select %p68_p4, %s1063_s16, %s70_s22  }
   0xe   : > { %198 = sbr.rel (!%p79_p3) target bundleno = 34 (0x22), region = 24  ;;  %s200_s24 = sand.u32 (%p79_p3), 1, %s1063_s16  }
   0xf   : > { %s945_s25 = sshll.u32 (%p79_p3), %s1071_s18, 3  ;;  %s899_s26 = sshll.u32 (%p79_p3), %s200_s24, 8 }
  0x10   : > { %s1145_s29 = scalar_lea.vmem (%p79_p3), %s1285_s1, %s945_s25  ;;  %s1150_s30 = scalar_lea.vmem (%p79_p3), [#allocation3], %s899_s26 }
  0x11   : > { %v297_v0 = vld [vmem:[%s1145_s29] sm:$0xff] (%p79_p3)  ;;  %v299_v1 = vld [vmem:[%s1145_s29 + $0x10] sm:$0xff] (%p79_p3) }
  0x12   : > { %v301_v2 = vld [vmem:[%s1145_s29 + $0x20] sm:$0xff] (%p79_p3)  ;;  %298 = vst [vmem:[%s1150_s30] sm:$0xff] (%p79_p3), %v297_v0  ;;  %300 = vst [vmem:[%s1150_s30 + $0x8] sm:$0xff] (%p79_p3), %v299_v1  ;;  %v303_v3 = vld [vmem:[%s1145_s29 + $0x30] sm:$0xff] (%p79_p3) }
  0x13   : > { %302 = vst [vmem:[%s1150_s30 + $0x10] sm:$0xff] (%p79_p3), %v301_v2  ;;  %v305_v4 = vld [vmem:[%s1145_s29 + $0x40] sm:$0xff] (%p79_p3)  ;;  %v307_v5 = vld [vmem:[%s1145_s29 + $0x50] sm:$0xff] (%p79_p3)  ;;  %304 = vst [vmem:[%s1150_s30 + $0x18] sm:$0xff] (%p79_p3), %v303_v3 }
  0x14   : > { %306 = vst [vmem:[%s1150_s30 + $0x20] sm:$0xff] (%p79_p3), %v305_v4  ;;  %308 = vst [vmem:[%s1150_s30 + $0x28] sm:$0xff] (%p79_p3), %v307_v5  ;;  %v309_v6 = vld [vmem:[%s1145_s29 + $0x60] sm:$0xff] (%p79_p3)  ;;  %v311_v7 = vld [vmem:[%s1145_s29 + $0x70] sm:$0xff] (%p79_p3) }
  0x15   : > { %v313_v8 = vld [vmem:[%s1145_s29 + $0x80] sm:$0xff]  ;;  %310 = vst [vmem:[%s1150_s30 + $0x30] sm:$0xff] %v309_v6  ;;  %312 = vst [vmem:[%s1150_s30 + $0x38] sm:$0xff] %v311_v7  ;;  %v315_v9 = vld [vmem:[%s1145_s29 + $0x90] sm:$0xff] }
  0x16   : > { %314 = vst [vmem:[%s1150_s30 + $0x40] sm:$0xff] %v313_v8  ;;  %v317_v10 = vld [vmem:[%s1145_s29 + $0xa0] sm:$0xff]  ;;  %v319_v11 = vld [vmem:[%s1145_s29 + $0xb0] sm:$0xff]  ;;  %316 = vst [vmem:[%s1150_s30 + $0x48] sm:$0xff] %v315_v9 }
  0x17   : > { %318 = vst [vmem:[%s1150_s30 + $0x50] sm:$0xff] %v317_v10  ;;  %320 = vst [vmem:[%s1150_s30 + $0x58] sm:$0xff] %v319_v11  ;;  %v321_v12 = vld [vmem:[%s1145_s29 + $0xc0] sm:$0xff]  ;;  %v323_v13 = vld [vmem:[%s1145_s29 + $0xd0] sm:$0xff] }
  0x18   : > { %v325_v14 = vld [vmem:[%s1145_s29 + $0xe0] sm:$0xff]  ;;  %322 = vst [vmem:[%s1150_s30 + $0x60] sm:$0xff] %v321_v12  ;;  %324 = vst [vmem:[%s1150_s30 + $0x68] sm:$0xff] %v323_v13  ;;  %v327_v15 = vld [vmem:[%s1145_s29 + $0xf0] sm:$0xff] }
  0x19   : > { %326 = vst [vmem:[%s1150_s30 + $0x70] sm:$0xff] %v325_v14  ;;  %v329_v16 = vld [vmem:[%s1145_s29 + $0x100] sm:$0xff]  ;;  %v331_v17 = vld [vmem:[%s1145_s29 + $0x110] sm:$0xff]  ;;  %328 = vst [vmem:[%s1150_s30 + $0x78] sm:$0xff] %v327_v15 }
  0x1a   : > { %330 = vst [vmem:[%s1150_s30 + $0x80] sm:$0xff] %v329_v16  ;;  %332 = vst [vmem:[%s1150_s30 + $0x88] sm:$0xff] %v331_v17  ;;  %v333_v18 = vld [vmem:[%s1145_s29 + $0x120] sm:$0xff]  ;;  %v335_v19 = vld [vmem:[%s1145_s29 + $0x130] sm:$0xff] }
  0x1b   : > { %v337_v20 = vld [vmem:[%s1145_s29 + $0x140] sm:$0xff]  ;;  %334 = vst [vmem:[%s1150_s30 + $0x90] sm:$0xff] %v333_v18  ;;  %336 = vst [vmem:[%s1150_s30 + $0x98] sm:$0xff] %v335_v19  ;;  %v339_v21 = vld [vmem:[%s1145_s29 + $0x150] sm:$0xff] }
  0x1c   : > { %338 = vst [vmem:[%s1150_s30 + $0xa0] sm:$0xff] %v337_v20  ;;  %v341_v22 = vld [vmem:[%s1145_s29 + $0x160] sm:$0xff]  ;;  %v343_v23 = vld [vmem:[%s1145_s29 + $0x170] sm:$0xff]  ;;  %340 = vst [vmem:[%s1150_s30 + $0xa8] sm:$0xff] %v339_v21 }
  0x1d   : > { %342 = vst [vmem:[%s1150_s30 + $0xb0] sm:$0xff] %v341_v22  ;;  %344 = vst [vmem:[%s1150_s30 + $0xb8] sm:$0xff] %v343_v23  ;;  %v345_v24 = vld [vmem:[%s1145_s29 + $0x180] sm:$0xff]  ;;  %v347_v25 = vld [vmem:[%s1145_s29 + $0x190] sm:$0xff] }
  0x1e   : > { %v349_v26 = vld [vmem:[%s1145_s29 + $0x1a0] sm:$0xff]  ;;  %346 = vst [vmem:[%s1150_s30 + $0xc0] sm:$0xff] %v345_v24  ;;  %348 = vst [vmem:[%s1150_s30 + $0xc8] sm:$0xff] %v347_v25  ;;  %v351_v27 = vld [vmem:[%s1145_s29 + $0x1b0] sm:$0xff] }
  0x1f   : > { %350 = vst [vmem:[%s1150_s30 + $0xd0] sm:$0xff] %v349_v26  ;;  %v353_v28 = vld [vmem:[%s1145_s29 + $0x1c0] sm:$0xff]  ;;  %v355_v29 = vld [vmem:[%s1145_s29 + $0x1d0] sm:$0xff]  ;;  %352 = vst [vmem:[%s1150_s30 + $0xd8] sm:$0xff] %v351_v27 }
  0x20   : > { %354 = vst [vmem:[%s1150_s30 + $0xe0] sm:$0xff] %v353_v28  ;;  %356 = vst [vmem:[%s1150_s30 + $0xe8] sm:$0xff] %v355_v29  ;;  %v357_v30 = vld [vmem:[%s1145_s29 + $0x1e0] sm:$0xff]  ;;  %v359_v31 = vld [vmem:[%s1145_s29 + $0x1f0] sm:$0xff] }
  0x21   : > { %358 = vst [vmem:[%s1150_s30 + $0xf0] sm:$0xff] %v357_v30  ;;  %360 = vst [vmem:[%s1150_s30 + $0xf8] sm:$0xff] %v359_v31 }
  0x22 PF: > { %p902_p6 = scmp.ge.s32.totalorder %s1075_s19, 1  ;;  %p381_p7 = scmp.lt.s32.totalorder %s1075_s19, 3 }
  0x24   : > { %p382_p8 = pnand %p902_p6, %p381_p7 }
  0x25   : > { %s388_s5 = sand.u32 (!%p382_p8), 1, %s1059_s15   ;;  %v1219_v32 = vld [vmem:[%s1284_s0] sm:$0xff] (!%p382_p8)  ;;  %s904_s10 = sshll.u32 (!%p382_p8), %s1067_s17, 1  ;;  %v724_v3 = vlaneseq (!%p382_p8) }
  0x26   : > { %385 = sbr.rel (%p382_p8) target bundleno = 325 (0x145), region = 70  ;;  %s903_s8 = sshll.u32 (!%p382_p8), %s388_s5, 8  ;;  %v909_v33 = vcombine.high (!%p382_p8), %v1219_v32, %v1219_v32  ;;  %v908_v2 = vcombine.low (!%p382_p8), %v1219_v32, %v1219_v32 }
  0x27   : > { %s1223_s9 = scalar_lea.vmem (!%p382_p8), [#allocation3], %s903_s8  ;;  %p445_p9 = scmp.lt.s32.totalorder (!%p382_p8), %s904_s10, 3  ;;  %v725_v4 = vshrl.u32 (!%p382_p8), %v724_v3, 7 }
  0x28   : > { %v987_v34 = vld [vmem:[%s1223_s9 + $0x4] ss:$8 sps:$4 sm:$0xff] (!%p382_p8)   ;;  %704 = vmatprep.mubr.bf16.mxu0 (!%p382_p8), %v909_v33  ;;  %v989_v35 = vld [vmem:[%s1223_s9] ss:$8 sps:$4 sm:$0xff] (!%p382_p8)   ;;  %v990_v36 = vld [vmem:[%s1223_s9 + $0x14] ss:$8 sps:$4 sm:$0xff] (!%p382_p8)  }
  0x29   : > { %672 = vmatprep.subr.bf16.mxu0 (!%p382_p8), %v987_v34  ;;  %v992_v37 = vld [vmem:[%s1223_s9 + $0x10] ss:$8 sps:$4 sm:$0xff] (!%p382_p8)   ;;  %v993_v38 = vld [vmem:[%s1223_s9 + $0x24] ss:$8 sps:$4 sm:$0xff] (!%p382_p8)   ;;  %v995_v39 = vld [vmem:[%s1223_s9 + $0x20] ss:$8 sps:$4 sm:$0xff] (!%p382_p8)  }
  0x2a   : > { %673 = vmatpush1.bf16.msra.mxu0 (!%p382_p8), %v989_v35  ;;  %v996_v40 = vld [vmem:[%s1223_s9 + $0x34] ss:$8 sps:$4 sm:$0xff] (!%p382_p8)   ;;  %v998_v41 = vld [vmem:[%s1223_s9 + $0x30] ss:$8 sps:$4 sm:$0xff] (!%p382_p8)   ;;  %v999_v42 = vld [vmem:[%s1223_s9 + $0x44] ss:$8 sps:$4 sm:$0xff] (!%p382_p8)  }
  0x2b   : > { %674 = vmatprep.subr.bf16.mxu0 (!%p382_p8), %v990_v36  ;;  %v1001_v43 = vld [vmem:[%s1223_s9 + $0x40] ss:$8 sps:$4 sm:$0xff] (!%p382_p8)   ;;  %v1002_v44 = vld [vmem:[%s1223_s9 + $0x54] ss:$8 sps:$4 sm:$0xff] (!%p382_p8)   ;;  %v1004_v45 = vld [vmem:[%s1223_s9 + $0x50] ss:$8 sps:$4 sm:$0xff] (!%p382_p8)  }
  0x2c   : > { %v1005_v46 = vld [vmem:[%s1223_s9 + $0x64] ss:$8 sps:$4 sm:$0xff] (!%p382_p8)   ;;  %v1007_v47 = vld [vmem:[%s1223_s9 + $0x60] ss:$8 sps:$4 sm:$0xff] (!%p382_p8)   ;;  %v1008_v48 = vld [vmem:[%s1223_s9 + $0x74] ss:$8 sps:$4 sm:$0xff] (!%p382_p8)  }
  0x2d   : > { %v1010_v49 = vld [vmem:[%s1223_s9 + $0x70] ss:$8 sps:$4 sm:$0xff]   ;;  %v1011_v50 = vld [vmem:[%s1223_s9 + $0x84] ss:$8 sps:$4 sm:$0xff]   ;;  %v1013_v51 = vld [vmem:[%s1223_s9 + $0x80] ss:$8 sps:$4 sm:$0xff]  }
  0x2e   : > { %675 = vmatpush1.bf16.msra.mxu0 %v992_v37  ;;  %v1014_v52 = vld [vmem:[%s1223_s9 + $0x94] ss:$8 sps:$4 sm:$0xff]   ;;  %v1016_v53 = vld [vmem:[%s1223_s9 + $0x90] ss:$8 sps:$4 sm:$0xff]   ;;  %v1017_v54 = vld [vmem:[%s1223_s9 + $0xa4] ss:$8 sps:$4 sm:$0xff]  }
  0x2f   : > { %676 = vmatprep.subr.bf16.mxu0 %v993_v38  ;;  %v1019_v55 = vld [vmem:[%s1223_s9 + $0xa0] ss:$8 sps:$4 sm:$0xff]   ;;  %v1020_v56 = vld [vmem:[%s1223_s9 + $0xb4] ss:$8 sps:$4 sm:$0xff]   ;;  %v1022_v57 = vld [vmem:[%s1223_s9 + $0xb0] ss:$8 sps:$4 sm:$0xff]  }
  0x30   : > { %v1023_v58 = vld [vmem:[%s1223_s9 + $0xc4] ss:$8 sps:$4 sm:$0xff]   ;;  %v1025_v59 = vld [vmem:[%s1223_s9 + $0xc0] ss:$8 sps:$4 sm:$0xff]   ;;  %v1026_v60 = vld [vmem:[%s1223_s9 + $0xd4] ss:$8 sps:$4 sm:$0xff]  }
  0x31   : > { %v1028_v61 = vld [vmem:[%s1223_s9 + $0xd0] ss:$8 sps:$4 sm:$0xff]   ;;  %v1029_v62 = vld [vmem:[%s1223_s9 + $0xe4] ss:$8 sps:$4 sm:$0xff]   ;;  %v1031_v63 = vld [vmem:[%s1223_s9 + $0xe0] ss:$8 sps:$4 sm:$0xff]  }
  0x32   : > { %677 = vmatpush1.bf16.msra.mxu0 %v995_v39  ;;  %v1032_v0 = vld [vmem:[%s1223_s9 + $0xf4] ss:$8 sps:$4 sm:$0xff]   ;;  %v1034_v1 = vld [vmem:[%s1223_s9 + $0xf0] ss:$8 sps:$4 sm:$0xff]   ;;  %s1296_s10 = smov (!%p445_p9, %s904_s10), 3  ;;  %v726_v5 = vsub.s32 0, %v725_v4 }
  0x33   : > { %678 = vmatprep.subr.bf16.mxu0 %v996_v40  ;;  %s447_s13 = scalar_lea.vmem %s1286_s2, %s1296_s10  ;;  %s452_s21 = scalar_lea.vmem %s1287_s3, %s1296_s10  ;;  %v730_v7 = vsub.s32 1, %v725_v4 }
  0x34   : > { %v722_v6 = vld [vmem:[%s447_s13] sm:$0x3]  ;;  %s907_s17 = sshll.u32 %s1296_s10, 2 }
  0x35   : > { %v736_v8 = vld [vmem:[%s452_s21] sm:$0x3]  ;;  %v727_v9 = vrot.slane %v722_v6, %v726_v5  ;;  %v731_v10 = vrot.slane %v722_v6, %v730_v7  ;;  %s462_s25 = scalar_lea.vmem %s1288_s4, %s907_s17 }
  0x36   : > { %679 = vmatpush1.bf16.msra.mxu0 %v998_v41  ;;  %v741_v11 = vrot.slane %v736_v8, %v726_v5  ;;  %v745_v13 = vrot.slane %v736_v8, %v730_v7 }
  0x37   : > { %680 = vmatprep.subr.bf16.mxu0 %v999_v42 }
  0x3a   : > { %681 = vmatpush1.bf16.msra.mxu0 %v1001_v43 }
  0x3b   : > { %682 = vmatprep.subr.bf16.mxu0 %v1002_v44 }
  0x3e   : > { %683 = vmatpush1.bf16.msra.mxu0 %v1004_v45 }
  0x3f   : > { %684 = vmatprep.subr.bf16.mxu0 %v1005_v46 }
  0x42   : > { %685 = vmatpush1.bf16.msra.mxu0 %v1007_v47 }
  0x43   : > { %686 = vmatprep.subr.bf16.mxu0 %v1008_v48 }
  0x46   : > { %687 = vmatpush1.bf16.msra.mxu0 %v1010_v49 }
  0x47   : > { %688 = vmatprep.subr.bf16.mxu0 %v1011_v50 }
  0x4a   : > { %689 = vmatpush1.bf16.msra.mxu0 %v1013_v51 }
  0x4b   : > { %690 = vmatprep.subr.bf16.mxu0 %v1014_v52 }
  0x4e   : > { %691 = vmatpush1.bf16.msra.mxu0 %v1016_v53 }
  0x4f   : > { %692 = vmatprep.subr.bf16.mxu0 %v1017_v54 }
  0x52   : > { %693 = vmatpush1.bf16.msra.mxu0 %v1019_v55 }
  0x53   : > { %694 = vmatprep.subr.bf16.mxu0 %v1020_v56 }
  0x56   : > { %695 = vmatpush1.bf16.msra.mxu0 %v1022_v57 }
  0x57   : > { %696 = vmatprep.subr.bf16.mxu0 %v1023_v58 }
  0x5a   : > { %697 = vmatpush1.bf16.msra.mxu0 %v1025_v59 }
  0x5b   : > { %698 = vmatprep.subr.bf16.mxu0 %v1026_v60 }
  0x5e   : > { %699 = vmatpush1.bf16.msra.mxu0 %v1028_v61 }
  0x5f   : > { %700 = vmatprep.subr.bf16.mxu0 %v1029_v62 }
  0x62   : > { %701 = vmatpush1.bf16.msra.mxu0 %v1031_v63 }
  0x63   : > { %702 = vmatprep.subr.bf16.mxu0 %v1032_v0 }
  0x66   : > { %703 = vmatpush1.bf16.msra.mxu0 %v1034_v1 }
  0x69   : > { %705 = vmatmul.mubr.bf16.vlgmr.msra.gmra.mrb[0].mxu0 %v908_v2 }
 0x13c   : > { %v706_v12 = vpop.f32.mrb[0].mxu0 }
 0x13d   : > { %v734_v14 = vmul.f32 %v727_v9, %v706_v12  ;;  %v708_v15 = vpop.f32.mrb[1].mxu0 }
 0x13e   : > { %v735_v16 = vmul.f32 %v731_v10, %v708_v15  ;;  %v710_v17 = vpop.f32.mrb[2].mxu0 }
 0x13f   : > { %v748_v18 = vadd.f32 %v741_v11, %v734_v14  ;;  %v711_v19 = vpop.f32.mrb[3].mxu0 }
 0x140   : > { %v749_v20 = vadd.f32 %v745_v13, %v735_v16 }
 0x142   : > { %v946_v21 = vpack.c.bf16 %v749_v20, %v748_v18 }
 0x144   : > { %758 = vst [vmem:[%s462_s25] sm:$0xff] %v946_v21 }
 0x145 PF: > { %s14_s19 = sadd.s32 1, %s1075_s19   ;;  %s1289_s15 = smov %s1063_s16 }
 0x146   : > { %p11_p10 = scmp.ge.s32.totalorder %s14_s19, 4   ;;  %s1290_s16 = smov %s1137_s23 }
 0x147   : > { %s1291_s17 = smov %s1071_s18  ;;  %s1292_s18 = smov %s1294_s20 }
 0x148   :  { %13 = sbr.rel (!%p11_p10) target bundleno = 3 (0x3), region = 126 }

// kernel: _lambda_.40
= control target key start
LH: loop header
LB: loop body
LE: loop exit
PB: predicated region body
PF: predicated region fallthrough
CT: control target
= control target key end

     0   :  { %s2016_s0 = inlined_call_operand.vmem [shape: bf16[9,8,512], index: 0, kind: input, shape index: {}]   ;;  %s2017_s1 = inlined_call_operand.vmem [shape: bf16[9,512,512], index: 1, kind: input, shape index: {}]   ;;  %s2018_s2 = inlined_call_operand.vmem [shape: f32[1,512], index: 2, kind: input, shape index: {}]   ;;  %s2019_s3 = inlined_call_operand.vmem [shape: f32[1,512], index: 3, kind: input, shape index: {}]   ;;  %s2020_s4 = inlined_call_operand.vmem [shape: bf16[8,512], index: 4, kind: input, shape index: {}]   ;;  %s2021_s5 = inlined_call_operand.vmem [shape: bf16[8,512], index: 5, kind: output, shape index: {}]  }
   0x1   :  { %2022 = sst [smem:[#allocation4_spill]] %s2017_s1 }
   0x2   :  { %s1689_s18 = smov 0   ;;  %s1691_s19 = smov 0  }
   0x3   :  { %s1693_s20 = smov 0   ;;  %s1695_s21 = smov 0  }
   0x4   :  { %s1697_s22 = smov 0   ;;  %s1699_s23 = smov 0  }
   0x5   :  { %s1701_s24 = smov 0  }
   0x6 LB: > { %s27_s25 = sadd.s32 1, %s1648_s22  ;;  %s30_s26 = sadd.s32 1, %s1652_s23  ;;  %s1656_s24 = sphi %s1701_s24, %s15_s24   ;;  %s1652_s23 = sphi %s1699_s23, %s2029_s23   ;;  %s1648_s22 = sphi %s1697_s22, %s2028_s22   ;;  %s1644_s21 = sphi %s1695_s21, %s2027_s21   ;;  %s1640_s20 = sphi %s1693_s20, %s2026_s20   ;;  %s1636_s19 = sphi %s1691_s19, %s2025_s19   ;;  %s1632_s18 = sphi %s1689_s18, %s2024_s18  }
   0x7   : > { %p28_p0 = scmp.ge.s32.totalorder %s27_s25, 9  ;;  %p78_p1 = scmp.ne.s32.totalorder %s1636_s19, %s1632_s18 }
   0x8   : > { %p79_p2 = scmp.eq.s32.totalorder %s1656_s24, 0  ;;  %s71_s30 = sadd.s32 1, %s1636_s19 }
   0x9   : > { %s2031_s25 = smov (%p28_p0, %s27_s25), 0  ;;  %s2033_s26 = smov (!%p28_p0, %s30_s26), %s1652_s23 }
   0xa   : > { %p80_p3 = por %p79_p2, %p78_p1  ;;  %p32_p4 = scmp.ge.s32.totalorder %s2033_s26, 2 }
   0xb   : > { %s66_s27 = ssub.s32 %s1648_s22, %s2031_s25  ;;  %p1355_p6 = scmp.ge.s32.totalorder %s1656_s24, 18 }
   0xc   : > { %s2035_s26 = smov (%p32_p4, %s2033_s26), 0 }
   0xd   : > { %s67_s28 = ssub.s32 %s1652_s23, %s2035_s26  ;;  %212 = sbr.rel (%p1355_p6) target bundleno = 62 (0x3e), region = 16 }
   0xe   : > { %s68_s29 = sor.u32 %s67_s28, %s66_s27 }
   0xf   : > { %p69_p5 = scmp.eq.s32.totalorder %s68_s29, 0 }
  0x11   : > { %s1740_s6 = scalar_select %p69_p5, %s1636_s19, %s71_s30  }
  0x14   : > { %227 = sbr.rel (!%p80_p3) target bundleno = 62 (0x3e), region = 24  ;;  %s229_s7 = sand.u32 (%p80_p3), 1, %s1636_s19  }
  0x15   : > { %s1357_s8 = sshll.u32 (%p80_p3), %s1652_s23, 1  ;;  %s1356_s9 = sshll.u32 (%p80_p3), %s229_s7, 9 }
  0x16   : > { %s1358_s10 = sshll.u32 (%p80_p3), %s1648_s22, 8  ;;  %s2023_s1 = sld [smem:[#allocation4_spill]] (%p80_p3) }
  0x17   : > { %s234_s11 = sadd.s32 (%p80_p3), %s1358_s10, %s1357_s8  ;;  %s1754_s16 = scalar_lea.vmem (%p80_p3), [#allocation3], %s1356_s9 }
  0x18   : > { %s1359_s12 = sshll.u32 (%p80_p3), %s234_s11, 2 }
  0x1c   : > { %s1749_s15 = scalar_lea.vmem %s2023_s1, %s1359_s12 }
  0x1d   : > { %v390_v0 = vld [vmem:[%s1749_s15] sm:$0xff]  ;;  %v392_v1 = vld [vmem:[%s1749_s15 + $0x10] sm:$0xff] }
  0x1e   : > { %v394_v2 = vld [vmem:[%s1749_s15 + $0x20] sm:$0xff]  ;;  %391 = vst [vmem:[%s1754_s16] sm:$0xff] %v390_v0  ;;  %393 = vst [vmem:[%s1754_s16 + $0x8] sm:$0xff] %v392_v1  ;;  %v396_v3 = vld [vmem:[%s1749_s15 + $0x30] sm:$0xff] }
  0x1f   : > { %395 = vst [vmem:[%s1754_s16 + $0x10] sm:$0xff] %v394_v2  ;;  %v398_v4 = vld [vmem:[%s1749_s15 + $0x40] sm:$0xff]  ;;  %v400_v5 = vld [vmem:[%s1749_s15 + $0x50] sm:$0xff]  ;;  %397 = vst [vmem:[%s1754_s16 + $0x18] sm:$0xff] %v396_v3 }
  0x20   : > { %399 = vst [vmem:[%s1754_s16 + $0x20] sm:$0xff] %v398_v4  ;;  %401 = vst [vmem:[%s1754_s16 + $0x28] sm:$0xff] %v400_v5  ;;  %v402_v6 = vld [vmem:[%s1749_s15 + $0x60] sm:$0xff]  ;;  %v404_v7 = vld [vmem:[%s1749_s15 + $0x70] sm:$0xff] }
  0x21   : > { %v406_v8 = vld [vmem:[%s1749_s15 + $0x80] sm:$0xff]  ;;  %403 = vst [vmem:[%s1754_s16 + $0x30] sm:$0xff] %v402_v6  ;;  %405 = vst [vmem:[%s1754_s16 + $0x38] sm:$0xff] %v404_v7  ;;  %v408_v9 = vld [vmem:[%s1749_s15 + $0x90] sm:$0xff] }
  0x22   : > { %407 = vst [vmem:[%s1754_s16 + $0x40] sm:$0xff] %v406_v8  ;;  %v410_v10 = vld [vmem:[%s1749_s15 + $0xa0] sm:$0xff]  ;;  %v412_v11 = vld [vmem:[%s1749_s15 + $0xb0] sm:$0xff]  ;;  %409 = vst [vmem:[%s1754_s16 + $0x48] sm:$0xff] %v408_v9 }
  0x23   : > { %411 = vst [vmem:[%s1754_s16 + $0x50] sm:$0xff] %v410_v10  ;;  %413 = vst [vmem:[%s1754_s16 + $0x58] sm:$0xff] %v412_v11  ;;  %v414_v12 = vld [vmem:[%s1749_s15 + $0xc0] sm:$0xff]  ;;  %v416_v13 = vld [vmem:[%s1749_s15 + $0xd0] sm:$0xff] }
  0x24   : > { %v418_v14 = vld [vmem:[%s1749_s15 + $0xe0] sm:$0xff]  ;;  %415 = vst [vmem:[%s1754_s16 + $0x60] sm:$0xff] %v414_v12  ;;  %417 = vst [vmem:[%s1754_s16 + $0x68] sm:$0xff] %v416_v13  ;;  %v420_v15 = vld [vmem:[%s1749_s15 + $0xf0] sm:$0xff] }
  0x25   : > { %419 = vst [vmem:[%s1754_s16 + $0x70] sm:$0xff] %v418_v14  ;;  %v422_v16 = vld [vmem:[%s1749_s15 + $0x100] sm:$0xff]  ;;  %v424_v17 = vld [vmem:[%s1749_s15 + $0x110] sm:$0xff]  ;;  %421 = vst [vmem:[%s1754_s16 + $0x78] sm:$0xff] %v420_v15 }
  0x26   : > { %423 = vst [vmem:[%s1754_s16 + $0x80] sm:$0xff] %v422_v16  ;;  %425 = vst [vmem:[%s1754_s16 + $0x88] sm:$0xff] %v424_v17  ;;  %v426_v18 = vld [vmem:[%s1749_s15 + $0x120] sm:$0xff]  ;;  %v428_v19 = vld [vmem:[%s1749_s15 + $0x130] sm:$0xff] }
  0x27   : > { %v430_v20 = vld [vmem:[%s1749_s15 + $0x140] sm:$0xff]  ;;  %427 = vst [vmem:[%s1754_s16 + $0x90] sm:$0xff] %v426_v18  ;;  %429 = vst [vmem:[%s1754_s16 + $0x98] sm:$0xff] %v428_v19  ;;  %v432_v21 = vld [vmem:[%s1749_s15 + $0x150] sm:$0xff] }
  0x28   : > { %431 = vst [vmem:[%s1754_s16 + $0xa0] sm:$0xff] %v430_v20  ;;  %v434_v22 = vld [vmem:[%s1749_s15 + $0x160] sm:$0xff]  ;;  %v436_v23 = vld [vmem:[%s1749_s15 + $0x170] sm:$0xff]  ;;  %433 = vst [vmem:[%s1754_s16 + $0xa8] sm:$0xff] %v432_v21 }
  0x29   : > { %435 = vst [vmem:[%s1754_s16 + $0xb0] sm:$0xff] %v434_v22  ;;  %437 = vst [vmem:[%s1754_s16 + $0xb8] sm:$0xff] %v436_v23  ;;  %v438_v24 = vld [vmem:[%s1749_s15 + $0x180] sm:$0xff]  ;;  %v440_v25 = vld [vmem:[%s1749_s15 + $0x190] sm:$0xff] }
  0x2a   : > { %v442_v26 = vld [vmem:[%s1749_s15 + $0x1a0] sm:$0xff]  ;;  %439 = vst [vmem:[%s1754_s16 + $0xc0] sm:$0xff] %v438_v24  ;;  %441 = vst [vmem:[%s1754_s16 + $0xc8] sm:$0xff] %v440_v25  ;;  %v444_v27 = vld [vmem:[%s1749_s15 + $0x1b0] sm:$0xff] }
  0x2b   : > { %443 = vst [vmem:[%s1754_s16 + $0xd0] sm:$0xff] %v442_v26  ;;  %v446_v28 = vld [vmem:[%s1749_s15 + $0x1c0] sm:$0xff]  ;;  %v448_v29 = vld [vmem:[%s1749_s15 + $0x1d0] sm:$0xff]  ;;  %445 = vst [vmem:[%s1754_s16 + $0xd8] sm:$0xff] %v444_v27 }
  0x2c   : > { %447 = vst [vmem:[%s1754_s16 + $0xe0] sm:$0xff] %v446_v28  ;;  %449 = vst [vmem:[%s1754_s16 + $0xe8] sm:$0xff] %v448_v29  ;;  %v450_v30 = vld [vmem:[%s1749_s15 + $0x1e0] sm:$0xff]  ;;  %v452_v31 = vld [vmem:[%s1749_s15 + $0x1f0] sm:$0xff] }
  0x2d   : > { %v454_v32 = vld [vmem:[%s1749_s15 + $0x200] sm:$0xff]  ;;  %451 = vst [vmem:[%s1754_s16 + $0xf0] sm:$0xff] %v450_v30  ;;  %453 = vst [vmem:[%s1754_s16 + $0xf8] sm:$0xff] %v452_v31  ;;  %v456_v33 = vld [vmem:[%s1749_s15 + $0x210] sm:$0xff] }
  0x2e   : > { %455 = vst [vmem:[%s1754_s16 + $0x100] sm:$0xff] %v454_v32  ;;  %v458_v34 = vld [vmem:[%s1749_s15 + $0x220] sm:$0xff]  ;;  %v460_v35 = vld [vmem:[%s1749_s15 + $0x230] sm:$0xff]  ;;  %457 = vst [vmem:[%s1754_s16 + $0x108] sm:$0xff] %v456_v33 }
  0x2f   : > { %459 = vst [vmem:[%s1754_s16 + $0x110] sm:$0xff] %v458_v34  ;;  %461 = vst [vmem:[%s1754_s16 + $0x118] sm:$0xff] %v460_v35  ;;  %v462_v36 = vld [vmem:[%s1749_s15 + $0x240] sm:$0xff]  ;;  %v464_v37 = vld [vmem:[%s1749_s15 + $0x250] sm:$0xff] }
  0x30   : > { %v466_v38 = vld [vmem:[%s1749_s15 + $0x260] sm:$0xff]  ;;  %463 = vst [vmem:[%s1754_s16 + $0x120] sm:$0xff] %v462_v36  ;;  %465 = vst [vmem:[%s1754_s16 + $0x128] sm:$0xff] %v464_v37  ;;  %v468_v39 = vld [vmem:[%s1749_s15 + $0x270] sm:$0xff] }
  0x31   : > { %467 = vst [vmem:[%s1754_s16 + $0x130] sm:$0xff] %v466_v38  ;;  %v470_v40 = vld [vmem:[%s1749_s15 + $0x280] sm:$0xff]  ;;  %v472_v41 = vld [vmem:[%s1749_s15 + $0x290] sm:$0xff]  ;;  %469 = vst [vmem:[%s1754_s16 + $0x138] sm:$0xff] %v468_v39 }
  0x32   : > { %471 = vst [vmem:[%s1754_s16 + $0x140] sm:$0xff] %v470_v40  ;;  %473 = vst [vmem:[%s1754_s16 + $0x148] sm:$0xff] %v472_v41  ;;  %v474_v42 = vld [vmem:[%s1749_s15 + $0x2a0] sm:$0xff]  ;;  %v476_v43 = vld [vmem:[%s1749_s15 + $0x2b0] sm:$0xff] }
  0x33   : > { %v478_v44 = vld [vmem:[%s1749_s15 + $0x2c0] sm:$0xff]  ;;  %475 = vst [vmem:[%s1754_s16 + $0x150] sm:$0xff] %v474_v42  ;;  %477 = vst [vmem:[%s1754_s16 + $0x158] sm:$0xff] %v476_v43  ;;  %v480_v45 = vld [vmem:[%s1749_s15 + $0x2d0] sm:$0xff] }
  0x34   : > { %479 = vst [vmem:[%s1754_s16 + $0x160] sm:$0xff] %v478_v44  ;;  %v482_v46 = vld [vmem:[%s1749_s15 + $0x2e0] sm:$0xff]  ;;  %v484_v47 = vld [vmem:[%s1749_s15 + $0x2f0] sm:$0xff]  ;;  %481 = vst [vmem:[%s1754_s16 + $0x168] sm:$0xff] %v480_v45 }
  0x35   : > { %483 = vst [vmem:[%s1754_s16 + $0x170] sm:$0xff] %v482_v46  ;;  %485 = vst [vmem:[%s1754_s16 + $0x178] sm:$0xff] %v484_v47  ;;  %v486_v48 = vld [vmem:[%s1749_s15 + $0x300] sm:$0xff]  ;;  %v488_v49 = vld [vmem:[%s1749_s15 + $0x310] sm:$0xff] }
  0x36   : > { %v490_v50 = vld [vmem:[%s1749_s15 + $0x320] sm:$0xff]  ;;  %487 = vst [vmem:[%s1754_s16 + $0x180] sm:$0xff] %v486_v48  ;;  %489 = vst [vmem:[%s1754_s16 + $0x188] sm:$0xff] %v488_v49  ;;  %v492_v51 = vld [vmem:[%s1749_s15 + $0x330] sm:$0xff] }
  0x37   : > { %491 = vst [vmem:[%s1754_s16 + $0x190] sm:$0xff] %v490_v50  ;;  %v494_v52 = vld [vmem:[%s1749_s15 + $0x340] sm:$0xff]  ;;  %v496_v53 = vld [vmem:[%s1749_s15 + $0x350] sm:$0xff]  ;;  %493 = vst [vmem:[%s1754_s16 + $0x198] sm:$0xff] %v492_v51 }
  0x38   : > { %495 = vst [vmem:[%s1754_s16 + $0x1a0] sm:$0xff] %v494_v52  ;;  %497 = vst [vmem:[%s1754_s16 + $0x1a8] sm:$0xff] %v496_v53  ;;  %v498_v54 = vld [vmem:[%s1749_s15 + $0x360] sm:$0xff]  ;;  %v500_v55 = vld [vmem:[%s1749_s15 + $0x370] sm:$0xff] }
  0x39   : > { %v502_v56 = vld [vmem:[%s1749_s15 + $0x380] sm:$0xff]  ;;  %499 = vst [vmem:[%s1754_s16 + $0x1b0] sm:$0xff] %v498_v54  ;;  %501 = vst [vmem:[%s1754_s16 + $0x1b8] sm:$0xff] %v500_v55  ;;  %v504_v57 = vld [vmem:[%s1749_s15 + $0x390] sm:$0xff] }
  0x3a   : > { %503 = vst [vmem:[%s1754_s16 + $0x1c0] sm:$0xff] %v502_v56  ;;  %v506_v58 = vld [vmem:[%s1749_s15 + $0x3a0] sm:$0xff]  ;;  %v508_v59 = vld [vmem:[%s1749_s15 + $0x3b0] sm:$0xff]  ;;  %505 = vst [vmem:[%s1754_s16 + $0x1c8] sm:$0xff] %v504_v57 }
  0x3b   : > { %507 = vst [vmem:[%s1754_s16 + $0x1d0] sm:$0xff] %v506_v58  ;;  %509 = vst [vmem:[%s1754_s16 + $0x1d8] sm:$0xff] %v508_v59  ;;  %v510_v60 = vld [vmem:[%s1749_s15 + $0x3c0] sm:$0xff]  ;;  %v512_v61 = vld [vmem:[%s1749_s15 + $0x3d0] sm:$0xff] }
  0x3c   : > { %v514_v62 = vld [vmem:[%s1749_s15 + $0x3e0] sm:$0xff]  ;;  %511 = vst [vmem:[%s1754_s16 + $0x1e0] sm:$0xff] %v510_v60  ;;  %513 = vst [vmem:[%s1754_s16 + $0x1e8] sm:$0xff] %v512_v61  ;;  %v516_v63 = vld [vmem:[%s1749_s15 + $0x3f0] sm:$0xff] }
  0x3d   : > { %515 = vst [vmem:[%s1754_s16 + $0x1f0] sm:$0xff] %v514_v62  ;;  %517 = vst [vmem:[%s1754_s16 + $0x1f8] sm:$0xff] %v516_v63 }
  0x3e PF: > { %p1360_p7 = scmp.ge.s32.totalorder %s1656_s24, 1  ;;  %p551_p8 = scmp.lt.s32.totalorder %s1656_s24, 19 }
  0x40   : > { %p552_p9 = pnand %p1360_p7, %p551_p8 }
  0x41   : > { %s558_s17 = sand.u32 (!%p552_p9), 1, %s1632_s18   ;;  %p615_p10 = scmp.lt.s32.totalorder (!%p552_p9), %s1640_s20, 8 }
  0x42   : > { %555 = sbr.rel (%p552_p9) target bundleno = 383 (0x17f), region = 74  ;;  %s1361_s27 = sshll.u32 (!%p552_p9), %s558_s17, 9 }
  0x43   : > { %s1364_s28 = sshll.u32 (!%p552_p9), %s1644_s21, 1  ;;  %p1370_p12 = scmp.ne.s32.totalorder (!%p552_p9), %s1640_s20, 0 }
  0x44   : > { %p626_p11 = scmp.lt.s32.totalorder (!%p552_p9), %s1364_s28, 3 }
  0x49   : > { %s616_s29 = scalar_select %p615_p10, %s1640_s20, 8 }
  0x4a   : > { %s2037_s28 = smov (!%p626_p11, %s1364_s28), 3  ;;  %658 = sbr.rel (%p1370_p12) target bundleno = 81 (0x51), region = 82 }
  0x4b   : > { %s1443_s30 = sshll.u32 %s616_s29, 4  ;;  %s628_s18 = scalar_lea.vmem %s2018_s2, %s2037_s28  ;;  %v1658_v0 = vmov (!%p1370_p12), 0.0  }
  0x4c   : > { %s1892_s9 = scalar_lea.vmem %s2016_s0, %s1443_s30  ;;  %s633_s21 = scalar_lea.vmem %s2019_s3, %s2037_s28  ;;  %659 = vst [vmem:[#allocation2] sm:$0xff] (!%p1370_p12), %v1658_v0  ;;  %660 = vst [vmem:[#allocation2 + $0x8] sm:$0xff] (!%p1370_p12), %v1658_v0 }
  0x4d   : > { %s1367_s14 = sshll.u32 %s2037_s28, 2  ;;  %s1913_s30 = scalar_lea.vmem [#allocation3], %s1361_s27 }
  0x4e   : > { %s1906_s17 = scalar_lea.vmem %s2020_s4, %s1367_s14  ;;  %s1911_s7 = scalar_lea.vmem %s2021_s5, %s1367_s14 }
  0x51 PF: > { %v1502_v1 = vld [vmem:[%s1913_s30 + $0x4] ss:$8 sps:$4 sm:$0xff]   ;;  %v1506_v3 = vld [vmem:[%s1913_s30] ss:$8 sps:$4 sm:$0xff]   ;;  %v1508_v5 = vld [vmem:[%s1913_s30 + $0x14] ss:$8 sps:$4 sm:$0xff]  }
  0x52   : > { %v1504_v2 = vld [vmem:[%s1913_s30 + $0x104] ss:$8 sps:$4 sm:$0xff]   ;;  %1063 = vmatprep.subr.bf16.mxu0 %v1502_v1  ;;  %v1507_v4 = vld [vmem:[%s1913_s30 + $0x100] ss:$8 sps:$4 sm:$0xff]   ;;  %v1510_v6 = vld [vmem:[%s1913_s30 + $0x114] ss:$8 sps:$4 sm:$0xff]  }
  0x53   : > { %1104 = vmatprep.subr.bf16.mxu1 %v1504_v2  ;;  %1064 = vmatpush1.bf16.msra.mxu0 %v1506_v3  ;;  %v1512_v7 = vld [vmem:[%s1913_s30 + $0x10] ss:$8 sps:$4 sm:$0xff]   ;;  %v1514_v9 = vld [vmem:[%s1913_s30 + $0x24] ss:$8 sps:$4 sm:$0xff]   ;;  %v1518_v11 = vld [vmem:[%s1913_s30 + $0x20] ss:$8 sps:$4 sm:$0xff]  }
  0x54   : > { %1105 = vmatpush1.bf16.msra.mxu1 %v1507_v4  ;;  %1065 = vmatprep.subr.bf16.mxu0 %v1508_v5  ;;  %v1513_v8 = vld [vmem:[%s1913_s30 + $0x110] ss:$8 sps:$4 sm:$0xff]   ;;  %v1516_v10 = vld [vmem:[%s1913_s30 + $0x124] ss:$8 sps:$4 sm:$0xff]   ;;  %v1519_v12 = vld [vmem:[%s1913_s30 + $0x120] ss:$8 sps:$4 sm:$0xff]  }
  0x55   : > { %1106 = vmatprep.subr.bf16.mxu1 %v1510_v6  ;;  %v1520_v13 = vld [vmem:[%s1913_s30 + $0x34] ss:$8 sps:$4 sm:$0xff]   ;;  %v1524_v15 = vld [vmem:[%s1913_s30 + $0x30] ss:$8 sps:$4 sm:$0xff]   ;;  %v1526_v17 = vld [vmem:[%s1913_s30 + $0x44] ss:$8 sps:$4 sm:$0xff]  }
  0x56   : > { %v1522_v14 = vld [vmem:[%s1913_s30 + $0x134] ss:$8 sps:$4 sm:$0xff]   ;;  %v1525_v16 = vld [vmem:[%s1913_s30 + $0x130] ss:$8 sps:$4 sm:$0xff]   ;;  %v1528_v18 = vld [vmem:[%s1913_s30 + $0x144] ss:$8 sps:$4 sm:$0xff]  }
  0x57   : > { %1066 = vmatpush1.bf16.msra.mxu0 %v1512_v7  ;;  %v1530_v19 = vld [vmem:[%s1913_s30 + $0x40] ss:$8 sps:$4 sm:$0xff]   ;;  %v1532_v21 = vld [vmem:[%s1913_s30 + $0x54] ss:$8 sps:$4 sm:$0xff]   ;;  %v1536_v23 = vld [vmem:[%s1913_s30 + $0x50] ss:$8 sps:$4 sm:$0xff]  }
  0x58   : > { %1107 = vmatpush1.bf16.msra.mxu1 %v1513_v8  ;;  %1067 = vmatprep.subr.bf16.mxu0 %v1514_v9  ;;  %v1531_v20 = vld [vmem:[%s1913_s30 + $0x140] ss:$8 sps:$4 sm:$0xff]   ;;  %v1534_v22 = vld [vmem:[%s1913_s30 + $0x154] ss:$8 sps:$4 sm:$0xff]   ;;  %v1537_v24 = vld [vmem:[%s1913_s30 + $0x150] ss:$8 sps:$4 sm:$0xff]  }
  0x59   : > { %1108 = vmatprep.subr.bf16.mxu1 %v1516_v10  ;;  %v1538_v25 = vld [vmem:[%s1913_s30 + $0x64] ss:$8 sps:$4 sm:$0xff]   ;;  %v1542_v27 = vld [vmem:[%s1913_s30 + $0x60] ss:$8 sps:$4 sm:$0xff]   ;;  %v1544_v29 = vld [vmem:[%s1913_s30 + $0x74] ss:$8 sps:$4 sm:$0xff]  }
  0x5a   : > { %v1540_v26 = vld [vmem:[%s1913_s30 + $0x164] ss:$8 sps:$4 sm:$0xff]   ;;  %v1543_v28 = vld [vmem:[%s1913_s30 + $0x160] ss:$8 sps:$4 sm:$0xff]   ;;  %v1546_v30 = vld [vmem:[%s1913_s30 + $0x174] ss:$8 sps:$4 sm:$0xff]  }
  0x5b   : > { %1068 = vmatpush1.bf16.msra.mxu0 %v1518_v11  ;;  %v1548_v31 = vld [vmem:[%s1913_s30 + $0x70] ss:$8 sps:$4 sm:$0xff]   ;;  %v1550_v33 = vld [vmem:[%s1913_s30 + $0x84] ss:$8 sps:$4 sm:$0xff]   ;;  %v1554_v35 = vld [vmem:[%s1913_s30 + $0x80] ss:$8 sps:$4 sm:$0xff]  }
  0x5c   : > { %1109 = vmatpush1.bf16.msra.mxu1 %v1519_v12  ;;  %1069 = vmatprep.subr.bf16.mxu0 %v1520_v13  ;;  %v1549_v32 = vld [vmem:[%s1913_s30 + $0x170] ss:$8 sps:$4 sm:$0xff]   ;;  %v1552_v34 = vld [vmem:[%s1913_s30 + $0x184] ss:$8 sps:$4 sm:$0xff]   ;;  %v1555_v36 = vld [vmem:[%s1913_s30 + $0x180] ss:$8 sps:$4 sm:$0xff]  }
  0x5d   : > { %1110 = vmatprep.subr.bf16.mxu1 %v1522_v14  ;;  %v1556_v37 = vld [vmem:[%s1913_s30 + $0x94] ss:$8 sps:$4 sm:$0xff]   ;;  %v1560_v39 = vld [vmem:[%s1913_s30 + $0x90] ss:$8 sps:$4 sm:$0xff]   ;;  %v1562_v41 = vld [vmem:[%s1913_s30 + $0xa4] ss:$8 sps:$4 sm:$0xff]  }
  0x5e   : > { %v1558_v38 = vld [vmem:[%s1913_s30 + $0x194] ss:$8 sps:$4 sm:$0xff]   ;;  %v1561_v40 = vld [vmem:[%s1913_s30 + $0x190] ss:$8 sps:$4 sm:$0xff]   ;;  %v1564_v42 = vld [vmem:[%s1913_s30 + $0x1a4] ss:$8 sps:$4 sm:$0xff]  }
  0x5f   : > { %1070 = vmatpush1.bf16.msra.mxu0 %v1524_v15  ;;  %v1566_v43 = vld [vmem:[%s1913_s30 + $0xa0] ss:$8 sps:$4 sm:$0xff]   ;;  %v1568_v45 = vld [vmem:[%s1913_s30 + $0xb4] ss:$8 sps:$4 sm:$0xff]   ;;  %v1572_v50 = vld [vmem:[%s1913_s30 + $0xb0] ss:$8 sps:$4 sm:$0xff]  }
  0x60   : > { %1111 = vmatpush1.bf16.msra.mxu1 %v1525_v16  ;;  %1071 = vmatprep.subr.bf16.mxu0 %v1526_v17  ;;  %v1567_v44 = vld [vmem:[%s1913_s30 + $0x1a0] ss:$8 sps:$4 sm:$0xff]   ;;  %v1570_v46 = vld [vmem:[%s1913_s30 + $0x1b4] ss:$8 sps:$4 sm:$0xff]   ;;  %v1573_v51 = vld [vmem:[%s1913_s30 + $0x1b0] ss:$8 sps:$4 sm:$0xff]  }
  0x61   : > { %1112 = vmatprep.subr.bf16.mxu1 %v1528_v18  ;;  %v663_v47 = vld [vmem:[%s1892_s9] sm:$0xff]  ;;  %v664_v49 = vld [vmem:[%s1892_s9 + $0x8] sm:$0xff]  ;;  %v1574_v53 = vld [vmem:[%s1913_s30 + $0xc4] ss:$8 sps:$4 sm:$0xff]   ;;  %p1439_p13 = scmp.ne.s32.totalorder %s1640_s20, 8 }
  0x62   : > { %v1372_v48 = vcombine.high %v663_v47, %v663_v47  ;;  %v1374_v52 = vcombine.high %v664_v49, %v664_v49  ;;  %v1576_v54 = vld [vmem:[%s1913_s30 + $0x1c4] ss:$8 sps:$4 sm:$0xff]   ;;  %v1578_v55 = vld [vmem:[%s1913_s30 + $0xc0] ss:$8 sps:$4 sm:$0xff]   ;;  %v1580_v57 = vld [vmem:[%s1913_s30 + $0xd4] ss:$8 sps:$4 sm:$0xff]   ;;  %v1371_v5 = vcombine.low %v663_v47, %v663_v47  ;;  %v1373_v6 = vcombine.low %v664_v49, %v664_v49 }
  0x63   : > { %1072 = vmatpush1.bf16.msra.mxu0 %v1530_v19  ;;  %v1579_v56 = vld [vmem:[%s1913_s30 + $0x1c0] ss:$8 sps:$4 sm:$0xff]   ;;  %v1582_v58 = vld [vmem:[%s1913_s30 + $0x1d4] ss:$8 sps:$4 sm:$0xff]   ;;  %v1584_v59 = vld [vmem:[%s1913_s30 + $0xd0] ss:$8 sps:$4 sm:$0xff]  }
  0x64   : > { %1113 = vmatpush1.bf16.msra.mxu1 %v1531_v20  ;;  %1073 = vmatprep.subr.bf16.mxu0 %v1532_v21  ;;  %v1585_v60 = vld [vmem:[%s1913_s30 + $0x1d0] ss:$8 sps:$4 sm:$0xff]   ;;  %v1586_v61 = vld [vmem:[%s1913_s30 + $0xe4] ss:$8 sps:$4 sm:$0xff]   ;;  %v1590_v63 = vld [vmem:[%s1913_s30 + $0xe0] ss:$8 sps:$4 sm:$0xff]   ;;  %v1157_v21 = vlaneseq (!%p1439_p13) }
  0x65   : > { %1114 = vmatprep.subr.bf16.mxu1 %v1534_v22  ;;  %1095 = vmatprep.mubr.bf16.mxu0 %v1372_v48  ;;  %v1588_v62 = vld [vmem:[%s1913_s30 + $0x1e4] ss:$8 sps:$4 sm:$0xff]   ;;  %v1591_v0 = vld [vmem:[%s1913_s30 + $0x1e0] ss:$8 sps:$4 sm:$0xff]   ;;  %v1592_v1 = vld [vmem:[%s1913_s30 + $0xf4] ss:$8 sps:$4 sm:$0xff]  }
  0x66   : > { %1136 = vmatprep.mubr.bf16.mxu1 %v1374_v52  ;;  %v1594_v2 = vld [vmem:[%s1913_s30 + $0x1f4] ss:$8 sps:$4 sm:$0xff]   ;;  %v1596_v3 = vld [vmem:[%s1913_s30 + $0xf0] ss:$8 sps:$4 sm:$0xff]   ;;  %v1158_v22 = vshrl.u32 (!%p1439_p13), %v1157_v21, 7 }
  0x67   : > { %1074 = vmatpush1.bf16.msra.mxu0 %v1536_v23  ;;  %v1597_v4 = vld [vmem:[%s1913_s30 + $0x1f0] ss:$8 sps:$4 sm:$0xff]  }
  0x68   : > { %1115 = vmatpush1.bf16.msra.mxu1 %v1537_v24  ;;  %1075 = vmatprep.subr.bf16.mxu0 %v1538_v25  ;;  %v661_v8 = vld [vmem:[#allocation2] sm:$0xff]  ;;  %v662_v12 = vld [vmem:[#allocation2 + $0x8] sm:$0xff]  ;;  %v1159_v25 = vsub.s32 (!%p1439_p13), 0, %v1158_v22 }
  0x69   : > { %1116 = vmatprep.subr.bf16.mxu1 %v1540_v26  ;;  %v1155_v23 = vld [vmem:[%s628_s18] sm:$0x3] (!%p1439_p13)  ;;  %v1163_v26 = vsub.s32 (!%p1439_p13), 1, %v1158_v22 }
  0x6a   : > { %v1169_v24 = vld [vmem:[%s633_s21] sm:$0x3] (!%p1439_p13) }
  0x6b   : > { %1076 = vmatpush1.bf16.msra.mxu0 %v1542_v27 }
  0x6c   : > { %1117 = vmatpush1.bf16.msra.mxu1 %v1543_v28  ;;  %1077 = vmatprep.subr.bf16.mxu0 %v1544_v29  ;;  %v1183_v29 = vld [vmem:[%s1906_s17] sm:$0xff] (!%p1439_p13) }
  0x6d   : > { %1118 = vmatprep.subr.bf16.mxu1 %v1546_v30  ;;  %v1160_v30 = vrot.slane (!%p1439_p13), %v1155_v23, %v1159_v25 }
  0x6f   : > { %1078 = vmatpush1.bf16.msra.mxu0 %v1548_v31  ;;  %v1164_v31 = vrot.slane (!%p1439_p13), %v1155_v23, %v1163_v26 }
  0x70   : > { %1119 = vmatpush1.bf16.msra.mxu1 %v1549_v32  ;;  %1079 = vmatprep.subr.bf16.mxu0 %v1550_v33  ;;  %v1174_v32 = vrot.slane (!%p1439_p13), %v1169_v24, %v1159_v25  ;;  %v1178_v33 = vrot.slane (!%p1439_p13), %v1169_v24, %v1163_v26 }
  0x71   : > { %1120 = vmatprep.subr.bf16.mxu1 %v1552_v34 }
  0x73   : > { %1080 = vmatpush1.bf16.msra.mxu0 %v1554_v35 }
  0x74   : > { %1121 = vmatpush1.bf16.msra.mxu1 %v1555_v36  ;;  %1081 = vmatprep.subr.bf16.mxu0 %v1556_v37  ;;  %v1184_v36 = vunpack.c.l.bf16 (!%p1439_p13), %v1183_v29  ;;  %v1185_v37 = vunpack.c.h.bf16 (!%p1439_p13), %v1183_v29 }
  0x75   : > { %1122 = vmatprep.subr.bf16.mxu1 %v1558_v38 }
  0x77   : > { %1082 = vmatpush1.bf16.msra.mxu0 %v1560_v39 }
  0x78   : > { %1123 = vmatpush1.bf16.msra.mxu1 %v1561_v40  ;;  %1083 = vmatprep.subr.bf16.mxu0 %v1562_v41 }
  0x79   : > { %1124 = vmatprep.subr.bf16.mxu1 %v1564_v42 }
  0x7b   : > { %1084 = vmatpush1.bf16.msra.mxu0 %v1566_v43 }
  0x7c   : > { %1125 = vmatpush1.bf16.msra.mxu1 %v1567_v44  ;;  %1085 = vmatprep.subr.bf16.mxu0 %v1568_v45 }
  0x7d   : > { %1126 = vmatprep.subr.bf16.mxu1 %v1570_v46 }
  0x7f   : > { %1086 = vmatpush1.bf16.msra.mxu0 %v1572_v50 }
  0x80   : > { %1127 = vmatpush1.bf16.msra.mxu1 %v1573_v51  ;;  %1087 = vmatprep.subr.bf16.mxu0 %v1574_v53 }
  0x81   : > { %1128 = vmatprep.subr.bf16.mxu1 %v1576_v54 }
  0x83   : > { %1088 = vmatpush1.bf16.msra.mxu0 %v1578_v55 }
  0x84   : > { %1129 = vmatpush1.bf16.msra.mxu1 %v1579_v56  ;;  %1089 = vmatprep.subr.bf16.mxu0 %v1580_v57 }
  0x85   : > { %1130 = vmatprep.subr.bf16.mxu1 %v1582_v58 }
  0x87   : > { %1090 = vmatpush1.bf16.msra.mxu0 %v1584_v59 }
  0x88   : > { %1131 = vmatpush1.bf16.msra.mxu1 %v1585_v60  ;;  %1091 = vmatprep.subr.bf16.mxu0 %v1586_v61 }
  0x89   : > { %1132 = vmatprep.subr.bf16.mxu1 %v1588_v62 }
  0x8b   : > { %1092 = vmatpush1.bf16.msra.mxu0 %v1590_v63 }
  0x8c   : > { %1133 = vmatpush1.bf16.msra.mxu1 %v1591_v0  ;;  %1093 = vmatprep.subr.bf16.mxu0 %v1592_v1 }
  0x8d   : > { %1134 = vmatprep.subr.bf16.mxu1 %v1594_v2 }
  0x8f   : > { %1094 = vmatpush1.bf16.msra.mxu0 %v1596_v3 }
  0x90   : > { %1135 = vmatpush1.bf16.msra.mxu1 %v1597_v4 }
  0x92   : > { %1096 = vmatmul.mubr.bf16.vlgmr.msra.gmra.mrb[0].mxu0 %v1371_v5 }
  0x93   : > { %1137 = vmatmul.mubr.bf16.vlgmr.msra.gmra.mrb[0].mxu1 %v1373_v6 }
 0x165   : > { %v1097_v7 = vpop.f32.mrb[0].mxu0 }
 0x166   : > { %v1138_v9 = vpop.f32.mrb[0].mxu1  ;;  %v1099_v11 = vpop.f32.mrb[1].mxu0  ;;  %1152 = sbr.rel (%p1439_p13) target bundleno = 383 (0x17f), region = 86 }
 0x167   : > { %v1139_v10 = vadd.f32 %v1138_v9, %v1097_v7  ;;  %v1140_v13 = vpop.f32.mrb[1].mxu1  ;;  %v1101_v15 = vpop.f32.mrb[2].mxu0 }
 0x168   : > { %v1141_v14 = vadd.f32 %v1140_v13, %v1099_v11  ;;  %v1142_v16 = vpop.f32.mrb[2].mxu1  ;;  %v1102_v18 = vpop.f32.mrb[3].mxu0 }
 0x169   : > { %v1145_v17 = vadd.f32 %v1139_v10, %v661_v8  ;;  %v1143_v19 = vpop.f32.mrb[3].mxu1 }
 0x16a   : > { %v1146_v20 = vadd.f32 %v1141_v14, %v662_v12 }
 0x16b   : > { %1147 = vst [vmem:[#allocation2] sm:$0xff] %v1145_v17 }
 0x16c   : > { %1148 = vst [vmem:[#allocation2 + $0x8] sm:$0xff] %v1146_v20 }
 0x172   : > { %v1153_v27 = vld [vmem:[#allocation2] sm:$0xff] }
 0x173   : > { %v1154_v28 = vld [vmem:[#allocation2 + $0x8] sm:$0xff]  ;;  %v1167_v34 = vmul.f32 %v1160_v30, %v1153_v27 }
 0x174   : > { %v1168_v35 = vmul.f32 %v1164_v31, %v1154_v28 }
 0x175   : > { %v1181_v38 = vadd.f32 %v1174_v32, %v1167_v34 }
 0x176   : > { %v1182_v39 = vadd.f32 %v1178_v33, %v1168_v35 }
 0x177   : > { %v1186_v40 = vadd.f32 %v1184_v36, %v1181_v38 }
 0x178   : > { %v1187_v41 = vadd.f32 %v1185_v37, %v1182_v39 }
 0x179   : > { %v1188_v42 = vmax.f32 %v1186_v40, 0.0 }
 0x17a   : > { %v1189_v43 = vmax.f32 %v1187_v41, 0.0 }
 0x17c   : > { %v1444_v44 = vpack.c.bf16 %v1189_v43, %v1188_v42 }
 0x17e   : > { %1198 = vst [vmem:[%s1911_s7] sm:$0xff] %v1444_v44 }
 0x17f PF: > { %s15_s24 = sadd.s32 1, %s1656_s24   ;;  %s2024_s18 = smov %s1636_s19 }
 0x180   : > { %p12_p0 = scmp.ge.s32.totalorder %s15_s24, 20   ;;  %s2025_s19 = smov %s1740_s6 }
 0x181   : > { %s2026_s20 = smov %s1648_s22  ;;  %s2027_s21 = smov %s1652_s23 }
 0x182   : > { %s2028_s22 = smov %s2031_s25  ;;  %s2029_s23 = smov %s2035_s26 }
 0x183   :  { %14 = sbr.rel (!%p12_p0) target bundleno = 6 (0x6), region = 133 }

// kernel: _lambda_.41
= control target key start
LH: loop header
LB: loop body
LE: loop exit
PB: predicated region body
PF: predicated region fallthrough
CT: control target
= control target key end

     0   :  { %s1596_s15 = smov 0   ;;  %s1598_s16 = smov 0   ;;  %s1917_s0 = inlined_call_operand.vmem [shape: bf16[9,8,512], index: 0, kind: input, shape index: {}]   ;;  %s1918_s1 = inlined_call_operand.vmem [shape: bf16[9,512,512], index: 1, kind: input, shape index: {}]   ;;  %s1919_s2 = inlined_call_operand.vmem [shape: f32[1,512], index: 2, kind: input, shape index: {}]   ;;  %s1920_s3 = inlined_call_operand.vmem [shape: f32[1,512], index: 3, kind: input, shape index: {}]   ;;  %s1921_s4 = inlined_call_operand.vmem [shape: bf16[8,512], index: 4, kind: output, shape index: {}]  }
   0x1   :  { %s1600_s17 = smov 0   ;;  %s1602_s18 = smov 0  }
   0x2   :  { %s1604_s19 = smov 0   ;;  %s1606_s20 = smov 0  }
   0x3   :  { %s1608_s21 = smov 0  }
   0x4 LB: > { %s26_s22 = sadd.s32 1, %s1560_s19  ;;  %s29_s23 = sadd.s32 1, %s1564_s20  ;;  %s1568_s21 = sphi %s1608_s21, %s14_s21   ;;  %s1564_s20 = sphi %s1606_s20, %s1927_s20   ;;  %s1560_s19 = sphi %s1604_s19, %s1926_s19   ;;  %s1556_s18 = sphi %s1602_s18, %s1925_s18   ;;  %s1552_s17 = sphi %s1600_s17, %s1924_s17   ;;  %s1548_s16 = sphi %s1598_s16, %s1923_s16   ;;  %s1544_s15 = sphi %s1596_s15, %s1922_s15  }
   0x5   : > { %p27_p0 = scmp.ge.s32.totalorder %s26_s22, 9  ;;  %p77_p1 = scmp.ne.s32.totalorder %s1548_s16, %s1544_s15 }
   0x6   : > { %p78_p2 = scmp.eq.s32.totalorder %s1568_s21, 0  ;;  %s70_s27 = sadd.s32 1, %s1548_s16 }
   0x7   : > { %s1929_s22 = smov (%p27_p0, %s26_s22), 0  ;;  %s1931_s23 = smov (!%p27_p0, %s29_s23), %s1564_s20 }
   0x8   : > { %p79_p3 = por %p78_p2, %p77_p1  ;;  %p31_p4 = scmp.ge.s32.totalorder %s1931_s23, 2 }
   0x9   : > { %s65_s24 = ssub.s32 %s1560_s19, %s1929_s22  ;;  %p1269_p6 = scmp.ge.s32.totalorder %s1568_s21, 18 }
   0xa   : > { %s1933_s23 = smov (%p31_p4, %s1931_s23), 0 }
   0xb   : > { %s66_s25 = ssub.s32 %s1564_s20, %s1933_s23  ;;  %183 = sbr.rel (%p1269_p6) target bundleno = 57 (0x39), region = 16 }
   0xc   : > { %s67_s26 = sor.u32 %s66_s25, %s65_s24 }
   0xd   : > { %p68_p5 = scmp.eq.s32.totalorder %s67_s26, 0 }
   0xf   : > { %s1647_s28 = scalar_select %p68_p5, %s1548_s16, %s70_s27  }
  0x12   : > { %198 = sbr.rel (!%p79_p3) target bundleno = 57 (0x39), region = 24  ;;  %s200_s29 = sand.u32 (%p79_p3), 1, %s1548_s16  }
  0x13   : > { %s1271_s30 = sshll.u32 (%p79_p3), %s1564_s20, 1  ;;  %s1270_s5 = sshll.u32 (%p79_p3), %s200_s29, 9 }
  0x14   : > { %s1272_s6 = sshll.u32 (%p79_p3), %s1560_s19, 8  ;;  %s1661_s12 = scalar_lea.vmem (%p79_p3), [#allocation3], %s1270_s5 }
  0x15   : > { %s205_s7 = sadd.s32 (%p79_p3), %s1272_s6, %s1271_s30 }
  0x16   : > { %s1273_s8 = sshll.u32 (%p79_p3), %s205_s7, 2 }
  0x17   : > { %s1656_s11 = scalar_lea.vmem (%p79_p3), %s1918_s1, %s1273_s8 }
  0x18   : > { %v361_v0 = vld [vmem:[%s1656_s11] sm:$0xff] (%p79_p3)  ;;  %v363_v1 = vld [vmem:[%s1656_s11 + $0x10] sm:$0xff] (%p79_p3) }
  0x19   : > { %v365_v2 = vld [vmem:[%s1656_s11 + $0x20] sm:$0xff]  ;;  %362 = vst [vmem:[%s1661_s12] sm:$0xff] %v361_v0  ;;  %364 = vst [vmem:[%s1661_s12 + $0x8] sm:$0xff] %v363_v1  ;;  %v367_v3 = vld [vmem:[%s1656_s11 + $0x30] sm:$0xff] }
  0x1a   : > { %366 = vst [vmem:[%s1661_s12 + $0x10] sm:$0xff] %v365_v2  ;;  %v369_v4 = vld [vmem:[%s1656_s11 + $0x40] sm:$0xff]  ;;  %v371_v5 = vld [vmem:[%s1656_s11 + $0x50] sm:$0xff]  ;;  %368 = vst [vmem:[%s1661_s12 + $0x18] sm:$0xff] %v367_v3 }
  0x1b   : > { %370 = vst [vmem:[%s1661_s12 + $0x20] sm:$0xff] %v369_v4  ;;  %372 = vst [vmem:[%s1661_s12 + $0x28] sm:$0xff] %v371_v5  ;;  %v373_v6 = vld [vmem:[%s1656_s11 + $0x60] sm:$0xff]  ;;  %v375_v7 = vld [vmem:[%s1656_s11 + $0x70] sm:$0xff] }
  0x1c   : > { %v377_v8 = vld [vmem:[%s1656_s11 + $0x80] sm:$0xff]  ;;  %374 = vst [vmem:[%s1661_s12 + $0x30] sm:$0xff] %v373_v6  ;;  %376 = vst [vmem:[%s1661_s12 + $0x38] sm:$0xff] %v375_v7  ;;  %v379_v9 = vld [vmem:[%s1656_s11 + $0x90] sm:$0xff] }
  0x1d   : > { %378 = vst [vmem:[%s1661_s12 + $0x40] sm:$0xff] %v377_v8  ;;  %v381_v10 = vld [vmem:[%s1656_s11 + $0xa0] sm:$0xff]  ;;  %v383_v11 = vld [vmem:[%s1656_s11 + $0xb0] sm:$0xff]  ;;  %380 = vst [vmem:[%s1661_s12 + $0x48] sm:$0xff] %v379_v9 }
  0x1e   : > { %382 = vst [vmem:[%s1661_s12 + $0x50] sm:$0xff] %v381_v10  ;;  %384 = vst [vmem:[%s1661_s12 + $0x58] sm:$0xff] %v383_v11  ;;  %v385_v12 = vld [vmem:[%s1656_s11 + $0xc0] sm:$0xff]  ;;  %v387_v13 = vld [vmem:[%s1656_s11 + $0xd0] sm:$0xff] }
  0x1f   : > { %v389_v14 = vld [vmem:[%s1656_s11 + $0xe0] sm:$0xff]  ;;  %386 = vst [vmem:[%s1661_s12 + $0x60] sm:$0xff] %v385_v12  ;;  %388 = vst [vmem:[%s1661_s12 + $0x68] sm:$0xff] %v387_v13  ;;  %v391_v15 = vld [vmem:[%s1656_s11 + $0xf0] sm:$0xff] }
  0x20   : > { %390 = vst [vmem:[%s1661_s12 + $0x70] sm:$0xff] %v389_v14  ;;  %v393_v16 = vld [vmem:[%s1656_s11 + $0x100] sm:$0xff]  ;;  %v395_v17 = vld [vmem:[%s1656_s11 + $0x110] sm:$0xff]  ;;  %392 = vst [vmem:[%s1661_s12 + $0x78] sm:$0xff] %v391_v15 }
  0x21   : > { %394 = vst [vmem:[%s1661_s12 + $0x80] sm:$0xff] %v393_v16  ;;  %396 = vst [vmem:[%s1661_s12 + $0x88] sm:$0xff] %v395_v17  ;;  %v397_v18 = vld [vmem:[%s1656_s11 + $0x120] sm:$0xff]  ;;  %v399_v19 = vld [vmem:[%s1656_s11 + $0x130] sm:$0xff] }
  0x22   : > { %v401_v20 = vld [vmem:[%s1656_s11 + $0x140] sm:$0xff]  ;;  %398 = vst [vmem:[%s1661_s12 + $0x90] sm:$0xff] %v397_v18  ;;  %400 = vst [vmem:[%s1661_s12 + $0x98] sm:$0xff] %v399_v19  ;;  %v403_v21 = vld [vmem:[%s1656_s11 + $0x150] sm:$0xff] }
  0x23   : > { %402 = vst [vmem:[%s1661_s12 + $0xa0] sm:$0xff] %v401_v20  ;;  %v405_v22 = vld [vmem:[%s1656_s11 + $0x160] sm:$0xff]  ;;  %v407_v23 = vld [vmem:[%s1656_s11 + $0x170] sm:$0xff]  ;;  %404 = vst [vmem:[%s1661_s12 + $0xa8] sm:$0xff] %v403_v21 }
  0x24   : > { %406 = vst [vmem:[%s1661_s12 + $0xb0] sm:$0xff] %v405_v22  ;;  %408 = vst [vmem:[%s1661_s12 + $0xb8] sm:$0xff] %v407_v23  ;;  %v409_v24 = vld [vmem:[%s1656_s11 + $0x180] sm:$0xff]  ;;  %v411_v25 = vld [vmem:[%s1656_s11 + $0x190] sm:$0xff] }
  0x25   : > { %v413_v26 = vld [vmem:[%s1656_s11 + $0x1a0] sm:$0xff]  ;;  %410 = vst [vmem:[%s1661_s12 + $0xc0] sm:$0xff] %v409_v24  ;;  %412 = vst [vmem:[%s1661_s12 + $0xc8] sm:$0xff] %v411_v25  ;;  %v415_v27 = vld [vmem:[%s1656_s11 + $0x1b0] sm:$0xff] }
  0x26   : > { %414 = vst [vmem:[%s1661_s12 + $0xd0] sm:$0xff] %v413_v26  ;;  %v417_v28 = vld [vmem:[%s1656_s11 + $0x1c0] sm:$0xff]  ;;  %v419_v29 = vld [vmem:[%s1656_s11 + $0x1d0] sm:$0xff]  ;;  %416 = vst [vmem:[%s1661_s12 + $0xd8] sm:$0xff] %v415_v27 }
  0x27   : > { %418 = vst [vmem:[%s1661_s12 + $0xe0] sm:$0xff] %v417_v28  ;;  %420 = vst [vmem:[%s1661_s12 + $0xe8] sm:$0xff] %v419_v29  ;;  %v421_v30 = vld [vmem:[%s1656_s11 + $0x1e0] sm:$0xff]  ;;  %v423_v31 = vld [vmem:[%s1656_s11 + $0x1f0] sm:$0xff] }
  0x28   : > { %v425_v32 = vld [vmem:[%s1656_s11 + $0x200] sm:$0xff]  ;;  %422 = vst [vmem:[%s1661_s12 + $0xf0] sm:$0xff] %v421_v30  ;;  %424 = vst [vmem:[%s1661_s12 + $0xf8] sm:$0xff] %v423_v31  ;;  %v427_v33 = vld [vmem:[%s1656_s11 + $0x210] sm:$0xff] }
  0x29   : > { %426 = vst [vmem:[%s1661_s12 + $0x100] sm:$0xff] %v425_v32  ;;  %v429_v34 = vld [vmem:[%s1656_s11 + $0x220] sm:$0xff]  ;;  %v431_v35 = vld [vmem:[%s1656_s11 + $0x230] sm:$0xff]  ;;  %428 = vst [vmem:[%s1661_s12 + $0x108] sm:$0xff] %v427_v33 }
  0x2a   : > { %430 = vst [vmem:[%s1661_s12 + $0x110] sm:$0xff] %v429_v34  ;;  %432 = vst [vmem:[%s1661_s12 + $0x118] sm:$0xff] %v431_v35  ;;  %v433_v36 = vld [vmem:[%s1656_s11 + $0x240] sm:$0xff]  ;;  %v435_v37 = vld [vmem:[%s1656_s11 + $0x250] sm:$0xff] }
  0x2b   : > { %v437_v38 = vld [vmem:[%s1656_s11 + $0x260] sm:$0xff]  ;;  %434 = vst [vmem:[%s1661_s12 + $0x120] sm:$0xff] %v433_v36  ;;  %436 = vst [vmem:[%s1661_s12 + $0x128] sm:$0xff] %v435_v37  ;;  %v439_v39 = vld [vmem:[%s1656_s11 + $0x270] sm:$0xff] }
  0x2c   : > { %438 = vst [vmem:[%s1661_s12 + $0x130] sm:$0xff] %v437_v38  ;;  %v441_v40 = vld [vmem:[%s1656_s11 + $0x280] sm:$0xff]  ;;  %v443_v41 = vld [vmem:[%s1656_s11 + $0x290] sm:$0xff]  ;;  %440 = vst [vmem:[%s1661_s12 + $0x138] sm:$0xff] %v439_v39 }
  0x2d   : > { %442 = vst [vmem:[%s1661_s12 + $0x140] sm:$0xff] %v441_v40  ;;  %444 = vst [vmem:[%s1661_s12 + $0x148] sm:$0xff] %v443_v41  ;;  %v445_v42 = vld [vmem:[%s1656_s11 + $0x2a0] sm:$0xff]  ;;  %v447_v43 = vld [vmem:[%s1656_s11 + $0x2b0] sm:$0xff] }
  0x2e   : > { %v449_v44 = vld [vmem:[%s1656_s11 + $0x2c0] sm:$0xff]  ;;  %446 = vst [vmem:[%s1661_s12 + $0x150] sm:$0xff] %v445_v42  ;;  %448 = vst [vmem:[%s1661_s12 + $0x158] sm:$0xff] %v447_v43  ;;  %v451_v45 = vld [vmem:[%s1656_s11 + $0x2d0] sm:$0xff] }
  0x2f   : > { %450 = vst [vmem:[%s1661_s12 + $0x160] sm:$0xff] %v449_v44  ;;  %v453_v46 = vld [vmem:[%s1656_s11 + $0x2e0] sm:$0xff]  ;;  %v455_v47 = vld [vmem:[%s1656_s11 + $0x2f0] sm:$0xff]  ;;  %452 = vst [vmem:[%s1661_s12 + $0x168] sm:$0xff] %v451_v45 }
  0x30   : > { %454 = vst [vmem:[%s1661_s12 + $0x170] sm:$0xff] %v453_v46  ;;  %456 = vst [vmem:[%s1661_s12 + $0x178] sm:$0xff] %v455_v47  ;;  %v457_v48 = vld [vmem:[%s1656_s11 + $0x300] sm:$0xff]  ;;  %v459_v49 = vld [vmem:[%s1656_s11 + $0x310] sm:$0xff] }
  0x31   : > { %v461_v50 = vld [vmem:[%s1656_s11 + $0x320] sm:$0xff]  ;;  %458 = vst [vmem:[%s1661_s12 + $0x180] sm:$0xff] %v457_v48  ;;  %460 = vst [vmem:[%s1661_s12 + $0x188] sm:$0xff] %v459_v49  ;;  %v463_v51 = vld [vmem:[%s1656_s11 + $0x330] sm:$0xff] }
  0x32   : > { %462 = vst [vmem:[%s1661_s12 + $0x190] sm:$0xff] %v461_v50  ;;  %v465_v52 = vld [vmem:[%s1656_s11 + $0x340] sm:$0xff]  ;;  %v467_v53 = vld [vmem:[%s1656_s11 + $0x350] sm:$0xff]  ;;  %464 = vst [vmem:[%s1661_s12 + $0x198] sm:$0xff] %v463_v51 }
  0x33   : > { %466 = vst [vmem:[%s1661_s12 + $0x1a0] sm:$0xff] %v465_v52  ;;  %468 = vst [vmem:[%s1661_s12 + $0x1a8] sm:$0xff] %v467_v53  ;;  %v469_v54 = vld [vmem:[%s1656_s11 + $0x360] sm:$0xff]  ;;  %v471_v55 = vld [vmem:[%s1656_s11 + $0x370] sm:$0xff] }
  0x34   : > { %v473_v56 = vld [vmem:[%s1656_s11 + $0x380] sm:$0xff]  ;;  %470 = vst [vmem:[%s1661_s12 + $0x1b0] sm:$0xff] %v469_v54  ;;  %472 = vst [vmem:[%s1661_s12 + $0x1b8] sm:$0xff] %v471_v55  ;;  %v475_v57 = vld [vmem:[%s1656_s11 + $0x390] sm:$0xff] }
  0x35   : > { %474 = vst [vmem:[%s1661_s12 + $0x1c0] sm:$0xff] %v473_v56  ;;  %v477_v58 = vld [vmem:[%s1656_s11 + $0x3a0] sm:$0xff]  ;;  %v479_v59 = vld [vmem:[%s1656_s11 + $0x3b0] sm:$0xff]  ;;  %476 = vst [vmem:[%s1661_s12 + $0x1c8] sm:$0xff] %v475_v57 }
  0x36   : > { %478 = vst [vmem:[%s1661_s12 + $0x1d0] sm:$0xff] %v477_v58  ;;  %480 = vst [vmem:[%s1661_s12 + $0x1d8] sm:$0xff] %v479_v59  ;;  %v481_v60 = vld [vmem:[%s1656_s11 + $0x3c0] sm:$0xff]  ;;  %v483_v61 = vld [vmem:[%s1656_s11 + $0x3d0] sm:$0xff] }
  0x37   : > { %v485_v62 = vld [vmem:[%s1656_s11 + $0x3e0] sm:$0xff]  ;;  %482 = vst [vmem:[%s1661_s12 + $0x1e0] sm:$0xff] %v481_v60  ;;  %484 = vst [vmem:[%s1661_s12 + $0x1e8] sm:$0xff] %v483_v61  ;;  %v487_v63 = vld [vmem:[%s1656_s11 + $0x3f0] sm:$0xff] }
  0x38   : > { %486 = vst [vmem:[%s1661_s12 + $0x1f0] sm:$0xff] %v485_v62  ;;  %488 = vst [vmem:[%s1661_s12 + $0x1f8] sm:$0xff] %v487_v63 }
  0x39 PF: > { %p1274_p7 = scmp.ge.s32.totalorder %s1568_s21, 1  ;;  %p509_p8 = scmp.lt.s32.totalorder %s1568_s21, 19 }
  0x3b   : > { %p510_p9 = pnand %p1274_p7, %p509_p8 }
  0x3c   : > { %s516_s13 = sand.u32 (!%p510_p9), 1, %s1544_s15   ;;  %p562_p10 = scmp.lt.s32.totalorder (!%p510_p9), %s1552_s17, 8 }
  0x3d   : > { %513 = sbr.rel (%p510_p9) target bundleno = 376 (0x178), region = 70  ;;  %s1275_s14 = sshll.u32 (!%p510_p9), %s516_s13, 9 }
  0x3e   : > { %s1278_s24 = sshll.u32 (!%p510_p9), %s1556_s18, 1  ;;  %s1815_s13 = scalar_lea.vmem (!%p510_p9), [#allocation3], %s1275_s14 }
  0x3f   : > { %p573_p11 = scmp.lt.s32.totalorder (!%p510_p9), %s1278_s24, 3  ;;  %p1282_p12 = scmp.ne.s32.totalorder (!%p510_p9), %s1552_s17, 0 }
  0x44   : > { %s563_s25 = scalar_select %p562_p10, %s1552_s17, 8 }
  0x45   : > { %s1935_s24 = smov (!%p573_p11, %s1278_s24), 3  ;;  %595 = sbr.rel (%p1282_p12) target bundleno = 76 (0x4c), region = 78 }
  0x46   : > { %s1355_s26 = sshll.u32 %s563_s25, 4  ;;  %s575_s15 = scalar_lea.vmem %s1919_s2, %s1935_s24  ;;  %v1570_v0 = vmov (!%p1282_p12), 0.0  }
  0x47   : > { %s1799_s30 = scalar_lea.vmem %s1917_s0, %s1355_s26  ;;  %s580_s18 = scalar_lea.vmem %s1920_s3, %s1935_s24  ;;  %596 = vst [vmem:[#allocation2] sm:$0xff] (!%p1282_p12), %v1570_v0  ;;  %597 = vst [vmem:[#allocation2 + $0x8] sm:$0xff] (!%p1282_p12), %v1570_v0 }
  0x48   : > { %s1281_s9 = sshll.u32 %s1935_s24, 2 }
  0x49   : > { %s1813_s12 = scalar_lea.vmem %s1921_s4, %s1281_s9 }
  0x4c PF: > { %v1414_v1 = vld [vmem:[%s1815_s13 + $0x4] ss:$8 sps:$4 sm:$0xff]   ;;  %v1418_v3 = vld [vmem:[%s1815_s13] ss:$8 sps:$4 sm:$0xff]   ;;  %v1420_v5 = vld [vmem:[%s1815_s13 + $0x14] ss:$8 sps:$4 sm:$0xff]  }
  0x4d   : > { %v1416_v2 = vld [vmem:[%s1815_s13 + $0x104] ss:$8 sps:$4 sm:$0xff]   ;;  %1000 = vmatprep.subr.bf16.mxu0 %v1414_v1  ;;  %v1419_v4 = vld [vmem:[%s1815_s13 + $0x100] ss:$8 sps:$4 sm:$0xff]   ;;  %v1422_v6 = vld [vmem:[%s1815_s13 + $0x114] ss:$8 sps:$4 sm:$0xff]  }
  0x4e   : > { %1041 = vmatprep.subr.bf16.mxu1 %v1416_v2  ;;  %1001 = vmatpush1.bf16.msra.mxu0 %v1418_v3  ;;  %v1424_v7 = vld [vmem:[%s1815_s13 + $0x10] ss:$8 sps:$4 sm:$0xff]   ;;  %v1426_v9 = vld [vmem:[%s1815_s13 + $0x24] ss:$8 sps:$4 sm:$0xff]   ;;  %v1430_v11 = vld [vmem:[%s1815_s13 + $0x20] ss:$8 sps:$4 sm:$0xff]  }
  0x4f   : > { %1042 = vmatpush1.bf16.msra.mxu1 %v1419_v4  ;;  %1002 = vmatprep.subr.bf16.mxu0 %v1420_v5  ;;  %v1425_v8 = vld [vmem:[%s1815_s13 + $0x110] ss:$8 sps:$4 sm:$0xff]   ;;  %v1428_v10 = vld [vmem:[%s1815_s13 + $0x124] ss:$8 sps:$4 sm:$0xff]   ;;  %v1431_v12 = vld [vmem:[%s1815_s13 + $0x120] ss:$8 sps:$4 sm:$0xff]  }
  0x50   : > { %1043 = vmatprep.subr.bf16.mxu1 %v1422_v6  ;;  %v1432_v13 = vld [vmem:[%s1815_s13 + $0x34] ss:$8 sps:$4 sm:$0xff]   ;;  %v1436_v15 = vld [vmem:[%s1815_s13 + $0x30] ss:$8 sps:$4 sm:$0xff]   ;;  %v1438_v17 = vld [vmem:[%s1815_s13 + $0x44] ss:$8 sps:$4 sm:$0xff]  }
  0x51   : > { %v1434_v14 = vld [vmem:[%s1815_s13 + $0x134] ss:$8 sps:$4 sm:$0xff]   ;;  %v1437_v16 = vld [vmem:[%s1815_s13 + $0x130] ss:$8 sps:$4 sm:$0xff]   ;;  %v1440_v18 = vld [vmem:[%s1815_s13 + $0x144] ss:$8 sps:$4 sm:$0xff]  }
  0x52   : > { %1003 = vmatpush1.bf16.msra.mxu0 %v1424_v7  ;;  %v1442_v19 = vld [vmem:[%s1815_s13 + $0x40] ss:$8 sps:$4 sm:$0xff]   ;;  %v1444_v21 = vld [vmem:[%s1815_s13 + $0x54] ss:$8 sps:$4 sm:$0xff]   ;;  %v1448_v23 = vld [vmem:[%s1815_s13 + $0x50] ss:$8 sps:$4 sm:$0xff]  }
  0x53   : > { %1044 = vmatpush1.bf16.msra.mxu1 %v1425_v8  ;;  %1004 = vmatprep.subr.bf16.mxu0 %v1426_v9  ;;  %v1443_v20 = vld [vmem:[%s1815_s13 + $0x140] ss:$8 sps:$4 sm:$0xff]   ;;  %v1446_v22 = vld [vmem:[%s1815_s13 + $0x154] ss:$8 sps:$4 sm:$0xff]   ;;  %v1449_v24 = vld [vmem:[%s1815_s13 + $0x150] ss:$8 sps:$4 sm:$0xff]  }
  0x54   : > { %1045 = vmatprep.subr.bf16.mxu1 %v1428_v10  ;;  %v1450_v25 = vld [vmem:[%s1815_s13 + $0x64] ss:$8 sps:$4 sm:$0xff]   ;;  %v1454_v27 = vld [vmem:[%s1815_s13 + $0x60] ss:$8 sps:$4 sm:$0xff]   ;;  %v1456_v29 = vld [vmem:[%s1815_s13 + $0x74] ss:$8 sps:$4 sm:$0xff]  }
  0x55   : > { %v1452_v26 = vld [vmem:[%s1815_s13 + $0x164] ss:$8 sps:$4 sm:$0xff]   ;;  %v1455_v28 = vld [vmem:[%s1815_s13 + $0x160] ss:$8 sps:$4 sm:$0xff]   ;;  %v1458_v30 = vld [vmem:[%s1815_s13 + $0x174] ss:$8 sps:$4 sm:$0xff]  }
  0x56   : > { %1005 = vmatpush1.bf16.msra.mxu0 %v1430_v11  ;;  %v1460_v31 = vld [vmem:[%s1815_s13 + $0x70] ss:$8 sps:$4 sm:$0xff]   ;;  %v1462_v33 = vld [vmem:[%s1815_s13 + $0x84] ss:$8 sps:$4 sm:$0xff]   ;;  %v1466_v35 = vld [vmem:[%s1815_s13 + $0x80] ss:$8 sps:$4 sm:$0xff]  }
  0x57   : > { %1046 = vmatpush1.bf16.msra.mxu1 %v1431_v12  ;;  %1006 = vmatprep.subr.bf16.mxu0 %v1432_v13  ;;  %v1461_v32 = vld [vmem:[%s1815_s13 + $0x170] ss:$8 sps:$4 sm:$0xff]   ;;  %v1464_v34 = vld [vmem:[%s1815_s13 + $0x184] ss:$8 sps:$4 sm:$0xff]   ;;  %v1467_v36 = vld [vmem:[%s1815_s13 + $0x180] ss:$8 sps:$4 sm:$0xff]  }
  0x58   : > { %1047 = vmatprep.subr.bf16.mxu1 %v1434_v14  ;;  %v1468_v37 = vld [vmem:[%s1815_s13 + $0x94] ss:$8 sps:$4 sm:$0xff]   ;;  %v1472_v39 = vld [vmem:[%s1815_s13 + $0x90] ss:$8 sps:$4 sm:$0xff]   ;;  %v1474_v41 = vld [vmem:[%s1815_s13 + $0xa4] ss:$8 sps:$4 sm:$0xff]  }
  0x59   : > { %v1470_v38 = vld [vmem:[%s1815_s13 + $0x194] ss:$8 sps:$4 sm:$0xff]   ;;  %v1473_v40 = vld [vmem:[%s1815_s13 + $0x190] ss:$8 sps:$4 sm:$0xff]   ;;  %v1476_v42 = vld [vmem:[%s1815_s13 + $0x1a4] ss:$8 sps:$4 sm:$0xff]  }
  0x5a   : > { %1007 = vmatpush1.bf16.msra.mxu0 %v1436_v15  ;;  %v1478_v43 = vld [vmem:[%s1815_s13 + $0xa0] ss:$8 sps:$4 sm:$0xff]   ;;  %v1480_v45 = vld [vmem:[%s1815_s13 + $0xb4] ss:$8 sps:$4 sm:$0xff]   ;;  %v1484_v50 = vld [vmem:[%s1815_s13 + $0xb0] ss:$8 sps:$4 sm:$0xff]  }
  0x5b   : > { %1048 = vmatpush1.bf16.msra.mxu1 %v1437_v16  ;;  %1008 = vmatprep.subr.bf16.mxu0 %v1438_v17  ;;  %v1479_v44 = vld [vmem:[%s1815_s13 + $0x1a0] ss:$8 sps:$4 sm:$0xff]   ;;  %v1482_v46 = vld [vmem:[%s1815_s13 + $0x1b4] ss:$8 sps:$4 sm:$0xff]   ;;  %v1485_v51 = vld [vmem:[%s1815_s13 + $0x1b0] ss:$8 sps:$4 sm:$0xff]  }
  0x5c   : > { %1049 = vmatprep.subr.bf16.mxu1 %v1440_v18  ;;  %v600_v47 = vld [vmem:[%s1799_s30] sm:$0xff]  ;;  %v601_v49 = vld [vmem:[%s1799_s30 + $0x8] sm:$0xff]  ;;  %v1486_v53 = vld [vmem:[%s1815_s13 + $0xc4] ss:$8 sps:$4 sm:$0xff]   ;;  %p1351_p13 = scmp.ne.s32.totalorder %s1552_s17, 8 }
  0x5d   : > { %v1284_v48 = vcombine.high %v600_v47, %v600_v47  ;;  %v1286_v52 = vcombine.high %v601_v49, %v601_v49  ;;  %v1488_v54 = vld [vmem:[%s1815_s13 + $0x1c4] ss:$8 sps:$4 sm:$0xff]   ;;  %v1490_v55 = vld [vmem:[%s1815_s13 + $0xc0] ss:$8 sps:$4 sm:$0xff]   ;;  %v1492_v57 = vld [vmem:[%s1815_s13 + $0xd4] ss:$8 sps:$4 sm:$0xff]   ;;  %v1283_v5 = vcombine.low %v600_v47, %v600_v47  ;;  %v1285_v6 = vcombine.low %v601_v49, %v601_v49 }
  0x5e   : > { %1009 = vmatpush1.bf16.msra.mxu0 %v1442_v19  ;;  %v1491_v56 = vld [vmem:[%s1815_s13 + $0x1c0] ss:$8 sps:$4 sm:$0xff]   ;;  %v1494_v58 = vld [vmem:[%s1815_s13 + $0x1d4] ss:$8 sps:$4 sm:$0xff]   ;;  %v1496_v59 = vld [vmem:[%s1815_s13 + $0xd0] ss:$8 sps:$4 sm:$0xff]  }
  0x5f   : > { %1050 = vmatpush1.bf16.msra.mxu1 %v1443_v20  ;;  %1010 = vmatprep.subr.bf16.mxu0 %v1444_v21  ;;  %v1497_v60 = vld [vmem:[%s1815_s13 + $0x1d0] ss:$8 sps:$4 sm:$0xff]   ;;  %v1498_v61 = vld [vmem:[%s1815_s13 + $0xe4] ss:$8 sps:$4 sm:$0xff]   ;;  %v1502_v63 = vld [vmem:[%s1815_s13 + $0xe0] ss:$8 sps:$4 sm:$0xff]   ;;  %v1094_v21 = vlaneseq (!%p1351_p13) }
  0x60   : > { %1051 = vmatprep.subr.bf16.mxu1 %v1446_v22  ;;  %1032 = vmatprep.mubr.bf16.mxu0 %v1284_v48  ;;  %v1500_v62 = vld [vmem:[%s1815_s13 + $0x1e4] ss:$8 sps:$4 sm:$0xff]   ;;  %v1503_v0 = vld [vmem:[%s1815_s13 + $0x1e0] ss:$8 sps:$4 sm:$0xff]   ;;  %v1504_v1 = vld [vmem:[%s1815_s13 + $0xf4] ss:$8 sps:$4 sm:$0xff]  }
  0x61   : > { %1073 = vmatprep.mubr.bf16.mxu1 %v1286_v52  ;;  %v1506_v2 = vld [vmem:[%s1815_s13 + $0x1f4] ss:$8 sps:$4 sm:$0xff]   ;;  %v1508_v3 = vld [vmem:[%s1815_s13 + $0xf0] ss:$8 sps:$4 sm:$0xff]   ;;  %v1095_v22 = vshrl.u32 (!%p1351_p13), %v1094_v21, 7 }
  0x62   : > { %1011 = vmatpush1.bf16.msra.mxu0 %v1448_v23  ;;  %v1509_v4 = vld [vmem:[%s1815_s13 + $0x1f0] ss:$8 sps:$4 sm:$0xff]  }
  0x63   : > { %1052 = vmatpush1.bf16.msra.mxu1 %v1449_v24  ;;  %1012 = vmatprep.subr.bf16.mxu0 %v1450_v25  ;;  %v598_v8 = vld [vmem:[#allocation2] sm:$0xff]  ;;  %v599_v12 = vld [vmem:[#allocation2 + $0x8] sm:$0xff]  ;;  %v1096_v25 = vsub.s32 (!%p1351_p13), 0, %v1095_v22 }
  0x64   : > { %1053 = vmatprep.subr.bf16.mxu1 %v1452_v26  ;;  %v1092_v23 = vld [vmem:[%s575_s15] sm:$0x3] (!%p1351_p13)  ;;  %v1100_v26 = vsub.s32 (!%p1351_p13), 1, %v1095_v22 }
  0x65   : > { %v1106_v24 = vld [vmem:[%s580_s18] sm:$0x3] (!%p1351_p13) }
  0x66   : > { %1013 = vmatpush1.bf16.msra.mxu0 %v1454_v27 }
  0x67   : > { %1054 = vmatpush1.bf16.msra.mxu1 %v1455_v28  ;;  %1014 = vmatprep.subr.bf16.mxu0 %v1456_v29  ;;  %v1097_v29 = vrot.slane (!%p1351_p13), %v1092_v23, %v1096_v25 }
  0x68   : > { %1055 = vmatprep.subr.bf16.mxu1 %v1458_v30  ;;  %v1101_v30 = vrot.slane (!%p1351_p13), %v1092_v23, %v1100_v26 }
  0x6a   : > { %1015 = vmatpush1.bf16.msra.mxu0 %v1460_v31  ;;  %v1111_v31 = vrot.slane (!%p1351_p13), %v1106_v24, %v1096_v25 }
  0x6b   : > { %1056 = vmatpush1.bf16.msra.mxu1 %v1461_v32  ;;  %1016 = vmatprep.subr.bf16.mxu0 %v1462_v33  ;;  %v1115_v32 = vrot.slane (!%p1351_p13), %v1106_v24, %v1100_v26 }
  0x6c   : > { %1057 = vmatprep.subr.bf16.mxu1 %v1464_v34 }
  0x6e   : > { %1017 = vmatpush1.bf16.msra.mxu0 %v1466_v35 }
  0x6f   : > { %1058 = vmatpush1.bf16.msra.mxu1 %v1467_v36  ;;  %1018 = vmatprep.subr.bf16.mxu0 %v1468_v37 }
  0x70   : > { %1059 = vmatprep.subr.bf16.mxu1 %v1470_v38 }
  0x72   : > { %1019 = vmatpush1.bf16.msra.mxu0 %v1472_v39 }
  0x73   : > { %1060 = vmatpush1.bf16.msra.mxu1 %v1473_v40  ;;  %1020 = vmatprep.subr.bf16.mxu0 %v1474_v41 }
  0x74   : > { %1061 = vmatprep.subr.bf16.mxu1 %v1476_v42 }
  0x76   : > { %1021 = vmatpush1.bf16.msra.mxu0 %v1478_v43 }
  0x77   : > { %1062 = vmatpush1.bf16.msra.mxu1 %v1479_v44  ;;  %1022 = vmatprep.subr.bf16.mxu0 %v1480_v45 }
  0x78   : > { %1063 = vmatprep.subr.bf16.mxu1 %v1482_v46 }
  0x7a   : > { %1023 = vmatpush1.bf16.msra.mxu0 %v1484_v50 }
  0x7b   : > { %1064 = vmatpush1.bf16.msra.mxu1 %v1485_v51  ;;  %1024 = vmatprep.subr.bf16.mxu0 %v1486_v53 }
  0x7c   : > { %1065 = vmatprep.subr.bf16.mxu1 %v1488_v54 }
  0x7e   : > { %1025 = vmatpush1.bf16.msra.mxu0 %v1490_v55 }
  0x7f   : > { %1066 = vmatpush1.bf16.msra.mxu1 %v1491_v56  ;;  %1026 = vmatprep.subr.bf16.mxu0 %v1492_v57 }
  0x80   : > { %1067 = vmatprep.subr.bf16.mxu1 %v1494_v58 }
  0x82   : > { %1027 = vmatpush1.bf16.msra.mxu0 %v1496_v59 }
  0x83   : > { %1068 = vmatpush1.bf16.msra.mxu1 %v1497_v60  ;;  %1028 = vmatprep.subr.bf16.mxu0 %v1498_v61 }
  0x84   : > { %1069 = vmatprep.subr.bf16.mxu1 %v1500_v62 }
  0x86   : > { %1029 = vmatpush1.bf16.msra.mxu0 %v1502_v63 }
  0x87   : > { %1070 = vmatpush1.bf16.msra.mxu1 %v1503_v0  ;;  %1030 = vmatprep.subr.bf16.mxu0 %v1504_v1 }
  0x88   : > { %1071 = vmatprep.subr.bf16.mxu1 %v1506_v2 }
  0x8a   : > { %1031 = vmatpush1.bf16.msra.mxu0 %v1508_v3 }
  0x8b   : > { %1072 = vmatpush1.bf16.msra.mxu1 %v1509_v4 }
  0x8d   : > { %1033 = vmatmul.mubr.bf16.vlgmr.msra.gmra.mrb[0].mxu0 %v1283_v5 }
  0x8e   : > { %1074 = vmatmul.mubr.bf16.vlgmr.msra.gmra.mrb[0].mxu1 %v1285_v6 }
 0x160   : > { %v1034_v7 = vpop.f32.mrb[0].mxu0 }
 0x161   : > { %v1075_v9 = vpop.f32.mrb[0].mxu1  ;;  %v1036_v11 = vpop.f32.mrb[1].mxu0  ;;  %1089 = sbr.rel (%p1351_p13) target bundleno = 376 (0x178), region = 82 }
 0x162   : > { %v1076_v10 = vadd.f32 %v1075_v9, %v1034_v7  ;;  %v1077_v13 = vpop.f32.mrb[1].mxu1  ;;  %v1038_v15 = vpop.f32.mrb[2].mxu0 }
 0x163   : > { %v1078_v14 = vadd.f32 %v1077_v13, %v1036_v11  ;;  %v1079_v16 = vpop.f32.mrb[2].mxu1  ;;  %v1039_v18 = vpop.f32.mrb[3].mxu0 }
 0x164   : > { %v1082_v17 = vadd.f32 %v1076_v10, %v598_v8  ;;  %v1080_v19 = vpop.f32.mrb[3].mxu1 }
 0x165   : > { %v1083_v20 = vadd.f32 %v1078_v14, %v599_v12 }
 0x166   : > { %1084 = vst [vmem:[#allocation2] sm:$0xff] %v1082_v17 }
 0x167   : > { %1085 = vst [vmem:[#allocation2 + $0x8] sm:$0xff] %v1083_v20 }
 0x16d   : > { %v1090_v27 = vld [vmem:[#allocation2] sm:$0xff] }
 0x16e   : > { %v1091_v28 = vld [vmem:[#allocation2 + $0x8] sm:$0xff]  ;;  %v1104_v33 = vmul.f32 %v1097_v29, %v1090_v27 }
 0x16f   : > { %v1105_v34 = vmul.f32 %v1101_v30, %v1091_v28 }
 0x170   : > { %v1118_v35 = vadd.f32 %v1111_v31, %v1104_v33 }
 0x171   : > { %v1119_v36 = vadd.f32 %v1115_v32, %v1105_v34 }
 0x172   : > { %v1120_v37 = vmax.f32 %v1118_v35, 0.0 }
 0x173   : > { %v1121_v38 = vmax.f32 %v1119_v36, 0.0 }
 0x175   : > { %v1356_v39 = vpack.c.bf16 %v1121_v38, %v1120_v37 }
 0x177   : > { %1130 = vst [vmem:[%s1813_s12] sm:$0xff] %v1356_v39 }
 0x178 PF: > { %s14_s21 = sadd.s32 1, %s1568_s21   ;;  %s1922_s15 = smov %s1548_s16 }
 0x179   : > { %p11_p0 = scmp.ge.s32.totalorder %s14_s21, 20   ;;  %s1923_s16 = smov %s1647_s28 }
 0x17a   : > { %s1924_s17 = smov %s1560_s19  ;;  %s1925_s18 = smov %s1564_s20 }
 0x17b   : > { %s1926_s19 = smov %s1929_s22  ;;  %s1927_s20 = smov %s1933_s23 }
 0x17c   :  { %13 = sbr.rel (!%p11_p0) target bundleno = 4 (0x4), region = 126 }

// kernel: _lambda_.43
= control target key start
LH: loop header
LB: loop body
LE: loop exit
PB: predicated region body
PF: predicated region fallthrough
CT: control target
= control target key end

     0   :  { %s637_s1 = inlined_call_operand.vmem [shape: bf16[512,128], index: 1, kind: input, shape index: {}]   ;;  %s638_s0 = inlined_call_operand.vmem [shape: bf16[8,512], index: 0, kind: input, shape index: {}]   ;;  %s639_s2 = inlined_call_operand.vmem [shape: f32[1,128], index: 2, kind: input, shape index: {}]   ;;  %s640_s3 = inlined_call_operand.vmem [shape: f32[8,128], index: 3, kind: output, shape index: {}]  }
   0x1   :  { %v469_v0 = vld [vmem:[%s637_s1 + $0x40] sm:$0xff]   ;;  %v473_v4 = vld [vmem:[%s637_s1 + $0x48] sm:$0xff]   ;;  %v477_v8 = vld [vmem:[%s637_s1 + $0x50] sm:$0xff]  }
   0x2   :  { %v470_v1 = vld [vmem:[%s637_s1 + $0xc0] sm:$0xff]   ;;  %425 = vmatprep.subr.bf16.mxu0 %v469_v0  ;;  %v474_v5 = vld [vmem:[%s637_s1 + $0xc8] sm:$0xff]   ;;  %v478_v9 = vld [vmem:[%s637_s1 + $0xd0] sm:$0xff]  }
   0x3   :  { %v471_v2 = vld [vmem:[%s637_s1] sm:$0xff]   ;;  %447 = vmatprep.subr.bf16.mxu1 %v470_v1  ;;  %v475_v6 = vld [vmem:[%s637_s1 + $0x8] sm:$0xff]   ;;  %v479_v10 = vld [vmem:[%s637_s1 + $0x10] sm:$0xff]  }
   0x4   :  { %v472_v3 = vld [vmem:[%s637_s1 + $0x80] sm:$0xff]   ;;  %426 = vmatpush3.bf16.msra.mxu0 %v471_v2  ;;  %v476_v7 = vld [vmem:[%s637_s1 + $0x88] sm:$0xff]   ;;  %v480_v11 = vld [vmem:[%s637_s1 + $0x90] sm:$0xff]  }
   0x5   :  { %448 = vmatpush3.bf16.msra.mxu1 %v472_v3  ;;  %427 = vmatprep.subr.bf16.mxu0 %v473_v4  ;;  %v481_v12 = vld [vmem:[%s637_s1 + $0x58] sm:$0xff]   ;;  %v485_v16 = vld [vmem:[%s637_s1 + $0x60] sm:$0xff]   ;;  %v489_v20 = vld [vmem:[%s637_s1 + $0x68] sm:$0xff]  }
   0x6   :  { %449 = vmatprep.subr.bf16.mxu1 %v474_v5  ;;  %v482_v13 = vld [vmem:[%s637_s1 + $0xd8] sm:$0xff]   ;;  %v486_v17 = vld [vmem:[%s637_s1 + $0xe0] sm:$0xff]   ;;  %v490_v21 = vld [vmem:[%s637_s1 + $0xe8] sm:$0xff]  }
   0x7   :  { %v483_v14 = vld [vmem:[%s637_s1 + $0x18] sm:$0xff]   ;;  %v487_v18 = vld [vmem:[%s637_s1 + $0x20] sm:$0xff]   ;;  %v491_v22 = vld [vmem:[%s637_s1 + $0x28] sm:$0xff]  }
   0x8   :  { %428 = vmatpush3.bf16.msra.mxu0 %v475_v6  ;;  %v484_v15 = vld [vmem:[%s637_s1 + $0x98] sm:$0xff]   ;;  %v488_v19 = vld [vmem:[%s637_s1 + $0xa0] sm:$0xff]   ;;  %v492_v23 = vld [vmem:[%s637_s1 + $0xa8] sm:$0xff]  }
   0x9   :  { %450 = vmatpush3.bf16.msra.mxu1 %v476_v7  ;;  %429 = vmatprep.subr.bf16.mxu0 %v477_v8  ;;  %v493_v24 = vld [vmem:[%s637_s1 + $0x70] sm:$0xff]   ;;  %v497_v28 = vld [vmem:[%s637_s1 + $0x78] sm:$0xff]   ;;  %v15_v32 = vld [vmem:[%s638_s0] sm:$0xff] }
   0xa   :  { %451 = vmatprep.subr.bf16.mxu1 %v478_v9  ;;  %v494_v25 = vld [vmem:[%s637_s1 + $0xf0] sm:$0xff]   ;;  %v498_v29 = vld [vmem:[%s637_s1 + $0xf8] sm:$0xff]   ;;  %v16_v33 = vld [vmem:[%s638_s0 + $0x8] sm:$0xff]  ;;  %v389_v34 = vcombine.low %v15_v32, %v15_v32  ;;  %v390_v35 = vcombine.high %v15_v32, %v15_v32 }
   0xb   :  { %v495_v26 = vld [vmem:[%s637_s1 + $0x30] sm:$0xff]   ;;  %v499_v30 = vld [vmem:[%s637_s1 + $0x38] sm:$0xff]   ;;  %v391_v36 = vcombine.low %v16_v33, %v16_v33  ;;  %v392_v37 = vcombine.high %v16_v33, %v16_v33  ;;  %v388_v40 = vld [vmem:[%s639_s2] ss:$0 sm:$0xff] }
   0xc   :  { %430 = vmatpush3.bf16.msra.mxu0 %v479_v10  ;;  %v496_v27 = vld [vmem:[%s637_s1 + $0xb0] sm:$0xff]   ;;  %v500_v31 = vld [vmem:[%s637_s1 + $0xb8] sm:$0xff]   ;;  %326 = vmatprep.mubr.bf16.mxu0 %v390_v35 }
   0xd   :  { %452 = vmatpush3.bf16.msra.mxu1 %v480_v11  ;;  %431 = vmatprep.subr.bf16.mxu0 %v481_v12 }
   0xe   :  { %453 = vmatprep.subr.bf16.mxu1 %v482_v13  ;;  %366 = vmatprep.mubr.bf16.mxu1 %v392_v37 }
  0x10   :  { %432 = vmatpush3.bf16.msra.mxu0 %v483_v14 }
  0x11   :  { %454 = vmatpush3.bf16.msra.mxu1 %v484_v15  ;;  %433 = vmatprep.subr.bf16.mxu0 %v485_v16 }
  0x12   :  { %455 = vmatprep.subr.bf16.mxu1 %v486_v17 }
  0x14   :  { %434 = vmatpush3.bf16.msra.mxu0 %v487_v18 }
  0x15   :  { %456 = vmatpush3.bf16.msra.mxu1 %v488_v19  ;;  %435 = vmatprep.subr.bf16.mxu0 %v489_v20 }
  0x16   :  { %457 = vmatprep.subr.bf16.mxu1 %v490_v21 }
  0x18   :  { %436 = vmatpush3.bf16.msra.mxu0 %v491_v22 }
  0x19   :  { %458 = vmatpush3.bf16.msra.mxu1 %v492_v23  ;;  %437 = vmatprep.subr.bf16.mxu0 %v493_v24 }
  0x1a   :  { %459 = vmatprep.subr.bf16.mxu1 %v494_v25 }
  0x1c   :  { %438 = vmatpush3.bf16.msra.mxu0 %v495_v26 }
  0x1d   :  { %460 = vmatpush3.bf16.msra.mxu1 %v496_v27  ;;  %439 = vmatprep.subr.bf16.mxu0 %v497_v28 }
  0x1e   :  { %461 = vmatprep.subr.bf16.mxu1 %v498_v29 }
  0x20   :  { %440 = vmatpush3.bf16.msra.mxu0 %v499_v30 }
  0x21   :  { %462 = vmatpush3.bf16.msra.mxu1 %v500_v31 }
  0x23   :  { %327 = vmatmul.mubr.bf16.vlgmr.msra.gmra.mrb[0].mxu0 %v389_v34 }
  0x24   :  { %367 = vmatmul.mubr.bf16.vlgmr.msra.gmra.mrb[0].mxu1 %v391_v36 }
  0xf6   :  { %v441_v38 = vpop.f32.mrb[0].mxu0 }
  0xf7   :  { %v463_v39 = vpop.f32.mrb[0].mxu1  ;;  %v442_v41 = vpop.f32.mrb[1].mxu0 }
  0xf8   :  { %v464_v42 = vpop.f32.mrb[1].mxu1  ;;  %v443_v43 = vadd.f32 %v442_v41, %v441_v38  ;;  %v444_v45 = vpop.f32.mrb[2].mxu0 }
  0xf9   :  { %v465_v44 = vadd.f32 %v464_v42, %v463_v39  ;;  %v466_v46 = vpop.f32.mrb[2].mxu1  ;;  %v445_v47 = vpop.f32.mrb[3].mxu0 }
  0xfa   :  { %v467_v48 = vpop.f32.mrb[3].mxu1  ;;  %v329_v49 = vadd.f32 %v443_v43, %v388_v40 }
  0xfc   :  { %v369_v50 = vadd.f32 %v465_v44, %v329_v49 }
  0xfe   :  { %374 = vmax.xlane.f32.xlu0 %v369_v50 }
 0x18b   :  { %v375_v51 = vpop.xlane.xlu0 %374 }
 0x18c   :  { %v376_v52 = vsub.f32 %v369_v50, %v375_v51 }
 0x18e   :  { %v377_v53 = vmul.f32 1.442695, %v376_v52 }
 0x190   :  { %505 = vpow2.f32 %v377_v53 }
 0x19a   :  { %v506_v54 = vpop.eup %505 }
 0x19b   :  { %379 = vadd.xlane.f32.xlu0 %v506_v54 }
 0x228   :  { %v380_v55 = vpop.xlane.xlu0 %379 }
 0x229   :  { %507 = vrcp.f32 %v380_v55 }
 0x233   :  { %v508_v56 = vpop.eup %507 }
 0x234   :  { %v382_v57 = vmul.f32 %v508_v56, %v506_v54 }
 0x236   :  { %383 = vst [vmem:[%s640_s3] sm:$0xff] %v382_v57 }

</bundles_post_ra>
